<compile_context>
chip_gen: v6e
topology: v6e:2x2x1
jax: 0.10.0
libtpu: 0.0.40
codegen_flags: <defaults>
</compile_context>

<pallas_src>
import functools

import numpy as np
import jax
import jax.numpy as jnp
from jax import lax
from jax.experimental import pallas as pl
from jax.experimental.pallas import tpu as pltpu


# ---------------------------------------------------------------------------
# Padded-flat layout helpers (host / XLA side)
# ---------------------------------------------------------------------------
def _geom(hs, ws):
    wp = ws + 2
    return wp, (hs + 3) * wp, wp + 1, hs * wp          # wp, S, OFF, LEN


def _interior_mask(hs, ws):
    """[1, LEN] f32: 1 at real pixels of the interior cover, 0 at halo ring."""
    wp, _, off, length = _geom(hs, ws)
    q = np.arange(length) + off
    ph, pw = q // wp, q % wp
    m = (ph >= 1) & (ph <= hs) & (pw >= 1) & (pw <= ws)
    return jnp.asarray(m.reshape(1, length), jnp.float32)


def _key_mask(hs, ws):
    """[1, S] f32 over the whole padded-flat slab (real positions = 1)."""
    wp, s, _, _ = _geom(hs, ws)
    q = np.arange(s)
    ph, pw = q // wp, q % wp
    m = (ph >= 1) & (ph <= hs) & (pw >= 1) & (pw <= ws)
    return jnp.asarray(m.reshape(1, s), jnp.float32)


def _pad_to_flat_cf(x):
    """[B, C, Hs, Ws] -> channels-first padded-flat [B, C, S]."""
    b, c, hs, ws = x.shape
    xp = jnp.pad(x, ((0, 0), (0, 0), (1, 2), (1, 1)))
    return xp.reshape(b, c, (hs + 3) * (ws + 2))


def _pad_to_flat_pm(x):
    """[B, C, Hs, Ws] -> position-major padded-flat [B, S, C]."""
    b, c, hs, ws = x.shape
    xp = jnp.pad(jnp.transpose(x, (0, 2, 3, 1)), ((0, 0), (1, 2), (1, 1), (0, 0)))
    return xp.reshape(b, (hs + 3) * (ws + 2), c)


def _flat_to_image_cf(xf, hs, ws):
    """padded-flat [B, C, S] -> [B, C, Hs, Ws] (real pixels only)."""
    b, c, _ = xf.shape
    x = xf.reshape(b, c, hs + 3, ws + 2)
    return x[:, :, 1:hs + 1, 1:ws + 1]


def _deinterleave2x2_cf(x):
    # [B, C, H, W] -> [B, 4C, H/2, W/2]; channel blocks ordered by 2x2 position
    # [a|b|c|d] (a=(0,0), b=(0,1), c=(1,0), d=(1,1)), each of C channels.
    b, c, h, w = x.shape
    h2, w2 = h // 2, w // 2
    x = x.reshape(b, c, h2, 2, w2, 2)
    x = jnp.transpose(x, (0, 3, 5, 1, 2, 4))
    return x.reshape(b, 4 * c, h2, w2)


def _interleave2x2_cf(y):
    # Inverse of _deinterleave2x2_cf.
    b, c4, h2, w2 = y.shape
    c = c4 // 4
    y = y.reshape(b, 2, 2, c, h2, w2)
    y = jnp.transpose(y, (0, 3, 4, 1, 5, 2))
    return y.reshape(b, c, 2 * h2, 2 * w2)


def _haar_kron(c):
    # Orthogonal, symmetric, self-inverse Haar butterfly acting per channel;
    # rows ~ subbands [LL|LH|HL|HH], cols ~ 2x2 positions [a|b|c|d].
    m = 0.5 * jnp.array([[1, 1, 1, 1],
                         [1, 1, -1, -1],
                         [1, -1, 1, -1],
                         [1, -1, -1, 1]], jnp.float32)
    return jnp.kron(m, jnp.eye(c, dtype=jnp.float32))      # [4C, 4C]


def _compiler_params(tensors):
    # VMEM budget derived from the actual per-step working set (inputs +
    # outputs, double-buffered) plus headroom for compiler-managed temporaries
    # (im2col slabs, energy matrix, spills); clamped under the smallest
    # per-core physical VMEM across current generations (v7x: 64 MiB).
    blk = sum(int(np.prod(t.shape)) * jnp.dtype(t.dtype).itemsize for t in tensors)
    limit = int(min(max(2 * blk + (16 << 20), 24 << 20), 56 << 20))
    return pltpu.CompilerParams(dimension_semantics=("parallel",),
                                vmem_limit_bytes=limit)


# ---------------------------------------------------------------------------
# In-kernel building blocks
# ---------------------------------------------------------------------------
def _conv3x3_cf(values, w, scale, bias, mask, *, wp, off, length, relu=True):
    """Channels-first direct 3x3 conv (+BN+ReLU) on padded-flat values.

    values: list of [Ci, S] arrays; w: [Cout, sum_i 9*Ci] bf16 (im2col-packed);
    scale/bias: [Cout, 1] f32; mask: [1, length] f32.  The 9 tap slices per
    input are gathered once into a single [K, length] im2col slab so the whole
    conv is ONE MXU matmul with K = 9*sum(Ci); the result [Cout, length] is
    lane-dense (length >= 128).
    """
    cols = []
    for v in values:
        for kh in range(3):
            for kw in range(3):
                d = (kh - 1) * wp + (kw - 1)
                cols.append(v[:, off + d:off + d + length])
    im2col = jnp.concatenate(cols, axis=0).astype(jnp.bfloat16)
    acc = jnp.dot(w, im2col, preferred_element_type=jnp.float32)    # [Cout, L]
    y = acc * scale + bias
    if relu:
        y = jnp.maximum(y, 0.0)
    if mask is not None:
        y = y * mask
    return y


def _repad_cf(y, off, s, dtype=jnp.bfloat16):
    """[C, length] interior values -> [C, s] padded-flat value (zero margins)."""
    c, length = y.shape
    return jnp.concatenate(
        [jnp.zeros((c, off), dtype), y.astype(dtype),
         jnp.zeros((c, s - off - length), dtype)], axis=1)


# ---------------------------------------------------------------------------
# Kernel 1: filter(dwt(x1)), filter(dwt(x2)), cat2(.), fused IDWT butterfly
# ---------------------------------------------------------------------------
def _dwt_filter_cat2_kernel(d1_ref, d2_ref, wf_ref, sf_ref, bf_ref,
                            w2_ref, s2_ref, b2_ref, kmat_ref, mh_ref,
                            xdwt_ref, xidwt_ref, *, wp, off, length):
    s_half = d1_ref.shape[1]
    mh = mh_ref[...]
    # 'filter' 3x3 conv+BN+ReLU on both branches; the Haar DWT butterfly is
    # folded into wf so the kernel consumes the raw 2x2-deinterleaved input.
    y1 = _conv3x3_cf([d1_ref[...]], wf_ref[...], sf_ref[...], bf_ref[...], mh,
                     wp=wp, off=off, length=length)
    y2 = _conv3x3_cf([d2_ref[...]], wf_ref[...], sf_ref[...], bf_ref[...], mh,
                     wp=wp, off=off, length=length)
    # 'cat2' 3x3 conv+BN+ReLU on the channel concat of the two branches; the
    # concat is just two extra im2col blocks (never materialized in HBM).
    y1p = _repad_cf(y1, off, s_half)
    y2p = _repad_cf(y2, off, s_half)
    xdwt = _conv3x3_cf([y1p, y2p], w2_ref[...], s2_ref[...], b2_ref[...], mh,
                       wp=wp, off=off, length=length)
    xdwt_ref[...] = jnp.zeros_like(xdwt_ref)
    xdwt_ref[:, off:off + length] = xdwt.astype(xdwt_ref.dtype)
    # Fused IDWT channel butterfly as an extra MXU head (spatial 2x2
    # interleave back to full res is pure layout and stays in XLA).
    xid = jnp.dot(kmat_ref[...], xdwt.astype(jnp.bfloat16),
                  preferred_element_type=jnp.float32)
    xidwt_ref[...] = jnp.zeros_like(xidwt_ref)
    xidwt_ref[:, off:off + length] = xid.astype(xidwt_ref.dtype)


def dwt_filter_cat2(d1, d2, params, h2, w2):
    bsz, c4, s_half = d1.shape
    wp, s_chk, off, length = _geom(h2, w2)
    assert s_chk == s_half
    mh = _interior_mask(h2, w2)
    pf, p2 = params["filter"], params["cat2"]
    args = (d1, d2, pf["w"], pf["scale"], pf["bias"],
            p2["w"], p2["scale"], p2["bias"], params["idwt_w"], mh)
    batched = pl.BlockSpec((None, c4, s_half), lambda b: (b, 0, 0))
    const2 = lambda a: pl.BlockSpec(a.shape, lambda b: (0, 0))
    out_shapes = (jax.ShapeDtypeStruct((bsz, c4, s_half), jnp.bfloat16),
                  jax.ShapeDtypeStruct((bsz, c4, s_half), jnp.bfloat16))
    return pl.pallas_call(
        functools.partial(_dwt_filter_cat2_kernel, wp=wp, off=off, length=length),
        grid=(bsz,),
        in_specs=[batched, batched] + [const2(t) for t in args[2:]],
        out_specs=(batched, batched),
        out_shape=out_shapes,
        compiler_params=_compiler_params(list(args) + list(out_shapes)),
    )(*args)


# ---------------------------------------------------------------------------
# Kernel 2: cat(.), fused q/k/v 1x1 convs, attention, fused cat3(.) epilogue
# ---------------------------------------------------------------------------
def _cat_attn_cat3_kernel(x1_ref, x2_ref, xdwt_ref, xidwt_ref,
                          wcat_ref, scat_ref, bcat_ref,
                          wq_ref, bq_ref, wk_ref, bk_ref, wv_ref, bv_ref,
                          w3_ref, s3_ref, b3_ref, mf_ref, kmask_ref,
                          o_ref, *, wp, off, length):
    s_full = xidwt_ref.shape[1]
    mf = mf_ref[...]                                           # [1, LF]
    # ---- 'cat' 3x3 conv+BN+ReLU, position-major so queries come out as
    #      [LF, C] rows with no in-kernel transpose (x1/x2 never touch HBM
    #      concatenated; they are two im2col blocks of one K=18C matmul).
    cols = []
    for v in (x1_ref, x2_ref):
        for kh in range(3):
            for kw in range(3):
                d = (kh - 1) * wp + (kw - 1)
                cols.append(v[off + d:off + d + length, :])
    im2col = jnp.concatenate(cols, axis=1)                     # [LF, 18C] bf16
    xcat = jnp.dot(im2col, wcat_ref[...],
                   preferred_element_type=jnp.float32)         # [LF, C]
    xcat = jnp.maximum(xcat * scat_ref[...] + bcat_ref[...], 0.0)
    # ---- fused 1x1 query/key/value convs --------------------------------
    q = jnp.dot(xcat.astype(jnp.bfloat16), wq_ref[...],
                preferred_element_type=jnp.float32) + bq_ref[...]          # [LF, C]
    xd = xdwt_ref[...]                                                     # [4C, Sh]
    k = jnp.dot(wk_ref[...], xd, preferred_element_type=jnp.float32) + bk_ref[...]
    v = jnp.dot(wv_ref[...], xd, preferred_element_type=jnp.float32) + bv_ref[...]
    # ---- attention (keys restricted to real half-res pixels) ------------
    # NOTE: forward of WaveAttention2 does not apply the 1/sqrt(d) scale.
    e = jnp.dot(q.astype(jnp.bfloat16), k.astype(jnp.bfloat16),
                preferred_element_type=jnp.float32)                        # [LF, Sh]
    e = e - (1.0 - kmask_ref[...]) * 1e30          # halo keys -> -inf-ish
    e = e - jnp.max(e, axis=-1, keepdims=True)
    p = jnp.exp(e)
    # Softmax denominator as an extra ones-row on the p@V matmul so numerator
    # and denominator share the same bf16 p; normalize via EUP reciprocal.
    v_aug = jnp.concatenate([v, jnp.ones((1, v.shape[1]), v.dtype)], axis=0)
    oa = lax.dot_general(v_aug.astype(jnp.bfloat16), p.astype(jnp.bfloat16),
                         dimension_numbers=(((1,), (1,)), ((), ())),
                         preferred_element_type=jnp.float32)               # [C+1, LF]
    attn = oa[:-1, :] * pl.reciprocal(oa[-1:, :], approx=True)             # [C, LF]
    attn = attn * mf               # zero the halo ring before cat3 taps read it
    # ---- 'cat3' 3x3 conv+BN+ReLU fused epilogue (saves one HBM round trip
    #      of `out` and one pallas_call) ----------------------------------
    attn_p = _repad_cf(attn, off, s_full)
    y = _conv3x3_cf([attn_p, xidwt_ref[...]], w3_ref[...], s3_ref[...],
                    b3_ref[...], mf, wp=wp, off=off, length=length)
    o_ref[...] = jnp.zeros_like(o_ref)
    o_ref[:, off:off + length] = y.astype(o_ref.dtype)


def cat_attn_cat3(x1p, x2p, xdwt, xidwt, params, h, w):
    bsz, s_full, c = x1p.shape
    c4, s_half = xdwt.shape[1], xdwt.shape[2]
    wp, s_chk, off, length = _geom(h, w)
    assert s_chk == s_full
    mf = _interior_mask(h, w)
    kmask = _key_mask(h // 2, w // 2)
    a, pc, p3 = params["attn"], params["cat"], params["cat3"]
    args = (x1p, x2p, xdwt, xidwt,
            pc["w"], pc["scale"], pc["bias"],
            a["wq"], a["bq"], a["wk"], a["bk"], a["wv"], a["bv"],
            p3["w"], p3["scale"], p3["bias"], mf, kmask)
    spec_x = pl.BlockSpec((None, s_full, c), lambda b: (b, 0, 0))
    spec_d = pl.BlockSpec((None, c4, s_half), lambda b: (b, 0, 0))
    spec_i = pl.BlockSpec((None, c, s_full), lambda b: (b, 0, 0))
    const2 = lambda t: pl.BlockSpec(t.shape, lambda b: (0, 0))
    out_shape = jax.ShapeDtypeStruct((bsz, c, s_full), jnp.float32)
    return pl.pallas_call(
        functools.partial(_cat_attn_cat3_kernel, wp=wp, off=off, length=length),
        grid=(bsz,),
        in_specs=[spec_x, spec_x, spec_d, spec_i] + [const2(t) for t in args[4:]],
        out_specs=pl.BlockSpec((None, c, s_full), lambda b: (b, 0, 0)),
        out_shape=out_shape,
        compiler_params=_compiler_params(list(args) + [out_shape]),
    )(*args)


# ---------------------------------------------------------------------------
# Parameters (deterministic synthetic init; BN fused, DWT folded into filter)
# ---------------------------------------------------------------------------
def init_params(key, dim):
    keys = iter(jax.random.split(key, 32))

    def nrm(shape, s=0.1):
        return s * jax.random.normal(next(keys), shape, jnp.float32)

    kmat = _haar_kron(dim)                                   # [4C, 4C] f32

    def conv_bn(cin, cout, blocks, fold=None, eps=1e-5):
        w = nrm((cout, cin, 3, 3))                           # torch layout
        b = nrm((cout,))
        gamma = 1.0 + nrm((cout,))
        beta = nrm((cout,))
        mean = nrm((cout,))
        var = 1.0 + jnp.abs(nrm((cout,)))
        if fold is not None:                                 # fold Haar DWT butterfly
            w = jnp.einsum("oqhw,qp->ophw", w, fold)
        s = gamma / jnp.sqrt(var + eps)
        bias = b * s + beta - mean * s
        parts = []
        for c0, nc in blocks:                                # im2col packing: column
            wb = jnp.transpose(w[:, c0:c0 + nc], (0, 2, 3, 1))  # = blk + t*nc + ch
            parts.append(wb.reshape(cout, 9 * nc))
        return {"w": jnp.concatenate(parts, axis=1).astype(jnp.bfloat16),
                "scale": s.reshape(cout, 1), "bias": bias.reshape(cout, 1)}

    def conv1x1(cin, cout):
        w = nrm((cout, cin, 1, 1))[:, :, 0, 0]               # [out, in]
        b = nrm((cout,))
        return w, b

    cat = conv_bn(2 * dim, dim, [(0, dim), (dim, dim)])
    filt = conv_bn(4 * dim, 4 * dim, [(0, 4 * dim)], fold=kmat)
    cat2 = conv_bn(8 * dim, 4 * dim, [(0, 4 * dim), (4 * dim, 4 * dim)])
    cat3 = conv_bn(2 * dim, dim, [(0, dim), (dim, dim)])

    wq, bq = conv1x1(dim, dim)
    wk, bk = conv1x1(4 * dim, dim)
    wv, bv = conv1x1(4 * dim, dim)

    # 'cat' runs position-major inside the attention kernel (queries come out
    # as [pos, C] rows), so its packed weight is stored transposed and its
    # fused BN scale/bias as row vectors.
    cat_pm = {"w": jnp.transpose(cat["w"]),
              "scale": cat["scale"].reshape(1, dim),
              "bias": cat["bias"].reshape(1, dim)}

    # NOTE: `reduce`, `Sigmoid`, `scale`, `num_heads`, `sr_ratio` are unused in
    # WaveAttention2.forward, so they are not materialized.
    return {
        "cat": cat_pm,
        "filter": filt,
        "cat2": cat2,
        "cat3": cat3,
        "idwt_w": kmat.astype(jnp.bfloat16),                 # fused IDWT head
        "attn": {"wq": jnp.transpose(wq).astype(jnp.bfloat16),   # [Cin, Cout]
                 "bq": bq.reshape(1, dim),
                 "wk": wk.astype(jnp.bfloat16),                  # [Cout, 4C]
                 "bk": bk.reshape(dim, 1),
                 "wv": wv.astype(jnp.bfloat16),
                 "bv": bv.reshape(dim, 1)},
    }


# ---------------------------------------------------------------------------
# Forward pass (mirrors WaveAttention2.forward; x1, x2 are NCHW like torch)
# ---------------------------------------------------------------------------
def wave_attention2_forward(params, x1, x2):
    bsz, c, h, w = x1.shape
    h2, w2 = h // 2, w // 2
    x1 = x1.astype(jnp.bfloat16)
    x2 = x2.astype(jnp.bfloat16)

    # --- XLA prep (layout only) on the raw inputs -------------------------
    x1p = _pad_to_flat_pm(x1)                        # [B, Sf, C]  query path
    x2p = _pad_to_flat_pm(x2)
    d1 = _pad_to_flat_cf(_deinterleave2x2_cf(x1))    # [B, 4C, Sh]
    d2 = _pad_to_flat_cf(_deinterleave2x2_cf(x2))

    # --- kernel 1: filter(dwt(x1)), filter(dwt(x2)), cat2, fused IDWT head -
    x_dwt, x_idwt_sub = dwt_filter_cat2(d1, d2, params, h2, w2)

    # --- XLA glue: 2x2 interleave of the IDWT head back to full resolution -
    x_idwt = _interleave2x2_cf(_flat_to_image_cf(x_idwt_sub, h2, w2))
    x_idwt = _pad_to_flat_cf(x_idwt)                 # [B, C, Sf] bf16

    # --- kernel 2: cat, q/k/v, attention, cat3 (fused epilogue) ------------
    out_flat = cat_attn_cat3(x1p, x2p, x_dwt, x_idwt, params, h, w)
    return _flat_to_image_cf(out_flat, h, w)         # [B, dim, H, W] f32


# ---------------------------------------------------------------------------
if __name__ == "__main__":
    dim = 4                       # channels
    B, H, W = 2, 16, 16
    key = jax.random.PRNGKey(0)
    kp, k1, k2 = jax.random.split(key, 3)

    params = init_params(kp, dim)
    x1 = jax.random.normal(k1, (B, dim, H, W), jnp.float32)   # NCHW like torch
    x2 = jax.random.normal(k2, (B, dim, H, W), jnp.float32)

    out = jax.jit(wave_attention2_forward)(params, x1, x2)
    jax.block_until_ready(out)
    assert out.shape == (B, dim, H, W) and out.dtype == jnp.float32
    assert bool(jnp.isfinite(out).all())
    print("KERNEL_OK")
</pallas_src>

<mosaic_0001>
module attributes {stable_mosaic.version = 11 : i64} {
  func.func @_dwt_filter_cat2_kernel(%arg0: i32, %arg1: memref<1x16x110xbf16, #tpu.memory_space<vmem>>, %arg2: memref<1x16x110xbf16, #tpu.memory_space<vmem>>, %arg3: memref<16x144xbf16, #tpu.memory_space<vmem>>, %arg4: memref<16x1xf32, #tpu.memory_space<vmem>>, %arg5: memref<16x1xf32, #tpu.memory_space<vmem>>, %arg6: memref<16x288xbf16, #tpu.memory_space<vmem>>, %arg7: memref<16x1xf32, #tpu.memory_space<vmem>>, %arg8: memref<16x1xf32, #tpu.memory_space<vmem>>, %arg9: memref<16x16xbf16, #tpu.memory_space<vmem>>, %arg10: memref<1x80xf32, #tpu.memory_space<vmem>>, %arg11: memref<1x16x110xbf16, #tpu.memory_space<vmem>>, %arg12: memref<1x16x110xbf16, #tpu.memory_space<vmem>>) attributes {dimension_semantics = [#tpu.dimension_semantics<parallel>], iteration_bounds = array<i64: 2>, scalar_prefetch = 0 : i64, scratch_operands = 0 : i64, tpu.core_type = #tpu.core_type<tc>, window_params = [{transform_indices = @transform_0, window_bounds = array<i64: 1, 16, 110>}, {transform_indices = @transform_1, window_bounds = array<i64: 1, 16, 110>}, {pipeline_mode = #tpu.pipeline_mode<synchronous>, transform_indices = @transform_2, window_bounds = array<i64: 16, 144>}, {pipeline_mode = #tpu.pipeline_mode<synchronous>, transform_indices = @transform_3, window_bounds = array<i64: 16, 1>}, {pipeline_mode = #tpu.pipeline_mode<synchronous>, transform_indices = @transform_4, window_bounds = array<i64: 16, 1>}, {pipeline_mode = #tpu.pipeline_mode<synchronous>, transform_indices = @transform_5, window_bounds = array<i64: 16, 288>}, {pipeline_mode = #tpu.pipeline_mode<synchronous>, transform_indices = @transform_6, window_bounds = array<i64: 16, 1>}, {pipeline_mode = #tpu.pipeline_mode<synchronous>, transform_indices = @transform_7, window_bounds = array<i64: 16, 1>}, {pipeline_mode = #tpu.pipeline_mode<synchronous>, transform_indices = @transform_8, window_bounds = array<i64: 16, 16>}, {pipeline_mode = #tpu.pipeline_mode<synchronous>, transform_indices = @transform_9, window_bounds = array<i64: 1, 80>}, {transform_indices = @transform_10, window_bounds = array<i64: 1, 16, 110>}, {transform_indices = @transform_11, window_bounds = array<i64: 1, 16, 110>}]} {
    %c0 = arith.constant 0 : index
    %c0_0 = arith.constant 0 : index
    %0 = vector.load %arg10[%c0, %c0_0] : memref<1x80xf32, #tpu.memory_space<vmem>>, vector<1x80xf32>
    %c0_1 = arith.constant 0 : index
    %c0_2 = arith.constant 0 : index
    %c0_3 = arith.constant 0 : index
    %1 = vector.load %arg1[%c0_1, %c0_2, %c0_3] : memref<1x16x110xbf16, #tpu.memory_space<vmem>>, vector<1x16x110xbf16>
    %2 = vector.shape_cast %1 : vector<1x16x110xbf16> to vector<16x110xbf16>
    %c0_4 = arith.constant 0 : index
    %c0_5 = arith.constant 0 : index
    %3 = vector.load %arg3[%c0_4, %c0_5] : memref<16x144xbf16, #tpu.memory_space<vmem>>, vector<16x144xbf16>
    %c0_6 = arith.constant 0 : index
    %c0_7 = arith.constant 0 : index
    %4 = vector.load %arg4[%c0_6, %c0_7] : memref<16x1xf32, #tpu.memory_space<vmem>>, vector<16x1xf32>
    %c0_8 = arith.constant 0 : index
    %c0_9 = arith.constant 0 : index
    %5 = vector.load %arg5[%c0_8, %c0_9] : memref<16x1xf32, #tpu.memory_space<vmem>>, vector<16x1xf32>
    %6 = vector.extract_strided_slice %2 {offsets = [0, 0], sizes = [16, 80], strides = [1, 1]} : vector<16x110xbf16> to vector<16x80xbf16>
    %7 = vector.extract_strided_slice %2 {offsets = [0, 1], sizes = [16, 80], strides = [1, 1]} : vector<16x110xbf16> to vector<16x80xbf16>
    %8 = vector.extract_strided_slice %2 {offsets = [0, 2], sizes = [16, 80], strides = [1, 1]} : vector<16x110xbf16> to vector<16x80xbf16>
    %9 = vector.extract_strided_slice %2 {offsets = [0, 10], sizes = [16, 80], strides = [1, 1]} : vector<16x110xbf16> to vector<16x80xbf16>
    %10 = vector.extract_strided_slice %2 {offsets = [0, 11], sizes = [16, 80], strides = [1, 1]} : vector<16x110xbf16> to vector<16x80xbf16>
    %11 = vector.extract_strided_slice %2 {offsets = [0, 12], sizes = [16, 80], strides = [1, 1]} : vector<16x110xbf16> to vector<16x80xbf16>
    %12 = vector.extract_strided_slice %2 {offsets = [0, 20], sizes = [16, 80], strides = [1, 1]} : vector<16x110xbf16> to vector<16x80xbf16>
    %13 = vector.extract_strided_slice %2 {offsets = [0, 21], sizes = [16, 80], strides = [1, 1]} : vector<16x110xbf16> to vector<16x80xbf16>
    %14 = vector.extract_strided_slice %2 {offsets = [0, 22], sizes = [16, 80], strides = [1, 1]} : vector<16x110xbf16> to vector<16x80xbf16>
    %15 = tpu.concatenate %6, %7, %8, %9, %10, %11, %12, %13, %14 in 0 : vector<16x80xbf16>, vector<16x80xbf16>, vector<16x80xbf16>, vector<16x80xbf16>, vector<16x80xbf16>, vector<16x80xbf16>, vector<16x80xbf16>, vector<16x80xbf16>, vector<16x80xbf16> -> vector<144x80xbf16>
    %cst = arith.constant dense<0.000000e+00> : vector<16x80xf32>
    %16 = tpu.matmul %3, %15, %cst {dimension_numbers = #tpu.dot_dimension_numbers<[1], [0], [0], [1], [0, 0, 1, 1], [], []>} : vector<16x144xbf16>, vector<144x80xbf16>, vector<16x80xf32> -> vector<16x80xf32>
    %17 = vector.broadcast %4 : vector<16x1xf32> to vector<16x80xf32>
    %18 = arith.mulf %16, %17 : vector<16x80xf32>
    %19 = vector.broadcast %5 : vector<16x1xf32> to vector<16x80xf32>
    %20 = arith.addf %18, %19 : vector<16x80xf32>
    %cst_10 = arith.constant 0.000000e+00 : f32
    %21 = vector.broadcast %cst_10 : f32 to vector<16x80xf32>
    %22 = arith.maximumf %20, %21 : vector<16x80xf32>
    %23 = vector.broadcast %0 : vector<1x80xf32> to vector<16x80xf32>
    %24 = arith.mulf %22, %23 : vector<16x80xf32>
    %c0_11 = arith.constant 0 : index
    %c0_12 = arith.constant 0 : index
    %c0_13 = arith.constant 0 : index
    %25 = vector.load %arg2[%c0_11, %c0_12, %c0_13] : memref<1x16x110xbf16, #tpu.memory_space<vmem>>, vector<1x16x110xbf16>
    %26 = vector.shape_cast %25 : vector<1x16x110xbf16> to vector<16x110xbf16>
    %c0_14 = arith.constant 0 : index
    %c0_15 = arith.constant 0 : index
    %27 = vector.load %arg3[%c0_14, %c0_15] : memref<16x144xbf16, #tpu.memory_space<vmem>>, vector<16x144xbf16>
    %c0_16 = arith.constant 0 : index
    %c0_17 = arith.constant 0 : index
    %28 = vector.load %arg4[%c0_16, %c0_17] : memref<16x1xf32, #tpu.memory_space<vmem>>, vector<16x1xf32>
    %c0_18 = arith.constant 0 : index
    %c0_19 = arith.constant 0 : index
    %29 = vector.load %arg5[%c0_18, %c0_19] : memref<16x1xf32, #tpu.memory_space<vmem>>, vector<16x1xf32>
    %30 = vector.extract_strided_slice %26 {offsets = [0, 0], sizes = [16, 80], strides = [1, 1]} : vector<16x110xbf16> to vector<16x80xbf16>
    %31 = vector.extract_strided_slice %26 {offsets = [0, 1], sizes = [16, 80], strides = [1, 1]} : vector<16x110xbf16> to vector<16x80xbf16>
    %32 = vector.extract_strided_slice %26 {offsets = [0, 2], sizes = [16, 80], strides = [1, 1]} : vector<16x110xbf16> to vector<16x80xbf16>
    %33 = vector.extract_strided_slice %26 {offsets = [0, 10], sizes = [16, 80], strides = [1, 1]} : vector<16x110xbf16> to vector<16x80xbf16>
    %34 = vector.extract_strided_slice %26 {offsets = [0, 11], sizes = [16, 80], strides = [1, 1]} : vector<16x110xbf16> to vector<16x80xbf16>
    %35 = vector.extract_strided_slice %26 {offsets = [0, 12], sizes = [16, 80], strides = [1, 1]} : vector<16x110xbf16> to vector<16x80xbf16>
    %36 = vector.extract_strided_slice %26 {offsets = [0, 20], sizes = [16, 80], strides = [1, 1]} : vector<16x110xbf16> to vector<16x80xbf16>
    %37 = vector.extract_strided_slice %26 {offsets = [0, 21], sizes = [16, 80], strides = [1, 1]} : vector<16x110xbf16> to vector<16x80xbf16>
    %38 = vector.extract_strided_slice %26 {offsets = [0, 22], sizes = [16, 80], strides = [1, 1]} : vector<16x110xbf16> to vector<16x80xbf16>
    %39 = tpu.concatenate %30, %31, %32, %33, %34, %35, %36, %37, %38 in 0 : vector<16x80xbf16>, vector<16x80xbf16>, vector<16x80xbf16>, vector<16x80xbf16>, vector<16x80xbf16>, vector<16x80xbf16>, vector<16x80xbf16>, vector<16x80xbf16>, vector<16x80xbf16> -> vector<144x80xbf16>
    %cst_20 = arith.constant dense<0.000000e+00> : vector<16x80xf32>
    %40 = tpu.matmul %27, %39, %cst_20 {dimension_numbers = #tpu.dot_dimension_numbers<[1], [0], [0], [1], [0, 0, 1, 1], [], []>} : vector<16x144xbf16>, vector<144x80xbf16>, vector<16x80xf32> -> vector<16x80xf32>
    %41 = vector.broadcast %28 : vector<16x1xf32> to vector<16x80xf32>
    %42 = arith.mulf %40, %41 : vector<16x80xf32>
    %43 = vector.broadcast %29 : vector<16x1xf32> to vector<16x80xf32>
    %44 = arith.addf %42, %43 : vector<16x80xf32>
    %cst_21 = arith.constant 0.000000e+00 : f32
    %45 = vector.broadcast %cst_21 : f32 to vector<16x80xf32>
    %46 = arith.maximumf %44, %45 : vector<16x80xf32>
    %47 = vector.broadcast %0 : vector<1x80xf32> to vector<16x80xf32>
    %48 = arith.mulf %46, %47 : vector<16x80xf32>
    %cst_22 = arith.constant 0.000000e+00 : bf16
    %49 = vector.broadcast %cst_22 : bf16 to vector<16x11xbf16>
    %50 = arith.truncf %24 : vector<16x80xf32> to vector<16x80xbf16>
    %cst_23 = arith.constant 0.000000e+00 : bf16
    %51 = vector.broadcast %cst_23 : bf16 to vector<16x19xbf16>
    %52 = tpu.concatenate %49, %50, %51 in 1 : vector<16x11xbf16>, vector<16x80xbf16>, vector<16x19xbf16> -> vector<16x110xbf16>
    %cst_24 = arith.constant 0.000000e+00 : bf16
    %53 = vector.broadcast %cst_24 : bf16 to vector<16x11xbf16>
    %54 = arith.truncf %48 : vector<16x80xf32> to vector<16x80xbf16>
    %cst_25 = arith.constant 0.000000e+00 : bf16
    %55 = vector.broadcast %cst_25 : bf16 to vector<16x19xbf16>
    %56 = tpu.concatenate %53, %54, %55 in 1 : vector<16x11xbf16>, vector<16x80xbf16>, vector<16x19xbf16> -> vector<16x110xbf16>
    %c0_26 = arith.constant 0 : index
    %c0_27 = arith.constant 0 : index
    %57 = vector.load %arg6[%c0_26, %c0_27] : memref<16x288xbf16, #tpu.memory_space<vmem>>, vector<16x288xbf16>
    %c0_28 = arith.constant 0 : index
    %c0_29 = arith.constant 0 : index
    %58 = vector.load %arg7[%c0_28, %c0_29] : memref<16x1xf32, #tpu.memory_space<vmem>>, vector<16x1xf32>
    %c0_30 = arith.constant 0 : index
    %c0_31 = arith.constant 0 : index
    %59 = vector.load %arg8[%c0_30, %c0_31] : memref<16x1xf32, #tpu.memory_space<vmem>>, vector<16x1xf32>
    %60 = vector.extract_strided_slice %52 {offsets = [0, 0], sizes = [16, 80], strides = [1, 1]} : vector<16x110xbf16> to vector<16x80xbf16>
    %61 = vector.extract_strided_slice %52 {offsets = [0, 1], sizes = [16, 80], strides = [1, 1]} : vector<16x110xbf16> to vector<16x80xbf16>
    %62 = vector.extract_strided_slice %52 {offsets = [0, 2], sizes = [16, 80], strides = [1, 1]} : vector<16x110xbf16> to vector<16x80xbf16>
    %63 = vector.extract_strided_slice %52 {offsets = [0, 10], sizes = [16, 80], strides = [1, 1]} : vector<16x110xbf16> to vector<16x80xbf16>
    %64 = vector.extract_strided_slice %52 {offsets = [0, 11], sizes = [16, 80], strides = [1, 1]} : vector<16x110xbf16> to vector<16x80xbf16>
    %65 = vector.extract_strided_slice %52 {offsets = [0, 12], sizes = [16, 80], strides = [1, 1]} : vector<16x110xbf16> to vector<16x80xbf16>
    %66 = vector.extract_strided_slice %52 {offsets = [0, 20], sizes = [16, 80], strides = [1, 1]} : vector<16x110xbf16> to vector<16x80xbf16>
    %67 = vector.extract_strided_slice %52 {offsets = [0, 21], sizes = [16, 80], strides = [1, 1]} : vector<16x110xbf16> to vector<16x80xbf16>
    %68 = vector.extract_strided_slice %52 {offsets = [0, 22], sizes = [16, 80], strides = [1, 1]} : vector<16x110xbf16> to vector<16x80xbf16>
    %69 = vector.extract_strided_slice %56 {offsets = [0, 0], sizes = [16, 80], strides = [1, 1]} : vector<16x110xbf16> to vector<16x80xbf16>
    %70 = vector.extract_strided_slice %56 {offsets = [0, 1], sizes = [16, 80], strides = [1, 1]} : vector<16x110xbf16> to vector<16x80xbf16>
    %71 = vector.extract_strided_slice %56 {offsets = [0, 2], sizes = [16, 80], strides = [1, 1]} : vector<16x110xbf16> to vector<16x80xbf16>
    %72 = vector.extract_strided_slice %56 {offsets = [0, 10], sizes = [16, 80], strides = [1, 1]} : vector<16x110xbf16> to vector<16x80xbf16>
    %73 = vector.extract_strided_slice %56 {offsets = [0, 11], sizes = [16, 80], strides = [1, 1]} : vector<16x110xbf16> to vector<16x80xbf16>
    %74 = vector.extract_strided_slice %56 {offsets = [0, 12], sizes = [16, 80], strides = [1, 1]} : vector<16x110xbf16> to vector<16x80xbf16>
    %75 = vector.extract_strided_slice %56 {offsets = [0, 20], sizes = [16, 80], strides = [1, 1]} : vector<16x110xbf16> to vector<16x80xbf16>
    %76 = vector.extract_strided_slice %56 {offsets = [0, 21], sizes = [16, 80], strides = [1, 1]} : vector<16x110xbf16> to vector<16x80xbf16>
    %77 = vector.extract_strided_slice %56 {offsets = [0, 22], sizes = [16, 80], strides = [1, 1]} : vector<16x110xbf16> to vector<16x80xbf16>
    %78 = tpu.concatenate %60, %61, %62, %63, %64, %65, %66, %67, %68, %69, %70, %71, %72, %73, %74, %75 in 0 : vector<16x80xbf16>, vector<16x80xbf16>, vector<16x80xbf16>, vector<16x80xbf16>, vector<16x80xbf16>, vector<16x80xbf16>, vector<16x80xbf16>, vector<16x80xbf16>, vector<16x80xbf16>, vector<16x80xbf16>, vector<16x80xbf16>, vector<16x80xbf16>, vector<16x80xbf16>, vector<16x80xbf16>, vector<16x80xbf16>, vector<16x80xbf16> -> vector<256x80xbf16>
    %79 = tpu.concatenate %76, %77 in 0 : vector<16x80xbf16>, vector<16x80xbf16> -> vector<32x80xbf16>
    %80 = tpu.concatenate %78, %79 in 0 : vector<256x80xbf16>, vector<32x80xbf16> -> vector<288x80xbf16>
    %cst_32 = arith.constant dense<0.000000e+00> : vector<16x80xf32>
    %81 = tpu.matmul %57, %80, %cst_32 {dimension_numbers = #tpu.dot_dimension_numbers<[1], [0], [0], [1], [0, 0, 1, 1], [], []>} : vector<16x288xbf16>, vector<288x80xbf16>, vector<16x80xf32> -> vector<16x80xf32>
    %82 = vector.broadcast %58 : vector<16x1xf32> to vector<16x80xf32>
    %83 = arith.mulf %81, %82 : vector<16x80xf32>
    %84 = vector.broadcast %59 : vector<16x1xf32> to vector<16x80xf32>
    %85 = arith.addf %83, %84 : vector<16x80xf32>
    %cst_33 = arith.constant 0.000000e+00 : f32
    %86 = vector.broadcast %cst_33 : f32 to vector<16x80xf32>
    %87 = arith.maximumf %85, %86 : vector<16x80xf32>
    %88 = vector.broadcast %0 : vector<1x80xf32> to vector<16x80xf32>
    %89 = arith.mulf %87, %88 : vector<16x80xf32>
    %cst_34 = arith.constant 0.000000e+00 : bf16
    %90 = vector.broadcast %cst_34 : bf16 to vector<16x110xbf16>
    %c0_35 = arith.constant 0 : index
    %c0_36 = arith.constant 0 : index
    %c0_37 = arith.constant 0 : index
    %91 = vector.load %arg11[%c0_35, %c0_36, %c0_37] : memref<1x16x110xbf16, #tpu.memory_space<vmem>>, vector<1x16x110xbf16>
    %92 = vector.shape_cast %91 : vector<1x16x110xbf16> to vector<16x110xbf16>
    %93 = vector.shape_cast %90 : vector<16x110xbf16> to vector<1x16x110xbf16>
    tpu.vector_store %arg11[%c0_35, %c0_36, %c0_37], %93 {strides = array<i32>} : memref<1x16x110xbf16, #tpu.memory_space<vmem>>, vector<1x16x110xbf16>,
    %94 = arith.truncf %89 : vector<16x80xf32> to vector<16x80xbf16>
    %c0_38 = arith.constant 0 : index
    %c0_39 = arith.constant 0 : index
    %c11 = arith.constant 11 : index
    %95 = vector.load %arg11[%c0_38, %c0_39, %c11] : memref<1x16x110xbf16, #tpu.memory_space<vmem>>, vector<1x16x80xbf16>
    %96 = vector.shape_cast %95 : vector<1x16x80xbf16> to vector<16x80xbf16>
    %97 = vector.shape_cast %94 : vector<16x80xbf16> to vector<1x16x80xbf16>
    tpu.vector_store %arg11[%c0_38, %c0_39, %c11], %97 {strides = array<i32>} : memref<1x16x110xbf16, #tpu.memory_space<vmem>>, vector<1x16x80xbf16>,
    %c0_40 = arith.constant 0 : index
    %c0_41 = arith.constant 0 : index
    %98 = vector.load %arg9[%c0_40, %c0_41] : memref<16x16xbf16, #tpu.memory_space<vmem>>, vector<16x16xbf16>
    %99 = arith.truncf %89 : vector<16x80xf32> to vector<16x80xbf16>
    %cst_42 = arith.constant dense<0.000000e+00> : vector<16x80xf32>
    %100 = tpu.matmul %98, %99, %cst_42 {dimension_numbers = #tpu.dot_dimension_numbers<[1], [0], [0], [1], [0, 0, 1, 1], [], []>} : vector<16x16xbf16>, vector<16x80xbf16>, vector<16x80xf32> -> vector<16x80xf32>
    %cst_43 = arith.constant 0.000000e+00 : bf16
    %101 = vector.broadcast %cst_43 : bf16 to vector<16x110xbf16>
    %c0_44 = arith.constant 0 : index
    %c0_45 = arith.constant 0 : index
    %c0_46 = arith.constant 0 : index
    %102 = vector.load %arg12[%c0_44, %c0_45, %c0_46] : memref<1x16x110xbf16, #tpu.memory_space<vmem>>, vector<1x16x110xbf16>
    %103 = vector.shape_cast %102 : vector<1x16x110xbf16> to vector<16x110xbf16>
    %104 = vector.shape_cast %101 : vector<16x110xbf16> to vector<1x16x110xbf16>
    tpu.vector_store %arg12[%c0_44, %c0_45, %c0_46], %104 {strides = array<i32>} : memref<1x16x110xbf16, #tpu.memory_space<vmem>>, vector<1x16x110xbf16>,
    %105 = arith.truncf %100 : vector<16x80xf32> to vector<16x80xbf16>
    %c0_47 = arith.constant 0 : index
    %c0_48 = arith.constant 0 : index
    %c11_49 = arith.constant 11 : index
    %106 = vector.load %arg12[%c0_47, %c0_48, %c11_49] : memref<1x16x110xbf16, #tpu.memory_space<vmem>>, vector<1x16x80xbf16>
    %107 = vector.shape_cast %106 : vector<1x16x80xbf16> to vector<16x80xbf16>
    %108 = vector.shape_cast %105 : vector<16x80xbf16> to vector<1x16x80xbf16>
    tpu.vector_store %arg12[%c0_47, %c0_48, %c11_49], %108 {strides = array<i32>} : memref<1x16x110xbf16, #tpu.memory_space<vmem>>, vector<1x16x80xbf16>,
    return
  }
  func.func @transform_0(%arg0: i32) -> (i32, i32, i32) {
    %c0_i32 = arith.constant 0 : i32
    %c0_i32_0 = arith.constant 0 : i32
    %c0_i32_1 = arith.constant 0 : i32
    return %arg0, %c0_i32, %c0_i32_0 : i32, i32, i32
  }
  func.func @transform_1(%arg0: i32) -> (i32, i32, i32) {
    %c0_i32 = arith.constant 0 : i32
    %c0_i32_0 = arith.constant 0 : i32
    %c0_i32_1 = arith.constant 0 : i32
    return %arg0, %c0_i32, %c0_i32_0 : i32, i32, i32
  }
  func.func @transform_2(%arg0: i32) -> (i32, i32) {
    %c0_i32 = arith.constant 0 : i32
    %c0_i32_0 = arith.constant 0 : i32
    %c0_i32_1 = arith.constant 0 : i32
    return %c0_i32, %c0_i32_0 : i32, i32
  }
  func.func @transform_3(%arg0: i32) -> (i32, i32) {
    %c0_i32 = arith.constant 0 : i32
    %c0_i32_0 = arith.constant 0 : i32
    %c0_i32_1 = arith.constant 0 : i32
    return %c0_i32, %c0_i32_0 : i32, i32
  }
  func.func @transform_4(%arg0: i32) -> (i32, i32) {
    %c0_i32 = arith.constant 0 : i32
    %c0_i32_0 = arith.constant 0 : i32
    %c0_i32_1 = arith.constant 0 : i32
    return %c0_i32, %c0_i32_0 : i32, i32
  }
  func.func @transform_5(%arg0: i32) -> (i32, i32) {
    %c0_i32 = arith.constant 0 : i32
    %c0_i32_0 = arith.constant 0 : i32
    %c0_i32_1 = arith.constant 0 : i32
    return %c0_i32, %c0_i32_0 : i32, i32
  }
  func.func @transform_6(%arg0: i32) -> (i32, i32) {
    %c0_i32 = arith.constant 0 : i32
    %c0_i32_0 = arith.constant 0 : i32
    %c0_i32_1 = arith.constant 0 : i32
    return %c0_i32, %c0_i32_0 : i32, i32
  }
  func.func @transform_7(%arg0: i32) -> (i32, i32) {
    %c0_i32 = arith.constant 0 : i32
    %c0_i32_0 = arith.constant 0 : i32
    %c0_i32_1 = arith.constant 0 : i32
    return %c0_i32, %c0_i32_0 : i32, i32
  }
  func.func @transform_8(%arg0: i32) -> (i32, i32) {
    %c0_i32 = arith.constant 0 : i32
    %c0_i32_0 = arith.constant 0 : i32
    %c0_i32_1 = arith.constant 0 : i32
    return %c0_i32, %c0_i32_0 : i32, i32
  }
  func.func @transform_9(%arg0: i32) -> (i32, i32) {
    %c0_i32 = arith.constant 0 : i32
    %c0_i32_0 = arith.constant 0 : i32
    %c0_i32_1 = arith.constant 0 : i32
    return %c0_i32, %c0_i32_0 : i32, i32
  }
  func.func @transform_10(%arg0: i32) -> (i32, i32, i32) {
    %c0_i32 = arith.constant 0 : i32
    %c0_i32_0 = arith.constant 0 : i32
    %c0_i32_1 = arith.constant 0 : i32
    return %arg0, %c0_i32, %c0_i32_0 : i32, i32, i32
  }
  func.func @transform_11(%arg0: i32) -> (i32, i32, i32) {
    %c0_i32 = arith.constant 0 : i32
    %c0_i32_0 = arith.constant 0 : i32
    %c0_i32_1 = arith.constant 0 : i32
    return %arg0, %c0_i32, %c0_i32_0 : i32, i32, i32
  }
}

module attributes {stable_mosaic.version = 11 : i64} {
  func.func @_cat_attn_cat3_kernel(%arg0: i32, %arg1: memref<1x342x4xbf16, #tpu.memory_space<vmem>>, %arg2: memref<1x342x4xbf16, #tpu.memory_space<vmem>>, %arg3: memref<1x16x110xbf16, #tpu.memory_space<vmem>>, %arg4: memref<1x4x342xbf16, #tpu.memory_space<vmem>>, %arg5: memref<72x4xbf16, #tpu.memory_space<vmem>>, %arg6: memref<1x4xf32, #tpu.memory_space<vmem>>, %arg7: memref<1x4xf32, #tpu.memory_space<vmem>>, %arg8: memref<4x4xbf16, #tpu.memory_space<vmem>>, %arg9: memref<1x4xf32, #tpu.memory_space<vmem>>, %arg10: memref<4x16xbf16, #tpu.memory_space<vmem>>, %arg11: memref<4x1xf32, #tpu.memory_space<vmem>>, %arg12: memref<4x16xbf16, #tpu.memory_space<vmem>>, %arg13: memref<4x1xf32, #tpu.memory_space<vmem>>, %arg14: memref<4x72xbf16, #tpu.memory_space<vmem>>, %arg15: memref<4x1xf32, #tpu.memory_space<vmem>>, %arg16: memref<4x1xf32, #tpu.memory_space<vmem>>, %arg17: memref<1x288xf32, #tpu.memory_space<vmem>>, %arg18: memref<1x110xf32, #tpu.memory_space<vmem>>, %arg19: memref<1x4x342xf32, #tpu.memory_space<vmem>>) attributes {dimension_semantics = [#tpu.dimension_semantics<parallel>], iteration_bounds = array<i64: 2>, scalar_prefetch = 0 : i64, scratch_operands = 0 : i64, tpu.core_type = #tpu.core_type<tc>, window_params = [{transform_indices = @transform_0, window_bounds = array<i64: 1, 342, 4>}, {transform_indices = @transform_1, window_bounds = array<i64: 1, 342, 4>}, {transform_indices = @transform_2, window_bounds = array<i64: 1, 16, 110>}, {transform_indices = @transform_3, window_bounds = array<i64: 1, 4, 342>}, {pipeline_mode = #tpu.pipeline_mode<synchronous>, transform_indices = @transform_4, window_bounds = array<i64: 72, 4>}, {pipeline_mode = #tpu.pipeline_mode<synchronous>, transform_indices = @transform_5, window_bounds = array<i64: 1, 4>}, {pipeline_mode = #tpu.pipeline_mode<synchronous>, transform_indices = @transform_6, window_bounds = array<i64: 1, 4>}, {pipeline_mode = #tpu.pipeline_mode<synchronous>, transform_indices = @transform_7, window_bounds = array<i64: 4, 4>}, {pipeline_mode = #tpu.pipeline_mode<synchronous>, transform_indices = @transform_8, window_bounds = array<i64: 1, 4>}, {pipeline_mode = #tpu.pipeline_mode<synchronous>, transform_indices = @transform_9, window_bounds = array<i64: 4, 16>}, {pipeline_mode = #tpu.pipeline_mode<synchronous>, transform_indices = @transform_10, window_bounds = array<i64: 4, 1>}, {pipeline_mode = #tpu.pipeline_mode<synchronous>, transform_indices = @transform_11, window_bounds = array<i64: 4, 16>}, {pipeline_mode = #tpu.pipeline_mode<synchronous>, transform_indices = @transform_12, window_bounds = array<i64: 4, 1>}, {pipeline_mode = #tpu.pipeline_mode<synchronous>, transform_indices = @transform_13, window_bounds = array<i64: 4, 72>}, {pipeline_mode = #tpu.pipeline_mode<synchronous>, transform_indices = @transform_14, window_bounds = array<i64: 4, 1>}, {pipeline_mode = #tpu.pipeline_mode<synchronous>, transform_indices = @transform_15, window_bounds = array<i64: 4, 1>}, {pipeline_mode = #tpu.pipeline_mode<synchronous>, transform_indices = @transform_16, window_bounds = array<i64: 1, 288>}, {pipeline_mode = #tpu.pipeline_mode<synchronous>, transform_indices = @transform_17, window_bounds = array<i64: 1, 110>}, {transform_indices = @transform_18, window_bounds = array<i64: 1, 4, 342>}]} {
    %c0 = arith.constant 0 : index
    %c0_0 = arith.constant 0 : index
    %0 = vector.load %arg17[%c0, %c0_0] : memref<1x288xf32, #tpu.memory_space<vmem>>, vector<1x288xf32>
    %c0_1 = arith.constant 0 : index
    %c0_2 = arith.constant 0 : index
    %c0_3 = arith.constant 0 : index
    %1 = vector.load %arg1[%c0_1, %c0_2, %c0_3] : memref<1x342x4xbf16, #tpu.memory_space<vmem>>, vector<1x288x4xbf16>
    %2 = vector.shape_cast %1 : vector<1x288x4xbf16> to vector<288x4xbf16>
    %c0_4 = arith.constant 0 : index
    %c1 = arith.constant 1 : index
    %c0_5 = arith.constant 0 : index
    %3 = vector.load %arg1[%c0_4, %c1, %c0_5] : memref<1x342x4xbf16, #tpu.memory_space<vmem>>, vector<1x288x4xbf16>
    %4 = vector.shape_cast %3 : vector<1x288x4xbf16> to vector<288x4xbf16>
    %c0_6 = arith.constant 0 : index
    %c2 = arith.constant 2 : index
    %c0_7 = arith.constant 0 : index
    %5 = vector.load %arg1[%c0_6, %c2, %c0_7] : memref<1x342x4xbf16, #tpu.memory_space<vmem>>, vector<1x288x4xbf16>
    %6 = vector.shape_cast %5 : vector<1x288x4xbf16> to vector<288x4xbf16>
    %c0_8 = arith.constant 0 : index
    %c18 = arith.constant 18 : index
    %c0_9 = arith.constant 0 : index
    %7 = vector.load %arg1[%c0_8, %c18, %c0_9] : memref<1x342x4xbf16, #tpu.memory_space<vmem>>, vector<1x288x4xbf16>
    %8 = vector.shape_cast %7 : vector<1x288x4xbf16> to vector<288x4xbf16>
    %c0_10 = arith.constant 0 : index
    %c19 = arith.constant 19 : index
    %c0_11 = arith.constant 0 : index
    %9 = vector.load %arg1[%c0_10, %c19, %c0_11] : memref<1x342x4xbf16, #tpu.memory_space<vmem>>, vector<1x288x4xbf16>
    %10 = vector.shape_cast %9 : vector<1x288x4xbf16> to vector<288x4xbf16>
    %c0_12 = arith.constant 0 : index
    %c20 = arith.constant 20 : index
    %c0_13 = arith.constant 0 : index
    %11 = vector.load %arg1[%c0_12, %c20, %c0_13] : memref<1x342x4xbf16, #tpu.memory_space<vmem>>, vector<1x288x4xbf16>
    %12 = vector.shape_cast %11 : vector<1x288x4xbf16> to vector<288x4xbf16>
    %c0_14 = arith.constant 0 : index
    %c36 = arith.constant 36 : index
    %c0_15 = arith.constant 0 : index
    %13 = vector.load %arg1[%c0_14, %c36, %c0_15] : memref<1x342x4xbf16, #tpu.memory_space<vmem>>, vector<1x288x4xbf16>
    %14 = vector.shape_cast %13 : vector<1x288x4xbf16> to vector<288x4xbf16>
    %c0_16 = arith.constant 0 : index
    %c37 = arith.constant 37 : index
    %c0_17 = arith.constant 0 : index
    %15 = vector.load %arg1[%c0_16, %c37, %c0_17] : memref<1x342x4xbf16, #tpu.memory_space<vmem>>, vector<1x288x4xbf16>
    %16 = vector.shape_cast %15 : vector<1x288x4xbf16> to vector<288x4xbf16>
    %c0_18 = arith.constant 0 : index
    %c38 = arith.constant 38 : index
    %c0_19 = arith.constant 0 : index
    %17 = vector.load %arg1[%c0_18, %c38, %c0_19] : memref<1x342x4xbf16, #tpu.memory_space<vmem>>, vector<1x288x4xbf16>
    %18 = vector.shape_cast %17 : vector<1x288x4xbf16> to vector<288x4xbf16>
    %c0_20 = arith.constant 0 : index
    %c0_21 = arith.constant 0 : index
    %c0_22 = arith.constant 0 : index
    %19 = vector.load %arg2[%c0_20, %c0_21, %c0_22] : memref<1x342x4xbf16, #tpu.memory_space<vmem>>, vector<1x288x4xbf16>
    %20 = vector.shape_cast %19 : vector<1x288x4xbf16> to vector<288x4xbf16>
    %c0_23 = arith.constant 0 : index
    %c1_24 = arith.constant 1 : index
    %c0_25 = arith.constant 0 : index
    %21 = vector.load %arg2[%c0_23, %c1_24, %c0_25] : memref<1x342x4xbf16, #tpu.memory_space<vmem>>, vector<1x288x4xbf16>
    %22 = vector.shape_cast %21 : vector<1x288x4xbf16> to vector<288x4xbf16>
    %c0_26 = arith.constant 0 : index
    %c2_27 = arith.constant 2 : index
    %c0_28 = arith.constant 0 : index
    %23 = vector.load %arg2[%c0_26, %c2_27, %c0_28] : memref<1x342x4xbf16, #tpu.memory_space<vmem>>, vector<1x288x4xbf16>
    %24 = vector.shape_cast %23 : vector<1x288x4xbf16> to vector<288x4xbf16>
    %c0_29 = arith.constant 0 : index
    %c18_30 = arith.constant 18 : index
    %c0_31 = arith.constant 0 : index
    %25 = vector.load %arg2[%c0_29, %c18_30, %c0_31] : memref<1x342x4xbf16, #tpu.memory_space<vmem>>, vector<1x288x4xbf16>
    %26 = vector.shape_cast %25 : vector<1x288x4xbf16> to vector<288x4xbf16>
    %c0_32 = arith.constant 0 : index
    %c19_33 = arith.constant 19 : index
    %c0_34 = arith.constant 0 : index
    %27 = vector.load %arg2[%c0_32, %c19_33, %c0_34] : memref<1x342x4xbf16, #tpu.memory_space<vmem>>, vector<1x288x4xbf16>
    %28 = vector.shape_cast %27 : vector<1x288x4xbf16> to vector<288x4xbf16>
    %c0_35 = arith.constant 0 : index
    %c20_36 = arith.constant 20 : index
    %c0_37 = arith.constant 0 : index
    %29 = vector.load %arg2[%c0_35, %c20_36, %c0_37] : memref<1x342x4xbf16, #tpu.memory_space<vmem>>, vector<1x288x4xbf16>
    %30 = vector.shape_cast %29 : vector<1x288x4xbf16> to vector<288x4xbf16>
    %c0_38 = arith.constant 0 : index
    %c36_39 = arith.constant 36 : index
    %c0_40 = arith.constant 0 : index
    %31 = vector.load %arg2[%c0_38, %c36_39, %c0_40] : memref<1x342x4xbf16, #tpu.memory_space<vmem>>, vector<1x288x4xbf16>
    %32 = vector.shape_cast %31 : vector<1x288x4xbf16> to vector<288x4xbf16>
    %c0_41 = arith.constant 0 : index
    %c37_42 = arith.constant 37 : index
    %c0_43 = arith.constant 0 : index
    %33 = vector.load %arg2[%c0_41, %c37_42, %c0_43] : memref<1x342x4xbf16, #tpu.memory_space<vmem>>, vector<1x288x4xbf16>
    %34 = vector.shape_cast %33 : vector<1x288x4xbf16> to vector<288x4xbf16>
    %c0_44 = arith.constant 0 : index
    %c38_45 = arith.constant 38 : index
    %c0_46 = arith.constant 0 : index
    %35 = vector.load %arg2[%c0_44, %c38_45, %c0_46] : memref<1x342x4xbf16, #tpu.memory_space<vmem>>, vector<1x288x4xbf16>
    %36 = vector.shape_cast %35 : vector<1x288x4xbf16> to vector<288x4xbf16>
    %37 = tpu.concatenate %2, %4, %6, %8, %10, %12, %14, %16, %18, %20, %22, %24, %26, %28, %30, %32 in 1 : vector<288x4xbf16>, vector<288x4xbf16>, vector<288x4xbf16>, vector<288x4xbf16>, vector<288x4xbf16>, vector<288x4xbf16>, vector<288x4xbf16>, vector<288x4xbf16>, vector<288x4xbf16>, vector<288x4xbf16>, vector<288x4xbf16>, vector<288x4xbf16>, vector<288x4xbf16>, vector<288x4xbf16>, vector<288x4xbf16>, vector<288x4xbf16> -> vector<288x64xbf16>
    %38 = tpu.concatenate %34, %36 in 1 : vector<288x4xbf16>, vector<288x4xbf16> -> vector<288x8xbf16>
    %39 = tpu.concatenate %37, %38 in 1 : vector<288x64xbf16>, vector<288x8xbf16> -> vector<288x72xbf16>
    %c0_47 = arith.constant 0 : index
    %c0_48 = arith.constant 0 : index
    %40 = vector.load %arg5[%c0_47, %c0_48] : memref<72x4xbf16, #tpu.memory_space<vmem>>, vector<72x4xbf16>
    %cst = arith.constant dense<0.000000e+00> : vector<288x4xf32>
    %41 = tpu.matmul %39, %40, %cst {dimension_numbers = #tpu.dot_dimension_numbers<[1], [0], [0], [1], [0, 0, 1, 1], [], []>} : vector<288x72xbf16>, vector<72x4xbf16>, vector<288x4xf32> -> vector<288x4xf32>
    %c0_49 = arith.constant 0 : index
    %c0_50 = arith.constant 0 : index
    %42 = vector.load %arg6[%c0_49, %c0_50] : memref<1x4xf32, #tpu.memory_space<vmem>>, vector<1x4xf32>
    %43 = vector.broadcast %42 : vector<1x4xf32> to vector<288x4xf32>
    %44 = arith.mulf %41, %43 : vector<288x4xf32>
    %c0_51 = arith.constant 0 : index
    %c0_52 = arith.constant 0 : index
    %45 = vector.load %arg7[%c0_51, %c0_52] : memref<1x4xf32, #tpu.memory_space<vmem>>, vector<1x4xf32>
    %46 = vector.broadcast %45 : vector<1x4xf32> to vector<288x4xf32>
    %47 = arith.addf %44, %46 : vector<288x4xf32>
    %cst_53 = arith.constant 0.000000e+00 : f32
    %48 = vector.broadcast %cst_53 : f32 to vector<288x4xf32>
    %49 = arith.maximumf %47, %48 : vector<288x4xf32>
    %50 = arith.truncf %49 : vector<288x4xf32> to vector<288x4xbf16>
    %c0_54 = arith.constant 0 : index
    %c0_55 = arith.constant 0 : index
    %51 = vector.load %arg8[%c0_54, %c0_55] : memref<4x4xbf16, #tpu.memory_space<vmem>>, vector<4x4xbf16>
    %cst_56 = arith.constant dense<0.000000e+00> : vector<288x4xf32>
    %52 = tpu.matmul %50, %51, %cst_56 {dimension_numbers = #tpu.dot_dimension_numbers<[1], [0], [0], [1], [0, 0, 1, 1], [], []>} : vector<288x4xbf16>, vector<4x4xbf16>, vector<288x4xf32> -> vector<288x4xf32>
    %c0_57 = arith.constant 0 : index
    %c0_58 = arith.constant 0 : index
    %53 = vector.load %arg9[%c0_57, %c0_58] : memref<1x4xf32, #tpu.memory_space<vmem>>, vector<1x4xf32>
    %54 = vector.broadcast %53 : vector<1x4xf32> to vector<288x4xf32>
    %55 = arith.addf %52, %54 : vector<288x4xf32>
    %c0_59 = arith.constant 0 : index
    %c0_60 = arith.constant 0 : index
    %c0_61 = arith.constant 0 : index
    %56 = vector.load %arg3[%c0_59, %c0_60, %c0_61] : memref<1x16x110xbf16, #tpu.memory_space<vmem>>, vector<1x16x110xbf16>
    %57 = vector.shape_cast %56 : vector<1x16x110xbf16> to vector<16x110xbf16>
    %c0_62 = arith.constant 0 : index
    %c0_63 = arith.constant 0 : index
    %58 = vector.load %arg10[%c0_62, %c0_63] : memref<4x16xbf16, #tpu.memory_space<vmem>>, vector<4x16xbf16>
    %cst_64 = arith.constant dense<0.000000e+00> : vector<4x110xf32>
    %59 = tpu.matmul %58, %57, %cst_64 {dimension_numbers = #tpu.dot_dimension_numbers<[1], [0], [0], [1], [0, 0, 1, 1], [], []>} : vector<4x16xbf16>, vector<16x110xbf16>, vector<4x110xf32> -> vector<4x110xf32>
    %c0_65 = arith.constant 0 : index
    %c0_66 = arith.constant 0 : index
    %60 = vector.load %arg11[%c0_65, %c0_66] : memref<4x1xf32, #tpu.memory_space<vmem>>, vector<4x1xf32>
    %61 = vector.broadcast %60 : vector<4x1xf32> to vector<4x110xf32>
    %62 = arith.addf %59, %61 : vector<4x110xf32>
    %c0_67 = arith.constant 0 : index
    %c0_68 = arith.constant 0 : index
    %63 = vector.load %arg12[%c0_67, %c0_68] : memref<4x16xbf16, #tpu.memory_space<vmem>>, vector<4x16xbf16>
    %cst_69 = arith.constant dense<0.000000e+00> : vector<4x110xf32>
    %64 = tpu.matmul %63, %57, %cst_69 {dimension_numbers = #tpu.dot_dimension_numbers<[1], [0], [0], [1], [0, 0, 1, 1], [], []>} : vector<4x16xbf16>, vector<16x110xbf16>, vector<4x110xf32> -> vector<4x110xf32>
    %c0_70 = arith.constant 0 : index
    %c0_71 = arith.constant 0 : index
    %65 = vector.load %arg13[%c0_70, %c0_71] : memref<4x1xf32, #tpu.memory_space<vmem>>, vector<4x1xf32>
    %66 = vector.broadcast %65 : vector<4x1xf32> to vector<4x110xf32>
    %67 = arith.addf %64, %66 : vector<4x110xf32>
    %68 = arith.truncf %55 : vector<288x4xf32> to vector<288x4xbf16>
    %69 = arith.truncf %62 : vector<4x110xf32> to vector<4x110xbf16>
    %cst_72 = arith.constant dense<0.000000e+00> : vector<288x110xf32>
    %70 = tpu.matmul %68, %69, %cst_72 {dimension_numbers = #tpu.dot_dimension_numbers<[1], [0], [0], [1], [0, 0, 1, 1], [], []>} : vector<288x4xbf16>, vector<4x110xbf16>, vector<288x110xf32> -> vector<288x110xf32>
    %c0_73 = arith.constant 0 : index
    %c0_74 = arith.constant 0 : index
    %71 = vector.load %arg18[%c0_73, %c0_74] : memref<1x110xf32, #tpu.memory_space<vmem>>, vector<1x110xf32>
    %cst_75 = arith.constant 1.000000e+00 : f32
    %72 = vector.broadcast %cst_75 : f32 to vector<1x110xf32>
    %73 = arith.subf %72, %71 : vector<1x110xf32>
    %cst_76 = arith.constant 1.000000e+30 : f32
    %74 = vector.broadcast %cst_76 : f32 to vector<1x110xf32>
    %75 = arith.mulf %73, %74 : vector<1x110xf32>
    %76 = vector.broadcast %75 : vector<1x110xf32> to vector<288x110xf32>
    %77 = arith.subf %70, %76 : vector<288x110xf32>
    %cst_77 = arith.constant dense<0xFF800000> : vector<288xf32>
    %78 = vector.multi_reduction <maximumf>, %77, %cst_77 [1] : vector<288x110xf32> to vector<288xf32>
    %79 = vector.shape_cast %78 : vector<288xf32> to vector<288x1xf32>
    %80 = vector.broadcast %79 : vector<288x1xf32> to vector<288x110xf32>
    %81 = arith.subf %77, %80 : vector<288x110xf32>
    %82 = math.exp %81 : vector<288x110xf32>
    %cst_78 = arith.constant 1.000000e+00 : f32
    %83 = vector.broadcast %cst_78 : f32 to vector<1x110xf32>
    %84 = tpu.concatenate %67, %83 in 0 : vector<4x110xf32>, vector<1x110xf32> -> vector<5x110xf32>
    %85 = arith.truncf %84 : vector<5x110xf32> to vector<5x110xbf16>
    %86 = arith.truncf %82 : vector<288x110xf32> to vector<288x110xbf16>
    %cst_79 = arith.constant dense<0.000000e+00> : vector<5x288xf32>
    %87 = tpu.matmul %85, %86, %cst_79 {dimension_numbers = #tpu.dot_dimension_numbers<[1], [1], [0], [0], [0, 0, 1, 0], [], []>} : vector<5x110xbf16>, vector<288x110xbf16>, vector<5x288xf32> -> vector<5x288xf32>
    %88 = vector.extract_strided_slice %87 {offsets = [0, 0], sizes = [4, 288], strides = [1, 1]} : vector<5x288xf32> to vector<4x288xf32>
    %89 = vector.extract_strided_slice %87 {offsets = [4, 0], sizes = [1, 288], strides = [1, 1]} : vector<5x288xf32> to vector<1x288xf32>
    %90 = tpu.reciprocal %89 {approx = true} : vector<1x288xf32> -> vector<1x288xf32>
    %91 = vector.broadcast %90 : vector<1x288xf32> to vector<4x288xf32>
    %92 = arith.mulf %88, %91 : vector<4x288xf32>
    %93 = vector.broadcast %0 : vector<1x288xf32> to vector<4x288xf32>
    %94 = arith.mulf %92, %93 : vector<4x288xf32>
    %cst_80 = arith.constant 0.000000e+00 : bf16
    %95 = vector.broadcast %cst_80 : bf16 to vector<4x19xbf16>
    %96 = arith.truncf %94 : vector<4x288xf32> to vector<4x288xbf16>
    %cst_81 = arith.constant 0.000000e+00 : bf16
    %97 = vector.broadcast %cst_81 : bf16 to vector<4x35xbf16>
    %98 = tpu.concatenate %95, %96, %97 in 1 : vector<4x19xbf16>, vector<4x288xbf16>, vector<4x35xbf16> -> vector<4x342xbf16>
    %c0_82 = arith.constant 0 : index
    %c0_83 = arith.constant 0 : index
    %c0_84 = arith.constant 0 : index
    %99 = vector.load %arg4[%c0_82, %c0_83, %c0_84] : memref<1x4x342xbf16, #tpu.memory_space<vmem>>, vector<1x4x342xbf16>
    %100 = vector.shape_cast %99 : vector<1x4x342xbf16> to vector<4x342xbf16>
    %c0_85 = arith.constant 0 : index
    %c0_86 = arith.constant 0 : index
    %101 = vector.load %arg14[%c0_85, %c0_86] : memref<4x72xbf16, #tpu.memory_space<vmem>>, vector<4x72xbf16>
    %c0_87 = arith.constant 0 : index
    %c0_88 = arith.constant 0 : index
    %102 = vector.load %arg15[%c0_87, %c0_88] : memref<4x1xf32, #tpu.memory_space<vmem>>, vector<4x1xf32>
    %c0_89 = arith.constant 0 : index
    %c0_90 = arith.constant 0 : index
    %103 = vector.load %arg16[%c0_89, %c0_90] : memref<4x1xf32, #tpu.memory_space<vmem>>, vector<4x1xf32>
    %104 = vector.extract_strided_slice %98 {offsets = [0, 0], sizes = [4, 288], strides = [1, 1]} : vector<4x342xbf16> to vector<4x288xbf16>
    %105 = vector.extract_strided_slice %98 {offsets = [0, 1], sizes = [4, 288], strides = [1, 1]} : vector<4x342xbf16> to vector<4x288xbf16>
    %106 = vector.extract_strided_slice %98 {offsets = [0, 2], sizes = [4, 288], strides = [1, 1]} : vector<4x342xbf16> to vector<4x288xbf16>
    %107 = vector.extract_strided_slice %98 {offsets = [0, 18], sizes = [4, 288], strides = [1, 1]} : vector<4x342xbf16> to vector<4x288xbf16>
    %108 = vector.extract_strided_slice %98 {offsets = [0, 19], sizes = [4, 288], strides = [1, 1]} : vector<4x342xbf16> to vector<4x288xbf16>
    %109 = vector.extract_strided_slice %98 {offsets = [0, 20], sizes = [4, 288], strides = [1, 1]} : vector<4x342xbf16> to vector<4x288xbf16>
    %110 = vector.extract_strided_slice %98 {offsets = [0, 36], sizes = [4, 288], strides = [1, 1]} : vector<4x342xbf16> to vector<4x288xbf16>
    %111 = vector.extract_strided_slice %98 {offsets = [0, 37], sizes = [4, 288], strides = [1, 1]} : vector<4x342xbf16> to vector<4x288xbf16>
    %112 = vector.extract_strided_slice %98 {offsets = [0, 38], sizes = [4, 288], strides = [1, 1]} : vector<4x342xbf16> to vector<4x288xbf16>
    %113 = vector.extract_strided_slice %100 {offsets = [0, 0], sizes = [4, 288], strides = [1, 1]} : vector<4x342xbf16> to vector<4x288xbf16>
    %114 = vector.extract_strided_slice %100 {offsets = [0, 1], sizes = [4, 288], strides = [1, 1]} : vector<4x342xbf16> to vector<4x288xbf16>
    %115 = vector.extract_strided_slice %100 {offsets = [0, 2], sizes = [4, 288], strides = [1, 1]} : vector<4x342xbf16> to vector<4x288xbf16>
    %116 = vector.extract_strided_slice %100 {offsets = [0, 18], sizes = [4, 288], strides = [1, 1]} : vector<4x342xbf16> to vector<4x288xbf16>
    %117 = vector.extract_strided_slice %100 {offsets = [0, 19], sizes = [4, 288], strides = [1, 1]} : vector<4x342xbf16> to vector<4x288xbf16>
    %118 = vector.extract_strided_slice %100 {offsets = [0, 20], sizes = [4, 288], strides = [1, 1]} : vector<4x342xbf16> to vector<4x288xbf16>
    %119 = vector.extract_strided_slice %100 {offsets = [0, 36], sizes = [4, 288], strides = [1, 1]} : vector<4x342xbf16> to vector<4x288xbf16>
    %120 = vector.extract_strided_slice %100 {offsets = [0, 37], sizes = [4, 288], strides = [1, 1]} : vector<4x342xbf16> to vector<4x288xbf16>
    %121 = vector.extract_strided_slice %100 {offsets = [0, 38], sizes = [4, 288], strides = [1, 1]} : vector<4x342xbf16> to vector<4x288xbf16>
    %122 = tpu.concatenate %104, %105, %106, %107, %108, %109, %110, %111, %112, %113, %114, %115, %116, %117, %118, %119 in 0 : vector<4x288xbf16>, vector<4x288xbf16>, vector<4x288xbf16>, vector<4x288xbf16>, vector<4x288xbf16>, vector<4x288xbf16>, vector<4x288xbf16>, vector<4x288xbf16>, vector<4x288xbf16>, vector<4x288xbf16>, vector<4x288xbf16>, vector<4x288xbf16>, vector<4x288xbf16>, vector<4x288xbf16>, vector<4x288xbf16>, vector<4x288xbf16> -> vector<64x288xbf16>
    %123 = tpu.concatenate %120, %121 in 0 : vector<4x288xbf16>, vector<4x288xbf16> -> vector<8x288xbf16>
    %124 = tpu.concatenate %122, %123 in 0 : vector<64x288xbf16>, vector<8x288xbf16> -> vector<72x288xbf16>
    %cst_91 = arith.constant dense<0.000000e+00> : vector<4x288xf32>
    %125 = tpu.matmul %101, %124, %cst_91 {dimension_numbers = #tpu.dot_dimension_numbers<[1], [0], [0], [1], [0, 0, 1, 1], [], []>} : vector<4x72xbf16>, vector<72x288xbf16>, vector<4x288xf32> -> vector<4x288xf32>
    %126 = vector.broadcast %102 : vector<4x1xf32> to vector<4x288xf32>
    %127 = arith.mulf %125, %126 : vector<4x288xf32>
    %128 = vector.broadcast %103 : vector<4x1xf32> to vector<4x288xf32>
    %129 = arith.addf %127, %128 : vector<4x288xf32>
    %cst_92 = arith.constant 0.000000e+00 : f32
    %130 = vector.broadcast %cst_92 : f32 to vector<4x288xf32>
    %131 = arith.maximumf %129, %130 : vector<4x288xf32>
    %132 = vector.broadcast %0 : vector<1x288xf32> to vector<4x288xf32>
    %133 = arith.mulf %131, %132 : vector<4x288xf32>
    %cst_93 = arith.constant 0.000000e+00 : f32
    %134 = vector.broadcast %cst_93 : f32 to vector<4x342xf32>
    %c0_94 = arith.constant 0 : index
    %c0_95 = arith.constant 0 : index
    %c0_96 = arith.constant 0 : index
    %135 = vector.load %arg19[%c0_94, %c0_95, %c0_96] : memref<1x4x342xf32, #tpu.memory_space<vmem>>, vector<1x4x342xf32>
    %136 = vector.shape_cast %135 : vector<1x4x342xf32> to vector<4x342xf32>
    %137 = vector.shape_cast %134 : vector<4x342xf32> to vector<1x4x342xf32>
    tpu.vector_store %arg19[%c0_94, %c0_95, %c0_96], %137 {strides = array<i32>} : memref<1x4x342xf32, #tpu.memory_space<vmem>>, vector<1x4x342xf32>,
    %c0_97 = arith.constant 0 : index
    %c0_98 = arith.constant 0 : index
    %c19_99 = arith.constant 19 : index
    %138 = vector.load %arg19[%c0_97, %c0_98, %c19_99] : memref<1x4x342xf32, #tpu.memory_space<vmem>>, vector<1x4x288xf32>
    %139 = vector.shape_cast %138 : vector<1x4x288xf32> to vector<4x288xf32>
    %140 = vector.shape_cast %133 : vector<4x288xf32> to vector<1x4x288xf32>
    tpu.vector_store %arg19[%c0_97, %c0_98, %c19_99], %140 {strides = array<i32>} : memref<1x4x342xf32, #tpu.memory_space<vmem>>, vector<1x4x288xf32>,
    return
  }
  func.func @transform_0(%arg0: i32) -> (i32, i32, i32) {
    %c0_i32 = arith.constant 0 : i32
    %c0_i32_0 = arith.constant 0 : i32
    %c0_i32_1 = arith.constant 0 : i32
    return %arg0, %c0_i32, %c0_i32_0 : i32, i32, i32
  }
  func.func @transform_1(%arg0: i32) -> (i32, i32, i32) {
    %c0_i32 = arith.constant 0 : i32
    %c0_i32_0 = arith.constant 0 : i32
    %c0_i32_1 = arith.constant 0 : i32
    return %arg0, %c0_i32, %c0_i32_0 : i32, i32, i32
  }
  func.func @transform_2(%arg0: i32) -> (i32, i32, i32) {
    %c0_i32 = arith.constant 0 : i32
    %c0_i32_0 = arith.constant 0 : i32
    %c0_i32_1 = arith.constant 0 : i32
    return %arg0, %c0_i32, %c0_i32_0 : i32, i32, i32
  }
  func.func @transform_3(%arg0: i32) -> (i32, i32, i32) {
    %c0_i32 = arith.constant 0 : i32
    %c0_i32_0 = arith.constant 0 : i32
    %c0_i32_1 = arith.constant 0 : i32
    return %arg0, %c0_i32, %c0_i32_0 : i32, i32, i32
  }
  func.func @transform_4(%arg0: i32) -> (i32, i32) {
    %c0_i32 = arith.constant 0 : i32
    %c0_i32_0 = arith.constant 0 : i32
    %c0_i32_1 = arith.constant 0 : i32
    return %c0_i32, %c0_i32_0 : i32, i32
  }
  func.func @transform_5(%arg0: i32) -> (i32, i32) {
    %c0_i32 = arith.constant 0 : i32
    %c0_i32_0 = arith.constant 0 : i32
    %c0_i32_1 = arith.constant 0 : i32
    return %c0_i32, %c0_i32_0 : i32, i32
  }
  func.func @transform_6(%arg0: i32) -> (i32, i32) {
    %c0_i32 = arith.constant 0 : i32
    %c0_i32_0 = arith.constant 0 : i32
    %c0_i32_1 = arith.constant 0 : i32
    return %c0_i32, %c0_i32_0 : i32, i32
  }
  func.func @transform_7(%arg0: i32) -> (i32, i32) {
    %c0_i32 = arith.constant 0 : i32
    %c0_i32_0 = arith.constant 0 : i32
    %c0_i32_1 = arith.constant 0 : i32
    return %c0_i32, %c0_i32_0 : i32, i32
  }
  func.func @transform_8(%arg0: i32) -> (i32, i32) {
    %c0_i32 = arith.constant 0 : i32
    %c0_i32_0 = arith.constant 0 : i32
    %c0_i32_1 = arith.constant 0 : i32
    return %c0_i32, %c0_i32_0 : i32, i32
  }
  func.func @transform_9(%arg0: i32) -> (i32, i32) {
    %c0_i32 = arith.constant 0 : i32
    %c0_i32_0 = arith.constant 0 : i32
    %c0_i32_1 = arith.constant 0 : i32
    return %c0_i32, %c0_i32_0 : i32, i32
  }
  func.func @transform_10(%arg0: i32) -> (i32, i32) {
    %c0_i32 = arith.constant 0 : i32
    %c0_i32_0 = arith.constant 0 : i32
    %c0_i32_1 = arith.constant 0 : i32
    return %c0_i32, %c0_i32_0 : i32, i32
  }
  func.func @transform_11(%arg0: i32) -> (i32, i32) {
    %c0_i32 = arith.constant 0 : i32
    %c0_i32_0 = arith.constant 0 : i32
    %c0_i32_1 = arith.constant 0 : i32
    return %c0_i32, %c0_i32_0 : i32, i32
  }
  func.func @transform_12(%arg0: i32) -> (i32, i32) {
    %c0_i32 = arith.constant 0 : i32
    %c0_i32_0 = arith.constant 0 : i32
    %c0_i32_1 = arith.constant 0 : i32
    return %c0_i32, %c0_i32_0 : i32, i32
  }
  func.func @transform_13(%arg0: i32) -> (i32, i32) {
    %c0_i32 = arith.constant 0 : i32
    %c0_i32_0 = arith.constant 0 : i32
    %c0_i32_1 = arith.constant 0 : i32
    return %c0_i32, %c0_i32_0 : i32, i32
  }
  func.func @transform_14(%arg0: i32) -> (i32, i32) {
    %c0_i32 = arith.constant 0 : i32
    %c0_i32_0 = arith.constant 0 : i32
    %c0_i32_1 = arith.constant 0 : i32
    return %c0_i32, %c0_i32_0 : i32, i32
  }
  func.func @transform_15(%arg0: i32) -> (i32, i32) {
    %c0_i32 = arith.constant 0 : i32
    %c0_i32_0 = arith.constant 0 : i32
    %c0_i32_1 = arith.constant 0 : i32
    return %c0_i32, %c0_i32_0 : i32, i32
  }
  func.func @transform_16(%arg0: i32) -> (i32, i32) {
    %c0_i32 = arith.constant 0 : i32
    %c0_i32_0 = arith.constant 0 : i32
    %c0_i32_1 = arith.constant 0 : i32
    return %c0_i32, %c0_i32_0 : i32, i32
  }
  func.func @transform_17(%arg0: i32) -> (i32, i32) {
    %c0_i32 = arith.constant 0 : i32
    %c0_i32_0 = arith.constant 0 : i32
    %c0_i32_1 = arith.constant 0 : i32
    return %c0_i32, %c0_i32_0 : i32, i32
  }
  func.func @transform_18(%arg0: i32) -> (i32, i32, i32) {
    %c0_i32 = arith.constant 0 : i32
    %c0_i32_0 = arith.constant 0 : i32
    %c0_i32_1 = arith.constant 0 : i32
    return %arg0, %c0_i32, %c0_i32_0 : i32, i32, i32
  }
}

</mosaic_0001>

<bundles_post_ra>
// kernel: wave_attention2_forward.2
= control target key start
LH: loop header
LB: loop body
LE: loop exit
PB: predicated region body
PF: predicated region fallthrough
CT: control target
= control target key end

     0   :  { %s1214_s17 = smov 0   ;;  %s1402_s0 = inlined_call_operand.vmem [shape: bf16[2,16,110], index: 0, kind: input, shape index: {}]   ;;  %s1403_s1 = inlined_call_operand.vmem [shape: bf16[2,16,110], index: 1, kind: input, shape index: {}]   ;;  %s1404_s2 = inlined_call_operand.vmem [shape: bf16[16,144], index: 2, kind: input, shape index: {}]   ;;  %s1405_s3 = inlined_call_operand.vmem [shape: f32[16,1], index: 3, kind: input, shape index: {}]   ;;  %s1406_s4 = inlined_call_operand.vmem [shape: f32[16,1], index: 4, kind: input, shape index: {}]   ;;  %s1407_s5 = inlined_call_operand.vmem [shape: bf16[16,288], index: 5, kind: input, shape index: {}]   ;;  %s1408_s6 = inlined_call_operand.vmem [shape: f32[16,1], index: 6, kind: input, shape index: {}]   ;;  %s1409_s7 = inlined_call_operand.vmem [shape: f32[16,1], index: 7, kind: input, shape index: {}]   ;;  %s1410_s8 = inlined_call_operand.vmem [shape: bf16[16,16], index: 8, kind: input, shape index: {}]   ;;  %s1411_s9 = inlined_call_operand.vmem [shape: f32[1,80], index: 9, kind: input, shape index: {}]   ;;  %s1412_s10 = inlined_call_operand.vmem [shape: bf16[2,16,110], index: 10, kind: output, shape index: {0}]   ;;  %s1413_s11 = inlined_call_operand.vmem [shape: bf16[2,16,110], index: 11, kind: output, shape index: {1}]  }
   0x1 LB: > { %s1020_s18 = sadd.s32 4294967295, %s1140_s17   ;;  %p1024_p0 = scmp.ge.s32.totalorder %s1140_s17, 1  ;;  %s1140_s17 = sphi %s1214_s17, %s22_s17  }
   0x2   : > { %p350_p1 = scmp.lt.s32.totalorder %s1140_s17, 3 }
   0x4   : > { %p351_p2 = pnand %p1024_p0, %p350_p1 }
   0x5   : > { %p400_p3 = scmp.lt.s32.totalorder (!%p351_p2), %s1020_s18, 1  ;;  %s1143_s26 = smov (!%p351_p2), 116  }
   0x6   : > { %354 = sbr.rel (%p351_p2) target bundleno = 1253 (0x4e5), region = 60  ;;  %s1144_s27 = smov (!%p351_p2), 107  }
   0x7   : > { %s1145_s28 = smov (!%p351_p2), 117   ;;  %s1146_s29 = smov (!%p351_p2), 108  }
   0x8   : > { %s1147_s30 = smov (!%p351_p2), 126   ;;  %s1148_s12 = smov (!%p351_p2), 118  }
   0x9   : > { %s1149_s13 = smov (!%p351_p2), 127   ;;  %s1150_s14 = smov (!%p351_p2), 106  }
   0xb   : > { %v1142_v0 = vmov 0   ;;  %s1415_s18 = smov (!%p400_p3, %s1020_s18), 1  ;;  %v1128_v3 = vld [vmem:[%s1404_s2 + $0x4] ss:$8 sps:$4 sm:$0xff]   ;;  %vm469_vm0 = vcmask 130048   ;;  %vm633_vm1 = vcmask 89088  }
   0xc   : > { %580 = vmatprep.subr.bf16.mxu1 %v1142_v0  ;;  %473 = vmatprep.subr.bf16.mxu0 %v1142_v0  ;;  %s1226_s19 = sshll.u32 %s1415_s18, 3  ;;  %v426_v4 = vld [vmem:[%s1405_s3] sm:$0xff]  ;;  %v427_v5 = vld [vmem:[%s1405_s3 + $0x8] sm:$0xff]  ;;  %vm637_vm2 = vcmask 744448   ;;  %vm1153_vm3 = vmmov 0   ;;  %vm721_vm4 = vcmask 261120  }
   0xd   : > { %1123 = vset.pattern.permute.xlu1 %v1142_v0  ;;  %1122 = vset.pattern.permute.xlu0 %v1142_v0  ;;  %s409_s22 = scalar_lea.vmem %s1403_s1, %s1226_s19  ;;  %s404_s25 = scalar_lea.vmem %s1402_s0, %s1226_s19  ;;  %v429_v6 = vld [vmem:[%s1406_s4 + $0x8] sm:$0xff]  ;;  %v428_v7 = vld [vmem:[%s1406_s4] sm:$0xff]  ;;  %vm835_vm5 = vcmask 896000   ;;  %vm850_vm6 = vcmask 740440  }
   0xe   : > { %v1232_v1 = vld [vmem:[%s409_s22] sm:$0xff]   ;;  %1039 = vmatprep.mubr.msk.bf16.mxu1 %vm469_vm0, %v1128_v3  ;;  %1036 = vmatprep.mubr.msk.bf16.mxu0 %vm469_vm0, %v1128_v3  ;;  %s1151_s22 = smov 11   ;;  %v653_v62 = vld [vmem:[%s1408_s6 + $0x8] sm:$0xff]  ;;  %s1367_s23 = scalar_lea.vmem %s1412_s10, %s1226_s19 }
   0xf   : > { %568 = vrot.lane.b32.xlu1 %v1232_v1, %s1143_s26  ;;  %574 = vrot.lane.b32.xlu0 %v1232_v1, %s1144_s27  ;;  %v1250_v2 = vld [vmem:[%s404_s25] sm:$0xff]   ;;  %836 = vst.msk [vmem:[%s1367_s23] sm:$0xf] %vm835_vm5, %v1142_v0 }
  0x10   : > { %v1126_v22 = vld [vmem:[%s1404_s2] ss:$8 sps:$4 sm:$0xff]   ;;  %v1131_v63 = vld [vmem:[%s1407_s5 + $0x4] ss:$12 sps:$4 sm:$0xff]   ;;  %837 = vst.msk [vmem:[%s1367_s23 + $0x4] sm:$0xf] %vm835_vm5, %v1142_v0 }
  0x11   : > { %v1313_v38 = vld [vmem:[%s1411_s9] ss:$0 sm:$0xff] }
  0x13   : > { %565 = vrot.lane.b32.xlu1 %v1232_v1, %s1145_s28  ;;  %571 = vrot.lane.b32.xlu0 %v1232_v1, %s1146_s29 }
  0x17   : > { %559 = vrot.lane.b32.xlu1 %v1232_v1, %s1147_s30  ;;  %562 = vrot.lane.b32.xlu0 %v1232_v1, %s1148_s12 }
  0x1b   : > { %556 = vrot.lane.b32.xlu0 %v1232_v1, %s1149_s13  ;;  %454 = vrot.lane.b32.xlu1 %v1250_v2, %s1144_s27 }
  0x1f   : > { %577 = vrot.lane.b32.xlu0 %v1232_v1, %s1150_s14  ;;  %451 = vrot.lane.b32.xlu1 %v1250_v2, %s1146_s29 }
  0x23   : > { %448 = vrot.lane.b32.xlu0 %v1250_v2, %s1143_s26  ;;  %445 = vrot.lane.b32.xlu1 %v1250_v2, %s1145_s28 }
  0x27   : > { %442 = vrot.lane.b32.xlu0 %v1250_v2, %s1148_s12  ;;  %439 = vrot.lane.b32.xlu1 %v1250_v2, %s1147_s30 }
  0x2b   : > { %436 = vrot.lane.b32.xlu0 %v1250_v2, %s1149_s13  ;;  %457 = vrot.lane.b32.xlu1 %v1250_v2, %s1150_s14 }
  0x2f   : > { %516 = vperm.xlu0 %1122, %v426_v4   ;;  %521 = vperm.xlu1 %1123, %v427_v5   ;;  %v652_v5 = vld [vmem:[%s1408_s6] sm:$0xff] }
  0x33   : > { %533 = vperm.xlu0 %1122, %v429_v6   ;;  %528 = vperm.xlu1 %1123, %v428_v7   ;;  %v654_v6 = vld [vmem:[%s1409_s7] sm:$0xff] }
  0x81   : > { %v569_v8 = vpop.permute.xlu1 %568  ;;  %v575_v9 = vpop.permute.xlu0 %574 }
  0x82   : > { %581 = vmatpush1.bf16.msra.mxu1 %v575_v9 }
  0x83   : > { %582 = vmatprep.subr.bf16.mxu1 %v1142_v0 }
  0x85   : > { %v566_v10 = vpop.permute.xlu1 %565  ;;  %v572_v11 = vpop.permute.xlu0 %571 }
  0x86   : > { %583 = vmatpush1.bf16.msra.mxu1 %v572_v11 }
  0x87   : > { %584 = vmatprep.subr.bf16.mxu1 %v1142_v0 }
  0x89   : > { %v560_v12 = vpop.permute.xlu1 %559  ;;  %v563_v13 = vpop.permute.xlu0 %562 }
  0x8a   : > { %585 = vmatpush1.bf16.msra.mxu1 %v569_v8 }
  0x8b   : > { %586 = vmatprep.subr.bf16.mxu1 %v1142_v0 }
  0x8d   : > { %v557_v14 = vpop.permute.xlu0 %556  ;;  %v455_v15 = vpop.permute.xlu1 %454 }
  0x8e   : > { %474 = vmatpush1.bf16.msra.mxu0 %v455_v15  ;;  %587 = vmatpush1.bf16.msra.mxu1 %v566_v10 }
  0x8f   : > { %588 = vmatprep.subr.bf16.mxu1 %v1142_v0  ;;  %475 = vmatprep.subr.bf16.mxu0 %v1142_v0 }
  0x91   : > { %v578_v16 = vpop.permute.xlu0 %577  ;;  %v452_v17 = vpop.permute.xlu1 %451 }
  0x92   : > { %476 = vmatpush1.bf16.msra.mxu0 %v452_v17  ;;  %589 = vmatpush1.bf16.msra.mxu1 %v563_v13 }
  0x93   : > { %590 = vmatprep.subr.bf16.mxu1 %v1142_v0  ;;  %477 = vmatprep.subr.bf16.mxu0 %v1142_v0 }
  0x95   : > { %v449_v18 = vpop.permute.xlu0 %448  ;;  %v446_v19 = vpop.permute.xlu1 %445 }
  0x96   : > { %478 = vmatpush1.bf16.msra.mxu0 %v449_v18  ;;  %591 = vmatpush1.bf16.msra.mxu1 %v560_v12 }
  0x97   : > { %479 = vmatprep.subr.bf16.mxu0 %v1142_v0  ;;  %592 = vmatprep.subr.bf16.mxu1 %v1142_v0 }
  0x99   : > { %v443_v20 = vpop.permute.xlu0 %442  ;;  %v440_v21 = vpop.permute.xlu1 %439 }
  0x9a   : > { %480 = vmatpush1.bf16.msra.mxu0 %v446_v19  ;;  %593 = vmatpush1.bf16.msra.mxu1 %v557_v14  ;;  %v1129_v19 = vld [vmem:[%s1407_s5] ss:$12 sps:$4 sm:$0xff]  }
  0x9b   : > { %594 = vmatprep.subr.bf16.mxu1 %v1142_v0  ;;  %481 = vmatprep.subr.bf16.mxu0 %v1142_v0 }
  0x9d   : > { %v437_v23 = vpop.permute.xlu0 %436  ;;  %v458_v24 = vpop.permute.xlu1 %457 }
  0x9e   : > { %482 = vmatpush1.bf16.msra.mxu0 %v443_v20  ;;  %595 = vmatpush1.bf16.msra.mxu1 %v1232_v1  ;;  %v655_v1 = vld [vmem:[%s1409_s7 + $0x8] sm:$0xff] }
  0x9f   : > { %483 = vmatprep.subr.bf16.mxu0 %v1142_v0  ;;  %610 = vmatprep.subr.bf16.mxu1 %v1142_v0 }
  0xa2   : > { %484 = vmatpush1.bf16.msra.mxu0 %v440_v21  ;;  %611 = vmatpush2.bf16.msra.mxu1 %v578_v16 }
  0xa3   : > { %485 = vmatprep.subr.bf16.mxu0 %v1142_v0 }
  0xa5   : > { %613 = vmatmul.mubr.bf16.vlgmr.msra.gmra.mxu1 %v1126_v22 }
  0xa6   : > { %486 = vmatpush1.bf16.msra.mxu0 %v437_v23 }
  0xa7   : > { %487 = vmatprep.subr.bf16.mxu0 %v1142_v0 }
  0xaa   : > { %488 = vmatpush1.bf16.msra.mxu0 %v1250_v2  ;;  %v522_v25 = vpop.permute.xlu1 %521  ;;  %v517_v26 = vpop.permute.xlu0 %516  ;;  %v1152_v2 = vmov 0.0  }
  0xab   : > { %503 = vmatprep.subr.bf16.mxu0 %v1142_v0  ;;  %1087 = vmatprep.subr.bf16.mxu1 %v1152_v2 }
  0xac   : > { %1091 = vmatprep.mubr.msk.bf16.mxu1 %vm1153_vm3, %v1152_v2 }
  0xae   : > { %504 = vmatpush2.bf16.msra.mxu0 %v458_v24  ;;  %v529_v28 = vpop.permute.xlu1 %528  ;;  %v534_v34 = vpop.permute.xlu0 %533 }
  0xb1   : > { %506 = vmatmul.mubr.bf16.vlgmr.msra.gmra.mxu0 %v1126_v22  ;;  %v1132_v22 = vld [vmem:[%s1407_s5 + $0x8] ss:$12 sps:$4 sm:$0xff]  }
  0xb2   : > { %757 = vmatprep.mubr.bf16.mxu0 %v1131_v63 }
 0x165   : > { %v614_v27 = vpop.f32.mrf.mxu1 }
 0x166   : > { %v621_v29 = vmul.f32 %v614_v27, %v517_v26 }
 0x167   : > { %v616_v30 = vpop.f32.mrf.mxu1 }
 0x168   : > { %v623_v31 = vadd.f32 %v621_v29, %v529_v28 }
 0x169   : > { %v617_v32 = vpop.f32.mrf.mxu1 }
 0x16a   : > { %v622_v33 = vmul.f32 %v617_v32, %v522_v25  ;;  %v625_v36 = vmax.f32 %v623_v31, 0.0 }
 0x16b   : > { %v619_v35 = vpop.f32.mrf.mxu1 }
 0x16c   : > { %v624_v37 = vadd.f32 %v622_v33, %v534_v34  ;;  %v627_v40 = vmul.f32 %v1313_v38, %v625_v36 }
 0x16e   : > { %v626_v39 = vmax.f32 %v624_v37, 0.0 }
 0x170   : > { %v628_v41 = vmul.f32 %v1313_v38, %v626_v39 }
 0x171   : > { %v507_v42 = vpop.f32.mrf.mxu0 }
 0x172   : > { %v524_v43 = vmul.f32 %v517_v26, %v507_v42  ;;  %v640_v44 = vpack.c.bf16 %v628_v41, %v627_v40 }
 0x173   : > { %v509_v45 = vpop.f32.mrf.mxu0 }
 0x174   : > { %v536_v46 = vadd.f32 %v529_v28, %v524_v43  ;;  %642 = vrot.lane.b32.xlu1 %v640_v44, %s1151_s22 }
 0x175   : > { %v510_v47 = vpop.f32.mrf.mxu0 }
 0x176   : > { %v525_v48 = vmul.f32 %v522_v25, %v510_v47  ;;  %v538_v50 = vmax.f32 %v536_v46, 0.0 }
 0x177   : > { %v512_v49 = vpop.f32.mrf.mxu0 }
 0x178   : > { %v537_v51 = vadd.f32 %v534_v34, %v525_v48  ;;  %v546_v53 = vmul.f32 %v1313_v38, %v538_v50 }
 0x17a   : > { %v539_v52 = vmax.f32 %v537_v51, 0.0  ;;  %v1133_v51 = vld [vmem:[%s1410_s8] sm:$0xff]  }
 0x17c   : > { %v547_v54 = vmul.f32 %v1313_v38, %v539_v52 }
 0x17e   : > { %v629_v55 = vpack.c.bf16 %v547_v54, %v546_v53 }
 0x180   : > { %631 = vrot.lane.b32.xlu0 %v629_v55, %s1151_s22 }
 0x1e6   : > { %v643_v56 = vpop.permute.xlu1 %642 }
 0x1e7   : > { %v645_v57 = vsel %vm633_vm1, 0, %v643_v56 }
 0x1e8   : > { %v646_v58 = vsel %vm637_vm2, %v645_v57, 0 }
 0x1e9   : > { %697 = vrot.lane.b32.xlu0 %v646_v58, %s1146_s29  ;;  %682 = vrot.lane.b32.xlu1 %v646_v58, %s1149_s13 }
 0x1ed   : > { %694 = vrot.lane.b32.xlu0 %v646_v58, %s1143_s26 }
 0x1f1   : > { %691 = vrot.lane.b32.xlu0 %v646_v58, %s1145_s28 }
 0x1f2   : > { %v632_v59 = vpop.permute.xlu0 %631 }
 0x1f3   : > { %v636_v60 = vsel %vm633_vm1, 0, %v632_v59 }
 0x1f4   : > { %v638_v61 = vsel %vm637_vm2, %v636_v60, 0 }
 0x1f5   : > { %688 = vrot.lane.b32.xlu0 %v646_v58, %s1148_s12  ;;  %675 = vrot.lane.b32.xlu1 %v638_v61, %s1144_s27 }
 0x1f9   : > { %685 = vrot.lane.b32.xlu0 %v646_v58, %s1147_s30  ;;  %672 = vrot.lane.b32.xlu1 %v638_v61, %s1146_s29  ;;  %s419_s29 = scalar_lea.vmem %s1413_s11, %s1226_s19 }
 0x1fa   : > { %904 = vst.msk [vmem:[%s419_s29] sm:$0xf] %vm835_vm5, %v1142_v0  ;;  %905 = vst.msk [vmem:[%s419_s29 + $0x4] sm:$0xf] %vm835_vm5, %v1142_v0 }
 0x1fd   : > { %660 = vrot.lane.b32.xlu0 %v638_v61, %s1147_s30  ;;  %669 = vrot.lane.b32.xlu1 %v638_v61, %s1143_s26 }
 0x201   : > { %678 = vrot.lane.b32.xlu0 %v638_v61, %s1150_s14  ;;  %666 = vrot.lane.b32.xlu1 %v638_v61, %s1145_s28 }
 0x205   : > { %700 = vrot.lane.b32.xlu0 %v646_v58, %s1144_s27  ;;  %663 = vrot.lane.b32.xlu1 %v638_v61, %s1148_s12 }
 0x209   : > { %814 = vperm.xlu0 %1122, %v653_v62   ;;  %657 = vrot.lane.b32.xlu1 %v638_v61, %s1149_s13 }
 0x20d   : > { %826 = vperm.xlu0 %1122, %v655_v1  }
 0x25b   : > { %v698_v3 = vpop.permute.xlu0 %697  ;;  %v683_v4 = vpop.permute.xlu1 %682 }
 0x25c   : > { %1060 = vmatprep.subr.bf16.mxu0 %v698_v3  ;;  %702 = vrot.lane.b32.xlu1 %v683_v4, %s1144_s27 }
 0x25f   : > { %v695_v7 = vpop.permute.xlu0 %694 }
 0x260   : > { %809 = vperm.xlu1 %1123, %v652_v5  }
 0x263   : > { %v692_v9 = vpop.permute.xlu0 %691 }
 0x264   : > { %821 = vperm.xlu1 %1123, %v654_v6  }
 0x267   : > { %v676_v8 = vpop.permute.xlu1 %675  ;;  %v689_v11 = vpop.permute.xlu0 %688 }
 0x268   : > { %1061 = vmatpush3.bf16.msra.mxu0 %v676_v8 }
 0x269   : > { %1062 = vmatprep.subr.bf16.mxu0 %v695_v7 }
 0x26b   : > { %v673_v10 = vpop.permute.xlu1 %672  ;;  %v686_v14 = vpop.permute.xlu0 %685 }
 0x26c   : > { %1063 = vmatpush3.bf16.msra.mxu0 %v673_v10 }
 0x26d   : > { %1064 = vmatprep.subr.bf16.mxu0 %v692_v9 }
 0x26f   : > { %v670_v12 = vpop.permute.xlu1 %669  ;;  %v661_v16 = vpop.permute.xlu0 %660 }
 0x270   : > { %1065 = vmatpush3.bf16.msra.mxu0 %v670_v12 }
 0x271   : > { %1066 = vmatprep.subr.bf16.mxu0 %v689_v11 }
 0x273   : > { %v667_v13 = vpop.permute.xlu1 %666  ;;  %v679_v18 = vpop.permute.xlu0 %678 }
 0x274   : > { %1067 = vmatpush3.bf16.msra.mxu0 %v667_v13 }
 0x275   : > { %1068 = vmatprep.subr.bf16.mxu0 %v686_v14 }
 0x277   : > { %v664_v15 = vpop.permute.xlu1 %663  ;;  %v701_v21 = vpop.permute.xlu0 %700 }
 0x278   : > { %1069 = vmatpush3.bf16.msra.mxu0 %v664_v15 }
 0x279   : > { %1070 = vmatprep.subr.bf16.mxu0 %v683_v4 }
 0x27b   : > { %v658_v17 = vpop.permute.xlu1 %657 }
 0x27c   : > { %1071 = vmatpush3.bf16.msra.mxu0 %v661_v16 }
 0x27d   : > { %1101 = vmatprep.subr.msk.bf16.mxu0 %vm637_vm2, %v645_v57 }
 0x280   : > { %1073 = vmatpush3.bf16.msra.mxu0 %v658_v17 }
 0x281   : > { %1074 = vmatprep.subr.bf16.mxu0 %v679_v18 }
 0x284   : > { %1075 = vmatpush3.bf16.msra.mxu0 %v638_v61  ;;  %v815_v31 = vpop.permute.xlu0 %814 }
 0x287   : > { %758 = vmatmul.mubr.bf16.vlgmr.msra.gmra.mxu0 %v1129_v19 }
 0x288   : > { %v827_v43 = vpop.permute.xlu0 %826 }
 0x2ce   : > { %v703_v20 = vpop.permute.xlu1 %702 }
 0x2cf   : > { %1088 = vmatpush3.bf16.msra.mxu1 %v703_v20 }
 0x2d0   : > { %1089 = vmatprep.subr.bf16.mxu1 %v1152_v2 }
 0x2d3   : > { %1090 = vmatpush3.bf16.msra.mxu1 %v701_v21 }
 0x2d4   : > { %1095 = vmatprep.subr.bf16.mxu1 %v1152_v2 }
 0x2d6   : > { %1092 = vmatmul.mubr.msk.bf16.vlgmr.msra.gmra.mxu1 %vm721_vm4, %v1132_v22 }
 0x2d7   : > { %1097 = vmatprep.mubr.msk.bf16.mxu1 %vm1153_vm3, %v1152_v2 }
 0x2db   : > { %v810_v26 = vpop.permute.xlu1 %809 }
 0x2df   : > { %v822_v35 = vpop.permute.xlu1 %821 }
 0x347   : > { %v1076_v23 = vpop.f32.mrf.mxu0 }
 0x349   : > { %v1077_v24 = vpop.f32.mrf.mxu0 }
 0x34a   : > { %v1078_v27 = vadd.f32 %v1077_v24, %v1076_v23 }
 0x34b   : > { %v1079_v25 = vpop.f32.mrf.mxu0 }
 0x34d   : > { %v1080_v28 = vpop.f32.mrf.mxu0 }
 0x34e   : > { %v1081_v33 = vadd.f32 %v1080_v28, %v1079_v25 }
 0x396   : > { %v800_v29 = vpop.f32.mrf.mxu1 }
 0x397   : > { %v801_v30 = vadd.f32 %v1078_v27, %v800_v29 }
 0x398   : > { %v1093_v32 = vpop.f32.mrf.mxu1 }
 0x399   : > { %v817_v34 = vmul.f32 %v810_v26, %v801_v30 }
 0x39a   : > { %v803_v36 = vpop.f32.mrf.mxu1 }
 0x39b   : > { %v829_v37 = vadd.f32 %v822_v35, %v817_v34  ;;  %v804_v39 = vadd.f32 %v1081_v33, %v803_v36 }
 0x39c   : > { %v1094_v40 = vpop.f32.mrf.mxu1 }
 0x39d   : > { %v831_v41 = vmax.f32 %v829_v37, 0.0  ;;  %v818_v42 = vmul.f32 %v815_v31, %v804_v39 }
 0x39f   : > { %v830_v44 = vadd.f32 %v827_v43, %v818_v42  ;;  %v833_v45 = vmul.f32 %v1313_v38, %v831_v41 }
 0x3a1   : > { %v832_v46 = vmax.f32 %v830_v44, 0.0  ;;  %v1056_v47 = vpack.c.bf16 %v833_v45, %v833_v45 }
 0x3a3   : > { %844 = vrot.lane.b32.xlu1 %v1056_v47, %s1151_s22  ;;  %v834_v48 = vmul.f32 %v1313_v38, %v832_v46 }
 0x3a5   : > { %v1057_v49 = vpack.c.bf16 %v834_v48, %v834_v48  ;;  %v838_v50 = vpack.c.bf16 %v834_v48, %v833_v45 }
 0x3a7   : > { %846 = vrot.lane.b32.xlu0 %v1057_v49, %s1151_s22  ;;  %1096 = vmatpush3.bf16.msra.mxu1 %v838_v50 }
 0x3aa   : > { %1098 = vmatmul.mubr.msk.bf16.vlgmr.msra.gmra.mxu1 %vm469_vm0, %v1133_v51 }
 0x415   : > { %v845_v38 = vpop.permute.xlu1 %844 }
 0x416   : > { %851 = vst.msk [vmem:[%s1367_s23] sm:$0xf] %vm850_vm6, %v845_v38 }
 0x419   : > { %v847_v52 = vpop.permute.xlu0 %846 }
 0x41a   : > { %852 = vst.msk [vmem:[%s1367_s23 + $0x4] sm:$0xf] %vm850_vm6, %v847_v52 }
 0x46a   : > { %v897_v53 = vpop.f32.mrf.mxu1 }
 0x46b   : > { %v1058_v54 = vpack.c.bf16 %v897_v53, %v897_v53 }
 0x46c   : > { %v1099_v55 = vpop.f32.mrf.mxu1 }
 0x46d   : > { %912 = vrot.lane.b32.xlu1 %v1058_v54, %s1151_s22 }
 0x46e   : > { %v900_v56 = vpop.f32.mrf.mxu1 }
 0x46f   : > { %v1059_v57 = vpack.c.bf16 %v900_v56, %v900_v56 }
 0x470   : > { %v1100_v58 = vpop.f32.mrf.mxu1 }
 0x471   : > { %914 = vrot.lane.b32.xlu0 %v1059_v57, %s1151_s22 }
 0x4df   : > { %v913_v59 = vpop.permute.xlu1 %912 }
 0x4e0   : > { %918 = vst.msk [vmem:[%s419_s29] sm:$0xf] %vm850_vm6, %v913_v59 }
 0x4e3   : > { %v915_v0 = vpop.permute.xlu0 %914 }
 0x4e4   : > { %919 = vst.msk [vmem:[%s419_s29 + $0x4] sm:$0xf] %vm850_vm6, %v915_v0 }
 0x4e5 PF: > { %s22_s17 = sadd.s32 1, %s1140_s17  }
 0x4e6   : > { %p19_p4 = scmp.ge.s32.totalorder %s22_s17, 4  }
 0x4e8   :  { %21 = sbr.rel (!%p19_p4) target bundleno = 1 (0x1), region = 105 }

// kernel: wave_attention2_forward.3
= control target key start
LH: loop header
LB: loop body
LE: loop exit
PB: predicated region body
PF: predicated region fallthrough
CT: control target
= control target key end

     0   :  { %s5955_s27 = smov 0   ;;  %s9614_s0 = inlined_call_operand.vmem [shape: bf16[2,342,4], index: 0, kind: input, shape index: {}]   ;;  %s9615_s1 = inlined_call_operand.vmem [shape: bf16[2,342,4], index: 1, kind: input, shape index: {}]   ;;  %s9616_s2 = inlined_call_operand.vmem [shape: bf16[2,16,110], index: 2, kind: input, shape index: {}]   ;;  %s9617_s3 = inlined_call_operand.vmem [shape: bf16[2,4,342], index: 3, kind: input, shape index: {}]   ;;  %s9618_s4 = inlined_call_operand.vmem [shape: bf16[72,4], index: 4, kind: input, shape index: {}]   ;;  %s9619_s5 = inlined_call_operand.vmem [shape: f32[1,4], index: 5, kind: input, shape index: {}]   ;;  %s9620_s6 = inlined_call_operand.vmem [shape: f32[1,4], index: 6, kind: input, shape index: {}]   ;;  %s9621_s7 = inlined_call_operand.vmem [shape: bf16[4,4], index: 7, kind: input, shape index: {}]   ;;  %s9622_s8 = inlined_call_operand.vmem [shape: f32[1,4], index: 8, kind: input, shape index: {}]   ;;  %s9623_s9 = inlined_call_operand.vmem [shape: bf16[4,16], index: 9, kind: input, shape index: {}]   ;;  %s9624_s10 = inlined_call_operand.vmem [shape: f32[4,1], index: 10, kind: input, shape index: {}]   ;;  %s9625_s11 = inlined_call_operand.vmem [shape: bf16[4,16], index: 11, kind: input, shape index: {}]   ;;  %s9626_s12 = inlined_call_operand.vmem [shape: f32[4,1], index: 12, kind: input, shape index: {}]   ;;  %s9627_s13 = inlined_call_operand.vmem [shape: bf16[4,72], index: 13, kind: input, shape index: {}]   ;;  %s9628_s14 = inlined_call_operand.vmem [shape: f32[4,1], index: 14, kind: input, shape index: {}]   ;;  %s9629_s15 = inlined_call_operand.vmem [shape: f32[4,1], index: 15, kind: input, shape index: {}]   ;;  %s9630_s16 = inlined_call_operand.vmem [shape: f32[1,288], index: 16, kind: input, shape index: {}]   ;;  %s9631_s17 = inlined_call_operand.vmem [shape: f32[1,110], index: 17, kind: input, shape index: {}]   ;;  %s9632_s18 = inlined_call_operand.vmem [shape: f32[2,4,342], index: 18, kind: output, shape index: {}]  }
   0x1   :  { %9786 = sst [smem:[#allocation53_spill]] %s9614_s0 }
   0x2   :  { %9787 = sst [smem:[#allocation54_spill]] %s9615_s1 }
   0x3   :  { %9788 = sst [smem:[#allocation55_spill]] %s9616_s2 }
   0x4   :  { %9789 = sst [smem:[#allocation56_spill]] %s9618_s4 }
   0x5   :  { %9790 = sst [smem:[#allocation57_spill]] %s9627_s13 }
   0x6   :  { %9791 = sst [smem:[#allocation58_spill]] %s9628_s14 }
   0x7   :  { %9792 = sst [smem:[#allocation59_spill]] %s9629_s15 }
   0x8   :  { %9793 = sst [smem:[#allocation60_spill]] %s9630_s16 }
   0x9   :  { %9794 = sst [smem:[#allocation61_spill]] %s9632_s18 }
   0xa LB: > { %9795 = sst [smem:[#allocation2_spill]] %s5829_s27  ;;  %s5191_s28 = sadd.s32 4294967295, %s5829_s27   ;;  %s5829_s27 = sphi %s5955_s27, %s28_s27  }
   0xb   : > { %p5195_p0 = scmp.ge.s32.totalorder %s5829_s27, 1  ;;  %p542_p1 = scmp.lt.s32.totalorder %s5829_s27, 3 }
   0xd   : > { %p543_p2 = pnand %p5195_p0, %p542_p1 }
   0xf   : > { %546 = sbr.rel (%p543_p2) target bundleno = 2470 (0x9a6), region = 92 }
  0x14   : > { %p611_p3 = scmp.lt.s32.totalorder %s5191_s28, 1  ;;  %s9796_s19 = sld [smem:[#allocation54_spill]]  ;;  %vm9752_vm0 = vsmask.f32 7424  ;;  %vm9750_vm1 = vcmask 1046528   ;;  %vm9785_vm3 = vcmask 1045504  }
  0x15   : > { %s9715_s20 = smov 4   ;;  %s9805_s2 = sld [smem:[#allocation53_spill]]  ;;  %vm9748_vm2 = vsmask.f32 6400  ;;  %vm1409_vm4 = vsmask.f32 5376 }
  0x16   : > { %s10225_s28 = smov (!%p611_p3, %s5191_s28), 1  ;;  %s9702_s24 = smov 8   ;;  %vm9757_vm5 = vcmask 1044480   ;;  %vm9747_vm6 = vcmask 1043456   ;;  %vm2313_vm7 = vcmask 31744   ;;  %vm9751_vm8 = vcmask 64512  }
  0x17   : > { %s5600_s29 = smul.u32 172, %s10225_s28  ;;  %s9687_s25 = smov 12   ;;  %vm2387_vm9 = vcmask 97280   ;;  %vm2424_vm10 = vcmask 130048   ;;  %vm2461_vm11 = vcmask 162816   ;;  %vm9753_vm12 = vcmask 195584  }
  0x18   : > { %s9685_s26 = smov 16   ;;  %s9734_s30 = smov 24   ;;  %vm9754_vm13 = vcmask 228352   ;;  %vm2572_vm14 = vcmask 261120   ;;  %vm9755_vm15 = vcmask 293888  }
  0x19   : > { %s9725_s0 = smov 28   ;;  %s9709_s21 = smov 36  }
  0x1a   : > { %s5971_s1 = scalar_lea.vmem %s9796_s19, %s5600_s29  ;;  %s9732_s19 = smov 32  }
  0x1b   : > { %v5974_v0 = vld [vmem:[%s5971_s1 + $0x20] sm:$0xff]   ;;  %v5977_v1 = vld [vmem:[%s5971_s1 + $0x28] sm:$0xff]   ;;  %v5980_v2 = vld [vmem:[%s5971_s1 + $0x14] sm:$0xf]  ;;  %s6101_s23 = scalar_lea.vmem %s9805_s2, %s5600_s29  ;;  %s9683_s29 = smov 20  }
  0x1c   : > { %v9658_v3 = vshll.u32 %v5974_v0, 16  ;;  %v9659_v4 = vshrl.u32 %v5974_v0, 16  ;;  %v9656_v5 = vshll.u32 %v5977_v1, 16  ;;  %v737_v6 = vld [vmem:[%s5971_s1 + $0x10] sm:$0x8]  ;;  %v5987_v7 = vld [vmem:[%s5971_s1 + $0x18] sm:$0xff]  }
  0x1d   : > { %v5261_v8 = vcombine.low %v737_v6, %v5980_v2  ;;  %v9662_v11 = vshll.u32 %v5987_v7, 16  ;;  %v5996_v12 = vld [vmem:[%s5971_s1 + $0x30] sm:$0xff]   ;;  %v9657_v15 = vshrl.u32 %v5977_v1, 16  ;;  %v9663_v16 = vshrl.u32 %v5987_v7, 16  ;;  %v6010_v22 = vld [vmem:[%s5971_s1 + $0x38] sm:$0xff]   ;;  %v6013_v23 = vld [vmem:[%s5971_s1 + $0x40] sm:$0xff]  }
  0x1e   : > { %v1776_v9 = vrot.slane %v9658_v3, 1  ;;  %v1784_v10 = vrot.slane %v9656_v5, 1  ;;  %v9654_v19 = vshll.u32 %v5996_v12, 16  ;;  %9797 = vst [vmem:[#allocation3_spill] sm:$0xff] %v6013_v23  ;;  %v9655_v24 = vshrl.u32 %v5996_v12, 16  ;;  %v6025_v28 = vld [vmem:[%s5971_s1 + $0x48] sm:$0xff]  }
  0x1f   : > { %v2875_v13 = vshrl.u32 %v5261_v8, 16  ;;  %v2877_v14 = vshll.u32 %v5261_v8, 16  ;;  %v6004_v18 = vrot.slane %v9662_v11, 1  ;;  %9798 = vst [vmem:[#allocation4_spill] sm:$0xff] %v6025_v28  ;;  %v9649_v30 = vshll.u32 %v6010_v22, 16  ;;  %v6033_v33 = vld [vmem:[%s5971_s1 + $0x50] sm:$0xff]  }
  0x20   : > { %v1780_v17 = vor.u32 %v9659_v4, %v1776_v9  ;;  %v1788_v21 = vor.u32 %v9657_v15, %v1784_v10  ;;  %v1792_v26 = vrot.slane %v9654_v19, 1  ;;  %v9653_v31 = vshrl.u32 %v6010_v22, 16  ;;  %9799 = vst [vmem:[#allocation5_spill] sm:$0xff] %v6033_v33  ;;  %v6042_v37 = vld [vmem:[%s5971_s1 + $0x58] sm:$0xff]   ;;  %v6052_v42 = vld [vmem:[%s5971_s1 + $0x60] sm:$0xff]   ;;  %v6081_v56 = vld [vmem:[%s5971_s1 + $0x68] sm:$0xff]  }
  0x21   : > { %v2879_v20 = vrot.slane %v2877_v14, 1  ;;  %v1772_v27 = vor.u32 %v9663_v16, %v6004_v18  ;;  %v9647_v32 = vshll.u32 %v6013_v23, 16  ;;  %v9643_v36 = vshll.u32 %v6025_v28, 16  ;;  %9800 = vst [vmem:[#allocation6_spill] sm:$0xff] %v6042_v37  ;;  %9801 = vst [vmem:[#allocation7_spill] sm:$0xff] %v6052_v42  ;;  %v6084_v57 = vld [vmem:[%s5971_s1 + $0x70] sm:$0xff]  }
  0x22   : > { %v6017_v25 = vsel %vm9752_vm0, %v1780_v17, %v1784_v10  ;;  %v6036_v34 = vsel %vm9752_vm0, %v1788_v21, %v1792_v26  ;;  %v1796_v35 = vor.u32 %v9655_v24, %v1792_v26  ;;  %v1800_v39 = vrot.slane %v9649_v30, 1  ;;  %9802 = vst [vmem:[#allocation8_spill] sm:$0xff] %v6081_v56  ;;  %9803 = vst [vmem:[#allocation9_spill] sm:$0xff] %v6084_v57  ;;  %v6087_v58 = vld [vmem:[%s5971_s1 + $0x78] sm:$0xff]   ;;  %v6111_v8 = vld [vmem:[%s5971_s1 + $0x80] sm:$0xff]   ;;  %s9699_s22 = smov 40  }
  0x23   : > { %2905 = vrot.lane.b32.xlu1 %v6017_v25, %s9715_s20  ;;  %v2880_v29 = vor.u32 %v2879_v20, %v2875_v13  ;;  %v1808_v40 = vrot.slane %v9647_v32, 1  ;;  %v9646_v41 = vshrl.u32 %v6025_v28, 16  ;;  %v1816_v43 = vrot.slane %v9643_v36, 1  ;;  %9804 = vst [vmem:[#allocation10_spill] sm:$0xff] %v6087_v58  ;;  %9806 = vst [vmem:[#allocation11_spill] sm:$0xff] %v6111_v8  ;;  %v6280_v4 = vld [vmem:[%s5971_s1 + $0x98] sm:$0xff]  }
  0x24   : > { %v9641_v44 = vshll.u32 %v6033_v33, 16  ;;  %v9648_v45 = vshrl.u32 %v6013_v23, 16  ;;  %v9639_v46 = vshll.u32 %v6042_v37, 16  ;;  %v6063_v47 = vsel %vm9752_vm0, %v1772_v27, %v1776_v9  ;;  %v638_v17 = vld [vmem:[%s6101_s23] sm:$0xf]  ;;  %s9677_s2 = smov 44  }
  0x25   : > { %v2881_v38 = vsel %vm9752_vm0, %v2880_v29, %v6004_v18  ;;  %v1804_v48 = vor.u32 %v9653_v31, %v1800_v39  ;;  %v9640_v49 = vshrl.u32 %v6042_v37, 16  ;;  %v9637_v50 = vshll.u32 %v6052_v42, 16  ;;  %v639_v27 = vld [vmem:[%s6101_s23 + $0x4] sm:$0xf]  ;;  %v681_v15 = vld [vmem:[%s6101_s23 + $0x8] sm:$0xc] }
  0x26   : > { %2901 = vrot.lane.b32.xlu0 %v2881_v38, %s9715_s20  ;;  %v1820_v51 = vor.u32 %v9646_v41, %v1816_v43  ;;  %v1824_v52 = vrot.slane %v9641_v44, 1  ;;  %v1832_v53 = vrot.slane %v9639_v46, 1  ;;  %v6092_v59 = vsel %vm9752_vm0, %v1796_v35, %v1800_v39  ;;  %v676_v46 = vld [vmem:[%s6101_s23 + $0x8] sm:$0xe]  ;;  %s9828_s4 = sld [smem:[#allocation56_spill]]  ;;  %s9887_s27 = smov 56  }
  0x27   : > { %2907 = vrot.lane.b32.xlu1 %v6036_v34, %s9715_s20  ;;  %v6076_v54 = vsel %vm9752_vm0, %v1804_v48, %v1808_v40  ;;  %v1840_v55 = vrot.slane %v9637_v50, 1  ;;  %v1812_v60 = vor.u32 %v9648_v45, %v1808_v40  ;;  %v9642_v62 = vshrl.u32 %v6033_v33, 16  ;;  %v640_v40 = vld [vmem:[%s6101_s23 + $0x8] sm:$0xf]  ;;  %v642_v50 = vld [vmem:[%s6101_s23 + $0x10] sm:$0xf] }
  0x28   : > { %v1836_v61 = vor.u32 %v9640_v49, %v1832_v53  ;;  %v9634_v63 = vshll.u32 %v6081_v56, 16  ;;  %v9635_v6 = vshrl.u32 %v6081_v56, 16  ;;  %v6114_v9 = vsel %vm9752_vm0, %v1820_v51, %v1824_v52  ;;  %s9888_s18 = smov 28   ;;  %s9890_s13 = smov 60  }
  0x29   : > { %9807 = vst [vmem:[#allocation12_spill] sm:$0xff] %v6114_v9  ;;  %v9636_v10 = vshll.u32 %v6084_v57, 16  ;;  %v9633_v13 = vshll.u32 %v6087_v58, 16  ;;  %v6124_v20 = vsel %vm9752_vm0, %v1812_v60, %v1816_v43  ;;  %v9645_v21 = vshrl.u32 %v6052_v42, 16  ;;  %v6141_v43 = vld [vmem:[%s6101_s23 + $0xc] sm:$0xf] }
  0x2a   : > { %2903 = vrot.lane.b32.xlu0 %v6063_v47, %s9715_s20  ;;  %v1848_v14 = vrot.slane %v9634_v63, 1  ;;  %9808 = vst [vmem:[#allocation13_spill] sm:$0xff] %v6124_v20  ;;  %v9638_v26 = vshll.u32 %v6111_v8, 16  ;;  %v6132_v29 = vsel %vm9752_vm0, %v1836_v61, %v1840_v55  ;;  %v1828_v35 = vor.u32 %v9642_v62, %v1824_v52  ;;  %v6158_v63 = vld [vmem:[%s5971_s1 + $0x88] sm:$0xff]   ;;  %s9893_s15 = smov 32   ;;  %s10194_s16 = sld [smem:[#allocation58_spill]] }
  0x2b   : > { %2911 = vrot.lane.b32.xlu1 %v6076_v54, %s9715_s20  ;;  %9809 = vst [vmem:[#allocation14_spill] sm:$0xff] %v6132_v29  ;;  %v1864_v38 = vrot.slane %v9633_v13, 1  ;;  %v9644_v39 = vshrl.u32 %v6087_v58, 16  ;;  %v1856_v51 = vrot.slane %v9636_v10, 1  ;;  %v6147_v60 = vcombine.low %v638_v17, %v639_v27  ;;  %9810 = vst [vmem:[#allocation15_spill] sm:$0xff] %v6158_v63 }
  0x2c   : > { %v1852_v48 = vor.u32 %v9635_v6, %v1848_v14  ;;  %v6150_v52 = vcombine.low %v640_v40, %v6141_v43  ;;  %v1872_v61 = vrot.slane %v9638_v26, 1  ;;  %v9652_v13 = vshrl.u32 %v6084_v57, 16  ;;  %v6172_v26 = vld [vmem:[%s6101_s23 + $0x14] sm:$0xf] }
  0x2d   : > { %v835_v6 = vshll.u32 %v6147_v60, 16  ;;  %v6164_v17 = vsel %vm9752_vm0, %v1828_v35, %v1832_v53  ;;  %v1844_v40 = vor.u32 %v9645_v21, %v1840_v55  ;;  %v1868_v10 = vor.u32 %v9644_v39, %v1864_v38  ;;  %v675_v53 = vld [vmem:[%s6101_s23] sm:$0xe] }
  0x2e   : > { %2909 = vrot.lane.b32.xlu0 %v6092_v59, %s9715_s20  ;;  %9811 = vst [vmem:[#allocation16_spill] sm:$0xff] %v6164_v17  ;;  %v6176_v49 = vsel %vm9752_vm0, %v1852_v48, %v1856_v51  ;;  %v833_v44 = vshrl.u32 %v6147_v60, 16  ;;  %v840_v36 = vshll.u32 %v6150_v52, 16  ;;  %v9651_v55 = vshrl.u32 %v6111_v8, 16 }
  0x2f   : > { %2915 = vrot.lane.b32.xlu1 %v6114_v9, %s9715_s20  ;;  %9812 = vst [vmem:[#allocation17_spill] sm:$0xff] %v6176_v49  ;;  %v837_v62 = vrot.slane %v835_v6, 1  ;;  %v9650_v35 = vshll.u32 %v6158_v63, 16  ;;  %v6186_v39 = vcombine.low %v642_v50, %v6172_v26  ;;  %v6191_v48 = vsel %vm9752_vm0, %v1844_v40, %v1848_v14 }
  0x30   : > { %9814 = vst [vmem:[#allocation19_spill] sm:$0xff] %v6191_v48  ;;  %v1860_v6 = vor.u32 %v9652_v13, %v1856_v51  ;;  %v5222_v21 = vcombine.low %v676_v46, %v6141_v43  ;;  %v6197_v41 = vsel %vm9752_vm0, %v1868_v10, %v1872_v61  ;;  %v842_v45 = vrot.slane %v840_v36, 1 }
  0x31   : > { %9813 = vst [vmem:[#allocation18_spill] sm:$0xff] %v6186_v39  ;;  %9815 = vst [vmem:[#allocation20_spill] sm:$0xff] %v6197_v41  ;;  %v838_v32 = vor.u32 %v837_v62, %v833_v44  ;;  %v5221_v30 = vcombine.low %v675_v53, %v639_v27  ;;  %v1876_v50 = vor.u32 %v9651_v55, %v1872_v61  ;;  %v6205_v14 = vrot.slane %v9650_v35, 1  ;;  %v6218_v53 = vld [vmem:[%s6101_s23 + $0x18] sm:$0xff]  }
  0x32   : > { %2913 = vrot.lane.b32.xlu0 %v6124_v20, %s9715_s20  ;;  %v848_v51 = vshll.u32 %v6186_v39, 16  ;;  %v6211_v44 = vsel %vm9752_vm0, %v1860_v6, %v1864_v38  ;;  %v844_v36 = vshrl.u32 %v6150_v52, 16  ;;  %v9661_v46 = vshrl.u32 %v6186_v39, 16 }
  0x33   : > { %2919 = vrot.lane.b32.xlu1 %v6132_v29, %s9715_s20  ;;  %9816 = vst [vmem:[#allocation21_spill] sm:$0xff] %v6211_v44  ;;  %v1151_v62 = vshrl.u32 %v5222_v21, 16  ;;  %v843_v10 = vsel %vm9752_vm0, %v838_v32, %v842_v45  ;;  %v1020_v27 = vrot.slane %v5221_v30, 1  ;;  %v1021_v61 = vrot.slane %v6150_v52, 1 }
  0x34   : > { %v1154_v40 = vshll.u32 %v5222_v21, 16  ;;  %v6224_v38 = vsel %vm9752_vm0, %v1876_v50, %v6205_v14  ;;  %v6226_v6 = vrot.slane %v848_v51, 1  ;;  %v1023_v35 = vrot.slane %v6186_v39, 1 }
  0x35   : > { %9817 = vst [vmem:[#allocation22_spill] sm:$0xff] %v6224_v38  ;;  %v846_v30 = vor.u32 %v844_v36, %v842_v45  ;;  %v1104_v32 = vrot.slane %v5222_v21, 1  ;;  %v1153_v55 = vrot.slane %v1151_v62, 1  ;;  %v1158_v13 = vrot.slane %v9661_v46, 1  ;;  %v687_v46 = vld [vmem:[%s6101_s23 + $0x10] sm:$0x8] }
  0x36   : > { %2917 = vrot.lane.b32.xlu0 %v6164_v17, %s9715_s20  ;;  %v1022_v31 = vsel %vm9750_vm1, %v1020_v27, %v1021_v61  ;;  %v1156_v19 = vrot.slane %v1154_v40, 2  ;;  %v1159_v24 = vrot.slane %v848_v51, 2  ;;  %v6234_v50 = vshll.u32 %v6218_v53, 16 }
  0x37   : > { %2923 = vrot.lane.b32.xlu1 %v6176_v49, %s9715_s20  ;;  %v6237_v5 = vshrl.u32 %v6218_v53, 16  ;;  %v851_v45 = vsel %vm9752_vm0, %v846_v30, %v6226_v6  ;;  %v1105_v21 = vsel %vm9750_vm1, %v1104_v32, %v1023_v35  ;;  %v5226_v62 = vcombine.low %v681_v15, %v6141_v43  ;;  %v6252_v30 = vld [vmem:[%s5971_s1 + $0x90] sm:$0xff]   ;;  %v6264_v32 = vld [vmem:[%s6101_s23 + $0x20] sm:$0xff]  }
  0x38   : > { %v1157_v51 = vor.u32 %v1156_v19, %v1153_v55  ;;  %v1160_v36 = vor.u32 %v1159_v24, %v1158_v13  ;;  %v9660_v27 = vrot.slane %v6218_v53, 1  ;;  %v1163_v3 = vrot.slane %v6234_v50, 2  ;;  %9818 = vst [vmem:[#allocation23_spill] sm:$0xff] %v6252_v30  ;;  %v692_v43 = vld [vmem:[%s5971_s1 + $0x10] sm:$0xf] }
  0x39   : > { %v1162_v40 = vrot.slane %v6237_v5, 1  ;;  %v1280_v24 = vrot.slane %v5226_v62, 2  ;;  %v1281_v13 = vrot.slane %v6186_v39, 2  ;;  %v9664_v55 = vshll.u32 %v6252_v30, 16 }
  0x3a   : > { %2921 = vrot.lane.b32.xlu0 %v6191_v48, %s9715_s20  ;;  %v1161_v15 = vsel %vm9748_vm2, %v1157_v51, %v1160_v36  ;;  %v6276_v62 = vcombine.low %v692_v43, %v5980_v2 }
  0x3b   : > { %2927 = vrot.lane.b32.xlu1 %v6197_v41, %s9715_s20 }
  0x3e   : > { %2925 = vrot.lane.b32.xlu0 %v6211_v44, %s9715_s20 }
  0x3f   : > { %980 = vrot.lane.b32.xlu1 %v843_v10, %s9715_s20  ;;  %v682_v10 = vld [vmem:[%s6101_s23 + $0x10] sm:$0xc] }
  0x40   : > { %v5227_v19 = vcombine.low %v682_v10, %v6172_v26  ;;  %v1282_v10 = vsel %vm9785_vm3, %v1280_v24, %v1281_v13 }
  0x42   : > { %2929 = vrot.lane.b32.xlu0 %v6224_v38, %s9715_s20  ;;  %v1364_v51 = vrot.slane %v5227_v19, 2  ;;  %v1762_v38 = vshrl.u32 %v6276_v62, 16 }
  0x43   : > { %1057 = vrot.lane.b32.xlu1 %v1022_v31, %s9702_s24  ;;  %v1024_v31 = vsel %vm9750_vm1, %v1021_v61, %v1023_v35  ;;  %v6269_v61 = vsel %vm9750_vm1, %v1023_v35, %v9660_v27  ;;  %v1418_v27 = vrot.slane %v6237_v5, 2  ;;  %v2886_v35 = vshll.u32 %v6280_v4, 16 }
  0x44   : > { %v2066_v41 = vrot.slane %v1762_v38, 1 }
  0x46   : > { %982 = vrot.lane.b32.xlu0 %v851_v45, %s9715_s20  ;;  %v6272_v45 = vor.u32 %v1163_v3, %v1162_v40  ;;  %v2882_v3 = vrot.slane %v9664_v55, 1  ;;  %v1758_v55 = vshll.u32 %v6276_v62, 16  ;;  %v1419_v40 = vrot.slane %v6234_v50, 3 }
  0x47   : > { %1110 = vrot.lane.b32.xlu1 %v1105_v21, %s9687_s25  ;;  %v1283_v21 = vrot.slane %v6218_v53, 2 }
  0x48   : > { %v1165_v43 = vsel %vm9748_vm2, %v1160_v36, %v6272_v45  ;;  %v9819_v36 = vshrl.u32 %v6158_v63, 16  ;;  %v2067_v8 = vrot.slane %v1758_v55, 2  ;;  %v9823_v63 = vshrl.u32 %v6252_v30, 16 }
  0x49   : > { %v1365_v24 = vsel %vm9785_vm3, %v1364_v51, %v1283_v21 }
  0x4a   : > { %1059 = vrot.lane.b32.xlu0 %v1024_v31, %s9702_s24  ;;  %v1411_v31 = vshrl.u32 %v5227_v19, 16  ;;  %v6304_v51 = vor.u32 %v9819_v36, %v6205_v14  ;;  %v9822_v14 = vshrl.u32 %v5987_v7, 16  ;;  %v2884_v44 = vor.u32 %v2882_v3, %v9823_v63 }
  0x4b   : > { %1240 = vrot.lane.b32.xlu1 %v1161_v15, %s9685_s26  ;;  %v1414_v15 = vshll.u32 %v5227_v19, 16  ;;  %v1284_v19 = vsel %vm9785_vm3, %v1281_v13, %v1283_v21  ;;  %v6313_v13 = vshll.u32 %v6264_v32, 16  ;;  %v6330_v57 = vor.u32 %v2067_v8, %v2066_v41 }
  0x4c   : > { %v1413_v11 = vrot.slane %v1411_v31, 2  ;;  %9820 = vst [vmem:[#allocation24_spill] sm:$0xff] %v6304_v51  ;;  %v2070_v36 = vrot.slane %v9822_v14, 1  ;;  %v2883_v58 = vsel %vm9752_vm0, %v6304_v51, %v2882_v3  ;;  %v1541_v8 = vrot.slane %v6218_v53, 3  ;;  %v688_v14 = vld [vmem:[%s5971_s1] sm:$0xf] }
  0x4d   : > { %v1416_v16 = vrot.slane %v1414_v15, 3  ;;  %v5231_v15 = vcombine.low %v687_v46, %v6172_v26  ;;  %v1423_v46 = vrot.slane %v6313_v13, 3 }
  0x4e   : > { %1112 = vrot.lane.b32.xlu0 %v6269_v61, %s9687_s25 }
  0x4f   : > { %1317 = vrot.lane.b32.xlu1 %v1282_v10, %s9683_s29  ;;  %v9821_v10 = vrot.slane %v6264_v32, 2  ;;  %v1417_v63 = vor.u32 %v1416_v16, %v1413_v11  ;;  %v1540_v41 = vrot.slane %v5231_v15, 3  ;;  %v690_v15 = vld [vmem:[%s5971_s1 + $0x8] sm:$0xf] }
  0x51   : > { %v6309_v31 = vsel %vm9785_vm3, %v1283_v21, %v9821_v10  ;;  %v6322_v21 = vrot.slane %v2886_v35, 1  ;;  %v9824_v10 = vshll.u32 %v5987_v7, 16  ;;  %v1420_v35 = vor.u32 %v1419_v40, %v1418_v27 }
  0x52   : > { %1242 = vrot.lane.b32.xlu0 %v1165_v43, %s9685_s26  ;;  %v6316_v43 = vshrl.u32 %v6264_v32, 16  ;;  %v1542_v27 = vsel %vm9757_vm5, %v1540_v41, %v1541_v8  ;;  %v1543_v40 = vrot.slane %v6264_v32, 3  ;;  %v866_v41 = vrot.slane %v6313_v13, 1 }
  0x53   : > { %1370 = vrot.lane.b32.xlu1 %v1365_v24, %s9734_s30  ;;  %v2071_v24 = vrot.slane %v9824_v10, 2  ;;  %v2889_v3 = vsel %vm9752_vm0, %v2884_v44, %v6322_v21  ;;  %v1421_v11 = vsel %vm1409_vm4, %v1417_v63, %v1420_v35  ;;  %v858_v44 = vrot.slane %v6234_v50, 1  ;;  %v6358_v10 = vld [vmem:[%s5971_s1 + $0xc] sm:$0xf] }
  0x54   : > { %v1422_v26 = vrot.slane %v6316_v43, 2  ;;  %v9825_v50 = vshrl.u32 %v6186_v39, 16 }
  0x55   : > { %v6332_v49 = vor.u32 %v2071_v24, %v2070_v36  ;;  %v689_v36 = vld [vmem:[%s5971_s1 + $0x4] sm:$0xf]  ;;  %v1760_v24 = vrot.slane %v1758_v55, 1  ;;  %v862_v55 = vor.u32 %v6237_v5, %v858_v44 }
  0x56   : > { %1319 = vrot.lane.b32.xlu0 %v1284_v19, %s9683_s29  ;;  %v6349_v16 = vor.u32 %v1423_v46, %v1422_v26  ;;  %v854_v63 = vor.u32 %v9825_v50, %v6226_v6  ;;  %v5232_v26 = vcombine.low %v688_v14, %v689_v36  ;;  %v725_v50 = vld [vmem:[%s5971_s1] sm:$0xe] }
  0x57   : > { %1372 = vrot.lane.b32.xlu1 %v6309_v31, %s9734_s30  ;;  %v6344_v19 = vsel %vm9748_vm2, %v6330_v57, %v6332_v49  ;;  %v1764_v46 = vor.u32 %v1762_v38, %v1760_v24  ;;  %v867_v5 = vsel %vm9752_vm0, %v862_v55, %v866_v41  ;;  %v6393_v55 = vld [vmem:[%s6101_s23 + $0x28] sm:$0xff]  }
  0x58   : > { %v859_v6 = vsel %vm9752_vm0, %v854_v63, %v858_v44  ;;  %v1745_v38 = vshll.u32 %v5232_v26, 16  ;;  %v9826_v63 = vrot.slane %v6218_v53, 1  ;;  %v6402_v53 = vshll.u32 %v6393_v55, 16 }
  0x5a   : > { %2931 = vrot.lane.b32.xlu0 %v2883_v58, %s9715_s20  ;;  %v1425_v58 = vsel %vm1409_vm4, %v1420_v35, %v6349_v16  ;;  %v6375_v35 = vsel %vm9752_vm0, %v1764_v46, %v6004_v18  ;;  %v1743_v18 = vshrl.u32 %v5232_v26, 16 }
  0x5b   : > { %2933 = vrot.lane.b32.xlu1 %v2889_v3, %s9715_s20  ;;  %v1544_v3 = vsel %vm9757_vm5, %v1541_v8, %v1543_v40 }
  0x5e   : > { %1500 = vrot.lane.b32.xlu0 %v1421_v11, %s9725_s0  ;;  %v5233_v11 = vcombine.low %v690_v15, %v6358_v10  ;;  %v1027_v15 = vrot.slane %v6264_v32, 1 }
  0x5f   : > { %1577 = vrot.lane.b32.xlu1 %v1542_v27, %s9732_s19  ;;  %v1747_v27 = vrot.slane %v1745_v38, 1 }
  0x60   : > { %v1750_v8 = vshll.u32 %v5233_v11, 16  ;;  %v1754_v44 = vshrl.u32 %v5233_v11, 16  ;;  %v1028_v46 = vsel %vm9750_vm1, %v9826_v63, %v1027_v15 }
  0x62   : > { %1502 = vrot.lane.b32.xlu0 %v1425_v58, %s9725_s0  ;;  %v1752_v14 = vrot.slane %v1750_v8, 1  ;;  %v1748_v58 = vor.u32 %v1747_v27, %v1743_v18  ;;  %v6405_v8 = vshrl.u32 %v6393_v55, 16  ;;  %v1166_v18 = vrot.slane %v6316_v43, 1 }
  0x63   : > { %1579 = vrot.lane.b32.xlu1 %v1544_v3, %s9732_s19  ;;  %v1167_v27 = vrot.slane %v6313_v13, 2 }
  0x64   : > { %v1756_v3 = vor.u32 %v1754_v44, %v1752_v14  ;;  %v1753_v38 = vsel %vm9752_vm0, %v1748_v58, %v1752_v14  ;;  %v1932_v14 = vrot.slane %v6276_v62, 1  ;;  %v726_v44 = vld [vmem:[%s5971_s1 + $0x8] sm:$0xe]  ;;  %v1170_v58 = vrot.slane %v6405_v8, 1 }
  0x65   : > { %v1168_v63 = vor.u32 %v1167_v27, %v1166_v18 }
  0x66   : > { %984 = vrot.lane.b32.xlu0 %v859_v6, %s9715_s20  ;;  %v5251_v6 = vcombine.low %v725_v50, %v689_v36  ;;  %v1930_v36 = vrot.slane %v5233_v11, 1  ;;  %v1171_v50 = vrot.slane %v6402_v53, 2 }
  0x67   : > { %986 = vrot.lane.b32.xlu1 %v867_v5, %s9715_s20  ;;  %v9692_v5 = vrot.slane %v6393_v55, 1 }
  0x6a   : > { %1703 = vrot.lane.b32.xlu0 %v5232_v26, %s9709_s21  ;;  %v1761_v26 = vsel %vm9752_vm0, %v1756_v3, %v1760_v24  ;;  %v6414_v24 = vsel %vm9750_vm1, %v1027_v15, %v9692_v5  ;;  %v5252_v3 = vcombine.low %v726_v44, %v6358_v10  ;;  %v1933_v15 = vsel %vm9750_vm1, %v1930_v36, %v1932_v14 }
  0x6b   : > { %1705 = vrot.lane.b32.xlu1 %v5233_v11, %s9709_s21 }
  0x6e   : > { %1061 = vrot.lane.b32.xlu0 %v6269_v61, %s9702_s24  ;;  %v1929_v61 = vrot.slane %v5251_v6, 1  ;;  %v6426_v6 = vor.u32 %v1171_v50, %v1170_v58  ;;  %v1287_v50 = vrot.slane %v6393_v55, 2 }
  0x6f   : > { %1063 = vrot.lane.b32.xlu1 %v1028_v46, %s9702_s24 }
  0x70   : > { %v1931_v11 = vsel %vm9750_vm1, %v1929_v61, %v1930_v36  ;;  %v2062_v61 = vshll.u32 %v5252_v3, 16  ;;  %v1173_v18 = vsel %vm9748_vm2, %v1168_v63, %v6426_v6  ;;  %v9691_v36 = vrot.slane %v5987_v7, 1 }
  0x72   : > { %1890 = vrot.lane.b32.xlu0 %v1753_v38, %s9699_s22  ;;  %v1169_v38 = vsel %vm9748_vm2, %v6272_v45, %v1168_v63  ;;  %v2064_v58 = vrot.slane %v2062_v61, 2  ;;  %v6441_v45 = vsel %vm9750_vm1, %v1932_v14, %v9691_v36 }
  0x73   : > { %1892 = vrot.lane.b32.xlu1 %v1761_v26, %s9699_s22  ;;  %v2059_v26 = vshrl.u32 %v5252_v3, 16 }
  0x75   : > { %v2061_v44 = vrot.slane %v2059_v26, 1 }
  0x76   : > { %1114 = vrot.lane.b32.xlu0 %v1028_v46, %s9687_s25  ;;  %v2013_v46 = vrot.slane %v5252_v3, 1  ;;  %v9827_v3 = vrot.slane %v6264_v32, 2 }
  0x77   : > { %1116 = vrot.lane.b32.xlu1 %v6414_v24, %s9687_s25  ;;  %v2065_v63 = vor.u32 %v2064_v58, %v2061_v44  ;;  %s9728_s25 = smov 60  }
  0x78   : > { %v2014_v27 = vsel %vm9750_vm1, %v2013_v46, %v1932_v14  ;;  %v2890_v14 = vshrl.u32 %v6280_v4, 16  ;;  %v732_v4 = vld [vmem:[%s5971_s1 + $0x10] sm:$0xc] }
  0x79   : > { %v2069_v26 = vsel %vm9748_vm2, %v2065_v63, %v6330_v57 }
  0x7a   : > { %1966 = vrot.lane.b32.xlu0 %v1931_v11, %s9677_s2  ;;  %v6445_v11 = vld [vmem:[%s5971_s1 + $0xa0] ss:$0 sps:$4 sm:$0x77]   ;;  %v2892_v44 = vor.u32 %v2890_v14, %v6322_v21 }
  0x7b   : > { %1968 = vrot.lane.b32.xlu1 %v1933_v15, %s9677_s2  ;;  %s9679_s2 = smov 48   ;;  %v1288_v15 = vsel %vm9785_vm3, %v9827_v3, %v1287_v50  ;;  %v2894_v46 = vshll.u32 %v6445_v11, 16  ;;  %v6468_v3 = vld [vmem:[%s6101_s23 + $0x30] sm:$0xff]  }
  0x7c   : > { %v6476_v21 = vshll.u32 %v6468_v3, 16  ;;  %v6479_v14 = vshrl.u32 %v6468_v3, 16 }
  0x7d   : > { %v2896_v58 = vrot.slane %v2894_v46, 1 }
  0x7e   : > { %1244 = vrot.lane.b32.xlu0 %v1169_v38, %s9685_s26  ;;  %v731_v38 = vld [vmem:[%s5971_s1 + $0x8] sm:$0xc] }
  0x7f   : > { %1246 = vrot.lane.b32.xlu1 %v1173_v18, %s9685_s26  ;;  %v5256_v61 = vcombine.low %v731_v38, %v6358_v10  ;;  %v1426_v18 = vrot.slane %v6405_v8, 2  ;;  %v2897_v63 = vsel %vm9752_vm0, %v2892_v44, %v2896_v58  ;;  %v5257_v38 = vcombine.low %v732_v4, %v5980_v2  ;;  %s9730_s26 = smov 56  }
  0x81   : > { %v2187_v57 = vrot.slane %v5256_v61, 2  ;;  %v2271_v2 = vrot.slane %v5257_v38, 2 }
  0x82   : > { %2019 = vrot.lane.b32.xlu0 %v2014_v27, %s9679_s2  ;;  %v1427_v27 = vrot.slane %v6402_v53, 3 }
  0x83   : > { %2021 = vrot.lane.b32.xlu1 %v6441_v45, %s9679_s2  ;;  %s9681_s2 = smov 52  }
  0x84   : > { %v1428_v10 = vor.u32 %v1427_v27, %v1426_v18  ;;  %v1430_v18 = vrot.slane %v6479_v14, 2  ;;  %v1431_v27 = vrot.slane %v6476_v21, 3 }
  0x86   : > { %1321 = vrot.lane.b32.xlu0 %v6309_v31, %s9683_s29  ;;  %v2188_v31 = vrot.slane %v6276_v62, 2  ;;  %v1429_v61 = vsel %vm1409_vm4, %v6349_v16, %v1428_v10 }
  0x87   : > { %1323 = vrot.lane.b32.xlu1 %v1288_v15, %s9683_s29  ;;  %s9713_s29 = smov 64  }
  0x88   : > { %v2189_v46 = vsel %vm9785_vm3, %v2187_v57, %v2188_v31  ;;  %v6503_v57 = vor.u32 %v1431_v27, %v1430_v18  ;;  %v9690_v18 = vrot.slane %v5974_v0, 2  ;;  %v5686_v27 = vld [vmem:[%s9828_s4 + $0x10] sm:$0xff]  }
  0x8a   : > { %2148 = vrot.lane.b32.xlu0 %v2069_v26, %s9681_s2  ;;  %v2190_v26 = vrot.slane %v5987_v7, 2 }
  0x8b   : > { %2150 = vrot.lane.b32.xlu1 %v6344_v19, %s9681_s2  ;;  %v9689_v19 = vrot.slane %v6468_v3, 2  ;;  %s9838_s2 = smov 12  }
  0x8c   : > { %v2272_v4 = vsel %vm9785_vm3, %v2271_v2, %v2190_v26  ;;  %v1433_v2 = vsel %vm1409_vm4, %v1428_v10, %v6503_v57  ;;  %v6527_v10 = vsel %vm9785_vm3, %v2190_v26, %v9690_v18 }
  0x8d   : > { %v6499_v16 = vsel %vm9785_vm3, %v1287_v50, %v9689_v19  ;;  %v2191_v50 = vsel %vm9785_vm3, %v2188_v31, %v2190_v26  ;;  %v1545_v31 = vrot.slane %v6393_v55, 3  ;;  %v874_v19 = vrot.slane %v6402_v53, 1 }
  0x8e   : > { %1374 = vrot.lane.b32.xlu0 %v1288_v15, %s9734_s30  ;;  %v5683_v15 = vld [vmem:[%s9828_s4 + $0x20] ss:$0 sps:$4 sm:$0xff]  }
  0x8f   : > { %2935 = vrot.lane.b32.xlu1 %v2897_v63, %s9715_s20  ;;  %5587 = vmatprep.subr.msk.bf16.mxu0 %vm9747_vm6, %v5683_v15  ;;  %v3277_v44 = vsel %vm9747_vm6, %v5683_v15, 0  ;;  %v5684_v63 = vld [vmem:[%s9828_s4 + $0x18] sm:$0xff]   ;;  %v2898_v15 = vshrl.u32 %v6445_v11, 16  ;;  %v1546_v13 = vsel %vm9757_vm5, %v1543_v40, %v1545_v31  ;;  %vm9756_vm6 = vcmask 326656  }
  0x90   : > { %5428 = vmatpush3.bf16.msra.mxu0 %v3277_v44 }
  0x91   : > { %5429 = vmatprep.subr.bf16.mxu0 %v5684_v63  ;;  %v2900_v11 = vor.u32 %v2898_v15, %v2896_v58  ;;  %v5687_v58 = vld [vmem:[%s9828_s4 + $0x8] sm:$0xff]  }
  0x92   : > { %2224 = vrot.lane.b32.xlu0 %v2189_v46, %s9730_s26 }
  0x93   : > { %1504 = vrot.lane.b32.xlu1 %v1429_v61, %s9725_s0 }
  0x94   : > { %5430 = vmatpush3.bf16.msra.mxu0 %v5684_v63  ;;  %v870_v63 = vor.u32 %v6316_v43, %v866_v41  ;;  %v9694_v43 = vrot.slane %v6468_v3, 3 }
  0x95   : > { %v2906_v46 = vpop.permute.xlu1 %2905  ;;  %5431 = vmatprep.subr.bf16.mxu0 %v5686_v27 }
  0x96   : > { %1376 = vrot.lane.b32.xlu0 %v6499_v16, %s9734_s30  ;;  %v875_v26 = vsel %vm9752_vm0, %v870_v63, %v874_v19  ;;  %v2945_v40 = vsel %vm2313_vm7, %v5974_v0, %v2906_v46 }
  0x97   : > { %2277 = vrot.lane.b32.xlu1 %v2272_v4, %s9728_s25  ;;  %v2993_v18 = vshrl.u32 %v2945_v40, 16  ;;  %v2996_v46 = vshll.u32 %v2945_v40, 16  ;;  %v1031_v40 = vrot.slane %v6468_v3, 1 }
  0x98   : > { %v2902_v61 = vpop.permute.xlu0 %2901  ;;  %5432 = vmatpush3.bf16.msra.mxu0 %v5686_v27 }
  0x99   : > { %v6519_v44 = vpop.permute.xlu1 %2907  ;;  %5433 = vmatprep.subr.bf16.mxu0 %v5687_v58  ;;  %v2941_v41 = vsel %vm2313_vm7, %v5257_v38, %v2902_v61  ;;  %v1548_v61 = vsel %vm9757_vm5, %v1545_v31, %v9694_v43 }
  0x9a   : > { %2226 = vrot.lane.b32.xlu0 %v2191_v50, %s9730_s26  ;;  %v2981_v38 = vshll.u32 %v2941_v41, 16 }
  0x9b   : > { %1506 = vrot.lane.b32.xlu1 %v1433_v2, %s9725_s0  ;;  %v5688_v2 = vld [vmem:[%s9828_s4] sm:$0xff]   ;;  %s9885_s4 = smov 24  }
  0x9c   : > { %v2904_v4 = vpop.permute.xlu0 %2903  ;;  %5434 = vmatpush3.bf16.msra.mxu0 %v5687_v58  ;;  %v878_v58 = vor.u32 %v6405_v8, %v874_v19  ;;  %v2983_v51 = vrot.slane %v2981_v38, 3  ;;  %v2995_v19 = vrot.slane %v2993_v18, 2 }
  0x9d   : > { %v6536_v15 = vpop.permute.xlu1 %2911  ;;  %v2943_v50 = vsel %vm2313_vm7, %v5987_v7, %v2904_v4  ;;  %5435 = vmatprep.subr.bf16.mxu0 %v5688_v2  ;;  %v2978_v4 = vshrl.u32 %v2941_v41, 16 }
  0x9e   : > { %2937 = vrot.lane.b32.xlu0 %v2900_v11, %s9715_s20  ;;  %v2985_v27 = vshrl.u32 %v2943_v50, 16  ;;  %v2988_v32 = vshll.u32 %v2943_v50, 16  ;;  %v9695_v50 = vrot.slane %v6476_v21, 1 }
  0x9f   : > { %2279 = vrot.lane.b32.xlu1 %v6527_v10, %s9728_s25  ;;  %v2980_v41 = vrot.slane %v2978_v4, 2 }
  0xa0   : > { %v6548_v53 = vpop.permute.xlu0 %2909  ;;  %5436 = vmatpush3.bf16.msra.mxu0 %v5688_v2  ;;  %v2987_v36 = vrot.slane %v2985_v27, 2  ;;  %v883_v8 = vsel %vm9752_vm0, %v878_v58, %v9695_v50  ;;  %v6599_v58 = vld [vmem:[%s6101_s23 + $0x38] sm:$0xff]  }
  0xa1   : > { %v6554_v11 = vpop.permute.xlu1 %2915 }
  0xa2   : > { %9829 = vst [vmem:[#allocation25_spill] sm:$0xff] %v6554_v11  ;;  %1581 = vrot.lane.b32.xlu0 %v1546_v13, %s9732_s19  ;;  %v2990_v13 = vrot.slane %v2988_v32, 3  ;;  %v2984_v32 = vor.u32 %v2983_v51, %v2980_v41  ;;  %v9836_v51 = vrot.slane %v6393_v55, 1  ;;  %v6611_v55 = vshll.u32 %v6599_v58, 16 }
  0xa3   : > { %988 = vrot.lane.b32.xlu1 %v875_v26, %s9715_s20  ;;  %v2998_v26 = vrot.slane %v2996_v46, 3 }
  0xa4   : > { %v6563_v63 = vpop.permute.xlu0 %2913  ;;  %v2991_v2 = vor.u32 %v2990_v13, %v2987_v36  ;;  %v5788_v36 = vld [vmem:[%s5971_s1 + $0x18] sm:$0xff]  }
  0xa5   : > { %v6567_v5 = vpop.permute.xlu1 %2919  ;;  %v6585_v4 = vor.u32 %v2998_v26, %v2995_v19  ;;  %v6614_v19 = vshrl.u32 %v6599_v58, 16 }
  0xa6   : > { %9830 = vst [vmem:[#allocation26_spill] sm:$0xff] %v6567_v5  ;;  %1583 = vrot.lane.b32.xlu0 %v1548_v61, %s9732_s19  ;;  %v2992_v38 = vsel %vm1409_vm4, %v2984_v32, %v2991_v2  ;;  %v1032_v61 = vsel %vm9750_vm1, %v9836_v51, %v1031_v40  ;;  %v1175_v32 = vrot.slane %v6476_v21, 2  ;;  %v6632_v51 = vld [vmem:[%s5971_s1 + $0x20] sm:$0xff]  }
  0xa7   : > { %1707 = vrot.lane.b32.xlu1 %v6276_v62, %s9709_s21  ;;  %v3000_v46 = vsel %vm1409_vm4, %v2991_v2, %v6585_v4  ;;  %v1174_v2 = vrot.slane %v6479_v14, 1 }
  0xa8   : > { %v6572_v31 = vpop.permute.xlu0 %2917 }
  0xa9   : > { %9831 = vst [vmem:[#allocation27_spill] sm:$0xff] %v6572_v31  ;;  %v6577_v27 = vpop.permute.xlu1 %2923  ;;  %v1176_v50 = vor.u32 %v1175_v32, %v1174_v2  ;;  %v9855_v31 = vrot.slane %v6476_v21, 1 }
  0xaa   : > { %9832 = vst [vmem:[#allocation28_spill] sm:$0xff] %v6577_v27  ;;  %1065 = vrot.lane.b32.xlu0 %v6414_v24, %s9702_s24  ;;  %v1291_v27 = vrot.slane %v6599_v58, 2 }
  0xab   : > { %990 = vrot.lane.b32.xlu1 %v883_v8, %s9715_s20  ;;  %v9698_v8 = vrot.slane %v6599_v58, 1  ;;  %s9851_s20 = smov 52   ;;  %v886_v11 = vor.u32 %v6479_v14, %v9855_v31 }
  0xac   : > { %v6582_v62 = vpop.permute.xlu0 %2921 }
  0xad   : > { %9833 = vst [vmem:[#allocation29_spill] sm:$0xff] %v6582_v62  ;;  %v6588_v18 = vpop.permute.xlu1 %2927 }
  0xae   : > { %9834 = vst [vmem:[#allocation30_spill] sm:$0xff] %v6588_v18  ;;  %3129 = vrot.lane.b32.xlu0 %v2992_v38, %s9713_s29 }
  0xaf   : > { %1709 = vrot.lane.b32.xlu1 %v5788_v36, %s9709_s21  ;;  %v6629_v36 = vsel %vm9750_vm1, %v1031_v40, %v9698_v8  ;;  %v9839_v40 = vrot.slane %v5987_v7, 1  ;;  %v6661_v7 = vld [vmem:[%s5971_s1 + $0x28] sm:$0xff]   ;;  %s9846_s21 = smov 48  }
  0xb0   : > { %v6593_v24 = vpop.permute.xlu0 %2925  ;;  %v9711_v32 = vrot.slane %v6661_v7, 1  ;;  %v2194_v62 = vrot.slane %v6661_v7, 2  ;;  %v2947_v20 = vsel %vm2313_vm7, %v6661_v7, %v6519_v44 }
  0xb1   : > { %9835 = vst [vmem:[#allocation31_spill] sm:$0xff] %v6593_v24  ;;  %v6603_v13 = vpop.permute.xlu1 %980 }
  0xb2   : > { %3131 = vrot.lane.b32.xlu0 %v3000_v46, %s9713_s29  ;;  %v1936_v46 = vrot.slane %v6632_v51, 1  ;;  %s9848_s29 = smov 20  }
  0xb3   : > { %1067 = vrot.lane.b32.xlu1 %v1032_v61, %s9702_s24  ;;  %s9841_s24 = smov 16  }
  0xb4   : > { %v6607_v41 = vpop.permute.xlu0 %2929  ;;  %v1937_v8 = vsel %vm9750_vm1, %v9839_v40, %v1936_v46 }
  0xb5   : > { %9837 = vst [vmem:[#allocation32_spill] sm:$0xff] %v6607_v41  ;;  %v6616_v26 = vpop.permute.xlu1 %1057 }
  0xb6   : > { %1894 = vrot.lane.b32.xlu0 %v6375_v35, %s9699_s22  ;;  %v1178_v35 = vrot.slane %v6614_v19, 1 }
  0xb7   : > { %1896 = vrot.lane.b32.xlu1 %v6063_v47, %s9699_s22  ;;  %v1179_v47 = vrot.slane %v6611_v55, 2  ;;  %s9840_s22 = smov 44  }
  0xb8   : > { %v6624_v38 = vpop.permute.xlu0 %982 }
  0xb9   : > { %v6637_v43 = vpop.permute.xlu1 %1110  ;;  %v6647_v41 = vor.u32 %v1179_v47, %v1178_v35  ;;  %v9843_v47 = vshll.u32 %v5974_v0, 16 }
  0xba   : > { %1118 = vrot.lane.b32.xlu0 %v1032_v61, %s9838_s2  ;;  %v1177_v61 = vsel %vm9748_vm2, %v6426_v6, %v1176_v50  ;;  %v9842_v6 = vshrl.u32 %v5974_v0, 16 }
  0xbb   : > { %1120 = vrot.lane.b32.xlu1 %v6629_v36, %s9838_s2  ;;  %v1181_v2 = vsel %vm9748_vm2, %v1176_v50, %v6647_v41  ;;  %v2075_v40 = vrot.slane %v9843_v47, 2  ;;  %v6677_v50 = vsel %vm9750_vm1, %v1936_v46, %v9711_v32  ;;  %v9847_v46 = vrot.slane %v6468_v3, 2 }
  0xbc   : > { %v6642_v30 = vpop.permute.xlu0 %1059 }
  0xbd   : > { %v6649_v18 = vpop.permute.xlu1 %1240  ;;  %v1292_v32 = vsel %vm9785_vm3, %v9847_v46, %v1291_v27 }
  0xbe   : > { %1970 = vrot.lane.b32.xlu0 %v6441_v45, %s9840_s22  ;;  %v2074_v45 = vrot.slane %v9842_v6, 1 }
  0xbf   : > { %1972 = vrot.lane.b32.xlu1 %v1937_v8, %s9840_s22 }
  0xc0   : > { %v6656_v48 = vpop.permute.xlu0 %1112  ;;  %v2076_v6 = vor.u32 %v2075_v40, %v2074_v45 }
  0xc1   : > { %v6664_v35 = vpop.permute.xlu1 %1317 }
  0xc2   : > { %1248 = vrot.lane.b32.xlu0 %v1177_v61, %s9841_s24  ;;  %v9844_v61 = vshrl.u32 %v5977_v1, 16 }
  0xc3   : > { %1250 = vrot.lane.b32.xlu1 %v1181_v2, %s9841_s24  ;;  %v9845_v2 = vshll.u32 %v5977_v1, 16 }
  0xc4   : > { %v6672_v24 = vpop.permute.xlu0 %1242  ;;  %v2078_v56 = vrot.slane %v9844_v61, 1  ;;  %v6697_v61 = vld [vmem:[%s6101_s23 + $0x40] sm:$0xff]  }
  0xc5   : > { %v2079_v42 = vrot.slane %v9845_v2, 2  ;;  %v6684_v29 = vpop.permute.xlu1 %1370  ;;  %v6715_v2 = vshrl.u32 %v6697_v61, 16 }
  0xc6   : > { %2023 = vrot.lane.b32.xlu0 %v1937_v8, %s9846_s21  ;;  %v2077_v8 = vsel %vm9748_vm2, %v6332_v49, %v2076_v6  ;;  %v1434_v49 = vrot.slane %v6614_v19, 2 }
  0xc7   : > { %2025 = vrot.lane.b32.xlu1 %v6677_v50, %s9846_s21  ;;  %v6694_v17 = vor.u32 %v2079_v42, %v2078_v56  ;;  %v9719_v42 = vrot.slane %v6697_v61, 2  ;;  %v6712_v56 = vshll.u32 %v6697_v61, 16  ;;  %v1438_v5 = vrot.slane %v6715_v2, 2 }
  0xc8   : > { %v6689_v47 = vpop.permute.xlu0 %1319 }
  0xc9   : > { %v6699_v1 = vpop.permute.xlu1 %1372  ;;  %v2081_v40 = vsel %vm9748_vm2, %v2076_v6, %v6694_v17  ;;  %v6728_v6 = vsel %vm9785_vm3, %v1291_v27, %v9719_v42  ;;  %v9852_v27 = vrot.slane %v5974_v0, 2 }
  0xca   : > { %1325 = vrot.lane.b32.xlu0 %v6499_v16, %s9848_s29  ;;  %v1435_v16 = vrot.slane %v6611_v55, 3 }
  0xcb   : > { %1327 = vrot.lane.b32.xlu1 %v1292_v32, %s9848_s29  ;;  %v2195_v42 = vsel %vm9785_vm3, %v9852_v27, %v2194_v62  ;;  %v3004_v27 = vshll.u32 %v2947_v20, 16 }
  0xcc   : > { %v6706_v45 = vpop.permute.xlu0 %2931 }
  0xcd   : > { %9849 = vst [vmem:[#allocation33_spill] sm:$0xff] %v6706_v45  ;;  %v6717_v46 = vpop.permute.xlu1 %2933  ;;  %v3006_v39 = vrot.slane %v3004_v27, 3 }
  0xce   : > { %9850 = vst [vmem:[#allocation34_spill] sm:$0xff] %v6717_v46  ;;  %2152 = vrot.lane.b32.xlu0 %v2077_v8, %s9851_s20  ;;  %v1439_v8 = vrot.slane %v6712_v56, 3 }
  0xcf   : > { %2154 = vrot.lane.b32.xlu1 %v2081_v40, %s9851_s20  ;;  %v1436_v40 = vor.u32 %v1435_v16, %v1434_v49 }
  0xd0   : > { %v6723_v45 = vpop.permute.xlu0 %1500  ;;  %v6743_v33 = vor.u32 %v1439_v8, %v1438_v5  ;;  %v6760_v5 = vld [vmem:[%s5971_s1 + $0x30] sm:$0xff]   ;;  %v3001_v8 = vshrl.u32 %v2947_v20, 16  ;;  %v890_v20 = vrot.slane %v6611_v55, 1 }
  0xd1   : > { %v6733_v46 = vpop.permute.xlu1 %1577  ;;  %v9727_v16 = vrot.slane %v6760_v5, 2 }
  0xd2   : > { %1378 = vrot.lane.b32.xlu0 %v1292_v32, %s9734_s30  ;;  %v1437_v32 = vsel %vm1409_vm4, %v6503_v57, %v1436_v40  ;;  %v1441_v0 = vsel %vm1409_vm4, %v1436_v40, %v6743_v33  ;;  %v1549_v57 = vrot.slane %v6599_v58, 3  ;;  %v891_v14 = vsel %vm9752_vm0, %v886_v11, %v890_v20 }
  0xd3   : > { %1380 = vrot.lane.b32.xlu1 %v6728_v6, %s9734_s30  ;;  %v6773_v40 = vsel %vm9785_vm3, %v2194_v62, %v9727_v16  ;;  %s9868_s30 = smov 40  }
  0xd4   : > { %v6738_v37 = vpop.permute.xlu0 %1502 }
  0xd5   : > { %v6745_v9 = vpop.permute.xlu1 %1579 }
  0xd6   : > { %2228 = vrot.lane.b32.xlu0 %v6527_v10, %s9730_s26 }
  0xd7   : > { %2230 = vrot.lane.b32.xlu1 %v2195_v42, %s9730_s26  ;;  %s9861_s26 = smov 36  }
  0xd8   : > { %v6755_v49 = vpop.permute.xlu0 %984 }
  0xd9   : > { %9853 = vst [vmem:[#allocation35_spill] sm:$0xff] %v6755_v49  ;;  %v6763_v44 = vpop.permute.xlu1 %986  ;;  %v9856_v49 = vrot.slane %v6468_v3, 3  ;;  %v9736_v3 = vrot.slane %v6697_v61, 3 }
  0xda   : > { %9854 = vst [vmem:[#allocation36_spill] sm:$0xff] %v6763_v44  ;;  %1508 = vrot.lane.b32.xlu0 %v1437_v32, %s9725_s0  ;;  %v3003_v44 = vrot.slane %v3001_v8, 2 }
  0xdb   : > { %1510 = vrot.lane.b32.xlu1 %v1441_v0, %s9725_s0  ;;  %v2949_v0 = vsel %vm2313_vm7, %v6760_v5, %v6548_v53  ;;  %v1550_v62 = vsel %vm9757_vm5, %v9856_v49, %v1549_v57  ;;  %s9859_s0 = smov 4   ;;  %v9737_v49 = vrot.slane %v6712_v56, 1 }
  0xdc   : > { %v6768_v10 = vpop.permute.xlu0 %1703  ;;  %v3007_v31 = vor.u32 %v3006_v39, %v3003_v44  ;;  %v3009_v55 = vshrl.u32 %v2949_v0, 16  ;;  %v3012_v8 = vshll.u32 %v2949_v0, 16  ;;  %v1552_v44 = vsel %vm9757_vm5, %v1549_v57, %v9736_v3 }
  0xdd   : > { %v6779_v32 = vpop.permute.xlu1 %1705  ;;  %v1035_v57 = vrot.slane %v6697_v61, 1 }
  0xde   : > { %2281 = vrot.lane.b32.xlu0 %v2195_v42, %s9728_s25  ;;  %v894_v42 = vor.u32 %v6614_v19, %v890_v20  ;;  %v3011_v16 = vrot.slane %v3009_v55, 2  ;;  %v3008_v39 = vsel %vm1409_vm4, %v6585_v4, %v3007_v31 }
  0xdf   : > { %2283 = vrot.lane.b32.xlu1 %v6773_v40, %s9728_s25  ;;  %s9860_s25 = smov 64  }
  0xe0   : > { %v6790_v21 = vpop.permute.xlu0 %1061  ;;  %v899_v20 = vsel %vm9752_vm0, %v894_v42, %v9737_v49  ;;  %v1940_v49 = vrot.slane %v6760_v5, 1  ;;  %vm2794_vm0 = vcmask 457728  }
  0xe1   : > { %9857 = vst [vmem:[#allocation37_spill] sm:$0xff] %v6790_v21  ;;  %v6793_v27 = vpop.permute.xlu1 %1063  ;;  %v3014_v21 = vrot.slane %v3012_v8, 3  ;;  %v6839_v8 = vld [vmem:[%s6101_s23 + $0x48] sm:$0xff]  }
  0xe2   : > { %9858 = vst [vmem:[#allocation38_spill] sm:$0xff] %v6793_v27  ;;  %1585 = vrot.lane.b32.xlu0 %v1550_v62, %s9732_s19 }
  0xe3   : > { %992 = vrot.lane.b32.xlu1 %v891_v14, %s9859_s0  ;;  %v6817_v0 = vor.u32 %v3014_v21, %v3011_v16  ;;  %v9865_v21 = vrot.slane %v6599_v58, 1  ;;  %v6853_v58 = vshrl.u32 %v6839_v8, 16 }
  0xe4   : > { %v6798_v53 = vpop.permute.xlu0 %1890 }
  0xe5   : > { %v6804_v11 = vpop.permute.xlu1 %1892  ;;  %v1036_v55 = vsel %vm9750_vm1, %v9865_v21, %v1035_v57 }
  0xe6   : > { %3133 = vrot.lane.b32.xlu0 %v3008_v39, %s9860_s25  ;;  %v9738_v39 = vrot.slane %v6839_v8, 1 }
  0xe7   : > { %1711 = vrot.lane.b32.xlu1 %v6632_v51, %s9861_s26  ;;  %v3016_v51 = vsel %vm1409_vm4, %v3007_v31, %v6817_v0 }
  0xe8   : > { %v6812_v19 = vpop.permute.xlu0 %1114  ;;  %v6868_v3 = vsel %vm9750_vm1, %v1035_v57, %v9738_v39  ;;  %v9871_v57 = vrot.slane %v6661_v7, 1 }
  0xe9   : > { %9862 = vst [vmem:[#allocation39_spill] sm:$0xff] %v6812_v19  ;;  %v6819_v4 = vpop.permute.xlu1 %1116  ;;  %v1295_v19 = vrot.slane %v6839_v8, 2 }
  0xea   : > { %9863 = vst [vmem:[#allocation40_spill] sm:$0xff] %v6819_v4  ;;  %1587 = vrot.lane.b32.xlu0 %v1552_v44, %s9732_s19  ;;  %s9867_s19 = smov 8   ;;  %v6850_v44 = vshll.u32 %v6839_v8, 16  ;;  %v1941_v39 = vsel %vm9750_vm1, %v9871_v57, %v1940_v49 }
  0xeb   : > { %994 = vrot.lane.b32.xlu1 %v899_v20, %s9859_s0 }
  0xec   : > { %v6823_v62 = vpop.permute.xlu0 %1966 }
  0xed   : > { %v6828_v14 = vpop.permute.xlu1 %1968 }
  0xee   : > { %3135 = vrot.lane.b32.xlu0 %v3016_v51, %s9860_s25  ;;  %v1183_v51 = vrot.slane %v6712_v56, 2 }
  0xef   : > { %1713 = vrot.lane.b32.xlu1 %v6661_v7, %s9861_s26  ;;  %v6897_v7 = vld [vmem:[%s5971_s1 + $0x38] sm:$0xff]  }
  0xf0   : > { %v6833_v16 = vpop.permute.xlu0 %1244 }
  0xf1   : > { %9864 = vst [vmem:[#allocation41_spill] sm:$0xff] %v6833_v16  ;;  %v6841_v42 = vpop.permute.xlu1 %1246 }
  0xf2   : > { %9866 = vst [vmem:[#allocation42_spill] sm:$0xff] %v6841_v42  ;;  %1069 = vrot.lane.b32.xlu0 %v6629_v36, %s9867_s19  ;;  %v1182_v36 = vrot.slane %v6715_v2, 1  ;;  %v1186_v42 = vrot.slane %v6853_v58, 1 }
  0xf3   : > { %1071 = vrot.lane.b32.xlu1 %v1036_v55, %s9867_s19 }
  0xf4   : > { %v6846_v31 = vpop.permute.xlu0 %2019 }
  0xf5   : > { %v6855_v20 = vpop.permute.xlu1 %2021 }
  0xf6   : > { %1898 = vrot.lane.b32.xlu0 %v6017_v25, %s9868_s30  ;;  %v1187_v25 = vrot.slane %v6850_v44, 2 }
  0xf7   : > { %1900 = vrot.lane.b32.xlu1 %v6036_v34, %s9868_s30  ;;  %v1184_v34 = vor.u32 %v1183_v51, %v1182_v36 }
  0xf8   : > { %v6863_v21 = vpop.permute.xlu0 %1321 }
  0xf9   : > { %9869 = vst [vmem:[#allocation43_spill] sm:$0xff] %v6863_v21  ;;  %v6873_v4 = vpop.permute.xlu1 %1323  ;;  %v6883_v21 = vor.u32 %v1187_v25, %v1186_v42  ;;  %v9743_v42 = vrot.slane %v6897_v7, 1  ;;  %v9876_v25 = vshll.u32 %v5996_v12, 16 }
  0xfa   : > { %9870 = vst [vmem:[#allocation44_spill] sm:$0xff] %v6873_v4  ;;  %1122 = vrot.lane.b32.xlu0 %v1036_v55, %s9838_s2  ;;  %v1185_v55 = vsel %vm9748_vm2, %v6647_v41, %v1184_v34  ;;  %v9875_v41 = vshrl.u32 %v5996_v12, 16 }
  0xfb   : > { %1124 = vrot.lane.b32.xlu1 %v6868_v3, %s9838_s2  ;;  %9872 = vst [vmem:[#allocation45_spill] sm:$0xff] %v6883_v21  ;;  %v1189_v36 = vsel %vm9748_vm2, %v1184_v34, %v6883_v21  ;;  %v2083_v57 = vrot.slane %v9876_v25, 2  ;;  %v6913_v34 = vsel %vm9750_vm1, %v1940_v49, %v9743_v42  ;;  %v9881_v25 = vrot.slane %v6697_v61, 2 }
  0xfc   : > { %v6878_v27 = vpop.permute.xlu0 %2148  ;;  %vm2720_vm1 = vcmask 392192  }
  0xfd   : > { %v6885_v16 = vpop.permute.xlu1 %2150  ;;  %v1296_v42 = vsel %vm9785_vm3, %v9881_v25, %v1295_v19 }
  0xfe   : > { %1974 = vrot.lane.b32.xlu0 %v6677_v50, %s9840_s22  ;;  %v2082_v50 = vrot.slane %v9875_v41, 1  ;;  %v6926_v41 = vld [vmem:[%s6101_s23 + $0x50] sm:$0xff]  }
  0xff   : > { %1976 = vrot.lane.b32.xlu1 %v1941_v39, %s9840_s22 }
 0x100   : > { %v6892_v4 = vpop.permute.xlu0 %1374  ;;  %v2084_v12 = vor.u32 %v2083_v57, %v2082_v50  ;;  %v9746_v50 = vrot.slane %v6926_v41, 2 }
 0x101   : > { %9873 = vst [vmem:[#allocation46_spill] sm:$0xff] %v6892_v4  ;;  %v6900_v51 = vpop.permute.xlu1 %2935 }
 0x102   : > { %9874 = vst [vmem:[#allocation47_spill] sm:$0xff] %v6900_v51  ;;  %1252 = vrot.lane.b32.xlu0 %v1185_v55, %s9841_s24  ;;  %v9877_v51 = vshrl.u32 %v6010_v22, 16 }
 0x103   : > { %1254 = vrot.lane.b32.xlu1 %v1189_v36, %s9841_s24  ;;  %v9878_v36 = vshll.u32 %v6010_v22, 16 }
 0x104   : > { %v6908_v4 = vpop.permute.xlu0 %2224  ;;  %v2086_v55 = vrot.slane %v9877_v51, 1 }
 0x105   : > { %v2087_v28 = vrot.slane %v9878_v36, 2  ;;  %v6920_v23 = vpop.permute.xlu1 %1504 }
 0x106   : > { %9879 = vst [vmem:[#allocation48_spill] sm:$0xff] %v6920_v23  ;;  %2027 = vrot.lane.b32.xlu0 %v1941_v39, %s9846_s21  ;;  %v2085_v39 = vsel %vm9748_vm2, %v6694_v17, %v2084_v12  ;;  %v1442_v17 = vrot.slane %v6853_v58, 2 }
 0x107   : > { %2029 = vrot.lane.b32.xlu1 %v6913_v34, %s9846_s21  ;;  %v6933_v51 = vor.u32 %v2087_v28, %v2086_v55  ;;  %v6948_v28 = vshll.u32 %v6926_v41, 16  ;;  %v6951_v55 = vshrl.u32 %v6926_v41, 16 }
 0x108   : > { %v6928_v49 = vpop.permute.xlu0 %1376 }
 0x109   : > { %9880 = vst [vmem:[#allocation49_spill] sm:$0xff] %v6928_v49  ;;  %9882 = vst [vmem:[#allocation50_spill] sm:$0xff] %v6933_v51  ;;  %v6935_v22 = vpop.permute.xlu1 %2277  ;;  %v2089_v36 = vsel %vm9748_vm2, %v2084_v12, %v6933_v51  ;;  %v6962_v12 = vsel %vm9785_vm3, %v1295_v19, %v9746_v50  ;;  %v2315_v49 = vsel %vm2313_vm7, %v6147_v60, %v6603_v13  ;;  %v1447_v51 = vrot.slane %v6948_v28, 3 }
 0x10a   : > { %1329 = vrot.lane.b32.xlu0 %v6728_v6, %s9848_s29  ;;  %v1443_v6 = vrot.slane %v6850_v44, 3  ;;  %v2951_v60 = vsel %vm2313_vm7, %v6897_v7, %v6536_v15  ;;  %v2352_v13 = vsel %vm9751_vm8, %v2315_v49, %v6616_v26  ;;  %vm2683_vm2 = vcmask 359424  }
 0x10b   : > { %1331 = vrot.lane.b32.xlu1 %v1296_v42, %s9848_s29 }
 0x10c   : > { %v6943_v57 = vpop.permute.xlu0 %2226  ;;  %v1444_v19 = vor.u32 %v1443_v6, %v1442_v17  ;;  %v3017_v6 = vshrl.u32 %v2951_v60, 16 }
 0x10d   : > { %v6953_v25 = vpop.permute.xlu1 %1506 }
 0x10e   : > { %9883 = vst [vmem:[#allocation51_spill] sm:$0xff] %v6953_v25  ;;  %2156 = vrot.lane.b32.xlu0 %v2085_v39, %s9851_s20  ;;  %v2198_v39 = vrot.slane %v6897_v7, 2  ;;  %v1446_v25 = vrot.slane %v6951_v55, 2 }
 0x10f   : > { %2158 = vrot.lane.b32.xlu1 %v2089_v36, %s9851_s20  ;;  %v2389_v36 = vsel %vm2387_vm9, %v2352_v13, %v6637_v43  ;;  %v2317_v43 = vsel %vm2313_vm7, %v6150_v52, %v6624_v38 }
 0x110   : > { %v6967_v23 = vpop.permute.xlu0 %2937  ;;  %v6989_v15 = vor.u32 %v1447_v51, %v1446_v25  ;;  %v2426_v26 = vsel %vm2424_vm10, %v2389_v36, %v6649_v18  ;;  %v1445_v51 = vsel %vm1409_vm4, %v6743_v33, %v1444_v19  ;;  %v3020_v18 = vshll.u32 %v2951_v60, 16 }
 0x111   : > { %9884 = vst [vmem:[#allocation52_spill] sm:$0xff] %v6967_v23  ;;  %v6972_v21 = vpop.permute.xlu1 %2279  ;;  %v2463_v13 = vsel %vm2461_vm11, %v2426_v26, %v6664_v35  ;;  %v2354_v25 = vsel %vm9751_vm8, %v2317_v43, %v6642_v30  ;;  %vm2757_vm8 = vcmask 424960  }
 0x112   : > { %1382 = vrot.lane.b32.xlu0 %v1296_v42, %s9885_s4  ;;  %v9886_v42 = vrot.slane %v6760_v5, 2  ;;  %v2500_v36 = vsel %vm9753_vm12, %v2463_v13, %v6684_v29  ;;  %v2391_v38 = vsel %vm2387_vm9, %v2354_v25, %v6656_v48  ;;  %v1449_v30 = vsel %vm1409_vm4, %v1444_v19, %v6989_v15 }
 0x113   : > { %1384 = vrot.lane.b32.xlu1 %v6962_v12, %s9885_s4  ;;  %v2537_v35 = vsel %vm9754_vm13, %v2500_v36, %v6723_v45  ;;  %v2428_v29 = vsel %vm2424_vm10, %v2391_v38, %v6672_v24  ;;  %v3019_v48 = vrot.slane %v3017_v6, 2  ;;  %v1553_v19 = vrot.slane %v6839_v8, 3 }
 0x114   : > { %v6984_v50 = vpop.permute.xlu0 %1581  ;;  %v2199_v17 = vsel %vm9785_vm3, %v9886_v42, %v2198_v39  ;;  %v7010_v42 = vld [vmem:[%s5971_s1 + $0x40] sm:$0xff]   ;;  %v2465_v45 = vsel %vm2461_vm11, %v2428_v29, %v6689_v47  ;;  %v3022_v43 = vrot.slane %v3020_v18, 3 }
 0x115   : > { %v6993_v49 = vpop.permute.xlu1 %988  ;;  %v9764_v52 = vrot.slane %v7010_v42, 2  ;;  %v2502_v24 = vsel %vm9753_vm12, %v2465_v45, %v6699_v1  ;;  %v9889_v1 = vrot.slane %v6712_v56, 1  ;;  %vm2831_vm12 = vcmask 490496  }
 0x116   : > { %2232 = vrot.lane.b32.xlu0 %v6773_v40, %s9887_s27  ;;  %v2574_v40 = vsel %vm2572_vm14, %v2537_v35, %v6733_v46 }
 0x117   : > { %2234 = vrot.lane.b32.xlu1 %v2199_v17, %s9887_s27  ;;  %v2611_v26 = vsel %vm9755_vm15, %v2574_v40, %v6768_v10  ;;  %v7041_v47 = vsel %vm9785_vm3, %v2198_v39, %v9764_v52  ;;  %v2539_v10 = vsel %vm9754_vm13, %v2502_v24, %v6738_v37  ;;  %v2953_v37 = vsel %vm2313_vm7, %v7010_v42, %v6563_v63 }
 0x118   : > { %v7017_v33 = vpop.permute.xlu0 %1583  ;;  %v2648_v46 = vsel %vm9756_vm6, %v2611_v26, %v6798_v53  ;;  %v906_v53 = vrot.slane %v6850_v44, 1  ;;  %v2576_v18 = vsel %vm2572_vm14, %v2539_v10, %v6745_v9  ;;  %vm3165_vm13 = vcmask 523264  }
 0x119   : > { %v7025_v60 = vpop.permute.xlu1 %1707  ;;  %v2685_v6 = vsel %vm2683_vm2, %v2648_v46, %v6823_v62  ;;  %v2613_v56 = vsel %vm9755_vm15, %v2576_v18, %v6779_v32  ;;  %vm9758_vm15 = vcmask 588800   ;;  %v3023_v63 = vor.u32 %v3022_v43, %v3019_v48  ;;  %v7137_v18 = vld [vmem:[%s6101_s23 + $0x58] sm:$0xff]  }
 0x11a   : > { %1512 = vrot.lane.b32.xlu0 %v1445_v51, %s9888_s18  ;;  %v902_v51 = vor.u32 %v6715_v2, %v9889_v1  ;;  %v2722_v39 = vsel %vm2720_vm1, %v2685_v6, %v6846_v31  ;;  %v2650_v9 = vsel %vm9756_vm6, %v2613_v56, %v6804_v11  ;;  %v9891_v31 = vrot.slane %v6697_v61, 3 }
 0x11b   : > { %1514 = vrot.lane.b32.xlu1 %v1449_v30, %s9888_s18  ;;  %v2759_v2 = vsel %vm2757_vm8, %v2722_v39, %v6878_v27  ;;  %v2687_v32 = vsel %vm2683_vm2, %v2650_v9, %v6828_v14  ;;  %vm9892_vm6 = vsmask.f32 7424  ;;  %v3025_v36 = vshrl.u32 %v2953_v37, 16 }
 0x11c   : > { %v7047_v13 = vpop.permute.xlu0 %1065  ;;  %v2796_v62 = vsel %vm2794_vm0, %v2759_v2, %v6908_v4  ;;  %v1554_v44 = vsel %vm9757_vm5, %v9891_v31, %v1553_v19  ;;  %v907_v11 = vsel %vm9892_vm6, %v902_v51, %v906_v53  ;;  %v3028_v4 = vshll.u32 %v2953_v37, 16 }
 0x11d   : > { %v7057_v25 = vpop.permute.xlu1 %990  ;;  %v2833_v27 = vsel %vm2831_vm12, %v2796_v62, %v6935_v22  ;;  %v2724_v61 = vsel %vm2720_vm1, %v2687_v32, %v6855_v20  ;;  %v9761_v22 = vrot.slane %v6926_v41, 3  ;;  %v910_v40 = vor.u32 %v6853_v58, %v906_v53 }
 0x11e   : > { %2285 = vrot.lane.b32.xlu0 %v2199_v17, %s9890_s13  ;;  %v2761_v30 = vsel %vm2757_vm8, %v2724_v61, %v6885_v16  ;;  %v9763_v48 = vrot.slane %v6948_v28, 1  ;;  %v3027_v16 = vrot.slane %v3025_v36, 2  ;;  %v3030_v45 = vrot.slane %v3028_v4, 3 }
 0x11f   : > { %2287 = vrot.lane.b32.xlu1 %v7041_v47, %s9890_s13  ;;  %v2798_v14 = vsel %vm2794_vm0, %v2761_v30, %v6943_v57  ;;  %v3024_v43 = vsel %vm1409_vm4, %v6817_v0, %v3023_v63  ;;  %v9894_v51 = vrot.slane %v6839_v8, 1  ;;  %v9760_v56 = vrot.slane %v7137_v18, 1 }
 0x120   : > { %v3130_v17 = vpop.permute.xlu0 %3129  ;;  %v2835_v20 = vsel %vm2831_vm12, %v2798_v14, %v6972_v21  ;;  %v1556_v21 = vsel %vm9757_vm5, %v1553_v19, %v9761_v22  ;;  %v915_v0 = vsel %vm9892_vm6, %v910_v40, %v9763_v48  ;;  %v7115_v24 = vor.u32 %v3030_v45, %v3027_v16 }
 0x121   : > { %v3167_v38 = vsel %vm3165_vm13, %v2833_v27, %v3130_v17  ;;  %v7084_v35 = vpop.permute.xlu1 %1709  ;;  %v1039_v19 = vrot.slane %v6926_v41, 1  ;;  %vm9895_vm6 = vcmask 1046528   ;;  %v7148_v2 = vshll.u32 %v7137_v18, 16 }
 0x122   : > { %1589 = vrot.lane.b32.xlu0 %v1554_v44, %s9893_s15  ;;  %5437 = vmatprep.mubr.msk.bf16.mxu0 %vm9758_vm15, %v3167_v38  ;;  %v7151_v8 = vshrl.u32 %v7137_v18, 16  ;;  %v1191_v62 = vrot.slane %v6948_v28, 2  ;;  %v9897_v38 = vld [vmem:[#allocation45_spill] sm:$0xff]  ;;  %vm9898_vm5 = vsmask.f32 6400 }
 0x123   : > { %996 = vrot.lane.b32.xlu1 %v907_v11, %s9859_s0  ;;  %v1040_v53 = vsel %vm9895_vm6, %v9894_v51, %v1039_v19  ;;  %v7166_v44 = vsel %vm9895_vm6, %v1039_v19, %v9760_v56  ;;  %v9896_v11 = vrot.slane %v6897_v7, 1  ;;  %v1299_v19 = vrot.slane %v7137_v18, 2  ;;  %v9921_v56 = vld [vmem:[#allocation48_spill] sm:$0xff] }
 0x124   : > { %v3132_v29 = vpop.permute.xlu0 %3131  ;;  %v1194_v32 = vrot.slane %v7151_v8, 1 }
 0x125   : > { %v3169_v26 = vsel %vm3165_vm13, %v2835_v20, %v3132_v29  ;;  %v7101_v57 = vpop.permute.xlu1 %1067 }
 0x126   : > { %3137 = vrot.lane.b32.xlu0 %v3024_v43, %s9860_s25  ;;  %5438 = vmatmul.mubr.msk.bf16.vlgmr.msra.gmra.mxu0 %vm9758_vm15, %v3169_v26  ;;  %vm9899_vm15 = vmmov %vm9898_vm5 }
 0x127   : > { %1715 = vrot.lane.b32.xlu1 %v6760_v5, %s9861_s26  ;;  %v3032_v5 = vsel %vm1409_vm4, %v3023_v63, %v7115_v24  ;;  %v1944_v63 = vrot.slane %v7010_v42, 1 }
 0x128   : > { %v7110_v58 = vpop.permute.xlu0 %1894 }
 0x129   : > { %v7117_v46 = vpop.permute.xlu1 %1896  ;;  %v1945_v36 = vsel %vm9895_vm6, %v9896_v11, %v1944_v63  ;;  %v9907_v11 = vrot.slane %v6926_v41, 2 }
 0x12a   : > { %1591 = vrot.lane.b32.xlu0 %v1556_v21, %s9893_s15 }
 0x12b   : > { %998 = vrot.lane.b32.xlu1 %v915_v0, %s9859_s0 }
 0x12c   : > { %v7121_v10 = vpop.permute.xlu0 %1118 }
 0x12d   : > { %v7126_v6 = vpop.permute.xlu1 %1120 }
 0x12e   : > { %3139 = vrot.lane.b32.xlu0 %v3032_v5, %s9860_s25  ;;  %v9904_v5 = vld [vmem:[#allocation4_spill] sm:$0xff] }
 0x12f   : > { %1717 = vrot.lane.b32.xlu1 %v6897_v7, %s9861_s26  ;;  %v7195_v7 = vld [vmem:[%s5971_s1 + $0x48] sm:$0xff]   ;;  %v9905_v51 = vshrl.u32 %v9904_v5, 16 }
 0x130   : > { %v7131_v1 = vpop.permute.xlu0 %1970  ;;  %v9759_v29 = vrot.slane %v7195_v7, 1 }
 0x131   : > { %v7139_v39 = vpop.permute.xlu1 %1972 }
 0x132   : > { %1073 = vrot.lane.b32.xlu0 %v6868_v3, %s9867_s19  ;;  %v1190_v3 = vrot.slane %v6951_v55, 1 }
 0x133   : > { %1075 = vrot.lane.b32.xlu1 %v1040_v53, %s9867_s19 }
 0x134   : > { %v7144_v37 = vpop.permute.xlu0 %1248 }
 0x135   : > { %v7153_v9 = vpop.permute.xlu1 %1250 }
 0x136   : > { %1902 = vrot.lane.b32.xlu0 %v6092_v59, %s9868_s30  ;;  %v1195_v59 = vrot.slane %v7148_v2, 2 }
 0x137   : > { %1904 = vrot.lane.b32.xlu1 %v6076_v54, %s9868_s30  ;;  %v1192_v54 = vor.u32 %v1191_v62, %v1190_v3  ;;  %v9906_v3 = vshll.u32 %v9904_v5, 16 }
 0x138   : > { %v7161_v31 = vpop.permute.xlu0 %2023  ;;  %v7181_v4 = vor.u32 %v1195_v59, %v1194_v32 }
 0x139   : > { %v7171_v27 = vpop.permute.xlu1 %2025  ;;  %v1193_v30 = vsel %vm9898_vm5, %v9897_v38, %v1192_v54  ;;  %vm9903_vm5 = vmmov %vm9895_vm6  ;;  %v2095_v62 = vrot.slane %v9906_v3, 2  ;;  %v1300_v38 = vsel %vm9785_vm3, %v9907_v11, %v1299_v19  ;;  %vm9913_vm6 = vsmask.f32 6400 }
 0x13a   : > { %1126 = vrot.lane.b32.xlu0 %v1040_v53, %s9838_s2  ;;  %v1197_v20 = vsel %vm9899_vm15, %v1192_v54, %v7181_v4  ;;  %v7211_v0 = vsel %vm9903_vm5, %v1944_v63, %v9759_v29  ;;  %v2094_v53 = vrot.slane %v9905_v51, 1  ;;  %v7224_v54 = vld [vmem:[%s6101_s23 + $0x60] sm:$0xff]   ;;  %vm9911_vm15 = vcmask 64512   ;;  %vm9915_vm5 = vmmov %vm9913_vm6 }
 0x13b   : > { %1128 = vrot.lane.b32.xlu1 %v7166_v44, %s9838_s2  ;;  %v9762_v51 = vrot.slane %v7224_v54, 2 }
 0x13c   : > { %v7176_v17 = vpop.permute.xlu0 %1325 }
 0x13d   : > { %v7183_v61 = vpop.permute.xlu1 %1327  ;;  %v7269_v29 = vsel %vm9785_vm3, %v1299_v19, %v9762_v51  ;;  %v5795_v19 = vld [vmem:[%s6101_s23 + $0x18] sm:$0xff]   ;;  %v9923_v51 = vld [vmem:[#allocation36_spill] sm:$0xff] }
 0x13e   : > { %1978 = vrot.lane.b32.xlu0 %v6913_v34, %s9840_s22  ;;  %v9900_v34 = vld [vmem:[#allocation3_spill] sm:$0xff]  ;;  %v2321_v48 = vsel %vm2313_vm7, %v5795_v19, %v9923_v51 }
 0x13f   : > { %1980 = vrot.lane.b32.xlu1 %v1945_v36, %s9840_s22  ;;  %v9901_v16 = vshrl.u32 %v9900_v34, 16  ;;  %v9902_v26 = vshll.u32 %v9900_v34, 16  ;;  %v9908_v34 = vld [vmem:[#allocation35_spill] sm:$0xff] }
 0x140   : > { %v7190_v14 = vpop.permute.xlu0 %2152 }
 0x141   : > { %v7198_v40 = vpop.permute.xlu1 %2154  ;;  %v2090_v45 = vrot.slane %v9901_v16, 1  ;;  %v2091_v43 = vrot.slane %v9902_v26, 2  ;;  %v9909_v16 = vld [vmem:[#allocation18_spill] sm:$0xff] }
 0x142   : > { %1256 = vrot.lane.b32.xlu0 %v1193_v30, %s9841_s24  ;;  %v7229_v30 = vor.u32 %v2095_v62, %v2094_v53  ;;  %v2319_v26 = vsel %vm2313_vm7, %v9909_v16, %v9908_v34  ;;  %v9914_v53 = vld [vmem:[#allocation39_spill] sm:$0xff]  ;;  %v7254_v34 = vshrl.u32 %v7224_v54, 16  ;;  %v9916_v16 = vld [vmem:[#allocation41_spill] sm:$0xff] }
 0x143   : > { %1258 = vrot.lane.b32.xlu1 %v1197_v20, %s9841_s24  ;;  %v2092_v59 = vor.u32 %v2091_v43, %v2090_v45  ;;  %v9912_v43 = vld [vmem:[#allocation50_spill] sm:$0xff] }
 0x144   : > { %v7206_v21 = vpop.permute.xlu0 %1378 }
 0x145   : > { %v7218_v32 = vpop.permute.xlu1 %1380  ;;  %v2093_v5 = vsel %vm9913_vm6, %v9912_v43, %v2092_v59  ;;  %v2097_v11 = vsel %vm9915_vm5, %v2092_v59, %v7229_v30  ;;  %v9918_v43 = vld [vmem:[#allocation43_spill] sm:$0xff]  ;;  %vm9922_vm6 = vcmask 228352   ;;  %vm9924_vm5 = vcmask 293888  }
 0x146   : > { %2031 = vrot.lane.b32.xlu0 %v1945_v36, %s9846_s21  ;;  %v9910_v36 = vld [vmem:[#allocation37_spill] sm:$0xff] }
 0x147   : > { %2033 = vrot.lane.b32.xlu1 %v7211_v0, %s9846_s21  ;;  %v2356_v45 = vsel %vm9911_vm15, %v2319_v26, %v9910_v36  ;;  %vm9920_vm15 = vcmask 195584  }
 0x148   : > { %v2229_v63 = vpop.permute.xlu0 %2228  ;;  %v2393_v3 = vsel %vm2387_vm9, %v2356_v45, %v9914_v53  ;;  %v9919_v53 = vld [vmem:[#allocation46_spill] sm:$0xff] }
 0x149   : > { %v7231_v20 = vpop.permute.xlu1 %2230  ;;  %v2430_v26 = vsel %vm2424_vm10, %v2393_v3, %v9916_v16  ;;  %v1450_v3 = vrot.slane %v7151_v8, 2  ;;  %v1451_v16 = vrot.slane %v7148_v2, 3 }
 0x14a   : > { %1333 = vrot.lane.b32.xlu0 %v6962_v12, %s9848_s29  ;;  %v7251_v12 = vshll.u32 %v7224_v54, 16  ;;  %v2467_v45 = vsel %vm2461_vm11, %v2430_v26, %v9918_v43  ;;  %v1454_v43 = vrot.slane %v7254_v34, 2 }
 0x14b   : > { %1335 = vrot.lane.b32.xlu1 %v1300_v38, %s9848_s29  ;;  %v2504_v59 = vsel %vm9920_vm15, %v2467_v45, %v9919_v53  ;;  %vm9926_vm15 = vcmask 64512  }
 0x14c   : > { %v7246_v62 = vpop.permute.xlu0 %1508  ;;  %v2541_v22 = vsel %vm9922_vm6, %v2504_v59, %v9921_v56  ;;  %v1455_v45 = vrot.slane %v7251_v12, 3  ;;  %v9925_v56 = vld [vmem:[#allocation38_spill] sm:$0xff]  ;;  %vm9927_vm6 = vcmask 326656  }
 0x14d   : > { %v7258_v36 = vpop.permute.xlu1 %1510  ;;  %v2358_v59 = vsel %vm9926_vm15, %v2321_v48, %v9925_v56  ;;  %vm9936_vm15 = vcmask 228352  }
 0x14e   : > { %9917 = vst [vmem:[#allocation45_spill] sm:$0xff] %v7258_v36  ;;  %2160 = vrot.lane.b32.xlu0 %v2093_v5, %s9851_s20  ;;  %v2202_v5 = vrot.slane %v7195_v7, 2  ;;  %v7301_v48 = vor.u32 %v1455_v45, %v1454_v43  ;;  %v9933_v45 = vld [vmem:[#allocation49_spill] sm:$0xff] }
 0x14f   : > { %2162 = vrot.lane.b32.xlu1 %v2097_v11, %s9851_s20  ;;  %v2578_v11 = vsel %vm2572_vm14, %v2541_v22, %v6984_v50  ;;  %v1452_v50 = vor.u32 %v1451_v16, %v1450_v3  ;;  %v9928_v22 = vld [vmem:[#allocation40_spill] sm:$0xff]  ;;  %v9931_v16 = vld [vmem:[#allocation25_spill] sm:$0xff] }
 0x150   : > { %v2282_v26 = vpop.permute.xlu0 %2281  ;;  %v2615_v52 = vsel %vm9924_vm5, %v2578_v11, %v7025_v60  ;;  %v2395_v36 = vsel %vm2387_vm9, %v2358_v59, %v9928_v22  ;;  %v9929_v60 = vrot.slane %v7010_v42, 2  ;;  %v9930_v11 = vld [vmem:[#allocation42_spill] sm:$0xff]  ;;  %vm9934_vm5 = vcmask 195584   ;;  %v9935_v22 = vld [vmem:[#allocation51_spill] sm:$0xff] }
 0x151   : > { %v2284_v53 = vpop.permute.xlu1 %2283  ;;  %v2652_v23 = vsel %vm9927_vm6, %v2615_v52, %v7110_v58  ;;  %v2432_v52 = vsel %vm2424_vm10, %v2395_v36, %v9930_v11  ;;  %v1453_v59 = vsel %vm1409_vm4, %v6989_v15, %v1452_v50  ;;  %vm9937_vm6 = vcmask 293888  }
 0x152   : > { %1386 = vrot.lane.b32.xlu0 %v1300_v38, %s9885_s4  ;;  %v2689_v51 = vsel %vm2683_vm2, %v2652_v23, %v7131_v1  ;;  %v2203_v38 = vsel %vm9785_vm3, %v9929_v60, %v2202_v5  ;;  %v2955_v23 = vsel %vm2313_vm7, %v7195_v7, %v9931_v16  ;;  %v9932_v1 = vld [vmem:[#allocation44_spill] sm:$0xff] }
 0x153   : > { %1388 = vrot.lane.b32.xlu1 %v7269_v29, %s9885_s4  ;;  %v2726_v58 = vsel %vm2720_vm1, %v2689_v51, %v7161_v31  ;;  %v2469_v56 = vsel %vm2461_vm11, %v2432_v52, %v9932_v1 }
 0x154   : > { %v7296_v19 = vpop.permute.xlu0 %1585  ;;  %v2763_v43 = vsel %vm2757_vm8, %v2726_v58, %v7190_v14  ;;  %v2506_v36 = vsel %vm9934_vm5, %v2469_v56, %v9933_v45  ;;  %v1457_v14 = vsel %vm1409_vm4, %v1452_v50, %v7301_v48  ;;  %v3033_v58 = vshrl.u32 %v2955_v23, 16 }
 0x155   : > { %v7307_v3 = vpop.permute.xlu1 %992  ;;  %v2800_v31 = vsel %vm2794_vm0, %v2763_v43, %v2229_v63  ;;  %v2543_v51 = vsel %vm9936_vm15, %v2506_v36, %v9935_v22  ;;  %v3036_v63 = vshll.u32 %v2955_v23, 16  ;;  %vm9938_vm5 = vcmask 588800  }
 0x156   : > { %2236 = vrot.lane.b32.xlu0 %v7041_v47, %s9887_s27  ;;  %v2837_v60 = vsel %vm2831_vm12, %v2800_v31, %v2282_v26  ;;  %v7330_v47 = vld [vmem:[%s5971_s1 + $0x50] sm:$0xff]   ;;  %v2580_v15 = vsel %vm2572_vm14, %v2543_v51, %v7017_v33  ;;  %vm9939_vm15 = vcmask 326656   ;;  %v1557_v23 = vrot.slane %v7137_v18, 3 }
 0x157   : > { %2238 = vrot.lane.b32.xlu1 %v2203_v38, %s9887_s27  ;;  %v9768_v52 = vrot.slane %v7330_v47, 2  ;;  %v2617_v26 = vsel %vm9937_vm6, %v2580_v15, %v7084_v35  ;;  %v9940_v43 = vrot.slane %v6948_v28, 1  ;;  %v3035_v36 = vrot.slane %v3033_v58, 2 }
 0x158   : > { %v3134_v11 = vpop.permute.xlu0 %3133  ;;  %v2654_v50 = vsel %vm9939_vm15, %v2617_v26, %v7117_v46  ;;  %v922_v46 = vrot.slane %v7148_v2, 1  ;;  %v3038_v31 = vrot.slane %v3036_v63, 3  ;;  %vm9943_vm6 = vcmask 1044480  }
 0x159   : > { %v3171_v16 = vsel %vm3165_vm13, %v2837_v60, %v3134_v11  ;;  %v7336_v1 = vpop.permute.xlu1 %1711  ;;  %v2691_v33 = vsel %vm2683_vm2, %v2654_v50, %v7139_v39  ;;  %v7353_v35 = vsel %vm9785_vm3, %v2202_v5, %v9768_v52  ;;  %v918_v45 = vor.u32 %v6951_v55, %v9940_v43  ;;  %v9941_v39 = vld [vmem:[#allocation27_spill] sm:$0xff]  ;;  %v9961_v52 = vld [vmem:[#allocation6_spill] sm:$0xff] }
 0x15a   : > { %1516 = vrot.lane.b32.xlu0 %v1453_v59, %s9888_s18  ;;  %5441 = vmatprep.mubr.msk.bf16.mxu0 %vm9938_vm5, %v3171_v16  ;;  %v2728_v59 = vsel %vm2720_vm1, %v2691_v33, %v7171_v27  ;;  %v2957_v51 = vsel %vm2313_vm7, %v7330_v47, %v9941_v39  ;;  %v9942_v55 = vrot.slane %v6926_v41, 3  ;;  %vm9944_vm5 = vsmask.f32 7424 }
 0x15b   : > { %1518 = vrot.lane.b32.xlu1 %v1457_v14, %s9888_s18  ;;  %v2765_v5 = vsel %vm2757_vm8, %v2728_v59, %v7198_v40  ;;  %v923_v11 = vsel %vm9944_vm5, %v918_v45, %v922_v46  ;;  %v3039_v14 = vor.u32 %v3038_v31, %v3035_v36  ;;  %v3041_v58 = vshrl.u32 %v2957_v51, 16 }
 0x15c   : > { %v7348_v56 = vpop.permute.xlu0 %1587  ;;  %v2802_v28 = vsel %vm2794_vm0, %v2765_v5, %v7231_v20  ;;  %v1558_v2 = vsel %vm9943_vm6, %v9942_v55, %v1557_v23  ;;  %v3044_v40 = vshll.u32 %v2957_v51, 16  ;;  %vm9945_vm15 = vcmask 588800   ;;  %v7426_v5 = vld [vmem:[%s6101_s23 + $0x68] sm:$0xff]  }
 0x15d   : > { %v7361_v22 = vpop.permute.xlu1 %994  ;;  %v2839_v27 = vsel %vm2831_vm12, %v2802_v28, %v2284_v53  ;;  %v9766_v41 = vrot.slane %v7224_v54, 3  ;;  %v926_v53 = vor.u32 %v7151_v8, %v922_v46  ;;  %v9767_v15 = vrot.slane %v7251_v12, 1 }
 0x15e   : > { %2289 = vrot.lane.b32.xlu0 %v2203_v38, %s9890_s13  ;;  %v3043_v16 = vrot.slane %v3041_v58, 2  ;;  %v3046_v26 = vrot.slane %v3044_v40, 3  ;;  %v3040_v50 = vsel %vm1409_vm4, %v7115_v24, %v3039_v14  ;;  %v9947_v39 = vrot.slane %v7137_v18, 1 }
 0x15f   : > { %2291 = vrot.lane.b32.xlu1 %v7353_v35, %s9890_s13  ;;  %v1560_v43 = vsel %vm9943_vm6, %v1557_v23, %v9766_v41  ;;  %v931_v45 = vsel %vm9944_vm5, %v926_v53, %v9767_v15  ;;  %v1043_v23 = vrot.slane %v7224_v54, 1  ;;  %v7440_v18 = vshrl.u32 %v7426_v5, 16 }
 0x160   : > { %v3136_v60 = vpop.permute.xlu0 %3135  ;;  %v7404_v46 = vor.u32 %v3046_v26, %v3043_v16  ;;  %v1199_v58 = vrot.slane %v7251_v12, 2  ;;  %v1948_v53 = vrot.slane %v7330_v47, 1  ;;  %v1303_v15 = vrot.slane %v7426_v5, 2 }
 0x161   : > { %v3173_v38 = vsel %vm3165_vm13, %v2839_v27, %v3136_v60  ;;  %v7379_v63 = vpop.permute.xlu1 %1713  ;;  %v7437_v27 = vshll.u32 %v7426_v5, 16  ;;  %v1202_v16 = vrot.slane %v7440_v18, 1 }
 0x162   : > { %1593 = vrot.lane.b32.xlu0 %v1558_v2, %s9893_s15  ;;  %5442 = vmatmul.mubr.msk.bf16.gmra.mxu0 %vm9945_vm15, %v3173_v38  ;;  %vm9948_vm15 = vcmask 1046528   ;;  %v9765_v2 = vrot.slane %v7426_v5, 1 }
 0x163   : > { %1000 = vrot.lane.b32.xlu1 %v923_v11, %s9859_s0  ;;  %v1044_v51 = vsel %vm9948_vm15, %v9947_v39, %v1043_v23  ;;  %v9950_v11 = vld [vmem:[#allocation13_spill] sm:$0xff]  ;;  %vm9952_vm6 = vmmov %vm9948_vm15  ;;  %v1203_v26 = vrot.slane %v7437_v27, 2  ;;  %vm9956_vm15 = vsmask.f32 6400 }
 0x164   : > { %v7385_v20 = vpop.permute.xlu0 %1069  ;;  %v7455_v38 = vsel %vm9952_vm6, %v1043_v23, %v9765_v2  ;;  %v9953_v23 = vrot.slane %v7195_v7, 1  ;;  %vm9954_vm5 = vmmov %vm9952_vm6 }
 0x165   : > { %v7391_v33 = vpop.permute.xlu1 %1071  ;;  %v7470_v39 = vor.u32 %v1203_v26, %v1202_v16  ;;  %vm9957_vm6 = vmmov %vm9956_vm15 }
 0x166   : > { %3141 = vrot.lane.b32.xlu0 %v3040_v50, %s9860_s25 }
 0x167   : > { %1719 = vrot.lane.b32.xlu1 %v7010_v42, %s9861_s26  ;;  %v3048_v42 = vsel %vm1409_vm4, %v3039_v14, %v7404_v46  ;;  %v9951_v14 = vld [vmem:[#allocation12_spill] sm:$0xff] }
 0x168   : > { %v7399_v8 = vpop.permute.xlu0 %1898 }
 0x169   : > { %v7406_v24 = vpop.permute.xlu1 %1900 }
 0x16a   : > { %1595 = vrot.lane.b32.xlu0 %v1560_v43, %s9893_s15 }
 0x16b   : > { %1002 = vrot.lane.b32.xlu1 %v931_v45, %s9859_s0 }
 0x16c   : > { %v7410_v36 = vpop.permute.xlu0 %1122 }
 0x16d   : > { %v7415_v31 = vpop.permute.xlu1 %1124 }
 0x16e   : > { %9946 = vst [vmem:[#allocation3_spill] sm:$0xff] %v7415_v31  ;;  %3143 = vrot.lane.b32.xlu0 %v3048_v42, %s9860_s25  ;;  %v1949_v42 = vsel %vm9954_vm5, %v9953_v23, %v1948_v53 }
 0x16f   : > { %1721 = vrot.lane.b32.xlu1 %v7195_v7, %s9861_s26  ;;  %v7484_v7 = vld [vmem:[%s5971_s1 + $0x58] sm:$0xff]  }
 0x170   : > { %v7420_v59 = vpop.permute.xlu0 %1974 }
 0x171   : > { %v7428_v28 = vpop.permute.xlu1 %1976 }
 0x172   : > { %1077 = vrot.lane.b32.xlu0 %v7166_v44, %s9867_s19  ;;  %v1198_v44 = vrot.slane %v7254_v34, 1 }
 0x173   : > { %1079 = vrot.lane.b32.xlu1 %v1044_v51, %s9867_s19 }
 0x174   : > { %v7433_v55 = vpop.permute.xlu0 %1252  ;;  %v1200_v43 = vor.u32 %v1199_v58, %v1198_v44  ;;  %v9769_v58 = vrot.slane %v7484_v7, 1 }
 0x175   : > { %v7442_v60 = vpop.permute.xlu1 %1254 }
 0x176   : > { %9949 = vst [vmem:[#allocation4_spill] sm:$0xff] %v7442_v60  ;;  %1906 = vrot.lane.b32.xlu0 %v9950_v11, %s9868_s30  ;;  %v1205_v44 = vsel %vm9957_vm6, %v1200_v43, %v7470_v39 }
 0x177   : > { %1908 = vrot.lane.b32.xlu1 %v9951_v14, %s9868_s30 }
 0x178   : > { %v7450_v40 = vpop.permute.xlu0 %2027 }
 0x179   : > { %v7460_v50 = vpop.permute.xlu1 %2029 }
 0x17a   : > { %1130 = vrot.lane.b32.xlu0 %v1044_v51, %s9838_s2  ;;  %v1201_v51 = vsel %vm9956_vm15, %v7181_v4, %v1200_v43  ;;  %v9958_v4 = vld [vmem:[#allocation5_spill] sm:$0xff]  ;;  %v7500_v43 = vsel %vm9954_vm5, %v1948_v53, %v9769_v58  ;;  %v5798_v53 = vld [vmem:[%s6101_s23 + $0x20] sm:$0xff]   ;;  %vm9966_vm15 = vcmask 64512   ;;  %vm9967_vm5 = vmmov %vm9957_vm6 }
 0x17b   : > { %1132 = vrot.lane.b32.xlu1 %v7455_v38, %s9838_s2  ;;  %v9960_v23 = vshll.u32 %v9958_v4, 16 }
 0x17c   : > { %v7465_v45 = vpop.permute.xlu0 %1329 }
 0x17d   : > { %v7472_v11 = vpop.permute.xlu1 %1331  ;;  %v2099_v2 = vrot.slane %v9960_v23, 2  ;;  %v2323_v23 = vsel %vm2313_vm7, %v5798_v53, %v6993_v49 }
 0x17e   : > { %9955 = vst [vmem:[#allocation35_spill] sm:$0xff] %v7472_v11  ;;  %1982 = vrot.lane.b32.xlu0 %v7211_v0, %s9840_s22  ;;  %v9959_v0 = vshrl.u32 %v9958_v4, 16  ;;  %v9962_v11 = vshrl.u32 %v9961_v52, 16 }
 0x17f   : > { %1984 = vrot.lane.b32.xlu1 %v1949_v42, %s9840_s22 }
 0x180   : > { %v7479_v14 = vpop.permute.xlu0 %2156  ;;  %v2098_v26 = vrot.slane %v9959_v0, 1  ;;  %v7513_v0 = vld [vmem:[%s6101_s23 + $0x70] sm:$0xff]  }
 0x181   : > { %v7487_v16 = vpop.permute.xlu1 %2158  ;;  %v9770_v49 = vrot.slane %v7513_v0, 2 }
 0x182   : > { %1260 = vrot.lane.b32.xlu0 %v1201_v51, %s9841_s24  ;;  %v2102_v51 = vrot.slane %v9962_v11, 1  ;;  %v2100_v4 = vor.u32 %v2099_v2, %v2098_v26  ;;  %v9965_v11 = vrot.slane %v7224_v54, 2  ;;  %v2360_v2 = vsel %vm9966_vm15, %v2323_v23, %v7047_v13 }
 0x183   : > { %1262 = vrot.lane.b32.xlu1 %v1205_v44, %s9841_s24  ;;  %v9963_v44 = vshll.u32 %v9961_v52, 16  ;;  %v2397_v26 = vsel %vm2387_vm9, %v2360_v2, %v7121_v10  ;;  %v7543_v13 = vshrl.u32 %v7513_v0, 16  ;;  %vm9968_vm15 = vcmask 195584  }
 0x184   : > { %v7495_v41 = vpop.permute.xlu0 %1382  ;;  %v1304_v52 = vsel %vm9785_vm3, %v9965_v11, %v1303_v15  ;;  %v7558_v23 = vsel %vm9785_vm3, %v1303_v15, %v9770_v49  ;;  %v1459_v11 = vrot.slane %v7437_v27, 3  ;;  %v5799_v15 = vld [vmem:[%s6101_s23 + $0x28] sm:$0xff]  }
 0x185   : > { %v2103_v60 = vrot.slane %v9963_v44, 2  ;;  %v7507_v31 = vpop.permute.xlu1 %1384 }
 0x186   : > { %9964 = vst [vmem:[#allocation18_spill] sm:$0xff] %v7507_v31  ;;  %2035 = vrot.lane.b32.xlu0 %v1949_v42, %s9846_s21  ;;  %v2101_v42 = vsel %vm9957_vm6, %v7229_v30, %v2100_v4  ;;  %v2434_v30 = vsel %vm2424_vm10, %v2397_v26, %v7144_v37  ;;  %v1458_v37 = vrot.slane %v7440_v18, 2  ;;  %vm9969_vm6 = vcmask 228352  }
 0x187   : > { %2037 = vrot.lane.b32.xlu1 %v7500_v43, %s9846_s21  ;;  %v7521_v44 = vor.u32 %v2103_v60, %v2102_v51  ;;  %v2471_v10 = vsel %vm2461_vm11, %v2434_v30, %v7176_v17  ;;  %v1462_v26 = vrot.slane %v7543_v13, 2 }
 0x188   : > { %v2233_v58 = vpop.permute.xlu0 %2232 }
 0x189   : > { %v7523_v31 = vpop.permute.xlu1 %2234  ;;  %v2105_v51 = vsel %vm9967_vm5, %v2100_v4, %v7521_v44  ;;  %v2508_v4 = vsel %vm9968_vm15, %v2471_v10, %v7206_v21  ;;  %v2325_v10 = vsel %vm2313_vm7, %v5799_v15, %v7057_v25  ;;  %vm9970_vm5 = vcmask 293888  }
 0x18a   : > { %1337 = vrot.lane.b32.xlu0 %v7269_v29, %s9848_s29  ;;  %v7540_v29 = vshll.u32 %v7513_v0, 16  ;;  %v2545_v2 = vsel %vm9969_vm6, %v2508_v4, %v7246_v62  ;;  %vm9971_vm15 = vcmask 64512   ;;  %vm9972_vm6 = vcmask 326656  }
 0x18b   : > { %1339 = vrot.lane.b32.xlu1 %v1304_v52, %s9848_s29  ;;  %v2362_v62 = vsel %vm9971_vm15, %v2325_v10, %v7101_v57  ;;  %vm9977_vm15 = vcmask 228352  }
 0x18c   : > { %v7535_v60 = vpop.permute.xlu0 %1512  ;;  %v1463_v21 = vrot.slane %v7540_v29, 3 }
 0x18d   : > { %v7547_v53 = vpop.permute.xlu1 %1514 }
 0x18e   : > { %2164 = vrot.lane.b32.xlu0 %v2101_v42, %s9851_s20  ;;  %v2206_v42 = vrot.slane %v7484_v7, 2  ;;  %v7590_v57 = vor.u32 %v1463_v21, %v1462_v26 }
 0x18f   : > { %2166 = vrot.lane.b32.xlu1 %v2105_v51, %s9851_s20  ;;  %v2582_v51 = vsel %vm2572_vm14, %v2545_v2, %v7296_v19  ;;  %v1460_v19 = vor.u32 %v1459_v11, %v1458_v37  ;;  %v2399_v2 = vsel %vm2387_vm9, %v2362_v62, %v7126_v6  ;;  %v9974_v6 = vld [vmem:[#allocation26_spill] sm:$0xff] }
 0x190   : > { %v2286_v17 = vpop.permute.xlu0 %2285  ;;  %v2619_v49 = vsel %vm9970_vm5, %v2582_v51, %v7336_v1  ;;  %v9973_v1 = vrot.slane %v7330_v47, 2  ;;  %vm9975_vm5 = vcmask 195584   ;;  %v9976_v51 = vld [vmem:[#allocation45_spill] sm:$0xff] }
 0x191   : > { %v2288_v30 = vpop.permute.xlu1 %2287  ;;  %v2656_v4 = vsel %vm9972_vm6, %v2619_v49, %v7399_v8  ;;  %v2436_v8 = vsel %vm2424_vm10, %v2399_v2, %v7153_v9  ;;  %v1461_v21 = vsel %vm1409_vm4, %v7301_v48, %v1460_v19  ;;  %vm9978_vm6 = vcmask 293888  }
 0x192   : > { %1390 = vrot.lane.b32.xlu0 %v1304_v52, %s9885_s4  ;;  %v2693_v25 = vsel %vm2683_vm2, %v2656_v4, %v7420_v59  ;;  %v2207_v52 = vsel %vm9785_vm3, %v9973_v1, %v2206_v42  ;;  %v2959_v59 = vsel %vm2313_vm7, %v7484_v7, %v9974_v6  ;;  %v2473_v11 = vsel %vm2461_vm11, %v2436_v8, %v7183_v61 }
 0x193   : > { %1392 = vrot.lane.b32.xlu1 %v7558_v23, %s9885_s4  ;;  %v2730_v49 = vsel %vm2720_vm1, %v2693_v25, %v7450_v40  ;;  %v2510_v9 = vsel %vm9975_vm5, %v2473_v11, %v7218_v32  ;;  %v3049_v4 = vshrl.u32 %v2959_v59, 16  ;;  %vm9979_vm5 = vcmask 588800  }
 0x194   : > { %v7585_v15 = vpop.permute.xlu0 %1589  ;;  %v2767_v26 = vsel %vm2757_vm8, %v2730_v49, %v7479_v14  ;;  %v2547_v10 = vsel %vm9977_vm15, %v2510_v9, %v9976_v51  ;;  %v1465_v14 = vsel %vm1409_vm4, %v1460_v19, %v7590_v57  ;;  %vm9980_vm15 = vcmask 326656  }
 0x195   : > { %v7596_v37 = vpop.permute.xlu1 %996  ;;  %v2804_v40 = vsel %vm2794_vm0, %v2767_v26, %v2233_v58  ;;  %v3052_v58 = vshll.u32 %v2959_v59, 16  ;;  %v2584_v48 = vsel %vm2572_vm14, %v2547_v10, %v7348_v56  ;;  %v1561_v1 = vrot.slane %v7426_v5, 3 }
 0x196   : > { %2240 = vrot.lane.b32.xlu0 %v7353_v35, %s9887_s27  ;;  %v2841_v61 = vsel %vm2831_vm12, %v2804_v40, %v2286_v17  ;;  %v7619_v35 = vld [vmem:[%s5971_s1 + $0x60] sm:$0xff]   ;;  %v2621_v17 = vsel %vm9978_vm6, %v2584_v48, %v7379_v63  ;;  %v9981_v49 = vrot.slane %v7251_v12, 1  ;;  %v3051_v59 = vrot.slane %v3049_v4, 2 }
 0x197   : > { %2242 = vrot.lane.b32.xlu1 %v2207_v52, %s9887_s27  ;;  %v9775_v32 = vrot.slane %v7619_v35, 2  ;;  %v2658_v19 = vsel %vm9980_vm15, %v2621_v17, %v7406_v24  ;;  %v938_v24 = vrot.slane %v7437_v27, 1  ;;  %v3054_v11 = vrot.slane %v3052_v58, 3 }
 0x198   : > { %v3138_v62 = vpop.permute.xlu0 %3137  ;;  %v2695_v56 = vsel %vm2683_vm2, %v2658_v19, %v7428_v28  ;;  %v934_v6 = vor.u32 %v7254_v34, %v9981_v49  ;;  %v9982_v28 = vld [vmem:[#allocation29_spill] sm:$0xff]  ;;  %v9983_v34 = vrot.slane %v7224_v54, 3  ;;  %vm9984_vm6 = vcmask 1044480  }
 0x199   : > { %v3175_v2 = vsel %vm3165_vm13, %v2841_v61, %v3138_v62  ;;  %v7625_v25 = vpop.permute.xlu1 %1715  ;;  %v7642_v63 = vsel %vm9785_vm3, %v2206_v42, %v9775_v32  ;;  %v2732_v26 = vsel %vm2720_vm1, %v2695_v56, %v7460_v50  ;;  %v2961_v40 = vsel %vm2313_vm7, %v7619_v35, %v9982_v28 }
 0x19a   : > { %1520 = vrot.lane.b32.xlu0 %v1461_v21, %s9888_s18  ;;  %5445 = vmatprep.mubr.msk.bf16.mxu0 %vm9979_vm5, %v3175_v2  ;;  %v2769_v42 = vsel %vm2757_vm8, %v2732_v26, %v7487_v16  ;;  %v1562_v27 = vsel %vm9984_vm6, %v9983_v34, %v1561_v1  ;;  %vm9985_vm5 = vsmask.f32 7424  ;;  %v3055_v10 = vor.u32 %v3054_v11, %v3051_v59  ;;  %v7715_v26 = vld [vmem:[%s6101_s23 + $0x78] sm:$0xff]  }
 0x19b   : > { %1522 = vrot.lane.b32.xlu1 %v1465_v14, %s9888_s18  ;;  %v2806_v12 = vsel %vm2794_vm0, %v2769_v42, %v7523_v31  ;;  %v939_v51 = vsel %vm9985_vm5, %v934_v6, %v938_v24  ;;  %v3057_v61 = vshrl.u32 %v2961_v40, 16  ;;  %v3060_v16 = vshll.u32 %v2961_v40, 16 }
 0x19c   : > { %v7637_v8 = vpop.permute.xlu0 %1591  ;;  %v2843_v50 = vsel %vm2831_vm12, %v2806_v12, %v2288_v30  ;;  %vm9986_vm15 = vcmask 588800   ;;  %v9772_v54 = vrot.slane %v7513_v0, 3  ;;  %v942_v30 = vor.u32 %v7440_v18, %v938_v24 }
 0x19d   : > { %v7650_v9 = vpop.permute.xlu1 %998  ;;  %v9773_v14 = vrot.slane %v7540_v29, 1  ;;  %v3059_v4 = vrot.slane %v3057_v61, 2  ;;  %v3062_v58 = vrot.slane %v3060_v16, 3  ;;  %v3056_v48 = vsel %vm1409_vm4, %v7404_v46, %v3055_v10 }
 0x19e   : > { %2293 = vrot.lane.b32.xlu0 %v2207_v52, %s9890_s13  ;;  %v1564_v17 = vsel %vm9984_vm6, %v1561_v1, %v9772_v54  ;;  %v1047_v1 = vrot.slane %v7513_v0, 1  ;;  %v9987_v59 = vrot.slane %v7426_v5, 1  ;;  %v9771_v42 = vrot.slane %v7715_v26, 1 }
 0x19f   : > { %2295 = vrot.lane.b32.xlu1 %v7642_v63, %s9890_s13  ;;  %v947_v19 = vsel %vm9985_vm5, %v942_v30, %v9773_v14  ;;  %v7693_v56 = vor.u32 %v3062_v58, %v3059_v4  ;;  %v7726_v12 = vshll.u32 %v7715_v26, 16  ;;  %v7729_v5 = vshrl.u32 %v7715_v26, 16 }
 0x1a0   : > { %v3140_v21 = vpop.permute.xlu0 %3139  ;;  %v1952_v61 = vrot.slane %v7619_v35, 1 }
 0x1a1   : > { %v3177_v52 = vsel %vm3165_vm13, %v2843_v50, %v3140_v21  ;;  %v7668_v62 = vpop.permute.xlu1 %1717  ;;  %v9990_v50 = vld [vmem:[#allocation14_spill] sm:$0xff]  ;;  %v1207_v21 = vrot.slane %v7540_v29, 2  ;;  %v1210_v16 = vrot.slane %v7729_v5, 1 }
 0x1a2   : > { %1597 = vrot.lane.b32.xlu0 %v1562_v27, %s9893_s15  ;;  %5446 = vmatmul.mubr.msk.bf16.gmra.mxu0 %vm9986_vm15, %v3177_v52  ;;  %vm9988_vm15 = vcmask 1046528   ;;  %v9989_v27 = vld [vmem:[#allocation16_spill] sm:$0xff]  ;;  %v1211_v52 = vrot.slane %v7726_v12, 2 }
 0x1a3   : > { %1004 = vrot.lane.b32.xlu1 %v939_v51, %s9859_s0  ;;  %v1048_v11 = vsel %vm9988_vm15, %v9987_v59, %v1047_v1  ;;  %vm9991_vm6 = vmmov %vm9988_vm15  ;;  %vm9995_vm15 = vsmask.f32 6400 }
 0x1a4   : > { %v7674_v31 = vpop.permute.xlu0 %1073  ;;  %vm9993_vm5 = vmmov %vm9991_vm6 }
 0x1a5   : > { %v7680_v2 = vpop.permute.xlu1 %1075 }
 0x1a6   : > { %3145 = vrot.lane.b32.xlu0 %v3056_v48, %s9860_s25  ;;  %v9992_v48 = vrot.slane %v7484_v7, 1 }
 0x1a7   : > { %1723 = vrot.lane.b32.xlu1 %v7330_v47, %s9861_s26  ;;  %v3064_v47 = vsel %vm1409_vm4, %v3055_v10, %v7693_v56  ;;  %v7744_v10 = vsel %vm9991_vm6, %v1047_v1, %v9771_v42  ;;  %vm9996_vm6 = vmmov %vm9995_vm15  ;;  %v10000_v42 = vld [vmem:[#allocation8_spill] sm:$0xff] }
 0x1a8   : > { %v7688_v18 = vpop.permute.xlu0 %1902 }
 0x1a9   : > { %v7695_v46 = vpop.permute.xlu1 %1904 }
 0x1aa   : > { %1599 = vrot.lane.b32.xlu0 %v1564_v17, %s9893_s15  ;;  %v1953_v17 = vsel %vm9993_vm5, %v9992_v48, %v1952_v61  ;;  %v1307_v48 = vrot.slane %v7715_v26, 2 }
 0x1ab   : > { %1006 = vrot.lane.b32.xlu1 %v947_v19, %s9859_s0  ;;  %v7759_v19 = vor.u32 %v1211_v52, %v1210_v16 }
 0x1ac   : > { %v7699_v49 = vpop.permute.xlu0 %1126 }
 0x1ad   : > { %v7704_v6 = vpop.permute.xlu1 %1128 }
 0x1ae   : > { %3147 = vrot.lane.b32.xlu0 %v3064_v47, %s9860_s25 }
 0x1af   : > { %1725 = vrot.lane.b32.xlu1 %v7484_v7, %s9861_s26  ;;  %v7773_v7 = vld [vmem:[%s5971_s1 + $0x68] sm:$0xff]  }
 0x1b0   : > { %v7709_v24 = vpop.permute.xlu0 %1978 }
 0x1b1   : > { %v7717_v28 = vpop.permute.xlu1 %1980 }
 0x1b2   : > { %1081 = vrot.lane.b32.xlu0 %v7455_v38, %s9867_s19  ;;  %v1206_v38 = vrot.slane %v7543_v13, 1 }
 0x1b3   : > { %1083 = vrot.lane.b32.xlu1 %v1048_v11, %s9867_s19 }
 0x1b4   : > { %v7722_v40 = vpop.permute.xlu0 %1256  ;;  %v1208_v4 = vor.u32 %v1207_v21, %v1206_v38 }
 0x1b5   : > { %v7731_v34 = vpop.permute.xlu1 %1258 }
 0x1b6   : > { %1910 = vrot.lane.b32.xlu0 %v9989_v27, %s9868_s30  ;;  %v1209_v47 = vsel %vm9995_vm15, %v7470_v39, %v1208_v4  ;;  %v9774_v27 = vrot.slane %v7773_v7, 1  ;;  %vm10004_vm15 = vcmask 64512  }
 0x1b7   : > { %1912 = vrot.lane.b32.xlu1 %v9990_v50, %s9868_s30 }
 0x1b8   : > { %v7739_v51 = vpop.permute.xlu0 %2031 }
 0x1b9   : > { %v7749_v30 = vpop.permute.xlu1 %2033 }
 0x1ba   : > { %1134 = vrot.lane.b32.xlu0 %v1048_v11, %s9838_s2  ;;  %v1213_v11 = vsel %vm9996_vm6, %v1208_v4, %v7759_v19  ;;  %v7789_v4 = vsel %vm9993_vm5, %v1952_v61, %v9774_v27  ;;  %v10003_v27 = vrot.slane %v7513_v0, 2  ;;  %vm10005_vm5 = vmmov %vm9996_vm6 }
 0x1bb   : > { %1136 = vrot.lane.b32.xlu1 %v7744_v10, %s9838_s2 }
 0x1bc   : > { %v7754_v58 = vpop.permute.xlu0 %1333  ;;  %v1308_v32 = vsel %vm9785_vm3, %v10003_v27, %v1307_v48 }
 0x1bd   : > { %v7761_v1 = vpop.permute.xlu1 %1335 }
 0x1be   : > { %9994 = vst [vmem:[#allocation37_spill] sm:$0xff] %v7761_v1  ;;  %1986 = vrot.lane.b32.xlu0 %v7500_v43, %s9840_s22  ;;  %v9997_v43 = vld [vmem:[#allocation7_spill] sm:$0xff] }
 0x1bf   : > { %1988 = vrot.lane.b32.xlu1 %v1953_v17, %s9840_s22  ;;  %v9998_v39 = vshrl.u32 %v9997_v43, 16  ;;  %v9999_v21 = vshll.u32 %v9997_v43, 16 }
 0x1c0   : > { %v7768_v59 = vpop.permute.xlu0 %2160 }
 0x1c1   : > { %v7776_v50 = vpop.permute.xlu1 %2162  ;;  %v2106_v38 = vrot.slane %v9998_v39, 1  ;;  %v2107_v16 = vrot.slane %v9999_v21, 2  ;;  %v7802_v21 = vld [vmem:[%s6101_s23 + $0x80] sm:$0xff]  }
 0x1c2   : > { %1264 = vrot.lane.b32.xlu0 %v1209_v47, %s9841_s24  ;;  %v10001_v47 = vshrl.u32 %v10000_v42, 16 }
 0x1c3   : > { %1266 = vrot.lane.b32.xlu1 %v1213_v11, %s9841_s24  ;;  %v10002_v11 = vshll.u32 %v10000_v42, 16  ;;  %v2108_v43 = vor.u32 %v2107_v16, %v2106_v38  ;;  %v5802_v42 = vld [vmem:[%s6101_s23 + $0x30] sm:$0xff]  }
 0x1c4   : > { %v7784_v52 = vpop.permute.xlu0 %1386  ;;  %v2110_v54 = vrot.slane %v10001_v47, 1 }
 0x1c5   : > { %v2111_v14 = vrot.slane %v10002_v11, 2  ;;  %v7796_v39 = vpop.permute.xlu1 %1388  ;;  %v2327_v11 = vsel %vm2313_vm7, %v5802_v42, %v7307_v3  ;;  %v2109_v38 = vsel %vm9996_vm6, %v7521_v44, %v2108_v43  ;;  %vm10008_vm6 = vcmask 228352  }
 0x1c6   : > { %2039 = vrot.lane.b32.xlu0 %v1953_v17, %s9846_s21  ;;  %v2364_v17 = vsel %vm10004_vm15, %v2327_v11, %v7385_v20  ;;  %v7832_v20 = vshrl.u32 %v7802_v21, 16  ;;  %vm10007_vm15 = vcmask 195584   ;;  %v1467_v11 = vrot.slane %v7726_v12, 3 }
 0x1c7   : > { %2041 = vrot.lane.b32.xlu1 %v7789_v4, %s9846_s21  ;;  %v7807_v1 = vor.u32 %v2111_v14, %v2110_v54  ;;  %v9776_v54 = vrot.slane %v7802_v21, 2  ;;  %v2401_v14 = vsel %vm2387_vm9, %v2364_v17, %v7410_v36 }
 0x1c8   : > { %v2237_v61 = vpop.permute.xlu0 %2236  ;;  %v2438_v44 = vsel %vm2424_vm10, %v2401_v14, %v7433_v55  ;;  %v1466_v55 = vrot.slane %v7729_v5, 2  ;;  %v1470_v14 = vrot.slane %v7832_v20, 2 }
 0x1c9   : > { %v7809_v47 = vpop.permute.xlu1 %2238  ;;  %v2113_v3 = vsel %vm10005_vm5, %v2108_v43, %v7807_v1  ;;  %v2475_v36 = vsel %vm2461_vm11, %v2438_v44, %v7465_v45  ;;  %v7847_v42 = vsel %vm9785_vm3, %v1307_v48, %v9776_v54  ;;  %v5803_v48 = vld [vmem:[%s6101_s23 + $0x38] sm:$0xff]   ;;  %vm10009_vm5 = vcmask 293888  }
 0x1ca   : > { %1341 = vrot.lane.b32.xlu0 %v7558_v23, %s9848_s29  ;;  %v7829_v23 = vshll.u32 %v7802_v21, 16  ;;  %v2512_v43 = vsel %vm10007_vm15, %v2475_v36, %v7495_v41  ;;  %v2329_v36 = vsel %vm2313_vm7, %v5803_v48, %v7361_v22  ;;  %vm10010_vm15 = vcmask 64512  }
 0x1cb   : > { %1343 = vrot.lane.b32.xlu1 %v1308_v32, %s9848_s29  ;;  %v2549_v17 = vsel %vm10008_vm6, %v2512_v43, %v7535_v60  ;;  %v2366_v60 = vsel %vm10010_vm15, %v2329_v36, %v7391_v33  ;;  %vm10011_vm6 = vcmask 326656   ;;  %v10016_v36 = vld [vmem:[#allocation35_spill] sm:$0xff]  ;;  %vm10019_vm15 = vcmask 228352  }
 0x1cc   : > { %v7824_v27 = vpop.permute.xlu0 %1516  ;;  %v1471_v41 = vrot.slane %v7829_v23, 3 }
 0x1cd   : > { %v7836_v16 = vpop.permute.xlu1 %1518 }
 0x1ce   : > { %10006 = vst [vmem:[#allocation50_spill] sm:$0xff] %v7836_v16  ;;  %2168 = vrot.lane.b32.xlu0 %v2109_v38, %s9851_s20  ;;  %v2210_v38 = vrot.slane %v7773_v7, 2  ;;  %v7879_v33 = vor.u32 %v1471_v41, %v1470_v14  ;;  %v10017_v41 = vld [vmem:[#allocation18_spill] sm:$0xff] }
 0x1cf   : > { %2170 = vrot.lane.b32.xlu1 %v2113_v3, %s9851_s20  ;;  %v2586_v3 = vsel %vm2572_vm14, %v2549_v17, %v7585_v15  ;;  %v1468_v15 = vor.u32 %v1467_v11, %v1466_v55  ;;  %v10012_v17 = vld [vmem:[#allocation3_spill] sm:$0xff]  ;;  %v10015_v11 = vld [vmem:[#allocation28_spill] sm:$0xff] }
 0x1d0   : > { %v2290_v45 = vpop.permute.xlu0 %2289  ;;  %v2623_v54 = vsel %vm10009_vm5, %v2586_v3, %v7625_v25  ;;  %v2403_v16 = vsel %vm2387_vm9, %v2366_v60, %v10012_v17  ;;  %v10014_v3 = vld [vmem:[#allocation4_spill] sm:$0xff]  ;;  %vm10018_vm5 = vcmask 195584  }
 0x1d1   : > { %v2292_v44 = vpop.permute.xlu1 %2291  ;;  %v2660_v43 = vsel %vm10011_vm6, %v2623_v54, %v7688_v18  ;;  %v2440_v18 = vsel %vm2424_vm10, %v2403_v16, %v10014_v3  ;;  %vm10020_vm6 = vcmask 293888  }
 0x1d2   : > { %1394 = vrot.lane.b32.xlu0 %v1308_v32, %s9885_s4  ;;  %v2697_v22 = vsel %vm2683_vm2, %v2660_v43, %v7709_v24  ;;  %v10013_v32 = vrot.slane %v7619_v35, 2  ;;  %v2963_v24 = vsel %vm2313_vm7, %v7773_v7, %v10015_v11  ;;  %v2477_v60 = vsel %vm2461_vm11, %v2440_v18, %v10016_v36 }
 0x1d3   : > { %1396 = vrot.lane.b32.xlu1 %v7847_v42, %s9885_s4  ;;  %v2734_v54 = vsel %vm2720_vm1, %v2697_v22, %v7739_v51  ;;  %v2514_v16 = vsel %vm10018_vm5, %v2477_v60, %v10017_v41  ;;  %v1469_v43 = vsel %vm1409_vm4, %v7590_v57, %v1468_v15  ;;  %v3065_v18 = vshrl.u32 %v2963_v24, 16 }
 0x1d4   : > { %v7874_v48 = vpop.permute.xlu0 %1593  ;;  %v2211_v25 = vsel %vm9785_vm3, %v10013_v32, %v2210_v38  ;;  %v2771_v14 = vsel %vm2757_vm8, %v2734_v54, %v7768_v59  ;;  %v2551_v17 = vsel %vm10019_vm15, %v2514_v16, %v7547_v53  ;;  %v1473_v59 = vsel %vm1409_vm4, %v1468_v15, %v7879_v33 }
 0x1d5   : > { %v7885_v55 = vpop.permute.xlu1 %1000  ;;  %v2808_v51 = vsel %vm2794_vm0, %v2771_v14, %v2237_v61  ;;  %v3068_v61 = vshll.u32 %v2963_v24, 16  ;;  %v2588_v57 = vsel %vm2572_vm14, %v2551_v17, %v7637_v8  ;;  %vm10021_vm5 = vcmask 588800  }
 0x1d6   : > { %2244 = vrot.lane.b32.xlu0 %v7642_v63, %s9887_s27  ;;  %v2845_v22 = vsel %vm2831_vm12, %v2808_v51, %v2290_v45  ;;  %v7908_v63 = vld [vmem:[%s5971_s1 + $0x70] sm:$0xff]   ;;  %v2625_v53 = vsel %vm10020_vm6, %v2588_v57, %v7668_v62  ;;  %vm10022_vm15 = vcmask 326656   ;;  %v1565_v15 = vrot.slane %v7715_v26, 3 }
 0x1d7   : > { %2246 = vrot.lane.b32.xlu1 %v2211_v25, %s9887_s27  ;;  %v9779_v3 = vrot.slane %v7908_v63, 2  ;;  %v2662_v45 = vsel %vm10022_vm15, %v2625_v53, %v7695_v46  ;;  %v10023_v36 = vrot.slane %v7540_v29, 1  ;;  %v954_v46 = vrot.slane %v7726_v12, 1 }
 0x1d8   : > { %v3142_v32 = vpop.permute.xlu0 %3141  ;;  %v2699_v8 = vsel %vm2683_vm2, %v2662_v45, %v7717_v28  ;;  %v3067_v14 = vrot.slane %v3065_v18, 2  ;;  %v3070_v41 = vrot.slane %v3068_v61, 3  ;;  %v10025_v28 = vld [vmem:[#allocation31_spill] sm:$0xff]  ;;  %vm10027_vm6 = vcmask 1044480  }
 0x1d9   : > { %v3179_v54 = vsel %vm3165_vm13, %v2845_v22, %v3142_v32  ;;  %v7914_v11 = vpop.permute.xlu1 %1719  ;;  %v7931_v62 = vsel %vm9785_vm3, %v2210_v38, %v9779_v3  ;;  %v950_v60 = vor.u32 %v7543_v13, %v10023_v36  ;;  %v2736_v16 = vsel %vm2720_vm1, %v2699_v8, %v7749_v30 }
 0x1da   : > { %1524 = vrot.lane.b32.xlu0 %v1469_v43, %s9888_s18  ;;  %5449 = vmatprep.mubr.msk.bf16.mxu0 %vm10021_vm5, %v3179_v54  ;;  %v2965_v43 = vsel %vm2313_vm7, %v7908_v63, %v10025_v28  ;;  %v2773_v38 = vsel %vm2757_vm8, %v2736_v16, %v7776_v50  ;;  %v10026_v13 = vrot.slane %v7513_v0, 3  ;;  %vm10028_vm5 = vsmask.f32 7424 }
 0x1db   : > { %1526 = vrot.lane.b32.xlu1 %v1473_v59, %s9888_s18  ;;  %v2810_v29 = vsel %vm2794_vm0, %v2773_v38, %v7809_v47  ;;  %v955_v22 = vsel %vm10028_vm5, %v950_v60, %v954_v46  ;;  %v3071_v32 = vor.u32 %v3070_v41, %v3067_v14  ;;  %v3073_v59 = vshrl.u32 %v2965_v43, 16 }
 0x1dc   : > { %v7926_v24 = vpop.permute.xlu0 %1595  ;;  %v1566_v12 = vsel %vm10027_vm6, %v10026_v13, %v1565_v15  ;;  %v2847_v30 = vsel %vm2831_vm12, %v2810_v29, %v2292_v44  ;;  %v3076_v50 = vshll.u32 %v2965_v43, 16  ;;  %vm10029_vm15 = vcmask 588800   ;;  %v7968_v44 = vld [vmem:[%s9619_s5] ss:$0 sm:$0xff] }
 0x1dd   : > { %v7939_v51 = vpop.permute.xlu1 %1002  ;;  %v9777_v0 = vrot.slane %v7802_v21, 3  ;;  %v958_v61 = vor.u32 %v7729_v5, %v954_v46  ;;  %v9778_v57 = vrot.slane %v7829_v23, 1  ;;  %v3075_v54 = vrot.slane %v3073_v59, 2  ;;  %v7986_v5 = vld [vmem:[%s9620_s6] ss:$0 sm:$0xff] }
 0x1de   : > { %10024 = vst [vmem:[#allocation39_spill] sm:$0xff] %v7939_v51  ;;  %2297 = vrot.lane.b32.xlu0 %v2211_v25, %s9890_s13  ;;  %v3078_v53 = vrot.slane %v3076_v50, 3  ;;  %v3072_v45 = vsel %vm1409_vm4, %v7693_v56, %v3071_v32 }
 0x1df   : > { %2299 = vrot.lane.b32.xlu1 %v7931_v62, %s9890_s13  ;;  %v1568_v14 = vsel %vm10027_vm6, %v1565_v15, %v9777_v0  ;;  %v963_v41 = vsel %vm10028_vm5, %v958_v61, %v9778_v57 }
 0x1e0   : > { %v3144_v17 = vpop.permute.xlu0 %3143  ;;  %v7993_v16 = vor.u32 %v3078_v53, %v3075_v54 }
 0x1e1   : > { %v3181_v25 = vsel %vm3165_vm13, %v2847_v30, %v3144_v17  ;;  %v7957_v18 = vpop.permute.xlu1 %1721 }
 0x1e2   : > { %1601 = vrot.lane.b32.xlu0 %v1566_v12, %s9893_s15  ;;  %5450 = vmatmul.mubr.msk.bf16.gmra.mxu0 %vm10029_vm15, %v3181_v25  ;;  %v1051_v12 = vrot.slane %v7802_v21, 1  ;;  %v3080_v59 = vsel %vm1409_vm4, %v3071_v32, %v7993_v16  ;;  %vm10033_vm15 = vcmask 1046528  }
 0x1e3   : > { %1008 = vrot.lane.b32.xlu1 %v955_v22, %s9859_s0  ;;  %vm10039_vm6 = vmmov %vm10033_vm15 }
 0x1e4   : > { %v7963_v47 = vpop.permute.xlu0 %1077  ;;  %vm10041_vm5 = vmmov %vm10039_vm6 }
 0x1e5   : > { %v7974_v8 = vpop.permute.xlu1 %1079 }
 0x1e6   : > { %10030 = vst [vmem:[#allocation41_spill] sm:$0xff] %v7974_v8  ;;  %3149 = vrot.lane.b32.xlu0 %v3072_v45, %s9860_s25  ;;  %v5439_v36 = vpop.f32.mrf.mxu0  ;;  %v10032_v45 = vrot.slane %v7715_v26, 1 }
 0x1e7   : > { %v3465_v60 = vmul.f32 %v5439_v36, %v7968_v44  ;;  %1727 = vrot.lane.b32.xlu1 %v7619_v35, %s9861_s26 }
 0x1e8   : > { %v7988_v56 = vpop.permute.xlu0 %1906  ;;  %v3313_v46 = vpop.f32.mrf.mxu0  ;;  %v1052_v36 = vsel %vm10033_vm15, %v10032_v45, %v1051_v12  ;;  %vm10043_vm15 = vsmask.f32 6400 }
 0x1e9   : > { %v3463_v28 = vmul.f32 %v7968_v44, %v3313_v46  ;;  %v7996_v15 = vpop.permute.xlu1 %1908  ;;  %v3508_v43 = vadd.f32 %v7986_v5, %v3465_v60  ;;  %v8022_v60 = vld [vmem:[%s6101_s23 + $0x88] sm:$0xff]  }
 0x1ea   : > { %1603 = vrot.lane.b32.xlu0 %v1568_v14, %s9893_s15  ;;  %v5440_v35 = vpop.f32.mrf.mxu0  ;;  %v8036_v26 = vrot.slane %v8022_v60, 1 }
 0x1eb   : > { %v3466_v38 = vmul.f32 %v5440_v35, %v7968_v44  ;;  %1010 = vrot.lane.b32.xlu1 %v963_v41, %s9859_s0  ;;  %v3506_v30 = vadd.f32 %v7986_v5, %v3463_v28  ;;  %v3544_v25 = vmax.f32 %v3508_v43, 0.0  ;;  %v8039_v43 = vshll.u32 %v8022_v60, 16 }
 0x1ec   : > { %v8002_v29 = vpop.permute.xlu0 %1130  ;;  %v3316_v13 = vpop.f32.mrf.mxu0 }
 0x1ed   : > { %v3509_v17 = vadd.f32 %v7986_v5, %v3466_v38  ;;  %v3464_v22 = vmul.f32 %v7968_v44, %v3316_v13  ;;  %v8010_v50 = vpop.permute.xlu1 %1132  ;;  %v3542_v32 = vmax.f32 %v3506_v30, 0.0  ;;  %v8042_v38 = vshrl.u32 %v8022_v60, 16  ;;  %v10037_v30 = vld [vmem:[#allocation19_spill] sm:$0xff] }
 0x1ee   : > { %10031 = vst [vmem:[#allocation43_spill] sm:$0xff] %v8010_v50  ;;  %3151 = vrot.lane.b32.xlu0 %v3080_v59, %s9860_s25  ;;  %v1219_v45 = vrot.slane %v8039_v43, 2 }
 0x1ef   : > { %v3545_v61 = vmax.f32 %v3509_v17, 0.0  ;;  %v3507_v54 = vadd.f32 %v7986_v5, %v3464_v22  ;;  %1729 = vrot.lane.b32.xlu1 %v7773_v7, %s9861_s26  ;;  %v1214_v17 = vrot.slane %v7832_v20, 1  ;;  %v1215_v22 = vrot.slane %v7829_v23, 2 }
 0x1f0   : > { %v8016_v53 = vpop.permute.xlu0 %1982 }
 0x1f1   : > { %v8024_v14 = vpack.c.bf16 %v3545_v61, %v3544_v25  ;;  %v3543_v46 = vmax.f32 %v3507_v54, 0.0  ;;  %v8026_v41 = vpop.permute.xlu1 %1984  ;;  %v8056_v25 = vsel %vm10039_vm6, %v1051_v12, %v8036_v26  ;;  %v1956_v61 = vrot.slane %v7908_v63, 1  ;;  %vm10044_vm6 = vmmov %vm10043_vm15 }
 0x1f2   : > { %1085 = vrot.lane.b32.xlu0 %v7744_v10, %s9867_s19  ;;  %v10038_v10 = vld [vmem:[#allocation17_spill] sm:$0xff]  ;;  %v1218_v54 = vrot.slane %v8042_v38, 1  ;;  %v10040_v12 = vrot.slane %v7773_v7, 1 }
 0x1f3   : > { %10034 = vst [vmem:[#allocation46_spill] sm:$0xff] %v8024_v14  ;;  %v8030_v28 = vpack.c.bf16 %v3543_v46, %v3542_v32  ;;  %1087 = vrot.lane.b32.xlu1 %v1052_v36, %s9867_s19  ;;  %v1216_v46 = vor.u32 %v1215_v22, %v1214_v17  ;;  %v8085_v7 = vld [vmem:[%s5971_s1 + $0x78] sm:$0xff]  }
 0x1f4   : > { %v8033_v35 = vpop.permute.xlu0 %1260  ;;  %v8071_v0 = vor.u32 %v1219_v45, %v1218_v54  ;;  %v9780_v22 = vrot.slane %v8085_v7, 1 }
 0x1f5   : > { %10035 = vst [vmem:[#allocation48_spill] sm:$0xff] %v8030_v28  ;;  %v8044_v13 = vpop.permute.xlu1 %1262 }
 0x1f6   : > { %10036 = vst [vmem:[#allocation36_spill] sm:$0xff] %v8044_v13  ;;  %1914 = vrot.lane.b32.xlu0 %v10037_v30, %s9868_s30  ;;  %v1221_v17 = vsel %vm10044_vm6, %v1216_v46, %v8071_v0  ;;  %v10049_v13 = vld [vmem:[#allocation10_spill] sm:$0xff] }
 0x1f7   : > { %1916 = vrot.lane.b32.xlu1 %v10038_v10, %s9868_s30  ;;  %v1957_v10 = vsel %vm10041_vm5, %v10040_v12, %v1956_v61 }
 0x1f8   : > { %v8052_v59 = vpop.permute.xlu0 %2035 }
 0x1f9   : > { %v8061_v32 = vpop.permute.xlu1 %2037 }
 0x1fa   : > { %1138 = vrot.lane.b32.xlu0 %v1052_v36, %s9838_s2  ;;  %v1217_v36 = vsel %vm10043_vm15, %v7759_v19, %v1216_v46  ;;  %v8101_v46 = vsel %vm10041_vm5, %v1956_v61, %v9780_v22  ;;  %v10052_v22 = vrot.slane %v7802_v21, 2  ;;  %vm10053_vm15 = vcmask 64512   ;;  %vm10054_vm5 = vmmov %vm10044_vm6 }
 0x1fb   : > { %1140 = vrot.lane.b32.xlu1 %v8056_v25, %s9838_s2 }
 0x1fc   : > { %v8066_v30 = vpop.permute.xlu0 %1337 }
 0x1fd   : > { %v8073_v57 = vpop.permute.xlu1 %1339 }
 0x1fe   : > { %10042 = vst [vmem:[#allocation38_spill] sm:$0xff] %v8073_v57  ;;  %1990 = vrot.lane.b32.xlu0 %v7789_v4, %s9840_s22  ;;  %v10045_v4 = vld [vmem:[#allocation9_spill] sm:$0xff]  ;;  %v1311_v57 = vrot.slane %v8022_v60, 2 }
 0x1ff   : > { %1992 = vrot.lane.b32.xlu1 %v1957_v10, %s9840_s22  ;;  %v10046_v19 = vshrl.u32 %v10045_v4, 16  ;;  %v10047_v12 = vshll.u32 %v10045_v4, 16 }
 0x200   : > { %v8080_v3 = vpop.permute.xlu0 %2164  ;;  %v1312_v51 = vsel %vm9785_vm3, %v10052_v22, %v1311_v57 }
 0x201   : > { %v8088_v54 = vpop.permute.xlu1 %2166  ;;  %v2114_v45 = vrot.slane %v10046_v19, 1  ;;  %v2115_v14 = vrot.slane %v10047_v12, 2  ;;  %v8114_v12 = vld [vmem:[%s6101_s23 + $0x90] sm:$0xff]  }
 0x202   : > { %1268 = vrot.lane.b32.xlu0 %v1217_v36, %s9841_s24  ;;  %v10050_v36 = vshrl.u32 %v10049_v13, 16 }
 0x203   : > { %1270 = vrot.lane.b32.xlu1 %v1221_v17, %s9841_s24  ;;  %v10051_v17 = vshll.u32 %v10049_v13, 16  ;;  %v2116_v4 = vor.u32 %v2115_v14, %v2114_v45  ;;  %v5806_v13 = vld [vmem:[%s6101_s23 + $0x40] sm:$0xff]  }
 0x204   : > { %v8096_v28 = vpop.permute.xlu0 %1390  ;;  %v2118_v50 = vrot.slane %v10050_v36, 1 }
 0x205   : > { %10048 = vst [vmem:[#allocation40_spill] sm:$0xff] %v8096_v28  ;;  %v2119_v8 = vrot.slane %v10051_v17, 2  ;;  %v8108_v19 = vpop.permute.xlu1 %1392  ;;  %v2331_v17 = vsel %vm2313_vm7, %v5806_v13, %v7596_v37 }
 0x206   : > { %2043 = vrot.lane.b32.xlu0 %v1957_v10, %s9846_s21  ;;  %v2368_v14 = vsel %vm10053_vm15, %v2331_v17, %v7674_v31  ;;  %v2117_v10 = vsel %vm10044_vm6, %v7807_v1, %v2116_v4  ;;  %v1226_v31 = vshll.u32 %v8114_v12, 16  ;;  %vm10055_vm15 = vcmask 195584  }
 0x207   : > { %2045 = vrot.lane.b32.xlu1 %v8101_v46, %s9846_s21  ;;  %v8119_v28 = vor.u32 %v2119_v8, %v2118_v50  ;;  %v8134_v8 = vrot.slane %v8114_v12, 2  ;;  %v2405_v50 = vsel %vm2387_vm9, %v2368_v14, %v7699_v49  ;;  %v1474_v17 = vrot.slane %v8042_v38, 2 }
 0x208   : > { %v2241_v61 = vpop.permute.xlu0 %2240  ;;  %v2442_v1 = vsel %vm2424_vm10, %v2405_v50, %v7722_v40  ;;  %v1475_v40 = vrot.slane %v8039_v43, 3  ;;  %vm10056_vm6 = vcmask 228352  }
 0x209   : > { %v8121_v36 = vpop.permute.xlu1 %2242  ;;  %v2121_v37 = vsel %vm10054_vm5, %v2116_v4, %v8119_v28  ;;  %v2479_v13 = vsel %vm2461_vm11, %v2442_v1, %v7754_v58  ;;  %v8156_v4 = vsel %vm9785_vm3, %v1311_v57, %v8134_v8  ;;  %v2214_v58 = vrot.slane %v8085_v7, 2  ;;  %v5807_v1 = vld [vmem:[%s6101_s23 + $0x48] sm:$0xff]  }
 0x20a   : > { %1345 = vrot.lane.b32.xlu0 %v7847_v42, %s9848_s29  ;;  %v9781_v42 = vshrl.u32 %v8114_v12, 16  ;;  %v2516_v49 = vsel %vm10055_vm15, %v2479_v13, %v7784_v52  ;;  %v1479_v52 = vrot.slane %v1226_v31, 3  ;;  %v2333_v13 = vsel %vm2313_vm7, %v5807_v1, %v7650_v9 }
 0x20b   : > { %1347 = vrot.lane.b32.xlu1 %v1312_v51, %s9848_s29  ;;  %v2553_v14 = vsel %vm10056_vm6, %v2516_v49, %v7824_v27  ;;  %vm10057_vm5 = vcmask 293888   ;;  %vm10058_vm15 = vcmask 64512   ;;  %vm10059_vm6 = vcmask 326656  }
 0x20c   : > { %v8138_v22 = vpop.permute.xlu0 %1520  ;;  %v2590_v57 = vsel %vm2572_vm14, %v2553_v14, %v7874_v48  ;;  %v2370_v49 = vsel %vm10058_vm15, %v2333_v13, %v7680_v2  ;;  %v1476_v48 = vor.u32 %v1475_v40, %v1474_v17  ;;  %v10064_v13 = vld [vmem:[#allocation50_spill] sm:$0xff]  ;;  %vm10065_vm15 = vcmask 228352  }
 0x20d   : > { %v8146_v45 = vpop.permute.xlu1 %1522  ;;  %v2627_v27 = vsel %vm10057_vm5, %v2590_v57, %v7914_v11  ;;  %v2407_v14 = vsel %vm2387_vm9, %v2370_v49, %v7704_v6  ;;  %v10060_v11 = vrot.slane %v7908_v63, 2  ;;  %v10061_v6 = vld [vmem:[#allocation30_spill] sm:$0xff]  ;;  %vm10063_vm5 = vcmask 195584  }
 0x20e   : > { %2172 = vrot.lane.b32.xlu0 %v2117_v10, %s9851_s20  ;;  %v1478_v10 = vrot.slane %v9781_v42, 2  ;;  %v2664_v42 = vsel %vm10059_vm6, %v2627_v27, %v7988_v56  ;;  %v2444_v56 = vsel %vm2424_vm10, %v2407_v14, %v7731_v34  ;;  %vm10066_vm6 = vcmask 293888  }
 0x20f   : > { %2174 = vrot.lane.b32.xlu1 %v2121_v37, %s9851_s20  ;;  %v2701_v9 = vsel %vm2683_vm2, %v2664_v42, %v8016_v53  ;;  %v2967_v53 = vsel %vm2313_vm7, %v8085_v7, %v10061_v6  ;;  %v10062_v42 = vld [vmem:[#allocation37_spill] sm:$0xff] }
 0x210   : > { %v2294_v50 = vpop.permute.xlu0 %2293  ;;  %v8190_v2 = vor.u32 %v1479_v52, %v1478_v10  ;;  %v2738_v17 = vsel %vm2720_vm1, %v2701_v9, %v8052_v59  ;;  %v2481_v57 = vsel %vm2461_vm11, %v2444_v56, %v10062_v42  ;;  %v1477_v52 = vsel %vm1409_vm4, %v7879_v33, %v1476_v48 }
 0x211   : > { %v2296_v37 = vpop.permute.xlu1 %2295  ;;  %v2775_v10 = vsel %vm2757_vm8, %v2738_v17, %v8080_v3  ;;  %v2518_v34 = vsel %vm10063_vm5, %v2481_v57, %v7796_v39  ;;  %v3081_v9 = vshrl.u32 %v2967_v53, 16  ;;  %vm10067_vm5 = vcmask 588800  }
 0x212   : > { %1398 = vrot.lane.b32.xlu0 %v1312_v51, %s9885_s4  ;;  %v2215_v51 = vsel %vm9785_vm3, %v10060_v11, %v2214_v58  ;;  %v2812_v59 = vsel %vm2794_vm0, %v2775_v10, %v2241_v61  ;;  %v2555_v27 = vsel %vm10065_vm15, %v2518_v34, %v10064_v13  ;;  %v1481_v3 = vsel %vm1409_vm4, %v1476_v48, %v8190_v2  ;;  %v10068_v48 = vld [vmem:[#allocation32_spill] sm:$0xff] }
 0x213   : > { %1400 = vrot.lane.b32.xlu1 %v8156_v4, %s9885_s4  ;;  %v2849_v49 = vsel %vm2831_vm12, %v2812_v59, %v2294_v50  ;;  %v3084_v61 = vshll.u32 %v2967_v53, 16  ;;  %v2592_v33 = vsel %vm2572_vm14, %v2555_v27, %v7926_v24  ;;  %vm10069_vm15 = vcmask 326656   ;;  %v8252_v34 = vld [vmem:[%s6101_s23 + $0x90] ss:$0 sps:$4 sm:$0x11]  }
 0x214   : > { %v8185_v1 = vpop.permute.xlu0 %1597  ;;  %v2629_v50 = vsel %vm10066_vm6, %v2592_v33, %v7957_v18  ;;  %v1569_v24 = vrot.slane %v8022_v60, 3  ;;  %v10070_v57 = vrot.slane %v7829_v23, 1  ;;  %v3083_v59 = vrot.slane %v3081_v9, 2 }
 0x215   : > { %v8196_v40 = vpop.permute.xlu1 %1004  ;;  %v2666_v6 = vsel %vm10069_vm15, %v2629_v50, %v7996_v15  ;;  %v970_v15 = vrot.slane %v8039_v43, 1  ;;  %v3086_v60 = vrot.slane %v3084_v61, 3  ;;  %vm10072_vm6 = vcmask 1044480  }
 0x216   : > { %2248 = vrot.lane.b32.xlu0 %v7931_v62, %s9887_s27  ;;  %v8219_v62 = vld [vmem:[%s5971_s1 + $0x80] sm:$0xff]   ;;  %v2703_v53 = vsel %vm2683_vm2, %v2666_v6, %v8026_v41  ;;  %v966_v10 = vor.u32 %v7832_v20, %v10070_v57  ;;  %v10071_v20 = vrot.slane %v7802_v21, 3  ;;  %vm10074_vm15 = vcmask 588800  }
 0x217   : > { %2250 = vrot.lane.b32.xlu1 %v2215_v51, %s9887_s27  ;;  %v9784_v39 = vrot.slane %v8219_v62, 2  ;;  %v2969_v17 = vsel %vm2313_vm7, %v8219_v62, %v10068_v48  ;;  %v2740_v41 = vsel %vm2720_vm1, %v2703_v53, %v8061_v32  ;;  %v974_v48 = vor.u32 %v8042_v38, %v970_v15 }
 0x218   : > { %v3146_v14 = vpop.permute.xlu0 %3145  ;;  %v2777_v13 = vsel %vm2757_vm8, %v2740_v41, %v8088_v54  ;;  %v1570_v43 = vsel %vm10072_vm6, %v10071_v20, %v1569_v24  ;;  %v3092_v27 = vshll.u32 %v2969_v17, 16  ;;  %v976_v54 = vshll.u32 %v8252_v34, 16 }
 0x219   : > { %v3183_v11 = vsel %vm3165_vm13, %v2849_v49, %v3146_v14  ;;  %v8225_v56 = vpop.permute.xlu1 %1723  ;;  %v8245_v18 = vsel %vm9785_vm3, %v2214_v58, %v9784_v39  ;;  %v3089_v58 = vshrl.u32 %v2969_v17, 16  ;;  %v2814_v23 = vsel %vm2794_vm0, %v2777_v13, %v8121_v36 }
 0x21a   : > { %1528 = vrot.lane.b32.xlu0 %v1477_v52, %s9888_s18  ;;  %5453 = vmatprep.mubr.msk.bf16.mxu0 %vm10067_vm5, %v3183_v11  ;;  %v2851_v32 = vsel %vm2831_vm12, %v2814_v23, %v2296_v37  ;;  %vm10073_vm5 = vsmask.f32 7424  ;;  %v9783_v37 = vrot.slane %v8114_v12, 3  ;;  %v3094_v33 = vrot.slane %v3092_v27, 3 }
 0x21b   : > { %1530 = vrot.lane.b32.xlu1 %v1481_v3, %s9888_s18  ;;  %v971_v14 = vsel %vm10073_vm5, %v966_v10, %v970_v15  ;;  %v3091_v61 = vrot.slane %v3089_v58, 2  ;;  %v978_v17 = vrot.slane %v976_v54, 1 }
 0x21c   : > { %v8240_v42 = vpop.permute.xlu0 %1599  ;;  %v1572_v41 = vsel %vm10072_vm6, %v1569_v24, %v9783_v37  ;;  %vm10077_vm6 = vcmask 1046528  }
 0x21d   : > { %v8256_v52 = vpop.permute.xlu1 %1006  ;;  %v8295_v38 = vor.u32 %v3094_v33, %v3091_v61  ;;  %v979_v13 = vsel %vm10073_vm5, %v974_v48, %v978_v17  ;;  %v3596_v61 = vld [vmem:[%s9621_s7] sm:$0x3]  ;;  %v5698_v48 = vld [vmem:[%s6101_s23 + $0x98] ss:$0 sps:$4 sm:$0x11]   ;;  %vm10079_vm5 = vmmov %vm10077_vm6 }
 0x21e   : > { %2301 = vrot.lane.b32.xlu0 %v2215_v51, %s9890_s13  ;;  %v3087_v51 = vor.u32 %v3086_v60, %v3083_v59  ;;  %v5699_v17 = vld [vmem:[%s6101_s23 + $0x98] ss:$0 sps:$4 sm:$0x33]  }
 0x21f   : > { %2303 = vrot.lane.b32.xlu1 %v8245_v18, %s9890_s13 }
 0x220   : > { %v3148_v49 = vpop.permute.xlu0 %3147  ;;  %v3088_v53 = vsel %vm1409_vm4, %v7993_v16, %v3087_v51 }
 0x221   : > { %v3185_v3 = vsel %vm3165_vm13, %v2851_v32, %v3148_v49  ;;  %v8272_v9 = vpop.permute.xlu1 %1725  ;;  %v3096_v49 = vsel %vm1409_vm4, %v3087_v51, %v8295_v38 }
 0x222   : > { %1605 = vrot.lane.b32.xlu0 %v1570_v43, %s9893_s15  ;;  %v5443_v21 = vpop.f32.mrf.mxu0  ;;  %5454 = vmatmul.mubr.msk.bf16.gmra.mxu0 %vm10074_vm15, %v3185_v3  ;;  %vm9782_vm15 = vcmask 1041408  }
 0x223   : > { %v3469_v36 = vmul.f32 %v5443_v21, %v7968_v44  ;;  %1012 = vrot.lane.b32.xlu1 %v971_v14, %s9859_s0  ;;  %v1055_v14 = vrot.slane %v8252_v34, 1  ;;  %5589 = vmatprep.subr.msk.bf16.mxu1 %vm9782_vm15, %v3596_v61  ;;  %v3660_v51 = vsel %vm9782_vm15, %v3596_v61, 0 }
 0x224   : > { %v8279_v11 = vpop.permute.xlu0 %1081  ;;  %v3329_v50 = vpop.f32.mrf.mxu0  ;;  %5584 = vmatpush3.bf16.msra.mxu1 %v3660_v51  ;;  %5588 = vmatprep.subr.msk.bf16.mxu0 %vm9782_vm15, %v3596_v61 }
 0x225   : > { %v3467_v6 = vmul.f32 %v7968_v44, %v3329_v50  ;;  %v8285_v57 = vpop.permute.xlu1 %1083  ;;  %v3512_v59 = vadd.f32 %v7986_v5, %v3469_v36  ;;  %v1056_v50 = vsel %vm10077_vm6, %v8036_v26, %v1055_v14  ;;  %5474 = vmatpush3.bf16.msra.mxu0 %v3660_v51  ;;  %vm10082_vm6 = vmmov %vm10079_vm5 }
 0x226   : > { %3153 = vrot.lane.b32.xlu0 %v3088_v53, %s9860_s25  ;;  %v5444_v10 = vpop.f32.mrf.mxu0  ;;  %v1106_v53 = vrot.slane %v8114_v12, 1 }
 0x227   : > { %v3470_v60 = vmul.f32 %v5444_v10, %v7968_v44  ;;  %1731 = vrot.lane.b32.xlu1 %v7908_v63, %s9861_s26  ;;  %v3510_v58 = vadd.f32 %v7986_v5, %v3467_v6  ;;  %v3548_v24 = vmax.f32 %v3512_v59, 0.0  ;;  %v1108_v59 = vrot.slane %v5698_v48, 1 }
 0x228   : > { %v8297_v15 = vpop.permute.xlu0 %1910  ;;  %v3332_v16 = vpop.f32.mrf.mxu0 }
 0x229   : > { %v3513_v23 = vadd.f32 %v7986_v5, %v3470_v60  ;;  %v3468_v20 = vmul.f32 %v7968_v44, %v3332_v16  ;;  %v8303_v43 = vpop.permute.xlu1 %1912  ;;  %v3546_v54 = vmax.f32 %v3510_v58, 0.0  ;;  %v1232_v60 = vshrl.u32 %v5699_v17, 16 }
 0x22a   : > { %1607 = vrot.lane.b32.xlu0 %v1572_v41, %s9893_s15  ;;  %v1235_v41 = vshll.u32 %v5699_v17, 16  ;;  %v1107_v58 = vsel %vm10079_vm5, %v8036_v26, %v1106_v53 }
 0x22b   : > { %v3549_v27 = vmax.f32 %v3513_v23, 0.0  ;;  %v3511_v63 = vadd.f32 %v7986_v5, %v3468_v20  ;;  %1014 = vrot.lane.b32.xlu1 %v979_v13, %s9859_s0  ;;  %v10078_v13 = vld [vmem:[#allocation21_spill] sm:$0xff]  ;;  %v10080_v23 = vld [vmem:[#allocation20_spill] sm:$0xff]  ;;  %v1234_v14 = vrot.slane %v1232_v60, 1  ;;  %s5855_s0 = smov 19  }
 0x22c   : > { %v8308_v32 = vpop.permute.xlu0 %1134 }
 0x22d   : > { %v8313_v3 = vpack.c.bf16 %v3549_v27, %v3548_v24  ;;  %v3547_v21 = vmax.f32 %v3511_v63, 0.0  ;;  %v8315_v36 = vpop.permute.xlu1 %1136  ;;  %v1228_v24 = vrot.slane %v1226_v31, 2  ;;  %v1109_v63 = vsel %vm10082_vm6, %v1106_v53, %v1108_v59 }
 0x22e   : > { %3155 = vrot.lane.b32.xlu0 %v3096_v49, %s9860_s25  ;;  %v1960_v49 = vrot.slane %v8219_v62, 1  ;;  %v10083_v31 = vrot.slane %v8085_v7, 1  ;;  %vm10084_vm6 = vsmask.f32 6400 }
 0x22f   : > { %10075 = vst [vmem:[#allocation42_spill] sm:$0xff] %v8313_v3  ;;  %v8323_v33 = vpack.c.bf16 %v3547_v21, %v3546_v54  ;;  %1733 = vrot.lane.b32.xlu1 %v8085_v7, %s9861_s26  ;;  %v1237_v54 = vrot.slane %v1235_v41, 2  ;;  %vm10085_vm15 = vmmov %vm10084_vm6  ;;  %v8378_v41 = vld [vmem:[%s5971_s1 + $0x88] sm:$0xff]  }
 0x230   : > { %v8327_v34 = vpop.permute.xlu0 %1986  ;;  %v1961_v51 = vsel %vm10079_vm5, %v10083_v31, %v1960_v49  ;;  %v8381_v7 = vrot.slane %v8378_v41, 1 }
 0x231   : > { %10076 = vst [vmem:[#allocation25_spill] sm:$0xff] %v8323_v33  ;;  %v8334_v6 = vpop.permute.xlu1 %1988 }
 0x232   : > { %1089 = vrot.lane.b32.xlu0 %v8056_v25, %s9867_s19  ;;  %v10081_v25 = vshrl.u32 %v8114_v12, 16 }
 0x233   : > { %1091 = vrot.lane.b32.xlu1 %v1056_v50, %s9867_s19  ;;  %v1238_v50 = vor.u32 %v1237_v54, %v1234_v14  ;;  %v10090_v14 = vld [vmem:[#allocation15_spill] sm:$0xff]  ;;  %s5856_s19 = smov 108  }
 0x234   : > { %v8340_v10 = vpop.permute.xlu0 %1264  ;;  %v1225_v20 = vrot.slane %v10081_v25, 1  ;;  %v10091_v54 = vshrl.u32 %v10090_v14, 16  ;;  %v10092_v31 = vshll.u32 %v10090_v14, 16 }
 0x235   : > { %v8342_v16 = vpop.permute.xlu1 %1266 }
 0x236   : > { %1918 = vrot.lane.b32.xlu0 %v10078_v13, %s9868_s30  ;;  %v1229_v26 = vor.u32 %v1228_v24, %v1225_v20 }
 0x237   : > { %1920 = vrot.lane.b32.xlu1 %v10080_v23, %s9868_s30 }
 0x238   : > { %v8354_v27 = vpop.permute.xlu0 %2039  ;;  %v1230_v53 = vsel %vm10084_vm6, %v8071_v0, %v1229_v26  ;;  %v1239_v60 = vsel %vm10085_vm15, %v1229_v26, %v1238_v50  ;;  %vm10089_vm15 = vmmov %vm10079_vm5  ;;  %v2126_v26 = vrot.slane %v10091_v54, 1  ;;  %v2127_v50 = vrot.slane %v10092_v31, 2  ;;  %v8415_v54 = vld [vmem:[%s6101_s23 + $0xa0] ss:$0 sps:$4 sm:$0x77]   ;;  %v5810_v31 = vld [vmem:[%s6101_s23 + $0x50] sm:$0xff]  }
 0x239   : > { %v8358_v21 = vpop.permute.xlu1 %2041  ;;  %v8395_v24 = vsel %vm10089_vm15, %v1960_v49, %v8381_v7  ;;  %vm10094_vm5 = vmmov %vm10084_vm6  ;;  %vm10095_vm6 = vcmask 64512   ;;  %v1495_v39 = vshll.u32 %v8415_v54, 16 }
 0x23a   : > { %1142 = vrot.lane.b32.xlu0 %v1107_v58, %s9838_s2  ;;  %vm10096_vm15 = vmmov %vm10094_vm5 }
 0x23b   : > { %1144 = vrot.lane.b32.xlu1 %v1109_v63, %s9838_s2  ;;  %v1315_v63 = vrot.slane %v5699_v17, 2 }
 0x23c   : > { %v8362_v61 = vpop.permute.xlu0 %1341 }
 0x23d   : > { %v8367_v48 = vpop.permute.xlu1 %1343  ;;  %v1316_v17 = vsel %vm9785_vm3, %v8134_v8, %v1315_v63 }
 0x23e   : > { %1994 = vrot.lane.b32.xlu0 %v8101_v46, %s9840_s22  ;;  %v10086_v46 = vld [vmem:[#allocation11_spill] sm:$0xff] }
 0x23f   : > { %1996 = vrot.lane.b32.xlu1 %v1961_v51, %s9840_s22  ;;  %v10087_v58 = vshrl.u32 %v10086_v46, 16  ;;  %v10088_v23 = vshll.u32 %v10086_v46, 16 }
 0x240   : > { %v8374_v59 = vpop.permute.xlu0 %2168 }
 0x241   : > { %v8383_v13 = vpop.permute.xlu1 %2170  ;;  %v2122_v0 = vrot.slane %v10087_v58, 1  ;;  %v2123_v25 = vrot.slane %v10088_v23, 2  ;;  %v5701_v58 = vld [vmem:[%s6101_s23 + $0xa0] ss:$0 sps:$4 sm:$0x33]   ;;  %v8412_v23 = vor.u32 %v2127_v50, %v2126_v26 }
 0x242   : > { %1272 = vrot.lane.b32.xlu0 %v1230_v53, %s9841_s24  ;;  %v1368_v26 = vrot.slane %v5701_v58, 2 }
 0x243   : > { %1274 = vrot.lane.b32.xlu1 %v1239_v60, %s9841_s24  ;;  %v2124_v46 = vor.u32 %v2123_v25, %v2122_v0  ;;  %v8405_v60 = vld [vmem:[%s6101_s23 + $0x98] sm:$0xff]  }
 0x244   : > { %v8391_v20 = vpop.permute.xlu0 %1394  ;;  %v1366_v25 = vrot.slane %v8405_v60, 2  ;;  %v1483_v50 = vshrl.u32 %v8405_v60, 16  ;;  %v1486_v37 = vshll.u32 %v8405_v60, 16 }
 0x245   : > { %v8401_v53 = vpop.permute.xlu1 %1396  ;;  %v2125_v0 = vsel %vm10094_vm5, %v8119_v28, %v2124_v46  ;;  %v2129_v28 = vsel %vm10096_vm15, %v2124_v46, %v8412_v23  ;;  %vm10099_vm5 = vcmask 195584   ;;  %vm10102_vm15 = vcmask 293888  }
 0x246   : > { %10093 = vst [vmem:[#allocation44_spill] sm:$0xff] %v8401_v53  ;;  %2047 = vrot.lane.b32.xlu0 %v1961_v51, %s9846_s21  ;;  %v2335_v51 = vsel %vm2313_vm7, %v5810_v31, %v7885_v55  ;;  %v1485_v3 = vrot.slane %v1483_v50, 2  ;;  %v5811_v53 = vld [vmem:[%s6101_s23 + $0x58] sm:$0xff]  }
 0x247   : > { %2049 = vrot.lane.b32.xlu1 %v8395_v24, %s9846_s21  ;;  %v2372_v63 = vsel %vm10095_vm6, %v2335_v51, %v7963_v47  ;;  %v10098_v51 = vld [vmem:[#allocation40_spill] sm:$0xff]  ;;  %vm10100_vm6 = vcmask 228352  }
 0x248   : > { %v2245_v49 = vpop.permute.xlu0 %2244  ;;  %v2409_v55 = vsel %vm2387_vm9, %v2372_v63, %v8002_v29  ;;  %v1367_v29 = vsel %vm9785_vm3, %v8134_v8, %v1366_v25  ;;  %v1369_v63 = vsel %vm9785_vm3, %v1366_v25, %v1368_v26  ;;  %v10106_v26 = vld [vmem:[#allocation43_spill] sm:$0xff] }
 0x249   : > { %v8417_v14 = vpop.permute.xlu1 %2246  ;;  %v2446_v47 = vsel %vm2424_vm10, %v2409_v55, %v8033_v35  ;;  %v1488_v35 = vrot.slane %v1486_v37, 3  ;;  %v10103_v37 = vld [vmem:[#allocation41_spill] sm:$0xff] }
 0x24a   : > { %1349 = vrot.lane.b32.xlu0 %v8156_v4, %s9848_s29  ;;  %v1492_v4 = vshrl.u32 %v8415_v54, 16 }
 0x24b   : > { %1351 = vrot.lane.b32.xlu1 %v1316_v17, %s9848_s29  ;;  %v2483_v17 = vsel %vm2461_vm11, %v2446_v47, %v8066_v30  ;;  %v2218_v30 = vrot.slane %v8378_v41, 2  ;;  %s5859_s29 = smov 90  }
 0x24c   : > { %v8434_v31 = vpop.permute.xlu0 %1524  ;;  %v2520_v46 = vsel %vm10099_vm5, %v2483_v17, %v10098_v51  ;;  %v1494_v47 = vrot.slane %v1492_v4, 2  ;;  %v10101_v17 = vld [vmem:[#allocation39_spill] sm:$0xff]  ;;  %vm10104_vm5 = vcmask 64512  }
 0x24d   : > { %v8442_v58 = vpop.permute.xlu1 %1526  ;;  %v2557_v55 = vsel %vm10100_vm6, %v2520_v46, %v8138_v22  ;;  %vm10105_vm6 = vcmask 326656   ;;  %v10108_v46 = vld [vmem:[#allocation36_spill] sm:$0xff] }
 0x24e   : > { %10097 = vst [vmem:[#allocation49_spill] sm:$0xff] %v8442_v58  ;;  %2176 = vrot.lane.b32.xlu0 %v2125_v0, %s9851_s20  ;;  %v1497_v0 = vrot.slane %v1495_v39, 3  ;;  %v2594_v8 = vsel %vm2572_vm14, %v2557_v55, %v8185_v1  ;;  %v1489_v1 = vor.u32 %v1488_v35, %v1485_v3 }
 0x24f   : > { %2178 = vrot.lane.b32.xlu1 %v2129_v28, %s9851_s20  ;;  %v2337_v28 = vsel %vm2313_vm7, %v5811_v53, %v10101_v17  ;;  %v2631_v25 = vsel %vm10102_vm15, %v2594_v8, %v8225_v56  ;;  %v10107_v56 = vrot.slane %v8219_v62, 2  ;;  %vm10112_vm15 = vcmask 195584  }
 0x250   : > { %v2298_v33 = vpop.permute.xlu0 %2297  ;;  %v2374_v22 = vsel %vm10104_vm5, %v2337_v28, %v10103_v37  ;;  %v2668_v39 = vsel %vm10105_vm6, %v2631_v25, %v8297_v15  ;;  %v1498_v51 = vor.u32 %v1497_v0, %v1494_v47  ;;  %v8494_v47 = vld [vmem:[%s5971_s1 + $0x90] sm:$0xff]   ;;  %v10111_v0 = vld [vmem:[#allocation34_spill] sm:$0xff]  ;;  %v1490_v37 = vsel %vm1409_vm4, %v8190_v2, %v1489_v1 }
 0x251   : > { %v2300_v58 = vpop.permute.xlu1 %2299  ;;  %v2411_v50 = vsel %vm2387_vm9, %v2374_v22, %v10106_v26  ;;  %v2705_v53 = vsel %vm2683_vm2, %v2668_v39, %v8327_v34  ;;  %v10110_v34 = vld [vmem:[#allocation38_spill] sm:$0xff]  ;;  %vm10113_vm5 = vcmask 228352   ;;  %v8510_v26 = vrot.slane %v8494_v47, 2 }
 0x252   : > { %1402 = vrot.lane.b32.xlu0 %v1367_v29, %s9885_s4  ;;  %v2219_v29 = vsel %vm9785_vm3, %v10107_v56, %v2218_v30  ;;  %v2448_v55 = vsel %vm2424_vm10, %v2411_v50, %v10108_v46  ;;  %v2742_v15 = vsel %vm2720_vm1, %v2705_v53, %v8354_v27  ;;  %v2973_v27 = vsel %vm2313_vm7, %v8494_v47, %v10111_v0 }
 0x253   : > { %1404 = vrot.lane.b32.xlu1 %v1369_v63, %s9885_s4  ;;  %v10109_v63 = vld [vmem:[#allocation33_spill] sm:$0xff]  ;;  %v2485_v8 = vsel %vm2461_vm11, %v2448_v55, %v10110_v34  ;;  %v2779_v17 = vsel %vm2757_vm8, %v2742_v15, %v8374_v59  ;;  %v1499_v39 = vsel %vm1409_vm4, %v1489_v1, %v1498_v51  ;;  %v3105_v56 = vshrl.u32 %v2973_v27, 16 }
 0x254   : > { %v8473_v4 = vpop.permute.xlu0 %1601  ;;  %v2971_v35 = vsel %vm2313_vm7, %v8378_v41, %v10109_v63  ;;  %v2522_v28 = vsel %vm10112_vm15, %v2485_v8, %v8108_v19  ;;  %v2816_v25 = vsel %vm2794_vm0, %v2779_v17, %v2245_v49  ;;  %v3108_v46 = vshll.u32 %v2973_v27, 16 }
 0x255   : > { %v8482_v3 = vpop.permute.xlu1 %1008  ;;  %v2559_v59 = vsel %vm10113_vm5, %v2522_v28, %v8146_v45  ;;  %v3097_v50 = vshrl.u32 %v2971_v35, 16  ;;  %v3100_v19 = vshll.u32 %v2971_v35, 16  ;;  %vm10114_vm6 = vcmask 293888  }
 0x256   : > { %2252 = vrot.lane.b32.xlu0 %v8245_v18, %s9887_s27  ;;  %v2853_v18 = vsel %vm2831_vm12, %v2816_v25, %v2298_v33  ;;  %v2596_v49 = vsel %vm2572_vm14, %v2559_v59, %v8240_v42  ;;  %vm10115_vm15 = vcmask 588800   ;;  %vm10116_vm5 = vcmask 326656  }
 0x257   : > { %2254 = vrot.lane.b32.xlu1 %v2219_v29, %s9887_s27  ;;  %v2633_v45 = vsel %vm10114_vm6, %v2596_v49, %v8272_v9  ;;  %v1573_v42 = vrot.slane %v8405_v60, 3  ;;  %v8531_v55 = vsel %vm9785_vm3, %v2218_v30, %v8510_v26  ;;  %v1575_v9 = vrot.slane %v8415_v54, 3 }
 0x258   : > { %v3150_v22 = vpop.permute.xlu0 %3149  ;;  %v2670_v33 = vsel %vm10116_vm5, %v2633_v45, %v8303_v43  ;;  %v3099_v15 = vrot.slane %v3097_v50, 2  ;;  %v3102_v63 = vrot.slane %v3100_v19, 3  ;;  %v3107_v34 = vrot.slane %v3105_v56, 2 }
 0x259   : > { %v3187_v2 = vsel %vm3165_vm13, %v2853_v18, %v3150_v22  ;;  %v8515_v53 = vpop.permute.xlu1 %1727  ;;  %v2707_v1 = vsel %vm2683_vm2, %v2670_v33, %v8334_v6  ;;  %v3110_v60 = vrot.slane %v3108_v46, 3  ;;  %v10117_v54 = vrot.slane %v8114_v12, 3 }
 0x25a   : > { %1532 = vrot.lane.b32.xlu0 %v1490_v37, %s9888_s18  ;;  %5457 = vmatprep.mubr.msk.bf16.mxu0 %vm10115_vm15, %v3187_v2  ;;  %v2744_v43 = vsel %vm2720_vm1, %v2707_v1, %v8358_v21  ;;  %vm10118_vm6 = vcmask 1044480   ;;  %v3103_v27 = vor.u32 %v3102_v63, %v3099_v15  ;;  %vm10120_vm5 = vcmask 588800   ;;  %v10121_v63 = vld [vmem:[#allocation22_spill] sm:$0xff] }
 0x25b   : > { %1534 = vrot.lane.b32.xlu1 %v1499_v39, %s9888_s18  ;;  %v2781_v6 = vsel %vm2757_vm8, %v2744_v43, %v8383_v13  ;;  %v1574_v8 = vsel %vm10118_vm6, %v10117_v54, %v1573_v42  ;;  %vm10119_vm15 = vmmov %vm10118_vm6  ;;  %v8553_v28 = vor.u32 %v3110_v60, %v3107_v34  ;;  %v5705_v34 = vld [vmem:[%s5971_s1 + $0x98] ss:$0 sps:$4 sm:$0x33]   ;;  %vm10126_vm6 = vsmask.f32 7424 }
 0x25c   : > { %v8527_v51 = vpop.permute.xlu0 %1603  ;;  %v2818_v30 = vsel %vm2794_vm0, %v2781_v6, %v8417_v14  ;;  %v1576_v0 = vsel %vm10119_vm15, %v1573_v42, %v1575_v9  ;;  %v3104_v18 = vsel %vm1409_vm4, %v8295_v38, %v3103_v27  ;;  %v2015_v6 = vrot.slane %v8494_v47, 1  ;;  %v10125_v47 = vld [vmem:[#allocation24_spill] sm:$0xff] }
 0x25d   : > { %v8536_v35 = vpop.permute.xlu1 %1010  ;;  %v2855_v21 = vsel %vm2831_vm12, %v2818_v30, %v2300_v58  ;;  %v5703_v58 = vld [vmem:[%s5971_s1 + $0x90] ss:$0 sps:$4 sm:$0x11]   ;;  %v3112_v50 = vsel %vm1409_vm4, %v3103_v27, %v8553_v28  ;;  %vm10127_vm15 = vcmask 1046528  }
 0x25e   : > { %2305 = vrot.lane.b32.xlu0 %v2219_v29, %s9890_s13  ;;  %v1886_v2 = vshll.u32 %v5703_v58, 16  ;;  %v1964_v27 = vrot.slane %v5703_v58, 1  ;;  %v10128_v58 = vld [vmem:[#allocation47_spill] sm:$0xff] }
 0x25f   : > { %2307 = vrot.lane.b32.xlu1 %v8531_v55, %s9890_s13 }
 0x260   : > { %v3152_v17 = vpop.permute.xlu0 %3151  ;;  %v1888_v43 = vrot.slane %v1886_v2, 1 }
 0x261   : > { %v3189_v13 = vsel %vm3165_vm13, %v2855_v21, %v3152_v17  ;;  %v8551_v29 = vpop.permute.xlu1 %1729 }
 0x262   : > { %1609 = vrot.lane.b32.xlu0 %v1574_v8, %s9893_s15  ;;  %v5447_v12 = vpop.f32.mrf.mxu0  ;;  %5458 = vmatmul.mubr.msk.bf16.gmra.mxu0 %vm10120_vm5, %v3189_v13  ;;  %vm10129_vm5 = vmmov %vm10127_vm15 }
 0x263   : > { %v3473_v14 = vmul.f32 %v5447_v12, %v7968_v44  ;;  %1611 = vrot.lane.b32.xlu1 %v1576_v0, %s9893_s15  ;;  %v1889_v12 = vsel %vm10126_vm6, %v10125_v47, %v1888_v43  ;;  %vm10130_vm6 = vsmask.f32 6400  ;;  %s10195_s15 = sld [smem:[#allocation59_spill]] }
 0x264   : > { %v8560_v25 = vpop.permute.xlu0 %1085  ;;  %v3345_v37 = vpop.f32.mrf.mxu0 }
 0x265   : > { %v3471_v59 = vmul.f32 %v7968_v44, %v3345_v37  ;;  %v8565_v22 = vpop.permute.xlu1 %1087  ;;  %v3516_v19 = vadd.f32 %v7986_v5, %v3473_v14  ;;  %v5704_v14 = vld [vmem:[%s5971_s1 + $0x98] ss:$0 sps:$4 sm:$0x11]   ;;  %v2140_v37 = vshrl.u32 %v5705_v34, 16 }
 0x266   : > { %3157 = vrot.lane.b32.xlu0 %v3104_v18, %s9860_s25  ;;  %v5448_v39 = vpop.f32.mrf.mxu0  ;;  %v2017_v2 = vrot.slane %v5704_v14, 1 }
 0x267   : > { %v3474_v49 = vmul.f32 %v5448_v39, %v7968_v44  ;;  %3159 = vrot.lane.b32.xlu1 %v3112_v50, %s9860_s25  ;;  %v3514_v38 = vadd.f32 %v7986_v5, %v3471_v59  ;;  %v3552_v1 = vmax.f32 %v3516_v19, 0.0  ;;  %v2143_v59 = vshll.u32 %v5705_v34, 16 }
 0x268   : > { %v8573_v56 = vpop.permute.xlu0 %1914  ;;  %v3348_v46 = vpop.f32.mrf.mxu0  ;;  %v2016_v39 = vsel %vm10127_vm15, %v8381_v7, %v2015_v6  ;;  %vm10131_vm15 = vmmov %vm10129_vm5 }
 0x269   : > { %v3517_v45 = vadd.f32 %v7986_v5, %v3474_v49  ;;  %v3472_v33 = vmul.f32 %v7968_v44, %v3348_v46  ;;  %v8578_v42 = vpop.permute.xlu1 %1916  ;;  %v10122_v44 = vld [vmem:[#allocation23_spill] sm:$0xff]  ;;  %v3550_v21 = vmax.f32 %v3514_v38, 0.0  ;;  %v2142_v46 = vrot.slane %v2140_v37, 1 }
 0x26a   : > { %1735 = vrot.lane.b32.xlu0 %v8219_v62, %s9861_s26  ;;  %v10123_v30 = vshrl.u32 %v10122_v44, 16  ;;  %v10124_v8 = vshll.u32 %v10122_v44, 16  ;;  %v2145_v38 = vrot.slane %v2143_v59, 2 }
 0x26b   : > { %v3553_v9 = vmax.f32 %v3517_v45, 0.0  ;;  %v3515_v15 = vadd.f32 %v7986_v5, %v3472_v33  ;;  %1922 = vrot.lane.b32.xlu1 %v10121_v63, %s9868_s30 }
 0x26c   : > { %v8586_v60 = vpop.permute.xlu0 %1138  ;;  %v2133_v54 = vrot.slane %v10123_v30, 1  ;;  %v2136_v62 = vrot.slane %v10124_v8, 2  ;;  %v2146_v63 = vor.u32 %v2145_v38, %v2142_v46 }
 0x26d   : > { %v8593_v17 = vpack.c.bf16 %v3553_v9, %v3552_v1  ;;  %v3551_v5 = vmax.f32 %v3515_v15, 0.0  ;;  %v8595_v0 = vpop.permute.xlu1 %1140 }
 0x26e   : > { %1737 = vrot.lane.b32.xlu0 %v8378_v41, %s9861_s26  ;;  %v2137_v50 = vor.u32 %v2136_v62, %v2133_v54  ;;  %v5813_v41 = vld [vmem:[%s5971_s1 + $0x98] sm:$0xff]   ;;  %v5814_v62 = vld [vmem:[%s5971_s1 + $0xa0] ss:$0 sps:$4 sm:$0x77]  }
 0x26f   : > { %v8599_v13 = vpack.c.bf16 %v3551_v5, %v3550_v21  ;;  %1998 = vrot.lane.b32.xlu1 %v8395_v24, %s9840_s22  ;;  %v2975_v49 = vsel %vm2313_vm7, %v5813_v41, %v10128_v58  ;;  %v1965_v24 = vsel %vm10129_vm5, %v8381_v7, %v1964_v27  ;;  %v2018_v7 = vsel %vm10131_vm15, %v2015_v6, %v2017_v2  ;;  %vm10133_vm5 = vmmov %vm10130_vm6  ;;  %v5706_v27 = vld [vmem:[%s5971_s1 + $0xa0] ss:$0 sps:$4 sm:$0x33]   ;;  %s5851_s1 = smov 127  }
 0x270   : > { %v8606_v18 = vpop.permute.xlu0 %1990  ;;  %v2138_v33 = vsel %vm10130_vm6, %v8412_v23, %v2137_v50  ;;  %v3113_v9 = vshrl.u32 %v2975_v49, 16  ;;  %v3116_v15 = vshll.u32 %v2975_v49, 16  ;;  %v2273_v44 = vrot.slane %v5813_v41, 2  ;;  %v10132_v23 = vld [vmem:[#allocation52_spill] sm:$0xff] }
 0x271   : > { %v8610_v19 = vpop.permute.xlu1 %1992  ;;  %v2977_v21 = vsel %vm2313_vm7, %v5814_v62, %v10132_v23  ;;  %v2147_v5 = vsel %vm10133_vm5, %v2137_v50, %v2146_v63  ;;  %v2222_v6 = vrot.slane %v5705_v34, 2  ;;  %vm10134_vm6 = vcmask 64512  }
 0x272   : > { %1924 = vrot.lane.b32.xlu0 %v1889_v12, %s9868_s30  ;;  %v3115_v54 = vrot.slane %v3113_v9, 2  ;;  %v3118_v8 = vrot.slane %v3116_v15, 3  ;;  %v2274_v12 = vsel %vm9785_vm3, %v8510_v26, %v2273_v44  ;;  %v3121_v14 = vshrl.u32 %v2977_v21, 16  ;;  %s10186_s30 = sld [smem:[#allocation60_spill]] }
 0x273   : > { %2051 = vrot.lane.b32.xlu1 %v2016_v39, %s9846_s21  ;;  %v3124_v37 = vshll.u32 %v2977_v21, 16  ;;  %v2223_v50 = vsel %vm9785_vm3, %v8510_v26, %v2222_v6  ;;  %vm10136_vm15 = vcmask 228352   ;;  %v5816_v6 = vld [vmem:[%s6101_s23 + $0x68] sm:$0xff]   ;;  %vm10137_vm5 = vcmask 293888  }
 0x274   : > { %v8619_v45 = vpop.permute.xlu0 %1268  ;;  %v3119_v39 = vor.u32 %v3118_v8, %v3115_v54  ;;  %v3123_v41 = vrot.slane %v3121_v14, 2 }
 0x275   : > { %v8623_v1 = vpop.permute.xlu1 %1270  ;;  %v3126_v58 = vrot.slane %v3124_v37, 3  ;;  %v10139_v37 = vld [vmem:[#allocation44_spill] sm:$0xff] }
 0x276   : > { %2000 = vrot.lane.b32.xlu0 %v1965_v24, %s9840_s22  ;;  %v3120_v24 = vsel %vm1409_vm4, %v8553_v28, %v3119_v39  ;;  %s5858_s22 = smov 126  }
 0x277   : > { %2180 = vrot.lane.b32.xlu1 %v2138_v33, %s9851_s20  ;;  %v3127_v26 = vor.u32 %v3126_v58, %v3123_v41 }
 0x278   : > { %v2044_v43 = vpop.permute.xlu0 %2043 }
 0x279   : > { %v8628_v30 = vpop.permute.xlu1 %2045  ;;  %v3128_v9 = vsel %vm1409_vm4, %v3119_v39, %v3127_v26  ;;  %vm10135_vm4 = vcmask 195584  }
 0x27a   : > { %2053 = vrot.lane.b32.xlu0 %v2018_v7, %s9846_s21  ;;  %v5815_v7 = vld [vmem:[%s6101_s23 + $0x60] sm:$0xff]   ;;  %s5857_s21 = smov 92  }
 0x27b   : > { %2256 = vrot.lane.b32.xlu1 %v8531_v55, %s9887_s27  ;;  %v2275_v55 = vrot.slane %v5706_v27, 2  ;;  %v2339_v28 = vsel %vm2313_vm7, %v5815_v7, %v8196_v40 }
 0x27c   : > { %v8638_v47 = vpop.permute.xlu0 %1345  ;;  %v2376_v63 = vsel %vm10134_vm6, %v2339_v28, %v8279_v11 }
 0x27d   : > { %v8642_v59 = vpop.permute.xlu1 %1347  ;;  %v2276_v2 = vsel %vm9785_vm3, %v2273_v44, %v2275_v55  ;;  %v2413_v44 = vsel %vm2387_vm9, %v2376_v63, %v8308_v32  ;;  %vm10153_vm3 = vcmask 293888  }
 0x27e   : > { %2182 = vrot.lane.b32.xlu0 %v2147_v5, %s9851_s20  ;;  %v2450_v8 = vsel %vm2424_vm10, %v2413_v44, %v8340_v10  ;;  %v2341_v10 = vsel %vm2313_vm7, %v5816_v6, %v8256_v52  ;;  %s5852_s20 = smov 91  }
 0x27f   : > { %2309 = vrot.lane.b32.xlu1 %v2274_v12, %s9890_s13  ;;  %v2487_v23 = vsel %vm2461_vm11, %v2450_v8, %v8362_v61  ;;  %v2378_v61 = vsel %vm10134_vm6, %v2341_v10, %v8285_v57  ;;  %vm10143_vm6 = vcmask 293888  }
 0x280   : > { %v2173_v34 = vpop.permute.xlu0 %2172  ;;  %v2524_v40 = vsel %vm10135_vm4, %v2487_v23, %v8391_v20  ;;  %vm10138_vm4 = vcmask 326656  }
 0x281   : > { %v2175_v49 = vpop.permute.xlu1 %2174  ;;  %v2561_v21 = vsel %vm10136_vm15, %v2524_v40, %v8434_v31  ;;  %v2415_v31 = vsel %vm2387_vm9, %v2378_v61, %v8315_v36  ;;  %vm10140_vm15 = vcmask 195584  }
 0x282   : > { %2258 = vrot.lane.b32.xlu0 %v2223_v50, %s9887_s27  ;;  %v2598_v32 = vsel %vm2572_vm14, %v2561_v21, %v8473_v4  ;;  %v2452_v52 = vsel %vm2424_vm10, %v2415_v31, %v8342_v16  ;;  %s5334_s27 = sshll.u32 %s10225_s28, 3 }
 0x283   : > { %3161 = vrot.lane.b32.xlu1 %v3120_v24, %s9860_s25  ;;  %v2635_v27 = vsel %vm10137_vm5, %v2598_v32, %v8515_v53  ;;  %v2489_v57 = vsel %vm2461_vm11, %v2452_v52, %v8367_v48  ;;  %vm10142_vm5 = vcmask 228352   ;;  %v8750_v32 = vld [vmem:[%s9620_s6] ss:$0 sm:$0xff] }
 0x284   : > { %v8653_v46 = vpop.permute.xlu0 %1398  ;;  %v2672_v20 = vsel %vm10138_vm4, %v2635_v27, %v8573_v56  ;;  %v2526_v36 = vsel %vm10140_vm15, %v2489_v57, %v10139_v37  ;;  %vm10144_vm4 = vcmask 588800   ;;  %vm10145_vm15 = vcmask 326656  }
 0x285   : > { %v8655_v38 = vpop.permute.xlu1 %1400  ;;  %v2709_v4 = vsel %vm2683_vm2, %v2672_v20, %v8606_v18  ;;  %v10141_v18 = vld [vmem:[#allocation49_spill] sm:$0xff] }
 0x286   : > { %2311 = vrot.lane.b32.xlu0 %v2276_v2, %s9890_s13  ;;  %v2746_v14 = vsel %vm2720_vm1, %v2709_v4, %v2044_v43  ;;  %v2563_v50 = vsel %vm10142_vm5, %v2526_v36, %v10141_v18  ;;  %vm10146_vm5 = vmmov %vm10144_vm4  ;;  %s5601_s13 = smul.u32 6, %s10225_s28 }
 0x287   : > { %v2783_v56 = vsel %vm2757_vm8, %v2746_v14, %v2173_v34  ;;  %v2600_v43 = vsel %vm2572_vm14, %v2563_v50, %v8527_v51 }
 0x288   : > { %v2249_v33 = vpop.permute.xlu0 %2248  ;;  %v2637_v48 = vsel %vm10143_vm6, %v2600_v43, %v8551_v29  ;;  %vm10147_vm6 = vcmask 64512  }
 0x289   : > { %v2251_v15 = vpop.permute.xlu1 %2250  ;;  %v2820_v39 = vsel %vm2794_vm0, %v2783_v56, %v2249_v33  ;;  %v2674_v34 = vsel %vm10145_vm15, %v2637_v48, %v8578_v42  ;;  %vm10149_vm15 = vcmask 195584  }
 0x28a   : > { %3163 = vrot.lane.b32.xlu0 %v3128_v9, %s9860_s25  ;;  %v2711_v24 = vsel %vm2683_vm2, %v2674_v34, %v8610_v19  ;;  %s10222_s25 = sld [smem:[#allocation61_spill]] }
 0x28b   : > { %v2748_v51 = vsel %vm2720_vm1, %v2711_v24, %v8628_v30  ;;  %v8740_v30 = vld [vmem:[%s9619_s5] ss:$0 sm:$0xff] }
 0x28c   : > { %v8667_v54 = vpop.permute.xlu0 %1528  ;;  %v2785_v33 = vsel %vm2757_vm8, %v2748_v51, %v2175_v49 }
 0x28d   : > { %v8671_v62 = vpop.permute.xlu1 %1530  ;;  %v2822_v9 = vsel %vm2794_vm0, %v2785_v33, %v2251_v15 }
 0x290   : > { %v2302_v11 = vpop.permute.xlu0 %2301 }
 0x291   : > { %v2304_v5 = vpop.permute.xlu1 %2303  ;;  %v2857_v55 = vsel %vm2831_vm12, %v2820_v39, %v2302_v11 }
 0x292   : > { %v2859_v29 = vsel %vm2831_vm12, %v2822_v9, %v2304_v5 }
 0x294   : > { %v8694_v12 = vpop.permute.xlu0 %1605 }
 0x295   : > { %v8699_v53 = vpop.permute.xlu1 %1012 }
 0x298   : > { %v3154_v16 = vpop.permute.xlu0 %3153 }
 0x299   : > { %v3191_v41 = vsel %vm3165_vm13, %v2857_v55, %v3154_v16  ;;  %v8713_v58 = vpop.permute.xlu1 %1731 }
 0x29a   : > { %5461 = vmatprep.mubr.msk.bf16.mxu0 %vm10144_vm4, %v3191_v41  ;;  %vm10148_vm4 = vmmov %vm10147_vm6 }
 0x29c   : > { %v8722_v2 = vpop.permute.xlu0 %1607 }
 0x29d   : > { %v8726_v26 = vpop.permute.xlu1 %1014 }
 0x2a0   : > { %v3156_v7 = vpop.permute.xlu0 %3155 }
 0x2a1   : > { %v3193_v28 = vsel %vm3165_vm13, %v2859_v29, %v3156_v7  ;;  %v8732_v42 = vpop.permute.xlu1 %1733  ;;  %v5819_v7 = vld [vmem:[%s6101_s23 + $0x70] sm:$0xff]  }
 0x2a2   : > { %v5451_v63 = vpop.f32.mrf.mxu0  ;;  %5462 = vmatmul.mubr.msk.bf16.gmra.mxu0 %vm10146_vm5, %v3193_v28  ;;  %v2343_v28 = vsel %vm2313_vm7, %v5819_v7, %v8482_v3  ;;  %vm10150_vm5 = vmmov %vm10149_vm15 }
 0x2a3   : > { %v3477_v8 = vmul.f32 %v8740_v30, %v5451_v63  ;;  %v5820_v63 = vld [vmem:[%s6101_s23 + $0x78] sm:$0xff]  }
 0x2a4   : > { %v8735_v19 = vpop.permute.xlu0 %1089  ;;  %v3361_v44 = vpop.f32.mrf.mxu0 }
 0x2a5   : > { %v3475_v49 = vmul.f32 %v8740_v30, %v3361_v44  ;;  %v8743_v15 = vpop.permute.xlu1 %1091  ;;  %v3520_v61 = vadd.f32 %v8750_v32, %v3477_v8  ;;  %v2345_v44 = vsel %vm2313_vm7, %v5820_v63, %v8536_v35 }
 0x2a6   : > { %v5452_v23 = vpop.f32.mrf.mxu0  ;;  %v2382_v8 = vsel %vm10148_vm4, %v2345_v44, %v8565_v22 }
 0x2a7   : > { %v3478_v40 = vmul.f32 %v8740_v30, %v5452_v23  ;;  %v3518_v5 = vadd.f32 %v8750_v32, %v3475_v49  ;;  %v3556_v56 = vmax.f32 %v3520_v61, 0.0  ;;  %v2380_v49 = vsel %vm10147_vm6, %v2343_v28, %v8560_v25 }
 0x2a8   : > { %v1919_v21 = vpop.permute.xlu0 %1918  ;;  %v3364_v11 = vpop.f32.mrf.mxu0  ;;  %v2417_v23 = vsel %vm2387_vm9, %v2380_v49, %v8586_v60  ;;  %vm10151_vm6 = vcmask 228352  }
 0x2a9   : > { %v3521_v6 = vadd.f32 %v8750_v32, %v3478_v40  ;;  %v3476_v10 = vmul.f32 %v8740_v30, %v3364_v11  ;;  %v1921_v27 = vpop.permute.xlu1 %1920  ;;  %v3554_v52 = vmax.f32 %v3518_v5, 0.0  ;;  %v2419_v11 = vsel %vm2387_vm9, %v2382_v8, %v8595_v0  ;;  %vm10152_vm4 = vmmov %vm10151_vm6  ;;  %v5821_v8 = vld [vmem:[%s6101_s23 + $0x80] sm:$0xff]  }
 0x2aa   : > { %v2454_v3 = vsel %vm2424_vm10, %v2417_v23, %v8619_v45  ;;  %v2456_v35 = vsel %vm2424_vm10, %v2419_v11, %v8623_v1  ;;  %v2347_v23 = vsel %vm2313_vm7, %v5821_v8, %v8699_v53  ;;  %v10174_v8 = vld [vmem:[#allocation42_spill] sm:$0xff] }
 0x2ab   : > { %v3519_v20 = vadd.f32 %v8750_v32, %v3476_v10  ;;  %v3557_v31 = vmax.f32 %v3521_v6, 0.0  ;;  %v2491_v25 = vsel %vm2461_vm11, %v2454_v3, %v8638_v47  ;;  %v2493_v22 = vsel %vm2461_vm11, %v2456_v35, %v8642_v59 }
 0x2ac   : > { %v8757_v4 = vpop.permute.xlu0 %1142  ;;  %v2528_v60 = vsel %vm10149_vm15, %v2491_v25, %v8653_v46  ;;  %v2530_v0 = vsel %vm10150_vm5, %v2493_v22, %v8655_v38  ;;  %vm10154_vm15 = vmmov %vm10153_vm3  ;;  %vm10155_vm5 = vcmask 326656  }
 0x2ad   : > { %v3555_v14 = vmax.f32 %v3519_v20, 0.0  ;;  %v8759_v57 = vpop.permute.xlu1 %1144  ;;  %v3585_v36 = vpack.c.bf16 %v3557_v31, %v3556_v56  ;;  %v2565_v45 = vsel %vm10151_vm6, %v2528_v60, %v8667_v54  ;;  %v2567_v10 = vsel %vm10152_vm4, %v2530_v0, %v8671_v62  ;;  %vm10156_vm6 = vmmov %vm10155_vm5 }
 0x2ae   : > { %v2602_v1 = vsel %vm2572_vm14, %v2565_v45, %v8694_v12  ;;  %v2604_v59 = vsel %vm2572_vm14, %v2567_v10, %v8722_v2 }
 0x2af   : > { %v3584_v37 = vpack.c.bf16 %v3555_v14, %v3554_v52  ;;  %v2639_v46 = vsel %vm10153_vm3, %v2602_v1, %v8713_v58  ;;  %v2641_v38 = vsel %vm10154_vm15, %v2604_v59, %v8732_v42  ;;  %vm10157_vm3 = vcmask 588800  }
 0x2b0   : > { %v1995_v39 = vpop.permute.xlu0 %1994  ;;  %v2676_v61 = vsel %vm10155_vm5, %v2639_v46, %v1919_v21  ;;  %v2678_v54 = vsel %vm10156_vm6, %v2641_v38, %v1921_v27  ;;  %vm10158_vm4 = vmmov %vm10157_vm3  ;;  %vm10159_vm15 = vcmask 64512   ;;  %vm10160_vm5 = vcmask 195584  }
 0x2b1   : > { %5487 = vmatprep.mubr.msk.bf16.mxu1 %vm2313_vm7, %v3584_v37  ;;  %v1997_v18 = vpop.permute.xlu1 %1996  ;;  %v2713_v20 = vsel %vm2683_vm2, %v2676_v61, %v1995_v39  ;;  %v2384_v3 = vsel %vm10159_vm15, %v2347_v23, %v8735_v19  ;;  %vm10161_vm6 = vcmask 228352  }
 0x2b2   : > { %5488 = vmatmul.mubr.msk.bf16.vlgmr.msra.gmra.mxu1 %vm2313_vm7, %v3585_v36  ;;  %v2715_v31 = vsel %vm2683_vm2, %v2678_v54, %v1997_v18  ;;  %v2421_v22 = vsel %vm2387_vm9, %v2384_v3, %v8757_v4 }
 0x2b4   : > { %v8763_v50 = vpop.permute.xlu0 %1272 }
 0x2b5   : > { %v8765_v55 = vpop.permute.xlu1 %1274  ;;  %v2458_v53 = vsel %vm2424_vm10, %v2421_v22, %v8763_v50 }
 0x2b8   : > { %v2048_v16 = vpop.permute.xlu0 %2047 }
 0x2b9   : > { %v2050_v43 = vpop.permute.xlu1 %2049  ;;  %v2750_v12 = vsel %vm2720_vm1, %v2713_v20, %v2048_v16  ;;  %v5822_v20 = vld [vmem:[%s6101_s23 + $0x88] sm:$0xff]   ;;  %s10175_s23 = sld [smem:[#allocation55_spill]] }
 0x2ba   : > { %v2752_v2 = vsel %vm2720_vm1, %v2715_v31, %v2050_v43  ;;  %v2349_v50 = vsel %vm2313_vm7, %v5822_v20, %v8726_v26 }
 0x2bc   : > { %v8767_v41 = vpop.permute.xlu0 %1349 }
 0x2bd   : > { %v8769_v48 = vpop.permute.xlu1 %1351  ;;  %v2495_v19 = vsel %vm2461_vm11, %v2458_v53, %v8767_v41 }
 0x2bf   : > { %s625_s24 = scalar_lea.vmem %s10175_s23, %s5334_s27  ;;  %s630_s27 = scalar_lea.vmem %s9617_s3, %s5601_s13 }
 0x2c0   : > { %v2177_v34 = vpop.permute.xlu0 %2176  ;;  %v8920_v53 = vld [vmem:[%s625_s24] sm:$0xff]   ;;  %s5853_s23 = smov 110   ;;  %s5854_s24 = smov 109  }
 0x2c1   : > { %v2179_v24 = vpop.permute.xlu1 %2178  ;;  %v2787_v58 = vsel %vm2757_vm8, %v2750_v12, %v2177_v34 }
 0x2c2   : > { %v2789_v14 = vsel %vm2757_vm8, %v2752_v2, %v2179_v24 }
 0x2c4   : > { %v8771_v51 = vpop.permute.xlu0 %1402 }
 0x2c5   : > { %v8773_v33 = vpop.permute.xlu1 %1404  ;;  %v2532_v4 = vsel %vm10160_vm5, %v2495_v19, %v8771_v51 }
 0x2c8   : > { %v2253_v9 = vpop.permute.xlu0 %2252 }
 0x2c9   : > { %v2255_v29 = vpop.permute.xlu1 %2254  ;;  %v2824_v42 = vsel %vm2794_vm0, %v2787_v58, %v2253_v9 }
 0x2ca   : > { %v2826_v21 = vsel %vm2794_vm0, %v2789_v14, %v2255_v29 }
 0x2cc   : > { %v8787_v40 = vpop.permute.xlu0 %1532 }
 0x2cd   : > { %v8793_v5 = vpop.permute.xlu1 %1534  ;;  %v2569_v46 = vsel %vm10161_vm6, %v2532_v4, %v8787_v40 }
 0x2d0   : > { %v2306_v6 = vpop.permute.xlu0 %2305 }
 0x2d1   : > { %v2308_v47 = vpop.permute.xlu1 %2307  ;;  %v2861_v27 = vsel %vm2831_vm12, %v2824_v42, %v2306_v6 }
 0x2d2   : > { %v2863_v37 = vsel %vm2831_vm12, %v2826_v21, %v2308_v47 }
 0x2d4   : > { %v1610_v62 = vpop.permute.xlu0 %1609 }
 0x2d5   : > { %v8822_v52 = vpop.permute.xlu1 %1611  ;;  %v2606_v31 = vsel %vm2572_vm14, %v2569_v46, %v1610_v62 }
 0x2d8   : > { %v3158_v56 = vpop.permute.xlu0 %3157 }
 0x2d9   : > { %v3195_v36 = vsel %vm3165_vm13, %v2861_v27, %v3158_v56  ;;  %v3160_v39 = vpop.permute.xlu1 %3159 }
 0x2da   : > { %5465 = vmatprep.mubr.msk.bf16.mxu0 %vm10157_vm3, %v3195_v36  ;;  %v3197_v18 = vsel %vm3165_vm13, %v2863_v37, %v3160_v39  ;;  %vm10162_vm3 = vmmov %vm10159_vm15  ;;  %vm10164_vm15 = vcmask 326656  }
 0x2db   : > { %5466 = vmatmul.mubr.msk.bf16.gmra.mxu0 %vm10158_vm4, %v3197_v18  ;;  %v2386_v12 = vsel %vm10162_vm3, %v2349_v50, %v8743_v15  ;;  %vm10163_vm4 = vcmask 293888   ;;  %vm10169_vm3 = vcmask 588800  }
 0x2dc   : > { %v1736_v16 = vpop.permute.xlu0 %1735  ;;  %v2423_v58 = vsel %vm2387_vm9, %v2386_v12, %v8759_v57  ;;  %vm10165_vm9 = vmmov %vm10160_vm5 }
 0x2dd   : > { %v1923_v43 = vpop.permute.xlu1 %1922  ;;  %v2643_v51 = vsel %vm10163_vm4, %v2606_v31, %v1736_v16  ;;  %v2460_v21 = vsel %vm2424_vm10, %v2423_v58, %v8765_v55  ;;  %vm10166_vm5 = vmmov %vm10161_vm6 }
 0x2de   : > { %v2680_v40 = vsel %vm10164_vm15, %v2643_v51, %v1923_v43  ;;  %v2497_v15 = vsel %vm2461_vm11, %v2460_v21, %v8769_v48  ;;  %vm10167_vm11 = vmmov %vm10163_vm4 }
 0x2df   : > { %v2534_v57 = vsel %vm10165_vm9, %v2497_v15, %v8773_v33  ;;  %vm10168_vm6 = vmmov %vm10164_vm15  ;;  %vm4754_vm9 = vcmask 744448  }
 0x2e0   : > { %v1738_v34 = vpop.permute.xlu0 %1737  ;;  %v2571_v55 = vsel %vm10166_vm5, %v2534_v57, %v8793_v5  ;;  %v5848_v57 = vmov 0  }
 0x2e1   : > { %v1999_v24 = vpop.permute.xlu1 %1998  ;;  %v2608_v39 = vsel %vm2572_vm14, %v2571_v55, %v8822_v52  ;;  %vm10170_vm14 = vmmov %vm10169_vm3  ;;  %5640 = vset.pattern.permute.xlu1 %v5848_v57  ;;  %5641 = vset.pattern.permute.xlu0 %v5848_v57 }
 0x2e2   : > { %v5455_v9 = vpop.f32.mrf.mxu0  ;;  %v2717_v26 = vsel %vm2683_vm2, %v2680_v40, %v1999_v24  ;;  %v2645_v16 = vsel %vm10167_vm11, %v2608_v39, %v1738_v34 }
 0x2e3   : > { %v3481_v44 = vmul.f32 %v8740_v30, %v5455_v9 }
 0x2e4   : > { %v1925_v29 = vpop.permute.xlu0 %1924  ;;  %v3377_v7 = vpop.f32.mrf.mxu0 }
 0x2e5   : > { %v3479_v28 = vmul.f32 %v8740_v30, %v3377_v7  ;;  %v2052_v63 = vpop.permute.xlu1 %2051  ;;  %v3524_v10 = vadd.f32 %v8750_v32, %v3481_v44  ;;  %v2682_v33 = vsel %vm10168_vm6, %v2645_v16, %v1925_v29  ;;  %v10171_v29 = vld [vmem:[#allocation48_spill] sm:$0xff]  ;;  %v10172_v44 = vld [vmem:[#allocation46_spill] sm:$0xff] }
 0x2e6   : > { %v5456_v49 = vpop.f32.mrf.mxu0  ;;  %v2754_v27 = vsel %vm2720_vm1, %v2717_v26, %v2052_v63 }
 0x2e7   : > { %v3482_v11 = vmul.f32 %v8740_v30, %v5456_v49  ;;  %v3522_v60 = vadd.f32 %v8750_v32, %v3479_v28  ;;  %v3560_v41 = vmax.f32 %v3524_v10, 0.0  ;;  %v10173_v49 = vld [vmem:[#allocation25_spill] sm:$0xff] }
 0x2e8   : > { %v2001_v35 = vpop.permute.xlu0 %2000  ;;  %v3380_v25 = vpop.f32.mrf.mxu0 }
 0x2e9   : > { %v3525_v0 = vadd.f32 %v8750_v32, %v3482_v11  ;;  %v3480_v45 = vmul.f32 %v8740_v30, %v3380_v25  ;;  %v2181_v6 = vpop.permute.xlu1 %2180  ;;  %v3558_v38 = vmax.f32 %v3522_v60, 0.0  ;;  %v2719_v24 = vsel %vm2683_vm2, %v2682_v33, %v2001_v35 }
 0x2ea   : > { %v2791_v56 = vsel %vm2757_vm8, %v2754_v27, %v2181_v6  ;;  %v5847_v6 = vmov 0.0   ;;  %v3842_v27 = vld [vmem:[%s9624_s10] sm:$0xf] }
 0x2eb   : > { %v3523_v1 = vadd.f32 %v8750_v32, %v3480_v45  ;;  %v3561_v47 = vmax.f32 %v3525_v0, 0.0  ;;  %5511 = vmatprep.subr.bf16.mxu1 %v5847_v6  ;;  %3845 = vperm.xlu1 %5640, %v3842_v27  }
 0x2ec   : > { %v2054_v59 = vpop.permute.xlu0 %2053  ;;  %5512 = vmatpush3.bf16.msra.mxu1 %v8920_v53 }
 0x2ed   : > { %v3559_v61 = vmax.f32 %v3523_v1, 0.0  ;;  %v2257_v54 = vpop.permute.xlu1 %2256  ;;  %v3587_v14 = vpack.c.bf16 %v3561_v47, %v3560_v41  ;;  %v2756_v9 = vsel %vm2720_vm1, %v2719_v24, %v2054_v59  ;;  %5517 = vmatprep.subr.bf16.mxu1 %v5847_v6  ;;  %vm10176_vm1 = vcmask 1041408  }
 0x2ee   : > { %v2828_v37 = vsel %vm2794_vm0, %v2791_v56, %v2257_v54  ;;  %vm10177_vm2 = vmmov %vm10176_vm1 }
 0x2ef   : > { %v3586_v2 = vpack.c.bf16 %v3559_v61, %v3558_v38  ;;  %vm10181_vm4 = vmmov %vm10176_vm1 }
 0x2f0   : > { %v2183_v42 = vpop.permute.xlu0 %2182  ;;  %vm10182_vm15 = vmmov %vm10176_vm1 }
 0x2f1   : > { %5491 = vmatprep.mubr.msk.bf16.mxu1 %vm2313_vm7, %v3586_v2  ;;  %v2310_v62 = vpop.permute.xlu1 %2309  ;;  %v2793_v7 = vsel %vm2757_vm8, %v2756_v9, %v2183_v42  ;;  %vm10178_vm8 = vmmov %vm10176_vm1 }
 0x2f2   : > { %5492 = vmatmul.mubr.msk.bf16.gmra.mxu1 %vm2313_vm7, %v3587_v14  ;;  %v2865_v48 = vsel %vm2831_vm12, %v2828_v37, %v2310_v62 }
 0x2f4   : > { %v2259_v36 = vpop.permute.xlu0 %2258 }
 0x2f5   : > { %v3162_v18 = vpop.permute.xlu1 %3161  ;;  %v2830_v52 = vsel %vm2794_vm0, %v2793_v7, %v2259_v36  ;;  %vm5849_vm0 = vmmov 0  }
 0x2f6   : > { %v3199_v43 = vsel %vm3165_vm13, %v2865_v48, %v3162_v18 }
 0x2f7   : > { %5469 = vmatprep.mubr.msk.bf16.mxu0 %vm10169_vm3, %v3199_v43  ;;  %vm4669_vm3 = vcmask 154624  }
 0x2f8   : > { %v2312_v5 = vpop.permute.xlu0 %2311 }
 0x2f9   : > { %v2867_v28 = vsel %vm2831_vm12, %v2830_v52, %v2312_v5  ;;  %vm4694_vm12 = vcmask 1039360  }
 0x2fc   : > { %v3164_v63 = vpop.permute.xlu0 %3163 }
 0x2fd   : > { %v3201_v34 = vsel %vm3165_vm13, %v2867_v28, %v3164_v63  ;;  %vm10180_vm13 = vmmov %vm10176_vm1 }
 0x2fe   : > { %5470 = vmatmul.mubr.msk.bf16.gmra.mxu0 %vm10170_vm14, %v3201_v34  ;;  %vm4727_vm14 = vcmask 891904  }
 0x2ff   : > { %5475 = vmatprep.mubr.msk.bf16.mxu0 %vm2313_vm7, %v10171_v29 }
 0x306   : > { %5476 = vmatmul.mubr.msk.bf16.vlgmr.msra.gmra.mxu0 %vm2313_vm7, %v10172_v44 }
 0x307   : > { %5479 = vmatprep.mubr.msk.bf16.mxu0 %vm2313_vm7, %v10173_v49 }
 0x30e   : > { %5480 = vmatmul.mubr.msk.bf16.gmra.mxu0 %vm2313_vm7, %v10174_v8 }
 0x30f   : > { %5483 = vmatprep.mubr.msk.bf16.mxu0 %vm2313_vm7, %v8599_v13 }
 0x316   : > { %5484 = vmatmul.mubr.msk.bf16.gmra.mxu0 %vm2313_vm7, %v8593_v17 }
 0x322   : > { %v5459_v23 = vpop.f32.mrf.mxu0 }
 0x323   : > { %v3485_v35 = vmul.f32 %v8740_v30, %v5459_v23 }
 0x324   : > { %v3393_v11 = vpop.f32.mrf.mxu0 }
 0x325   : > { %v3483_v3 = vmul.f32 %v8740_v30, %v3393_v11  ;;  %v3528_v17 = vadd.f32 %v8750_v32, %v3485_v35 }
 0x326   : > { %v5460_v25 = vpop.f32.mrf.mxu0 }
 0x327   : > { %v3486_v22 = vmul.f32 %v8740_v30, %v5460_v25  ;;  %v3526_v0 = vadd.f32 %v8750_v32, %v3483_v3  ;;  %v3564_v47 = vmax.f32 %v3528_v17, 0.0 }
 0x328   : > { %v3396_v60 = vpop.f32.mrf.mxu0 }
 0x329   : > { %v3529_v45 = vadd.f32 %v8750_v32, %v3486_v22  ;;  %v3484_v13 = vmul.f32 %v8740_v30, %v3396_v60  ;;  %v3562_v1 = vmax.f32 %v3526_v0, 0.0 }
 0x32b   : > { %v3527_v10 = vadd.f32 %v8750_v32, %v3484_v13  ;;  %v3565_v19 = vmax.f32 %v3529_v45, 0.0 }
 0x32d   : > { %v3563_v4 = vmax.f32 %v3527_v10, 0.0  ;;  %v3589_v46 = vpack.c.bf16 %v3565_v19, %v3564_v47 }
 0x32f   : > { %v3588_v59 = vpack.c.bf16 %v3563_v4, %v3562_v1  ;;  %v8963_v1 = vld [vmem:[%s9622_s8] ss:$0 sm:$0xff] }
 0x331   : > { %5495 = vmatprep.mubr.msk.bf16.mxu1 %vm2313_vm7, %v3588_v59 }
 0x332   : > { %5496 = vmatmul.mubr.msk.bf16.gmra.mxu1 %vm2313_vm7, %v3589_v46 }
 0x362   : > { %v5463_v38 = vpop.f32.mrf.mxu0 }
 0x363   : > { %v3489_v20 = vmul.f32 %v8740_v30, %v5463_v38 }
 0x364   : > { %v3409_v61 = vpop.f32.mrf.mxu0 }
 0x365   : > { %v3487_v54 = vmul.f32 %v8740_v30, %v3409_v61  ;;  %v3532_v58 = vadd.f32 %v8750_v32, %v3489_v20 }
 0x366   : > { %v5464_v50 = vpop.f32.mrf.mxu0 }
 0x367   : > { %v3490_v31 = vmul.f32 %v8740_v30, %v5464_v50  ;;  %v3530_v12 = vadd.f32 %v8750_v32, %v3487_v54  ;;  %v3568_v26 = vmax.f32 %v3532_v58, 0.0  ;;  %v3841_v58 = vld [vmem:[%s9623_s9] sm:$0x3] }
 0x368   : > { %v3412_v41 = vpop.f32.mrf.mxu0 }
 0x369   : > { %v3533_v51 = vadd.f32 %v8750_v32, %v3490_v31  ;;  %v3488_v2 = vmul.f32 %v8740_v30, %v3412_v41  ;;  %v3566_v42 = vmax.f32 %v3530_v12, 0.0 }
 0x36b   : > { %v3531_v40 = vadd.f32 %v8750_v32, %v3488_v2  ;;  %v3569_v14 = vmax.f32 %v3533_v51, 0.0 }
 0x36d   : > { %v3567_v21 = vmax.f32 %v3531_v40, 0.0  ;;  %v3591_v15 = vpack.c.bf16 %v3569_v14, %v3568_v26 }
 0x36f   : > { %v3590_v62 = vpack.c.bf16 %v3567_v21, %v3566_v42 }
 0x371   : > { %5499 = vmatprep.mubr.msk.bf16.mxu1 %vm2313_vm7, %v3590_v62 }
 0x372   : > { %5500 = vmatmul.mubr.msk.bf16.gmra.mxu1 %vm2313_vm7, %v3591_v15 }
 0x39b   : > { %v5467_v56 = vpop.f32.mrf.mxu0 }
 0x39c   : > { %v3493_v36 = vmul.f32 %v8740_v30, %v5467_v56 }
 0x39d   : > { %v3425_v55 = vpop.f32.mrf.mxu0 }
 0x39e   : > { %v3491_v37 = vmul.f32 %v8740_v30, %v3425_v55  ;;  %v3536_v24 = vadd.f32 %v8750_v32, %v3493_v36 }
 0x39f   : > { %v5468_v39 = vpop.f32.mrf.mxu0 }
 0x3a0   : > { %v3494_v48 = vmul.f32 %v8740_v30, %v5468_v39  ;;  %v3534_v16 = vadd.f32 %v8750_v32, %v3491_v37  ;;  %v3572_v28 = vmax.f32 %v3536_v24, 0.0  ;;  %v3897_v37 = vld [vmem:[%s9625_s11] sm:$0x3] }
 0x3a1   : > { %v3428_v18 = vpop.f32.mrf.mxu0 }
 0x3a2   : > { %v3537_v43 = vadd.f32 %v8750_v32, %v3494_v48  ;;  %v3492_v33 = vmul.f32 %v8740_v30, %v3428_v18  ;;  %v3570_v7 = vmax.f32 %v3534_v16, 0.0  ;;  %v5489_v16 = vpop.f32.mrf.mxu1 }
 0x3a4   : > { %v3535_v5 = vadd.f32 %v8750_v32, %v3492_v33  ;;  %v3573_v9 = vmax.f32 %v3537_v43, 0.0  ;;  %v3744_v43 = vpop.f32.mrf.mxu1 }
 0x3a6   : > { %v3571_v52 = vmax.f32 %v3535_v5, 0.0  ;;  %v3593_v34 = vpack.c.bf16 %v3573_v9, %v3572_v28  ;;  %v5490_v33 = vpop.f32.mrf.mxu1 }
 0x3a8   : > { %v3592_v63 = vpack.c.bf16 %v3571_v52, %v3570_v7  ;;  %v3747_v24 = vpop.f32.mrf.mxu1 }
 0x3aa   : > { %5503 = vmatprep.mubr.msk.bf16.mxu1 %vm2313_vm7, %v3592_v63 }
 0x3ab   : > { %5504 = vmatmul.mubr.msk.bf16.gmra.mxu1 %vm2313_vm7, %v3593_v34 }
 0x3b2   : > { %v5493_v5 = vpop.f32.mrf.mxu1 }
 0x3b4   : > { %v3760_v9 = vpop.f32.mrf.mxu1 }
 0x3b6   : > { %v5494_v7 = vpop.f32.mrf.mxu1 }
 0x3b8   : > { %v3763_v52 = vpop.f32.mrf.mxu1 }
 0x3be   : > { %v5471_v29 = vpop.f32.mrf.mxu0 }
 0x3bf   : > { %v3497_v8 = vmul.f32 %v8740_v30, %v5471_v29 }
 0x3c0   : > { %v3441_v44 = vpop.f32.mrf.mxu0 }
 0x3c1   : > { %v3495_v49 = vmul.f32 %v8740_v30, %v3441_v44  ;;  %v3540_v60 = vadd.f32 %v8750_v32, %v3497_v8 }
 0x3c2   : > { %v5472_v23 = vpop.f32.mrf.mxu0 }
 0x3c3   : > { %v3498_v11 = vmul.f32 %v8740_v30, %v5472_v23  ;;  %v3538_v35 = vadd.f32 %v8750_v32, %v3495_v49  ;;  %v3576_v4 = vmax.f32 %v3540_v60, 0.0 }
 0x3c4   : > { %v3444_v3 = vpop.f32.mrf.mxu0 }
 0x3c5   : > { %v3541_v25 = vadd.f32 %v8750_v32, %v3498_v11  ;;  %v3496_v22 = vmul.f32 %v8740_v30, %v3444_v3  ;;  %v3574_v10 = vmax.f32 %v3538_v35, 0.0 }
 0x3c6   : > { %v5477_v0 = vpop.f32.mrf.mxu0 }
 0x3c7   : > { %v3539_v45 = vadd.f32 %v8750_v32, %v3496_v22  ;;  %v3577_v13 = vmax.f32 %v3541_v25, 0.0  ;;  %v8966_v46 = vadd.f32 %v5477_v0, %v8963_v1 }
 0x3c8   : > { %v3696_v17 = vpop.f32.mrf.mxu0 }
 0x3c9   : > { %v3575_v19 = vmax.f32 %v3539_v45, 0.0  ;;  %v3595_v38 = vpack.c.bf16 %v3577_v13, %v3576_v4  ;;  %v3697_v61 = vadd.f32 %v8963_v1, %v3696_v17  ;;  %v3846_v13 = vpop.permute.xlu1 %3845 }
 0x3ca   : > { %v5478_v47 = vpop.f32.mrf.mxu0 }
 0x3cb   : > { %v3594_v59 = vpack.c.bf16 %v3575_v19, %v3574_v10  ;;  %v8969_v30 = vadd.f32 %v5478_v47, %v8963_v1  ;;  %v3748_v47 = vadd.f32 %v8963_v1, %v3747_v24 }
 0x3cc   : > { %v3699_v32 = vpop.f32.mrf.mxu0 }
 0x3cd   : > { %v3948_v54 = vpack.c.bf16 %v8969_v30, %v8966_v46  ;;  %v3700_v20 = vadd.f32 %v8963_v1, %v3699_v32  ;;  %5507 = vmatprep.mubr.msk.bf16.mxu1 %vm2313_vm7, %v3594_v59  ;;  %v3745_v32 = vadd.f32 %v8963_v1, %v3744_v43 }
 0x3ce   : > { %v5481_v50 = vpop.f32.mrf.mxu0  ;;  %5508 = vmatmul.mubr.msk.bf16.gmra.mxu1 %vm2313_vm7, %v3595_v38 }
 0x3cf   : > { %v3947_v31 = vpack.c.bf16 %v3700_v20, %v3697_v61  ;;  %5513 = vmatprep.mubr.msk.bf16.mxu1 %vm5849_vm0, %v5847_v6  ;;  %v8981_v51 = vadd.f32 %v5481_v50, %v8963_v1  ;;  %v3953_v20 = vpack.c.bf16 %v3748_v47, %v3745_v32 }
 0x3d0   : > { %v3712_v41 = vpop.f32.mrf.mxu0 }
 0x3d1   : > { %5525 = vmatprep.mubr.msk.bf16.mxu0 %vm2313_vm7, %v3947_v31  ;;  %v8990_v14 = vadd.f32 %v8963_v1, %v3712_v41  ;;  %v3756_v41 = vadd.f32 %v5490_v33, %v8963_v1 }
 0x3d2   : > { %v5482_v12 = vpop.f32.mrf.mxu0 }
 0x3d3   : > { %v8984_v2 = vadd.f32 %v5482_v12, %v8963_v1  ;;  %v3764_v12 = vadd.f32 %v8963_v1, %v3763_v52 }
 0x3d4   : > { %v3715_v40 = vpop.f32.mrf.mxu0 }
 0x3d5   : > { %v3950_v42 = vpack.c.bf16 %v8984_v2, %v8981_v51  ;;  %v3716_v21 = vadd.f32 %v8963_v1, %v3715_v40  ;;  %v3753_v40 = vadd.f32 %v5489_v16, %v8963_v1 }
 0x3d6   : > { %v5485_v26 = vpop.f32.mrf.mxu0  ;;  %5514 = vmatmul.mubr.msk.bf16.vlgmr.msra.gmra.mxu1 %vm2424_vm10, %v3841_v58 }
 0x3d7   : > { %v3949_v62 = vpack.c.bf16 %v3716_v21, %v8990_v14  ;;  %5518 = vmatpush3.bf16.msra.mxu1 %v8920_v53  ;;  %5519 = vmatprep.mubr.msk.bf16.mxu1 %vm5849_vm0, %v5847_v6  ;;  %v3737_v56 = vadd.f32 %v5485_v26, %v8963_v1  ;;  %v3761_v14 = vadd.f32 %v8963_v1, %v3760_v9 }
 0x3d8   : > { %v3728_v15 = vpop.f32.mrf.mxu0  ;;  %v3954_v46 = vpack.c.bf16 %v3756_v41, %v3753_v40 }
 0x3d9   : > { %v3729_v39 = vadd.f32 %v8963_v1, %v3728_v15  ;;  %v3955_v30 = vpack.c.bf16 %v3764_v12, %v3761_v14 }
 0x3da   : > { %v5486_v27 = vpop.f32.mrf.mxu0 }
 0x3db   : > { %v3740_v55 = vadd.f32 %v5486_v27, %v8963_v1 }
 0x3dc   : > { %v3731_v36 = vpop.f32.mrf.mxu0 }
 0x3dd   : > { %v3952_v48 = vpack.c.bf16 %v3740_v55, %v3737_v56  ;;  %v3732_v18 = vadd.f32 %v8963_v1, %v3731_v36 }
 0x3de   : > { %5520 = vmatmul.mubr.msk.bf16.vlgmr.msra.gmra.mxu1 %vm2424_vm10, %v3897_v37  ;;  %vm4245_vm10 = vcmask 900096  }
 0x3df   : > { %v3951_v53 = vpack.c.bf16 %v3732_v18, %v3729_v39 }
 0x3e1   : > { %5533 = vmatprep.mubr.msk.bf16.mxu1 %vm2313_vm7, %v3951_v53 }
 0x3f2   : > { %v5497_v28 = vpop.f32.mrf.mxu1 }
 0x3f4   : > { %v3776_v63 = vpop.f32.mrf.mxu1 }
 0x3f5   : > { %v3777_v15 = vadd.f32 %v8963_v1, %v3776_v63 }
 0x3f6   : > { %v5498_v34 = vpop.f32.mrf.mxu1 }
 0x3f7   : > { %v3788_v51 = vadd.f32 %v5498_v34, %v8963_v1 }
 0x3f8   : > { %v3779_v29 = vpop.f32.mrf.mxu1 }
 0x3f9   : > { %v3780_v26 = vadd.f32 %v8963_v1, %v3779_v29  ;;  %v4204_v29 = vlaneseq }
 0x3fb   : > { %v3957_v56 = vpack.c.bf16 %v3780_v26, %v3777_v15 }
 0x432   : > { %v9009_v44 = vpop.f32.mrf.mxu1 }
 0x433   : > { %v3801_v18 = vadd.f32 %v9009_v44, %v8963_v1  ;;  %v4200_v44 = vld [vmem:[%s9631_s17] sm:$0x1] }
 0x434   : > { %v3792_v49 = vpop.f32.mrf.mxu1 }
 0x435   : > { %v3793_v55 = vadd.f32 %v8963_v1, %v3792_v49  ;;  %v4201_v49 = vsub.f32 1.0, %v4200_v44 }
 0x436   : > { %v5502_v8 = vpop.f32.mrf.mxu1 }
 0x437   : > { %v3804_v39 = vadd.f32 %v5502_v8, %v8963_v1  ;;  %v9084_v8 = vshrl.u32 %v4204_v29, 7 }
 0x438   : > { %v3795_v23 = vpop.f32.mrf.mxu1 }
 0x439   : > { %v3796_v2 = vadd.f32 %v8963_v1, %v3795_v23  ;;  %v3960_v16 = vpack.c.bf16 %v3804_v39, %v3801_v18  ;;  %v4202_v23 = vmul.f32 1e+30, %v4201_v49 }
 0x43b   : > { %v3959_v36 = vpack.c.bf16 %v3796_v2, %v3793_v55 }
 0x46b   : > { %v9011_v11 = vpop.f32.mrf.mxu1 }
 0x46d   : > { %v3808_v3 = vpop.f32.mrf.mxu1 }
 0x46e   : > { %v3809_v53 = vadd.f32 %v8963_v1, %v3808_v3 }
 0x46f   : > { %v9013_v35 = vpop.f32.mrf.mxu1 }
 0x470   : > { %v3820_v33 = vadd.f32 %v9013_v35, %v8963_v1 }
 0x471   : > { %v3811_v25 = vpop.f32.mrf.mxu1 }
 0x48e   : > { %v9015_v22 = vpop.f32.mrf.mxu1 }
 0x48f   : > { %v3833_v63 = vadd.f32 %v9015_v22, %v8963_v1 }
 0x490   : > { %v9017_v60 = vpop.f32.mrf.mxu1 }
 0x491   : > { %v3825_v9 = vadd.f32 %v8963_v1, %v9017_v60 }
 0x492   : > { %v9019_v0 = vpop.f32.mrf.mxu1 }
 0x494   : > { %v3827_v45 = vpop.f32.mrf.mxu1 }
 0x495   : > { %v3828_v24 = vadd.f32 %v8963_v1, %v3827_v45 }
 0x496   : > { %v3891_v17 = vpop.f32.mrf.mxu1 }
 0x497   : > { %v3892_v10 = vadd.f32 %v3891_v17, %v3846_v13  ;;  %v3963_v52 = vpack.c.bf16 %v3828_v24, %v3825_v9 }
 0x498   : > { %v5515_v19 = vpop.f32.mrf.mxu1 }
 0x499   : > { %v3965_v4 = vpack.c.bf16 %v3892_v10, %v3892_v10 }
 0x49a   : > { %v3894_v59 = vpop.f32.mrf.mxu1 }
 0x49b   : > { %5590 = vmatprep.subr.msk.bf16.mxu0 %vm10176_vm1, %v3965_v4  ;;  %5591 = vmatprep.subr.msk.bf16.mxu1 %vm10177_vm2, %v3965_v4  ;;  %v4021_v38 = vsel %vm10178_vm8, %v3965_v4, 0  ;;  %vm4676_vm1 = vcmask 416768   ;;  %vm4745_vm8 = vcmask 752640  }
 0x49c   : > { %v5516_v61 = vpop.f32.mrf.mxu1  ;;  %5524 = vmatpush3.bf16.msra.mxu0 %v4021_v38  ;;  %5586 = vmatpush3.bf16.msra.mxu1 %v4021_v38 }
 0x49d   : > { %5561 = vmatprep.subr.bf16.mxu0 %v5847_v6 }
 0x49e   : > { %v9027_v50 = vpop.f32.mrf.mxu1 }
 0x49f   : > { %5526 = vmatmul.mubr.msk.bf16.vlgmr.msra.gmra.mxu0 %vm2313_vm7, %v3948_v54  ;;  %5534 = vmatmul.mubr.msk.bf16.vlgmr.msra.gmra.mxu1 %vm2313_vm7, %v3952_v48  ;;  %v3772_v54 = vadd.f32 %v5494_v7, %v8963_v1  ;;  %v3812_v48 = vadd.f32 %v8963_v1, %v3811_v25 }
 0x4a0   : > { %5529 = vmatprep.mubr.msk.bf16.mxu0 %vm2313_vm7, %v3949_v62  ;;  %5537 = vmatprep.mubr.msk.bf16.mxu1 %vm2313_vm7, %v3953_v20  ;;  %v5521_v31 = vpop.f32.mrf.mxu1  ;;  %v3769_v62 = vadd.f32 %v5493_v5, %v8963_v1  ;;  %v3817_v5 = vadd.f32 %v9011_v11, %v8963_v1  ;;  %v4206_v11 = vsub.s32 0, %v9084_v8 }
 0x4a1   : > { %v3961_v43 = vpack.c.bf16 %v3812_v48, %v3809_v53 }
 0x4a2   : > { %v3944_v58 = vpop.f32.mrf.mxu1  ;;  %v3956_v27 = vpack.c.bf16 %v3772_v54, %v3769_v62  ;;  %v3962_v7 = vpack.c.bf16 %v3820_v33, %v3817_v5  ;;  %v9089_v3 = vrot.slane %v4202_v23, %v4206_v11 }
 0x4a4   : > { %v5522_v21 = vpop.f32.mrf.mxu1 }
 0x4a7   : > { %5530 = vmatmul.mubr.msk.bf16.gmra.mxu0 %vm2313_vm7, %v3950_v42  ;;  %5538 = vmatmul.mubr.msk.bf16.gmra.mxu1 %vm2313_vm7, %v3954_v46  ;;  %v3785_v42 = vadd.f32 %v5497_v28, %v8963_v1  ;;  %v3836_v28 = vadd.f32 %v9019_v0, %v8963_v1 }
 0x4a8   : > { %5541 = vmatprep.mubr.msk.bf16.mxu1 %vm2313_vm7, %v3955_v30  ;;  %5565 = vmatprep.mubr.msk.bf16.mxu0 %vm5849_vm0, %v5847_v6 }
 0x4a9   : > { %v3958_v37 = vpack.c.bf16 %v3788_v51, %v3785_v42  ;;  %v3964_v34 = vpack.c.bf16 %v3836_v28, %v3833_v63 }
 0x4af   : > { %5542 = vmatmul.mubr.msk.bf16.gmra.mxu1 %vm2313_vm7, %v3956_v27 }
 0x4b0   : > { %5545 = vmatprep.mubr.msk.bf16.mxu1 %vm2313_vm7, %v3957_v56 }
 0x4b7   : > { %5546 = vmatmul.mubr.msk.bf16.gmra.mxu1 %vm2313_vm7, %v3958_v37 }
 0x4b8   : > { %5549 = vmatprep.mubr.msk.bf16.mxu1 %vm2313_vm7, %v3959_v36 }
 0x4bf   : > { %5550 = vmatmul.mubr.msk.bf16.gmra.mxu1 %vm2313_vm7, %v3960_v16 }
 0x4c0   : > { %5553 = vmatprep.mubr.msk.bf16.mxu1 %vm2313_vm7, %v3961_v43 }
 0x4c7   : > { %5554 = vmatmul.mubr.msk.bf16.gmra.mxu1 %vm2313_vm7, %v3962_v7 }
 0x4c8   : > { %5557 = vmatprep.mubr.msk.bf16.mxu1 %vm2313_vm7, %v3963_v52 }
 0x4cf   : > { %5558 = vmatmul.mubr.msk.bf16.gmra.mxu1 %vm2313_vm7, %v3964_v34  ;;  %vm10179_vm7 = vcmask 1043456  }
 0x4d0   : > { %vm10183_vm5 = vmmov %vm10179_vm7 }
 0x4d1   : > { %vm10184_vm11 = vmmov %vm10183_vm5 }
 0x4d2   : > { %vm10185_vm6 = vmmov %vm10183_vm5 }
 0x55f   : > { %v5535_v35 = vpop.f32.mrf.mxu1  ;;  %v5527_v56 = vpop.f32.mrf.mxu0 }
 0x560   : > { %v9092_v1 = vsub.f32 %v5535_v35, %v9089_v3 }
 0x561   : > { %v4089_v25 = vpop.f32.mrf.mxu1  ;;  %v9134_v55 = vpop.f32.mrf.mxu0 }
 0x562   : > { %v4276_v22 = vsel %vm4245_vm10, %v9092_v1, -inf  ;;  %v9155_v9 = vsub.f32 %v4089_v25, %v9089_v3 }
 0x563   : > { %4277 = vmax.xlane.f32.xlu1 %v4276_v22  ;;  %v5536_v60 = vpop.f32.mrf.mxu1  ;;  %v5528_v43 = vpop.f32.mrf.mxu0 }
 0x564   : > { %v9150_v33 = vsub.f32 %v5536_v60, %v9089_v3  ;;  %v4270_v29 = vsel %vm4245_vm10, %v9155_v9, -inf }
 0x565   : > { %v9096_v0 = vpop.f32.mrf.mxu1  ;;  %v9159_v52 = vpop.f32.mrf.mxu0 }
 0x566   : > { %v4279_v63 = vsel %vm4245_vm10, %v9150_v33, -inf  ;;  %v9183_v22 = vsub.f32 %v9096_v0, %v9089_v3 }
 0x567   : > { %v5539_v45 = vpop.f32.mrf.mxu1  ;;  %v5531_v44 = vpop.f32.mrf.mxu0 }
 0x568   : > { %v9099_v13 = vsub.f32 %v5539_v45, %v9089_v3  ;;  %v9177_v35 = vsub.f32 %v5531_v44, %v9089_v3 }
 0x569   : > { %v4105_v17 = vpop.f32.mrf.mxu1  ;;  %v4073_v45 = vpop.f32.mrf.mxu0 }
 0x56a   : > { %v9102_v10 = vsub.f32 %v4105_v17, %v9089_v3  ;;  %v4288_v19 = vsel %vm4245_vm10, %v9099_v13, -inf }
 0x56b   : > { %4289 = vmax.xlane.f32.xlu0 %v4288_v19  ;;  %v5540_v4 = vpop.f32.mrf.mxu1  ;;  %v4264_v19 = vsel %vm4245_vm10, %v9177_v35, -inf  ;;  %v5532_v0 = vpop.f32.mrf.mxu0 }
 0x56c   : > { %v9107_v47 = vsub.f32 %v5540_v4, %v9089_v3  ;;  %v4282_v59 = vsel %vm4245_vm10, %v9102_v10, -inf }
 0x56d   : > { %4283 = vmax.xlane.f32.xlu1 %v4282_v59  ;;  %v4108_v38 = vpop.f32.mrf.mxu1  ;;  %v4273_v59 = vsel %vm4245_vm10, %v9183_v22, -inf }
 0x56e   : > { %v9112_v32 = vsub.f32 %v4108_v38, %v9089_v3  ;;  %v4291_v20 = vsel %vm4245_vm10, %v9107_v47, -inf  ;;  %v9198_v38 = vsub.f32 %v4073_v45, %v9089_v3 }
 0x56f   : > { %v9114_v61 = vpop.f32.mrf.mxu1 }
 0x570   : > { %v4285_v31 = vsel %vm4245_vm10, %v9112_v32, -inf }
 0x571   : > { %4292 = vmax.xlane.f32.xlu1 %v4291_v20  ;;  %4286 = vmax.xlane.f32.xlu0 %v4285_v31  ;;  %v4121_v41 = vpop.f32.mrf.mxu1  ;;  %v9203_v31 = vsub.f32 %v5532_v0, %v9089_v3 }
 0x572   : > { %v9121_v12 = vsub.f32 %v4121_v41, %v9089_v3 }
 0x573   : > { %v5544_v58 = vpop.f32.mrf.mxu1 }
 0x574   : > { %v9124_v40 = vsub.f32 %v5544_v58, %v9089_v3 }
 0x575   : > { %v4124_v14 = vpop.f32.mrf.mxu1 }
 0x576   : > { %v9127_v21 = vsub.f32 %v4124_v14, %v9089_v3  ;;  %v4258_v14 = vsel %vm4245_vm10, %v9198_v38, -inf  ;;  %v4303_v44 = vsel %vm4245_vm10, %v9124_v40, -inf }
 0x577   : > { %v5547_v46 = vpop.f32.mrf.mxu1 }
 0x578   : > { %v9188_v17 = vsub.f32 %v5547_v46, %v9089_v3 }
 0x579   : > { %v4137_v30 = vpop.f32.mrf.mxu1 }
 0x57a   : > { %v4312_v20 = vsel %vm4245_vm10, %v9188_v17, -inf  ;;  %v9208_v58 = vsub.f32 %v4137_v30, %v9089_v3 }
 0x57b   : > { %v5548_v54 = vpop.f32.mrf.mxu1 }
 0x57c   : > { %v9213_v46 = vsub.f32 %v5548_v54, %v9089_v3  ;;  %v9229_v54 = vsub.f32 %v9114_v61, %v9089_v3 }
 0x57d   : > { %v9129_v26 = vpop.f32.mrf.mxu1 }
 0x57e   : > { %v4300_v61 = vsel %vm4245_vm10, %v9229_v54, -inf }
 0x57f   : > { %v5551_v62 = vpop.f32.mrf.mxu1 }
 0x580   : > { %v9142_v18 = vsub.f32 %v5551_v62, %v9089_v3  ;;  %v4267_v62 = vsel %vm4245_vm10, %v9203_v31, -inf }
 0x581   : > { %v4153_v15 = vpop.f32.mrf.mxu1 }
 0x582   : > { %v4324_v7 = vsel %vm4245_vm10, %v9142_v18, -inf  ;;  %v9167_v34 = vsub.f32 %v4153_v15, %v9089_v3  ;;  %v4076_v15 = vpop.f32.mrf.mxu0 }
 0x583   : > { %v5552_v27 = vpop.f32.mrf.mxu1  ;;  %v9223_v30 = vsub.f32 %v4076_v15, %v9089_v3  ;;  %v5850_v15 = vmov 1983009808  }
 0x584   : > { %v9172_v49 = vsub.f32 %v5552_v27, %v9089_v3  ;;  %v4318_v25 = vsel %vm4245_vm10, %v9167_v34, -inf  ;;  %v9218_v27 = vsub.f32 %v5527_v56, %v9089_v3  ;;  %v9235_v56 = vsub.f32 %v9129_v26, %v9089_v3 }
 0x585   : > { %v4156_v51 = vpop.f32.mrf.mxu1 }
 0x586   : > { %v4327_v60 = vsel %vm4245_vm10, %v9172_v49, -inf  ;;  %v9193_v4 = vsub.f32 %v4156_v51, %v9089_v3  ;;  %v4306_v51 = vsel %vm4245_vm10, %v9208_v58, -inf }
 0x587   : > { %v5555_v2 = vpop.f32.mrf.mxu1 }
 0x588   : > { %v9132_v42 = vsub.f32 %v5555_v2, %v9089_v3  ;;  %v4321_v41 = vsel %vm4245_vm10, %v9193_v4, -inf  ;;  %v4315_v2 = vsel %vm4245_vm10, %v9213_v46, -inf }
 0x589   : > { %v4169_v37 = vpop.f32.mrf.mxu1 }
 0x58a   : > { %v9137_v36 = vsub.f32 %v4169_v37, %v9089_v3  ;;  %v4336_v39 = vsel %vm4245_vm10, %v9132_v42, -inf  ;;  %v4252_v37 = vsel %vm4245_vm10, %v9218_v27, -inf }
 0x58b   : > { %4337 = vmax.xlane.f32.xlu0 %v4336_v39  ;;  %v5556_v48 = vpop.f32.mrf.mxu1  ;;  %v4261_v39 = vsel %vm4245_vm10, %v9223_v30, -inf }
 0x58c   : > { %v9145_v53 = vsub.f32 %v5556_v48, %v9089_v3  ;;  %v4330_v16 = vsel %vm4245_vm10, %v9137_v36, -inf  ;;  %v9241_v48 = vsub.f32 %v9134_v55, %v9089_v3 }
 0x58d   : > { %4331 = vmax.xlane.f32.xlu1 %v4330_v16  ;;  %v4172_v5 = vpop.f32.mrf.mxu1  ;;  %v9246_v16 = vsub.f32 %v5528_v43, %v9089_v3  ;;  %v4294_v43 = vsel %vm4245_vm10, %v9121_v12, -inf }
 0x58e   : > { %v4339_v24 = vsel %vm4245_vm10, %v9145_v53, -inf  ;;  %v9162_v28 = vsub.f32 %v4172_v5, %v9089_v3  ;;  %v4246_v5 = vsel %vm4245_vm10, %v9241_v48, -inf }
 0x58f   : > { %4340 = vmax.xlane.f32.xlu0 %v4339_v24  ;;  %v4309_v24 = vsel %vm4245_vm10, %v9235_v56, -inf  ;;  %v5559_v26 = vpop.f32.mrf.mxu1  ;;  %v4255_v55 = vsel %vm4245_vm10, %v9246_v16, -inf }
 0x590   : > { %v4333_v23 = vsel %vm4245_vm10, %v9162_v28, -inf }
 0x591   : > { %4325 = vmax.xlane.f32.xlu1 %v4324_v7  ;;  %v4185_v7 = vpop.f32.mrf.mxu1 }
 0x593   : > { %4280 = vmax.xlane.f32.xlu0 %v4279_v63  ;;  %v9255_v63 = vsub.f32 %v5559_v26, %v9089_v3 }
 0x595   : > { %4271 = vmax.xlane.f32.xlu1 %v4270_v29  ;;  %v9261_v29 = vsub.f32 %v9159_v52, %v9089_v3 }
 0x597   : > { %4334 = vmax.xlane.f32.xlu0 %v4333_v23  ;;  %v5560_v23 = vpop.f32.mrf.mxu1  ;;  %v4249_v52 = vsel %vm4245_vm10, %v9261_v29, -inf }
 0x598   : > { %v9271_v45 = vsub.f32 %v5560_v23, %v9089_v3 }
 0x599   : > { %4319 = vmax.xlane.f32.xlu1 %v4318_v25  ;;  %v9266_v25 = vsub.f32 %v4185_v7, %v9089_v3  ;;  %v4188_v0 = vpop.f32.mrf.mxu1 }
 0x59b   : > { %4328 = vmax.xlane.f32.xlu0 %v4327_v60  ;;  %v4348_v60 = vsel %vm4245_vm10, %v9255_v63, -inf }
 0x59d   : > { %4265 = vmax.xlane.f32.xlu1 %v4264_v19  ;;  %v4342_v19 = vsel %vm4245_vm10, %v9266_v25, -inf }
 0x59f   : > { %4274 = vmax.xlane.f32.xlu0 %v4273_v59  ;;  %v4351_v59 = vsel %vm4245_vm10, %v9271_v45, -inf }
 0x5a1   : > { %4313 = vmax.xlane.f32.xlu1 %v4312_v20  ;;  %v9280_v20 = vsub.f32 %v4188_v0, %v9089_v3  ;;  %v9293_v3 = vld [vmem:[%s630_s27] sm:$0x3f] }
 0x5a3   : > { %4322 = vmax.xlane.f32.xlu0 %v4321_v41  ;;  %v4297_v41 = vsel %vm4245_vm10, %v9127_v21, -inf }
 0x5a5   : > { %4259 = vmax.xlane.f32.xlu1 %v4258_v14  ;;  %v4345_v14 = vsel %vm4245_vm10, %v9280_v20, -inf }
 0x5a7   : > { %4268 = vmax.xlane.f32.xlu0 %v4267_v62  ;;  %v3898_v62 = vld [vmem:[%s9626_s12] sm:$0xf] }
 0x5a9   : > { %4307 = vmax.xlane.f32.xlu1 %v4306_v51  ;;  %v4769_v51 = vunpack.c.l.s4 %v5850_v15 }
 0x5ab   : > { %4316 = vmax.xlane.f32.xlu0 %v4315_v2  ;;  %v4770_v2 = vunpack.c.0.s8 %v4769_v51 }
 0x5ad   : > { %4253 = vmax.xlane.f32.xlu1 %v4252_v37  ;;  %v4767_v37 = vcombine.low %v9293_v3, %v9293_v3 }
 0x5af   : > { %4262 = vmax.xlane.f32.xlu0 %v4261_v39  ;;  %v9298_v39 = vsub.s32 %v4770_v2, %v9084_v8 }
 0x5b1   : > { %4301 = vmax.xlane.f32.xlu1 %v4300_v61  ;;  %v9301_v61 = vrot.slane %v4767_v37, %v9298_v39 }
 0x5b3   : > { %4310 = vmax.xlane.f32.xlu0 %v4309_v24  ;;  %v9305_v24 = vrot.slane %v9293_v3, %v9298_v39  ;;  %v9311_v26 = vcombine.high %v9301_v61, %v9301_v61 }
 0x5b5   : > { %4247 = vmax.xlane.f32.xlu1 %v4246_v5 }
 0x5b7   : > { %4256 = vmax.xlane.f32.xlu0 %v4255_v55 }
 0x5b9   : > { %4295 = vmax.xlane.f32.xlu1 %v4294_v43 }
 0x5bb   : > { %4304 = vmax.xlane.f32.xlu0 %v4303_v44 }
 0x5bd   : > { %4349 = vmax.xlane.f32.xlu1 %v4348_v60 }
 0x5bf   : > { %4250 = vmax.xlane.f32.xlu0 %v4249_v52 }
 0x5c1   : > { %4343 = vmax.xlane.f32.xlu1 %v4342_v19 }
 0x5c3   : > { %4352 = vmax.xlane.f32.xlu0 %v4351_v59 }
 0x5c7   : > { %4298 = vmax.xlane.f32.xlu0 %v4297_v41 }
 0x5cb   : > { %4346 = vmax.xlane.f32.xlu0 %v4345_v14 }
 0x5d2   : > { %3901 = vperm.xlu1 %5640, %v3898_v62  }
 0x5d6   : > { %4938 = vrot.lane.b32.xlu1 %v9301_v61, %s5851_s1 }
 0x5da   : > { %4940 = vrot.lane.b32.xlu1 %v9311_v26, %s5851_s1 }
 0x5e1   : > { %4795 = vrot.lane.b32.xlu0 %v9305_v24, %s5851_s1 }
 0x5ec   : > { %v4278_v5 = vpop.xlane.xlu1 %4277 }
 0x5f4   : > { %v4290_v7 = vpop.xlane.xlu0 %4289 }
 0x5f5   : > { %v4368_v60 = vsub.f32 %v9099_v13, %v4290_v7 }
 0x5f6   : > { %v4284_v55 = vpop.xlane.xlu1 %4283 }
 0x5f7   : > { %v4418_v41 = vmul.f32 1.442695, %v4368_v60  ;;  %v4366_v37 = vsub.f32 %v9102_v10, %v4284_v55  ;;  %v4364_v10 = vsub.f32 %v9092_v1, %v4278_v5 }
 0x5fa   : > { %v4293_v43 = vpop.xlane.xlu1 %4292  ;;  %v4287_v44 = vpop.xlane.xlu0 %4286 }
 0x5fb   : > { %v4369_v23 = vsub.f32 %v9107_v47, %v4293_v43  ;;  %v4367_v15 = vsub.f32 %v9112_v32, %v4287_v44 }
 0x5fd   : > { %v4420_v19 = vmul.f32 1.442695, %v4369_v23  ;;  %v4416_v43 = vmul.f32 1.442695, %v4367_v15  ;;  %v4414_v23 = vmul.f32 1.442695, %v4366_v37 }
 0x5ff   : > { %5710 = vpow2.f32 %v4420_v19 }
 0x600   : > { %5712 = vpow2.f32 %v4418_v41 }
 0x614   : > { %v4338_v52 = vpop.xlane.xlu0 %4337 }
 0x615   : > { %v4384_v59 = vsub.f32 %v9132_v42, %v4338_v52 }
 0x616   : > { %v4332_v0 = vpop.xlane.xlu1 %4331 }
 0x617   : > { %v4450_v14 = vmul.f32 1.442695, %v4384_v59  ;;  %v4382_v13 = vsub.f32 %v9137_v36, %v4332_v0 }
 0x618   : > { %v4341_v62 = vpop.xlane.xlu0 %4340 }
 0x619   : > { %v4385_v51 = vsub.f32 %v9145_v53, %v4341_v62  ;;  %5714 = vpow2.f32 %v4450_v14  ;;  %v4446_v52 = vmul.f32 1.442695, %v4382_v13  ;;  %v4410_v62 = vmul.f32 1.442695, %v4364_v10 }
 0x61a   : > { %v4326_v2 = vpop.xlane.xlu1 %4325 }
 0x61b   : > { %v4452_v47 = vmul.f32 1.442695, %v4385_v51  ;;  %v4380_v60 = vsub.f32 %v9142_v18, %v4326_v2  ;;  %v5711_v18 = vpop.eup %5710 }
 0x61c   : > { %v4281_v7 = vpop.xlane.xlu0 %4280 }
 0x61d   : > { %5716 = vpow2.f32 %v4452_v47  ;;  %v4365_v32 = vsub.f32 %v9150_v33, %v4281_v7  ;;  %v4442_v55 = vmul.f32 1.442695, %v4380_v60 }
 0x61e   : > { %v4272_v42 = vpop.xlane.xlu1 %4271  ;;  %5718 = vpow2.f32 %v4416_v43 }
 0x61f   : > { %5720 = vpow2.f32 %v4414_v23  ;;  %v4412_v59 = vmul.f32 1.442695, %v4365_v32 }
 0x620   : > { %v4335_v44 = vpop.xlane.xlu0 %4334  ;;  %5722 = vpow2.f32 %v4446_v52 }
 0x621   : > { %v4383_v53 = vsub.f32 %v9162_v28, %v4335_v44  ;;  %v5713_v28 = vpop.eup %5712 }
 0x622   : > { %v4320_v19 = vpop.xlane.xlu1 %4319  ;;  %v4471_v2 = vpack.c.bf16 %v5711_v18, %v5713_v28 }
 0x623   : > { %v4448_v36 = vmul.f32 1.442695, %v4383_v53  ;;  %v4378_v33 = vsub.f32 %v9167_v34, %v4320_v19 }
 0x624   : > { %v4329_v0 = vpop.xlane.xlu0 %4328  ;;  %v4507_v60 = vsel %vm4245_vm10, %v4471_v2, 0 }
 0x625   : > { %5724 = vpow2.f32 %v4448_v36  ;;  %v4381_v41 = vsub.f32 %v9172_v49, %v4329_v0  ;;  %v4362_v49 = vsub.f32 %v9155_v9, %v4272_v42  ;;  %v4438_v13 = vmul.f32 1.442695, %v4378_v33 }
 0x626   : > { %v4266_v14 = vpop.xlane.xlu1 %4265  ;;  %5726 = vpow2.f32 %v4442_v55  ;;  %v5715_v1 = vpop.eup %5714 }
 0x627   : > { %v4444_v15 = vmul.f32 1.442695, %v4381_v41  ;;  %5728 = vpow2.f32 %v4412_v59  ;;  %v4360_v36 = vsub.f32 %v9177_v35, %v4266_v14 }
 0x628   : > { %v4275_v51 = vpop.xlane.xlu0 %4274 }
 0x629   : > { %5730 = vpow2.f32 %v4444_v15  ;;  %v4363_v5 = vsub.f32 %v9183_v22, %v4275_v51  ;;  %v4406_v22 = vmul.f32 1.442695, %v4362_v49 }
 0x62a   : > { %v5717_v37 = vpop.eup %5716  ;;  %v4314_v47 = vpop.xlane.xlu1 %4313  ;;  %5732 = vpow2.f32 %v4410_v62 }
 0x62b   : > { %v4479_v7 = vpack.c.bf16 %v5717_v37, %v5715_v1  ;;  %v4408_v43 = vmul.f32 1.442695, %v4363_v5  ;;  %v5719_v52 = vpop.eup %5718  ;;  %5734 = vpow2.f32 %v4438_v13  ;;  %v4376_v44 = vsub.f32 %v9188_v17, %v4314_v47 }
 0x62c   : > { %v4323_v23 = vpop.xlane.xlu0 %4322  ;;  %v5721_v19 = vpop.eup %5720 }
 0x62d   : > { %v4379_v34 = vsub.f32 %v9193_v4, %v4323_v23  ;;  %5592 = vmatprep.subr.msk.bf16.mxu1 %vm4245_vm10, %v4479_v7  ;;  %5736 = vpow2.f32 %v4408_v43  ;;  %v5723_v42 = vpop.eup %5722  ;;  %v4470_v4 = vpack.c.bf16 %v5719_v52, %v5721_v19  ;;  %v4434_v0 = vmul.f32 1.442695, %v4376_v44 }
 0x62e   : > { %5401 = vmatpush3.bf16.xpose.msra.mxu1 %v4507_v60  ;;  %v4260_v32 = vpop.xlane.xlu1 %4259 }
 0x62f   : > { %v4440_v53 = vmul.f32 1.442695, %v4379_v34  ;;  %v4504_v28 = vsel %vm4245_vm10, %v4470_v4, 0  ;;  %v4358_v49 = vsub.f32 %v9198_v38, %v4260_v32 }
 0x630   : > { %v4269_v9 = vpop.xlane.xlu0 %4268 }
 0x631   : > { %5738 = vpow2.f32 %v4440_v53  ;;  %v4361_v10 = vsub.f32 %v9203_v31, %v4269_v9  ;;  %v4402_v31 = vmul.f32 1.442695, %v4360_v36  ;;  %v4398_v44 = vmul.f32 1.442695, %v4358_v49 }
 0x632   : > { %v5725_v55 = vpop.eup %5724  ;;  %v4308_v59 = vpop.xlane.xlu1 %4307  ;;  %5740 = vpow2.f32 %v4406_v22 }
 0x633   : > { %v4478_v41 = vpack.c.bf16 %v5725_v55, %v5723_v42  ;;  %v5727_v18 = vpop.eup %5726  ;;  %v4404_v62 = vmul.f32 1.442695, %v4361_v10  ;;  %5742 = vpow2.f32 %v4434_v0  ;;  %v4374_v35 = vsub.f32 %v9208_v58, %v4308_v59 }
 0x634   : > { %v4317_v33 = vpop.xlane.xlu0 %4316  ;;  %v5729_v17 = vpop.eup %5728 }
 0x635   : > { %v4377_v15 = vsub.f32 %v9213_v46, %v4317_v33  ;;  %5593 = vmatprep.subr.msk.bf16.mxu1 %vm4245_vm10, %v4478_v41  ;;  %5744 = vpow2.f32 %v4404_v62  ;;  %v4430_v7 = vmul.f32 1.442695, %v4374_v35 }
 0x636   : > { %v5731_v51 = vpop.eup %5730  ;;  %5403 = vmatpush3.bf16.xpose.msra.mxu1 %v4504_v28  ;;  %v4254_v1 = vpop.xlane.xlu1 %4253 }
 0x637   : > { %v4436_v14 = vmul.f32 1.442695, %v4377_v15  ;;  %v4477_v5 = vpack.c.bf16 %v5731_v51, %v5727_v18  ;;  %v5733_v2 = vpop.eup %5732  ;;  %v4356_v10 = vsub.f32 %v9218_v27, %v4254_v1 }
 0x638   : > { %v4263_v37 = vpop.xlane.xlu0 %4262  ;;  %v4469_v46 = vpack.c.bf16 %v5729_v17, %v5733_v2  ;;  %v5735_v43 = vpop.eup %5734 }
 0x639   : > { %5746 = vpow2.f32 %v4436_v14  ;;  %v4359_v47 = vsub.f32 %v9223_v30, %v4263_v37  ;;  %5594 = vmatprep.subr.msk.bf16.mxu1 %vm4245_vm10, %v4477_v5  ;;  %v4394_v33 = vmul.f32 1.442695, %v4356_v10 }
 0x63a   : > { %v4302_v13 = vpop.xlane.xlu1 %4301  ;;  %5748 = vpow2.f32 %v4402_v31  ;;  %v5737_v58 = vpop.eup %5736  ;;  %v4501_v52 = vsel %vm4245_vm10, %v4469_v46, 0 }
 0x63b   : > { %v4400_v23 = vmul.f32 1.442695, %v4359_v47  ;;  %5750 = vpow2.f32 %v4430_v7  ;;  %v4372_v53 = vsub.f32 %v9229_v54, %v4302_v13 }
 0x63c   : > { %v4311_v34 = vpop.xlane.xlu0 %4310 }
 0x63d   : > { %v4375_v60 = vsub.f32 %v9235_v56, %v4311_v34  ;;  %5752 = vpow2.f32 %v4400_v23  ;;  %v4426_v55 = vmul.f32 1.442695, %v4372_v53 }
 0x63e   : > { %v5739_v22 = vpop.eup %5738  ;;  %5405 = vmatpush3.bf16.xpose.msra.mxu1 %v4501_v52  ;;  %v4248_v30 = vpop.xlane.xlu1 %4247 }
 0x63f   : > { %v4432_v19 = vmul.f32 1.442695, %v4375_v60  ;;  %v4476_v38 = vpack.c.bf16 %v5739_v22, %v5735_v43  ;;  %v5741_v32 = vpop.eup %5740  ;;  %v4354_v1 = vsub.f32 %v9241_v48, %v4248_v30 }
 0x640   : > { %v4257_v9 = vpop.xlane.xlu0 %4256  ;;  %v4468_v56 = vpack.c.bf16 %v5737_v58, %v5741_v32  ;;  %v5743_v36 = vpop.eup %5742 }
 0x641   : > { %5754 = vpow2.f32 %v4432_v19  ;;  %v4357_v42 = vsub.f32 %v9246_v16, %v4257_v9  ;;  %5595 = vmatprep.subr.msk.bf16.mxu1 %vm4245_vm10, %v4476_v38 }
 0x642   : > { %v4296_v4 = vpop.xlane.xlu1 %4295  ;;  %5756 = vpow2.f32 %v4398_v44  ;;  %v5745_v54 = vpop.eup %5744  ;;  %v4498_v18 = vsel %vm4245_vm10, %v4468_v56, 0 }
 0x643   : > { %v4396_v59 = vmul.f32 1.442695, %v4357_v42  ;;  %5758 = vpow2.f32 %v4426_v55  ;;  %v4370_v2 = vsub.f32 %v9121_v12, %v4296_v4 }
 0x644   : > { %v4305_v0 = vpop.xlane.xlu0 %4304 }
 0x645   : > { %v4373_v41 = vsub.f32 %v9124_v40, %v4305_v0  ;;  %5760 = vpow2.f32 %v4396_v59  ;;  %v4422_v58 = vmul.f32 1.442695, %v4370_v2  ;;  %v4783_v2 = vcombine.high %v9293_v3, %v9293_v3 }
 0x646   : > { %v5747_v62 = vpop.eup %5746  ;;  %5407 = vmatpush3.bf16.xpose.msra.mxu1 %v4498_v18  ;;  %v4350_v16 = vpop.xlane.xlu1 %4349 }
 0x647   : > { %v4428_v17 = vmul.f32 1.442695, %v4373_v41  ;;  %v4388_v15 = vsub.f32 %v9255_v63, %v4350_v16  ;;  %v4475_v27 = vpack.c.bf16 %v5747_v62, %v5743_v36  ;;  %v5749_v28 = vpop.eup %5748 }
 0x648   : > { %v4251_v51 = vpop.xlane.xlu0 %4250  ;;  %v4467_v40 = vpack.c.bf16 %v5745_v54, %v5749_v28  ;;  %v5751_v5 = vpop.eup %5750 }
 0x649   : > { %5762 = vpow2.f32 %v4428_v17  ;;  %v4355_v31 = vsub.f32 %v9261_v29, %v4251_v51  ;;  %5596 = vmatprep.subr.msk.bf16.mxu1 %vm4245_vm10, %v4475_v27  ;;  %v4458_v14 = vmul.f32 1.442695, %v4388_v15  ;;  %v4390_v29 = vmul.f32 1.442695, %v4354_v1 }
 0x64a   : > { %v4344_v35 = vpop.xlane.xlu1 %4343  ;;  %5764 = vpow2.f32 %v4394_v33  ;;  %v5753_v47 = vpop.eup %5752  ;;  %v4495_v49 = vsel %vm4245_vm10, %v4467_v40, 0  ;;  %v4810_v1 = vcombine.high %v9305_v24, %v9305_v24 }
 0x64b   : > { %v4392_v37 = vmul.f32 1.442695, %v4355_v31  ;;  %5766 = vpow2.f32 %v4458_v14  ;;  %v4386_v12 = vsub.f32 %v9266_v25, %v4344_v35 }
 0x64c   : > { %v4353_v63 = vpop.xlane.xlu0 %4352 }
 0x64d   : > { %v4389_v46 = vsub.f32 %v9271_v45, %v4353_v63  ;;  %5768 = vpow2.f32 %v4392_v37  ;;  %v4790_v37 = vrot.slane %v4783_v2, %v9298_v39 }
 0x64e   : > { %v5755_v13 = vpop.eup %5754  ;;  %v3902_v7 = vpop.permute.xlu1 %3901  ;;  %5409 = vmatpush3.bf16.xpose.msra.mxu1 %v4495_v49 }
 0x64f   : > { %v4460_v43 = vmul.f32 1.442695, %v4389_v46  ;;  %v3942_v48 = vadd.f32 %v9027_v50, %v3902_v7  ;;  %v4474_v23 = vpack.c.bf16 %v5755_v13, %v5751_v5  ;;  %v5757_v34 = vpop.eup %5756  ;;  %v4454_v50 = vmul.f32 1.442695, %v4386_v12 }
 0x650   : > { %v4299_v60 = vpop.xlane.xlu0 %4298  ;;  %v4466_v22 = vpack.c.bf16 %v5753_v47, %v5757_v34  ;;  %v5759_v53 = vpop.eup %5758 }
 0x651   : > { %5770 = vpow2.f32 %v4460_v43  ;;  %v4462_v45 = vsel %vm10179_vm7, %v3942_v48, 1.0  ;;  %v4371_v52 = vsub.f32 %v9127_v21, %v4299_v60  ;;  %5597 = vmatprep.subr.msk.bf16.mxu1 %vm4245_vm10, %v4474_v23  ;;  %vm10187_vm7 = vmmov %vm10177_vm2 }
 0x652   : > { %v4463_v44 = vpack.c.bf16 %v4462_v45, %v4462_v45  ;;  %5772 = vpow2.f32 %v4390_v29  ;;  %v5761_v38 = vpop.eup %5760  ;;  %v4492_v32 = vsel %vm4245_vm10, %v4466_v22, 0  ;;  %v4939_v51 = vpop.permute.xlu1 %4938  ;;  %v4625_v45 = vsub.s32 4, %v9084_v8 }
 0x653   : > { %v4424_v30 = vmul.f32 1.442695, %v4371_v52  ;;  %5774 = vpow2.f32 %v4422_v58  ;;  %v637_v52 = vld [vmem:[%s10186_s30] sm:$0x7]  ;;  %v4645_v22 = vsub.s32 1, %v9084_v8 }
 0x654   : > { %5416 = vmatprep.mubr.msk.bf16.mxu1 %vm4245_vm10, %v4463_v44  ;;  %v4347_v19 = vpop.xlane.xlu0 %4346 }
 0x655   : > { %5776 = vpow2.f32 %v4424_v30  ;;  %v4387_v25 = vsub.f32 %v9280_v20, %v4347_v19 }
 0x656   : > { %v5763_v9 = vpop.eup %5762  ;;  %5411 = vmatpush3.bf16.xpose.msra.mxu1 %v4492_v32  ;;  %5778 = vpow2.f32 %v4454_v50  ;;  %v4941_v31 = vpop.permute.xlu1 %4940  ;;  %v4649_v50 = vsub.s32 2, %v9084_v8  ;;  %v9423_v32 = vrot.slane %v637_v52, %v4645_v22 }
 0x657   : > { %v4456_v21 = vmul.f32 1.442695, %v4387_v25  ;;  %v4473_v42 = vpack.c.bf16 %v5763_v9, %v5759_v53  ;;  %v5765_v56 = vpop.eup %5764  ;;  %v4942_v35 = vsel %vm4694_vm12, %v4939_v51, %v4941_v31  ;;  %v9420_v53 = vrot.slane %v637_v52, %v4206_v11 }
 0x658   : > { %v4465_v10 = vpack.c.bf16 %v5761_v38, %v5765_v56  ;;  %v5767_v4 = vpop.eup %5766  ;;  %v9381_v40 = vpop.permute.xlu0 %4795 }
 0x659   : > { %5780 = vpow2.f32 %v4456_v21  ;;  %5598 = vmatprep.subr.msk.bf16.mxu1 %vm4245_vm10, %v4473_v42  ;;  %v4943_v14 = vsel %vm4694_vm12, %v4941_v31, %v9381_v40  ;;  %v4951_v63 = vsel %vm10182_vm15, %v4790_v37, %v9381_v40  ;;  %vm10190_vm15 = vmmov %vm10183_vm5 }
 0x65a   : > { %v5769_v55 = vpop.eup %5768  ;;  %v4489_v36 = vsel %vm4245_vm10, %v4465_v10, 0  ;;  %v4948_v5 = vsel %vm10181_vm4, %v4810_v1, %v4943_v14  ;;  %v9426_v10 = vrot.slane %v637_v52, %v4649_v50  ;;  %vm10189_vm4 = vcmask 1045504  }
 0x65b   : > { %4957 = vrot.lane.b32.xlu0 %v4948_v5, %s5852_s20 }
 0x65e   : > { %v5771_v59 = vpop.eup %5770  ;;  %5413 = vmatpush3.bf16.xpose.msra.mxu1 %v4489_v36 }
 0x65f   : > { %v4481_v0 = vpack.c.bf16 %v5771_v59, %v5767_v4  ;;  %v5773_v20 = vpop.eup %5772  ;;  %4813 = vrot.lane.b32.xlu0 %v4810_v1, %s5853_s23 }
 0x660   : > { %v5775_v54 = vpop.eup %5774  ;;  %v4464_v18 = vpack.c.bf16 %v5769_v55, %v5773_v20  ;;  %v4791_v20 = vcombine.low %v9305_v24, %v9305_v24 }
 0x661   : > { %v4537_v41 = vsel %vm4245_vm10, %v4481_v0, 0  ;;  %v4792_v0 = vcombine.low %v4790_v37, %v4790_v37 }
 0x662   : > { %v5777_v62 = vpop.eup %5776  ;;  %5562 = vmatpush3.bf16.xpose.msra.mxu0 %v4537_v41  ;;  %v4486_v17 = vsel %vm4245_vm10, %v4464_v18, 0 }
 0x663   : > { %v4472_v33 = vpack.c.bf16 %v5777_v62, %v5775_v54  ;;  %5563 = vmatprep.subr.bf16.mxu0 %v5847_v6  ;;  %v5779_v16 = vpop.eup %5778  ;;  %4821 = vrot.lane.b32.xlu0 %v9311_v26, %s5854_s24  ;;  %v4801_v54 = vcombine.low %v9301_v61, %v9301_v61 }
 0x665   : > { %5599 = vmatprep.subr.msk.bf16.mxu1 %vm4245_vm10, %v4472_v33 }
 0x666   : > { %v5781_v15 = vpop.eup %5780  ;;  %5415 = vmatpush3.bf16.xpose.msra.mxu1 %v4486_v17 }
 0x667   : > { %v4480_v27 = vpack.c.bf16 %v5781_v15, %v5779_v16  ;;  %4811 = vrot.lane.b32.xlu0 %v9305_v24, %s5853_s23 }
 0x669   : > { %v4534_v28 = vsel %vm4245_vm10, %v4480_v27, 0 }
 0x66a   : > { %5564 = vmatpush3.bf16.xpose.msra.mxu0 %v4534_v28 }
 0x66b   : > { %5569 = vmatprep.subr.bf16.mxu0 %v5847_v6 }
 0x66d   : > { %5417 = vmatmul.mubr.msk.bf16.vlgmr.msra.gmra.mxu1 %vm4245_vm10, %v4463_v44 }
 0x66e   : > { %5007 = vmatprep.mubr.bf16.mxu1 %v5848_v57  ;;  %v4945_v57 = vsel %vm10180_vm13, %v9305_v24, %v4942_v35  ;;  %vm10188_vm13 = vmmov %vm10183_vm5 }
 0x66f   : > { %4955 = vrot.lane.b32.xlu1 %v4945_v57, %s5852_s20 }
 0x671   : > { %5566 = vmatmul.mubr.msk.bf16.vlgmr.msra.gmra.mxu0 %vm4245_vm10, %v4463_v44 }
 0x672   : > { %5579 = vmatprep.mubr.msk.bf16.mxu0 %vm5849_vm0, %v5847_v6  ;;  %vm4736_vm0 = vcmask 883712  }
 0x673   : > { %4959 = vrot.lane.b32.xlu1 %v4951_v63, %s5852_s20 }
 0x677   : > { %4815 = vrot.lane.b32.xlu1 %v4790_v37, %s5853_s23 }
 0x67b   : > { %4823 = vrot.lane.b32.xlu1 %v9305_v24, %s5854_s24 }
 0x6cd   : > { %v4958_v39 = vpop.permute.xlu0 %4957 }
 0x6d1   : > { %v4814_v41 = vpop.permute.xlu0 %4813 }
 0x6d5   : > { %v4822_v18 = vpop.permute.xlu0 %4821 }
 0x6d9   : > { %v4812_v33 = vpop.permute.xlu0 %4811 }
 0x6e1   : > { %v4956_v3 = vpop.permute.xlu1 %4955 }
 0x6e2   : > { %v4961_v47 = vsel %vm4754_vm9, %v4956_v3, %v4958_v39 }
 0x6e3   : > { %v4967_v46 = vsel %vm10183_vm5, %v4961_v47, 0  ;;  %vm10191_vm5 = vmmov %vm10189_vm4 }
 0x6e5   : > { %v4960_v49 = vpop.permute.xlu1 %4959 }
 0x6e6   : > { %v4962_v13 = vsel %vm4754_vm9, %v4958_v39, %v4960_v49  ;;  %v4973_v29 = vsel %vm10184_vm11, %v4960_v49, 0  ;;  %vm10192_vm11 = vmmov %vm10177_vm2 }
 0x6e7   : > { %5329 = vmatprep.subr.msk.bf16.mxu1 %vm10185_vm6, %v4962_v13  ;;  %5570 = vmatpush3.bf16.msra.mxu0 %v4973_v29 }
 0x6e8   : > { %4982 = vmatpush1.bf16.msra.mxu1 %v4967_v46  ;;  %5571 = vmatprep.subr.bf16.mxu0 %v5847_v6 }
 0x6e9   : > { %v4816_v62 = vpop.permute.xlu1 %4815 }
 0x6ea   : > { %v4818_v63 = vsel %vm4245_vm10, %v4814_v41, %v4816_v62 }
 0x6ed   : > { %v4824_v16 = vpop.permute.xlu1 %4823 }
 0x6ee   : > { %v4826_v3 = vsel %vm4727_vm14, %v4822_v18, %v4824_v16  ;;  %v4922_v39 = vsel %vm10177_vm2, %v4816_v62, %v4824_v16  ;;  %vm4763_vm2 = vcmask 736256  }
 0x6ef   : > { %v4919_v49 = vsel %vm10187_vm7, %v4818_v63, %v4826_v3 }
 0x72d   : > { %v4573_v7 = vpop.f32.mrf.mxu1 }
 0x72e   : > { %5782 = vrcp.f32 %v4573_v7 }
 0x72f   : > { %v4575_v43 = vpop.f32.mrf.mxu1 }
 0x730   : > { %5784 = vrcp.f32 %v4575_v43 }
 0x731   : > { %v4577_v48 = vpop.f32.mrf.mxu1  ;;  %v4614_v23 = vpop.f32.mrf.mxu0 }
 0x732   : > { %5786 = vrcp.f32 %v4614_v23 }
 0x733   : > { %v4578_v34 = vpop.f32.mrf.mxu1  ;;  %v5567_v58 = vpop.f32.mrf.mxu0 }
 0x735   : > { %v4617_v12 = vpop.f32.mrf.mxu0 }
 0x737   : > { %v5568_v60 = vpop.f32.mrf.mxu0 }
 0x738   : > { %v4817_v60 = vsel %vm4245_vm10, %v4812_v33, %v4814_v41 }
 0x73b   : > { %v5783_v44 = vpop.eup %5782 }
 0x73c   : > { %v4626_v30 = vrot.slane %v5783_v44, %v4625_v45 }
 0x73d   : > { %v5785_v19 = vpop.eup %5784 }
 0x73e   : > { %v4635_v38 = vmul.f32 %v4626_v30, %v4573_v7  ;;  %v4630_v25 = vrot.slane %v5785_v19, %v4625_v45 }
 0x73f   : > { %v5787_v9 = vpop.eup %5786 }
 0x740   : > { %v4654_v21 = vmul.f32 %v9420_v53, %v4635_v38  ;;  %v4636_v42 = vmul.f32 %v4630_v25, %v4575_v43  ;;  %v4634_v56 = vrot.slane %v5787_v9, %v4625_v45 }
 0x742   : > { %v4657_v4 = vpack.c.bf16 %v4654_v21, %v4654_v21  ;;  %v4655_v55 = vmul.f32 %v9423_v32, %v4636_v42  ;;  %v4637_v36 = vmul.f32 %v4634_v56, %v4614_v23  ;;  %v4681_v42 = vld [vmem:[%s10194_s16] sm:$0xf] }
 0x743   : > { %v4682_v56 = vld [vmem:[%s10195_s15] sm:$0xf] }
 0x744   : > { %v4656_v11 = vmul.f32 %v9426_v10, %v4637_v36  ;;  %4663 = vrot.lane.b32.xlu0 %v4657_v4, %s5855_s0  ;;  %v4658_v8 = vpack.c.bf16 %v4655_v55, %v4655_v55 }
 0x746   : > { %v4659_v59 = vpack.c.bf16 %v4656_v11, %v4656_v11 }
 0x748   : > { %4667 = vrot.lane.b32.xlu1 %v4659_v59, %s5855_s0  ;;  %4665 = vrot.lane.b32.xlu0 %v4658_v8, %s5855_s0 }
 0x74c   : > { %4819 = vrot.lane.b32.xlu1 %v9301_v61, %s5854_s24  ;;  %4829 = vrot.lane.b32.xlu0 %v9305_v24, %s5856_s19 }
 0x750   : > { %4831 = vrot.lane.b32.xlu1 %v4792_v0, %s5856_s19  ;;  %4827 = vrot.lane.b32.xlu0 %v4791_v20, %s5856_s19 }
 0x754   : > { %4837 = vrot.lane.b32.xlu1 %v9301_v61, %s5857_s21  ;;  %4839 = vrot.lane.b32.xlu0 %v4791_v20, %s5857_s21 }
 0x758   : > { %4835 = vrot.lane.b32.xlu1 %v4801_v54, %s5857_s21  ;;  %4793 = vrot.lane.b32.xlu0 %v4791_v20, %s5851_s1 }
 0x75c   : > { %4797 = vrot.lane.b32.xlu1 %v4792_v0, %s5851_s1  ;;  %4806 = vrot.lane.b32.xlu0 %v4791_v20, %s5858_s22 }
 0x760   : > { %4804 = vrot.lane.b32.xlu1 %v9301_v61, %s5858_s22 }
 0x764   : > { %4802 = vrot.lane.b32.xlu1 %v4801_v54, %s5858_s22 }
 0x7b6   : > { %v4664_v17 = vpop.permute.xlu0 %4663 }
 0x7b7   : > { %v9454_v15 = vsel %vm4669_vm3, 0, %v4664_v17 }
 0x7b8   : > { %4757 = vrot.lane.b32.xlu0 %v9454_v15, %s5859_s29  ;;  %v4685_v27 = vrot.slane %v9454_v15, 6  ;;  %v4709_v31 = vrot.slane %v9454_v15, 2  ;;  %v4697_v57 = vrot.slane %v9454_v15, 4 }
 0x7ba   : > { %v4668_v28 = vpop.permute.xlu1 %4667  ;;  %4730 = vrot.lane.b32.xlu1 %v4685_v27, %s5856_s19  ;;  %v4666_v51 = vpop.permute.xlu0 %4665 }
 0x7bb   : > { %v9467_v14 = vsel %vm4669_vm3, %v4664_v17, %v4666_v51  ;;  %v4671_v5 = vsel %vm4669_vm3, %v4666_v51, %v4668_v28 }
 0x7bc   : > { %4721 = vrot.lane.b32.xlu0 %v9454_v15, %s5854_s24  ;;  %v9480_v46 = vsel %vm4676_vm1, %v4671_v5, 0  ;;  %vm10193_vm1 = vmmov %vm10189_vm4  ;;  %v4710_v50 = vrot.slane %v9467_v14, 2  ;;  %v4686_v19 = vrot.slane %v9467_v14, 6  ;;  %v4698_v38 = vrot.slane %v9467_v14, 4 }
 0x7bd   : > { %v4687_v25 = vrot.slane %v9480_v46, 6  ;;  %v4699_v9 = vrot.slane %v9480_v46, 4  ;;  %v4711_v21 = vrot.slane %v9480_v46, 2 }
 0x7be   : > { %v4820_v1 = vpop.permute.xlu1 %4819  ;;  %4748 = vrot.lane.b32.xlu1 %v4709_v31, %s5852_s20  ;;  %v4830_v35 = vpop.permute.xlu0 %4829 }
 0x7bf   : > { %v4825_v43 = vsel %vm4727_vm14, %v4820_v1, %v4822_v18 }
 0x7c0   : > { %4759 = vrot.lane.b32.xlu0 %v9467_v14, %s5859_s29  ;;  %v4916_v45 = vsel %vm10192_vm11, %v4817_v60, %v4825_v43 }
 0x7c2   : > { %v4832_v2 = vpop.permute.xlu1 %4831  ;;  %4700 = vrot.lane.b32.xlu1 %v4697_v57, %s5858_s22  ;;  %v4828_v37 = vpop.permute.xlu0 %4827 }
 0x7c3   : > { %v4834_v47 = vsel %vm4736_vm0, %v4830_v35, %v4832_v2  ;;  %v4928_v13 = vsel %vm10188_vm13, %v4922_v39, %v4832_v2  ;;  %v4833_v58 = vsel %vm4736_vm0, %v4828_v37, %v4830_v35  ;;  %vm4706_vm13 = vcmask 1031168  }
 0x7c4   : > { %4723 = vrot.lane.b32.xlu0 %v9467_v14, %s5854_s24  ;;  %v4926_v34 = vsel %vm10190_vm15, %v4919_v49, %v4834_v47  ;;  %v4924_v22 = vsel %vm10185_vm6, %v4916_v45, %v4833_v58 }
 0x7c6   : > { %v4838_v29 = vpop.permute.xlu1 %4837  ;;  %4761 = vrot.lane.b32.xlu1 %v9480_v46, %s5859_s29  ;;  %v4840_v7 = vpop.permute.xlu0 %4839 }
 0x7c7   : > { %v4842_v48 = vsel %vm4745_vm8, %v4838_v29, %v4840_v7  ;;  %v4936_v23 = vsel %vm10189_vm4, %v4928_v13, %v4840_v7  ;;  %vm10196_vm4 = vmmov %vm10187_vm7 }
 0x7c8   : > { %4739 = vrot.lane.b32.xlu0 %v4697_v57, %s5857_s21  ;;  %v4933_v12 = vsel %vm10191_vm5, %v4926_v34, %v4842_v48  ;;  %5572 = vmatpush3.bf16.msra.mxu0 %v4936_v23  ;;  %vm10197_vm15 = vmmov %vm10196_vm4 }
 0x7c9   : > { %4983 = vmatprep.subr.bf16.mxu1 %v4933_v12  ;;  %5573 = vmatprep.subr.bf16.mxu0 %v5847_v6  ;;  %vm10198_vm5 = vmmov %vm10185_vm6 }
 0x7ca   : > { %v4836_v52 = vpop.permute.xlu1 %4835  ;;  %4725 = vrot.lane.b32.xlu1 %v9480_v46, %s5854_s24  ;;  %v4794_v55 = vpop.permute.xlu0 %4793  ;;  %vm10199_vm11 = vmmov %vm10198_vm5 }
 0x7cb   : > { %v4841_v44 = vsel %vm4745_vm8, %v4836_v52, %v4838_v29  ;;  %vm10200_vm6 = vmmov %vm10193_vm1 }
 0x7cc   : > { %4688 = vrot.lane.b32.xlu0 %v4685_v27, %s5851_s1  ;;  %v4930_v30 = vsel %vm10193_vm1, %v4924_v22, %v4841_v44  ;;  %v4799_v27 = vsel %vm4694_vm12, %v4794_v55, %v9381_v40  ;;  %vm10201_vm1 = vmmov %vm10198_vm5 }
 0x7cd   : > { %4984 = vmatpush1.bf16.msra.mxu1 %v4930_v30 }
 0x7ce   : > { %4750 = vrot.lane.b32.xlu1 %v4710_v50, %s5852_s20  ;;  %v4798_v4 = vpop.permute.xlu1 %4797  ;;  %v4807_v11 = vpop.permute.xlu0 %4806 }
 0x7d0   : > { %4732 = vrot.lane.b32.xlu0 %v4686_v19, %s5856_s19 }
 0x7d2   : > { %4702 = vrot.lane.b32.xlu1 %v4698_v38, %s5858_s22  ;;  %v4805_v36 = vpop.permute.xlu1 %4804 }
 0x7d3   : > { %v4809_v5 = vsel %vm4706_vm13, %v4805_v36, %v4807_v11 }
 0x7d4   : > { %4741 = vrot.lane.b32.xlu0 %v4698_v38, %s5857_s21 }
 0x7d6   : > { %4734 = vrot.lane.b32.xlu1 %v4687_v25, %s5856_s19  ;;  %v4803_v8 = vpop.permute.xlu1 %4802 }
 0x7d7   : > { %v4808_v63 = vsel %vm4706_vm13, %v4803_v8, %v4805_v36 }
 0x7d8   : > { %4690 = vrot.lane.b32.xlu0 %v4686_v19, %s5851_s1 }
 0x7da   : > { %4743 = vrot.lane.b32.xlu1 %v4699_v9, %s5857_s21 }
 0x7dc   : > { %4714 = vrot.lane.b32.xlu0 %v4710_v50, %s5853_s23 }
 0x7de   : > { %4692 = vrot.lane.b32.xlu1 %v4687_v25, %s5851_s1  ;;  %s10218_s1 = sld [smem:[#allocation57_spill]] }
 0x7e0   : > { %4752 = vrot.lane.b32.xlu0 %v4711_v21, %s5852_s20  ;;  %s5602_s20 = smul.u32 12, %s10225_s28 }
 0x7e2   : > { %4716 = vrot.lane.b32.xlu1 %v4711_v21, %s5853_s23  ;;  %s9596_s26 = scalar_lea.vmem %s10222_s25, %s5602_s20 }
 0x7e3   : > { %5078 = vst [vmem:[%s9596_s26] sm:$0xff] %v5847_v6 }
 0x7e4   : > { %4704 = vrot.lane.b32.xlu0 %v4699_v9, %s5858_s22 }
 0x7e6   : > { %5058 = vperm.xlu1 %5640, %v4681_v42  }
 0x7e8   : > { %4712 = vrot.lane.b32.xlu0 %v4709_v31, %s5853_s23  ;;  %v4800_v31 = vsel %vm4694_vm12, %v9381_v40, %v4798_v4 }
 0x7ec   : > { %5066 = vperm.xlu0 %5641, %v4682_v56  }
 0x82a   : > { %v4758_v59 = vpop.permute.xlu0 %4757 }
 0x82c   : > { %v4731_v0 = vpop.permute.xlu1 %4730 }
 0x82e   : > { %v4722_v20 = vpop.permute.xlu0 %4721 }
 0x830   : > { %v4749_v54 = vpop.permute.xlu1 %4748 }
 0x832   : > { %v4760_v41 = vpop.permute.xlu0 %4759 }
 0x833   : > { %v4764_v18 = vsel %vm4763_vm2, %v4758_v59, %v4760_v41 }
 0x834   : > { %v9529_v62 = vpop.permute.xlu1 %4700  ;;  %v4892_v16 = vsel %vm10187_vm7, %v4764_v18, %v9301_v61 }
 0x835   : > { %v4900_v61 = vsel %vm10199_vm11, %v4892_v16, %v4799_v27  ;;  %vm10206_vm11 = vmmov %vm10196_vm4 }
 0x836   : > { %v4724_v33 = vpop.permute.xlu0 %4723 }
 0x837   : > { %v4728_v12 = vsel %vm4727_vm14, %v4722_v20, %v4724_v33 }
 0x838   : > { %v4762_v17 = vpop.permute.xlu1 %4761 }
 0x839   : > { %v4765_v28 = vsel %vm4763_vm2, %v4760_v41, %v4762_v17  ;;  %v4898_v51 = vsel %vm10196_vm4, %v4762_v17, %v9305_v24  ;;  %vm10202_vm2 = vmmov %vm10200_vm6 }
 0x83a   : > { %v4895_v1 = vsel %vm10197_vm15, %v4765_v28, %v9311_v26  ;;  %v4904_v35 = vsel %vm10198_vm5, %v4898_v51, %v4798_v4  ;;  %v4740_v57 = vpop.permute.xlu0 %4739  ;;  %vm10203_vm7 = vmmov %vm10202_vm2 }
 0x83b   : > { %v4912_v2 = vsel %vm10200_vm6, %v4904_v35, %v4807_v11  ;;  %v4902_v37 = vsel %vm10201_vm1, %v4895_v1, %v4800_v31  ;;  %v4906_v26 = vsel %vm10203_vm7, %v4900_v61, %v4808_v63  ;;  %vm10204_vm15 = vmmov %vm10196_vm4 }
 0x83c   : > { %v4726_v24 = vpop.permute.xlu1 %4725  ;;  %5574 = vmatpush3.bf16.msra.mxu0 %v4912_v2  ;;  %v4909_v40 = vsel %vm10202_vm2, %v4902_v37, %v4809_v5  ;;  %vm10205_vm5 = vmmov %vm10201_vm1 }
 0x83d   : > { %4985 = vmatprep.subr.bf16.mxu1 %v4909_v40  ;;  %5575 = vmatprep.subr.bf16.mxu0 %v5847_v6  ;;  %v4729_v52 = vsel %vm4727_vm14, %v4724_v33, %v4726_v24  ;;  %vm10207_vm6 = vmmov %vm10201_vm1 }
 0x83e   : > { %4986 = vmatpush1.bf16.msra.mxu1 %v4906_v26  ;;  %v4689_v3 = vpop.permute.xlu0 %4688  ;;  %vm10213_vm7 = vmmov %vm10201_vm1 }
 0x840   : > { %v4751_v39 = vpop.permute.xlu1 %4750 }
 0x841   : > { %v4755_v42 = vsel %vm4754_vm9, %v4749_v54, %v4751_v39 }
 0x842   : > { %v4733_v47 = vpop.permute.xlu0 %4732 }
 0x843   : > { %v4737_v48 = vsel %vm4736_vm0, %v4731_v0, %v4733_v47 }
 0x844   : > { %v4703_v49 = vpop.permute.xlu1 %4702  ;;  %v4868_v22 = vsel %vm10196_vm4, %v4728_v12, %v4737_v48 }
 0x845   : > { %v4707_v17 = vsel %vm4706_vm13, %v9529_v62, %v4703_v49 }
 0x846   : > { %v4742_v13 = vpop.permute.xlu0 %4741 }
 0x847   : > { %v4746_v34 = vsel %vm4745_vm8, %v4740_v57, %v4742_v13 }
 0x848   : > { %v4735_v29 = vpop.permute.xlu1 %4734  ;;  %v4876_v30 = vsel %vm10205_vm5, %v4868_v22, %v4746_v34 }
 0x849   : > { %v4738_v58 = vsel %vm4736_vm0, %v4733_v47, %v4735_v29  ;;  %v4874_v44 = vsel %vm10204_vm15, %v4726_v24, %v4735_v29  ;;  %vm10208_vm0 = vmmov %vm10202_vm2 }
 0x84a   : > { %v4691_v7 = vpop.permute.xlu0 %4690  ;;  %v4871_v50 = vsel %vm10206_vm11, %v4729_v52, %v4738_v58  ;;  %vm10209_vm14 = vmmov %vm10208_vm0 }
 0x84b   : > { %v4695_v55 = vsel %vm4694_vm12, %v4689_v3, %v4691_v7  ;;  %vm10211_vm2 = vmmov %vm10196_vm4 }
 0x84c   : > { %v4744_v43 = vpop.permute.xlu1 %4743  ;;  %vm10215_vm4 = vmmov %vm10208_vm0 }
 0x84d   : > { %v4747_v60 = vsel %vm4745_vm8, %v4742_v13, %v4744_v43  ;;  %v4880_v19 = vsel %vm10207_vm6, %v4874_v44, %v4744_v43  ;;  %vm10210_vm8 = vmmov %vm10208_vm0  ;;  %vm10220_vm6 = vcmask 588800  }
 0x84e   : > { %v4715_v23 = vpop.permute.xlu0 %4714  ;;  %v4878_v21 = vsel %vm10201_vm1, %v4871_v50, %v4747_v60  ;;  %v4882_v11 = vsel %vm10210_vm8, %v4876_v30, %v4755_v42  ;;  %vm10216_vm15 = vmmov %vm10201_vm1 }
 0x84f   : > { %vm10217_vm5 = vmmov %vm10208_vm0 }
 0x850   : > { %v4693_v45 = vpop.permute.xlu1 %4692  ;;  %vm10219_vm11 = vmmov %vm10201_vm1 }
 0x851   : > { %v4696_v56 = vsel %vm4694_vm12, %v4691_v7, %v4693_v45  ;;  %v4849_v8 = vsel %vm10211_vm2, %v9480_v46, %v4693_v45  ;;  %vm10214_vm12 = vmmov %vm10211_vm2 }
 0x852   : > { %v4753_v38 = vpop.permute.xlu0 %4752  ;;  %v4844_v41 = vsel %vm10214_vm12, %v9454_v15, %v4695_v55  ;;  %vm10221_vm1 = vmmov %vm10220_vm6 }
 0x853   : > { %v4756_v25 = vsel %vm4754_vm9, %v4751_v39, %v4753_v38  ;;  %v4888_v9 = vsel %vm10208_vm0, %v4880_v19, %v4753_v38  ;;  %vm10212_vm9 = vmmov %vm10211_vm2  ;;  %v4851_v28 = vsel %vm10219_vm11, %v4844_v41, %v4707_v17  ;;  %vm5098_vm2 = vcmask 412672  }
 0x854   : > { %5576 = vmatpush3.bf16.msra.mxu0 %v4888_v9  ;;  %v4885_v4 = vsel %vm10209_vm14, %v4878_v21, %v4756_v25  ;;  %v4717_v36 = vpop.permute.xlu1 %4716  ;;  %v4847_v0 = vsel %vm10212_vm9, %v9467_v14, %v4696_v56  ;;  %v4680_v14 = vld [vmem:[%s10218_s1] sm:$0x3]  ;;  %vm5095_vm14 = vcmask 1047556  }
 0x855   : > { %4987 = vmatprep.subr.bf16.mxu1 %v4885_v4  ;;  %5577 = vmatprep.subr.bf16.mxu0 %v5847_v6  ;;  %v4720_v18 = vsel %vm4245_vm10, %v4715_v23, %v4717_v36 }
 0x856   : > { %4988 = vmatpush1.bf16.msra.mxu1 %v4882_v11  ;;  %v4705_v59 = vpop.permute.xlu0 %4704 }
 0x857   : > { %v4708_v20 = vsel %vm4706_vm13, %v4703_v49, %v4705_v59  ;;  %v4855_v54 = vsel %vm10213_vm7, %v4849_v8, %v4705_v59  ;;  %vm5094_vm13 = vcmask 1043608  }
 0x858   : > { %v4864_v33 = vsel %vm10215_vm4, %v4855_v54, %v4717_v36  ;;  %v4853_v16 = vsel %vm10216_vm15, %v4847_v0, %v4708_v20  ;;  %vm5096_vm8 = vmor %vm5095_vm14, %vm5094_vm13 }
 0x859   : > { %5578 = vmatpush3.bf16.msra.mxu0 %v4864_v33  ;;  %v4861_v46 = vsel %vm10217_vm5, %v4853_v16, %v4720_v18 }
 0x85a   : > { %4989 = vmatprep.subr.bf16.mxu1 %v4861_v46  ;;  %v4713_v27 = vpop.permute.xlu0 %4712 }
 0x85b   : > { %v4719_v15 = vsel %vm4245_vm10, %v4713_v27, %v4715_v23  ;;  %vm5079_vm10 = vcmask 699392  }
 0x85c   : > { %5580 = vmatmul.mubr.msk.bf16.vlgmr.msra.gmra.mxu0 %vm10220_vm6, %v4680_v14  ;;  %v4858_v51 = vsel %vm10208_vm0, %v4851_v28, %v4719_v15  ;;  %5080 = vst.msk [vmem:[%s9596_s26 + $0x8] sm:$0xf] %vm5079_vm10, %v5847_v6 }
 0x85d   : > { %4990 = vmatpush1.bf16.msra.mxu1 %v4858_v51 }
 0x860   : > { %5330 = vmatmul.mubr.msk.bf16.vlgmr.msra.gmra.mxu1 %vm10221_vm1, %v4680_v14 }
 0x861   : > { %v5059_v1 = vpop.permute.xlu1 %5058 }
 0x867   : > { %v5067_v61 = vpop.permute.xlu0 %5066 }
 0x91c   : > { %v5050_v62 = vpop.f32.mrf.mxu0 }
 0x91d   : > { %v5063_v63 = vmul.f32 %v5059_v1, %v5050_v62 }
 0x91e   : > { %v5581_v31 = vpop.f32.mrf.mxu0 }
 0x91f   : > { %v5071_v49 = vadd.f32 %v5067_v61, %v5063_v63 }
 0x920   : > { %v5009_v35 = vpop.f32.mrf.mxu1  ;;  %v5053_v57 = vpop.f32.mrf.mxu0 }
 0x921   : > { %v5061_v5 = vmul.f32 %v5059_v1, %v5009_v35  ;;  %v5074_v43 = vmax.f32 %v5071_v49, 0.0 }
 0x922   : > { %v5011_v2 = vpop.f32.mrf.mxu1  ;;  %v5582_v37 = vpop.f32.mrf.mxu0 }
 0x923   : > { %v5069_v24 = vadd.f32 %v5067_v61, %v5061_v5  ;;  %v5062_v40 = vmul.f32 %v5059_v1, %v5011_v2  ;;  %v5077_v23 = vmul.f32 %v5074_v43, %v9426_v10 }
 0x924   : > { %v5013_v26 = vpop.f32.mrf.mxu1 }
 0x925   : > { %v5072_v3 = vmax.f32 %v5069_v24, 0.0  ;;  %v5070_v39 = vadd.f32 %v5067_v61, %v5062_v40 }
 0x926   : > { %v5014_v47 = vpop.f32.mrf.mxu1 }
 0x927   : > { %v5073_v13 = vmax.f32 %v5070_v39, 0.0  ;;  %v5075_v29 = vmul.f32 %v5072_v3, %v9420_v53 }
 0x929   : > { %v5076_v7 = vmul.f32 %v5073_v13, %v9423_v32 }
 0x92b   : > { %v5084_v48 = vcombine.low %v5075_v29, %v5076_v7 }
 0x92d   : > { %5085 = vrot.lane.b32.xlu1 %v5084_v48, %s5855_s0 }
 0x931   : > { %5087 = vrot.lane.b32.xlu1 %v5077_v23, %s5855_s0 }
 0x99f   : > { %v5086_v6 = vpop.permute.xlu1 %5085 }
 0x9a0   : > { %v5089_v34 = vrot.slane %v5086_v6, 4 }
 0x9a2   : > { %v5090_v58 = vsel %vm4669_vm3, %v5089_v34, %v5086_v6 }
 0x9a3   : > { %5097 = vst.msk [vmem:[%s9596_s26] sm:$0xff] %vm5096_vm8, %v5090_v58  ;;  %v5088_v53 = vpop.permute.xlu1 %5087 }
 0x9a4   : > { %v5091_v32 = vsel %vm4669_vm3, %v5089_v34, %v5088_v53 }
 0x9a5   : > { %5099 = vst.msk [vmem:[%s9596_s26 + $0x8] sm:$0xf] %vm5098_vm2, %v5091_v32 }
 0x9a6 PF: > { %s10223_s28 = sld [smem:[#allocation2_spill]] }
 0x9ac   : > { %s28_s27 = sadd.s32 1, %s10223_s28  }
 0x9ad   : > { %p25_p4 = scmp.ge.s32.totalorder %s28_s27, 4  }
 0x9af   :  { %27 = sbr.rel (!%p25_p4) target bundleno = 10 (0xa), region = 131 }

</bundles_post_ra>
